<compile_context>
chip_gen: v7x
topology: tpu7x:2x2x1
jax: 0.10.0
libtpu: 0.0.40
codegen_flags: <defaults>
</compile_context>

<pallas_src>
import math

import numpy as np
import jax
import jax.numpy as jnp
from jax import lax
from jax.experimental import pallas as pl
from jax.experimental.pallas import tpu as pltpu

# ---------------- config (small, consistent with the module) ----------------
B = 2
N_EV = 64
H = W = 16
P = H * W
EMBED = 32
NHEAD = 4
DHEAD = EMBED // NHEAD
NUM_CLASSES = 10
FINE_BINS = 8
COARSE_BINS = 4
SMOOTH_K = 5
EPS_LN = 1e-5
BN_SCALE = 1.0 / math.sqrt(1.0 + 1e-5)     # eval BatchNorm2d (mean=0, var=1)
ATTN_SCALE = 1.0 / math.sqrt(DHEAD)
NEG_MASK = -1e30                           # finite "masked" bias (no NaN softmax)
M_IMG = B * FINE_BINS                      # 16 stacked (batch, time) rows

VMEM_SPEC = pl.BlockSpec(memory_space=pltpu.MemorySpace.VMEM)
SMEM_SPEC = pl.BlockSpec(memory_space=pltpu.MemorySpace.SMEM)

_TX_KEYS = ("w_qkv", "b_qkv", "w_out", "b_out", "ln1_w", "ln1_b",
            "w_ff1", "b_ff1", "w_ff2", "b_ff2", "ln2_w", "ln2_b")

IN_NAMES = (
    # batched data
    "counts_fine", "counts_coarse", "frame", "wins",
    # constant structure operators (host-built)
    "Sf_block", "Sc_block", "U_block", "Gavg_f", "Gavg_c",
    "Dm1", "Dp1", "P_bm2tm", "P_tm2bm", "Rep", "Bmean", "GSel",
    # conv weights (host-reshaped)
    "Wt1", "S2big", "c2_b72", "CW_mat", "Wt2",
    # projections
    "cp_w", "cp_b", "ef_w", "ef_b", "pef_w", "pef_b", "pec_w", "pec_b",
    "mg_w", "mg_b", "em_w", "em_b",
    # liquid block 1
    "l1_wx", "l1_wt", "l1_btau", "l1_wmem", "l1_bmem", "l1_logth",
    # neuromodulation
    "nm1_w", "nm1_b", "nm2_w", "nm2_b",
    # liquid block 2
    "l2_wx", "l2_wt", "l2_btau", "l2_wmem", "l2_bmem", "l2_logth",
) + tuple("t1_" + k for k in _TX_KEYS) + tuple("t2_" + k for k in _TX_KEYS) + (
    "head_w", "head_b", "efn_w", "efn_b",
    "c1_sw_s", "c1_sb_s",                   # SMEM scalars (conv1 3x3 weights/bias)
)
OUT_NAMES = ("logits", "early_mid", "early_final", "spikes", "membrane",
             "threshold", "feats")

# 9 spatial cases of a 3x3 / pad=1 conv over a spatially constant field:
# interior, top, bottom, left, right, TL, TR, BL, BR.  Weight = pixels / (H*W).
CASE_WEIGHTS = (
    (H - 2) * (W - 2) / float(P),
    (W - 2) / float(P), (W - 2) / float(P),
    (H - 2) / float(P), (H - 2) / float(P),
    1.0 / float(P), 1.0 / float(P), 1.0 / float(P), 1.0 / float(P),
)


# ---------------- in-kernel helpers ----------------
def _mm(a, b):
    return jnp.dot(a, b, preferred_element_type=jnp.float32)


def _ln_rows(x):
    mu = jnp.mean(x, axis=-1, keepdims=True)
    var = jnp.mean((x - mu) ** 2, axis=-1, keepdims=True)
    return (x - mu) * lax.rsqrt(var + EPS_LN)


def _ln_groups(x, gavg):
    """LayerNorm over each batch's whole [T, P] block (rows grouped by gavg)."""
    row_mu = jnp.mean(x, axis=-1, keepdims=True)
    cen = x - _mm(gavg, row_mu)
    row_var = jnp.mean(cen * cen, axis=-1, keepdims=True)
    return cen * lax.rsqrt(_mm(gavg, row_var) + EPS_LN)


# ---------------- the single fused network kernel ----------------
def _net_kernel(*refs):
    r = dict(zip(IN_NAMES, refs[:len(IN_NAMES)]))
    o = dict(zip(OUT_NAMES, refs[len(IN_NAMES):]))
    Tf = FINE_BINS

    # ---- spike encoders (both batches at once via block-diagonal operators) ----
    xf = _ln_groups(_ln_rows(_mm(r["Sf_block"][...], r["counts_fine"][...])),
                    r["Gavg_f"][...])                          # [B*Tf, P]
    xc = _ln_groups(_ln_rows(_mm(r["Sc_block"][...], r["counts_coarse"][...])),
                    r["Gavg_c"][...])                          # [B*Tc, P]
    xcu = _mm(r["U_block"][...], xc)                           # [B*Tf, P] linear upsample

    # ---- ConvSNN block 1: 3x3 spatial conv = 36 scalar MACs on lane-dense
    #      [B*Tf, H*W] tiles, fused BN + ReLU + spatial mean.  The pooled ->
    #      temporal-conv weight product is a rank-1 accumulation (no nano-matmul).
    c1w, c1b = r["c1_sw_s"], r["c1_sb_s"]                      # SMEM scalar refs
    w0 = r["wins"][0]
    accs = [c1w[c * 9] * w0 for c in range(4)]
    for k in range(1, 9):
        wk = r["wins"][k]                                      # [B*Tf, P]
        for c in range(4):
            accs[c] = accs[c] + c1w[c * 9 + k] * wk
    Wt1 = r["Wt1"][...]                                        # [4, 3*4]  (tap-major cols)
    p_all = None
    for c in range(4):
        z = jnp.maximum((accs[c] + c1b[c]) * BN_SCALE, 0.0)
        zc = jnp.sum(z, axis=-1, keepdims=True) * (1.0 / P)    # [B*Tf, 1] spatial mean
        term = zc * Wt1[c:c + 1, :]                            # rank-1 outer product
        p_all = term if p_all is None else p_all + term        # [B*Tf, 12]

    # temporal conv (k=3, pad=1, no bias): shift-and-add of the 3 tap products
    Dm1, Dp1 = r["Dm1"][...], r["Dp1"][...]
    c1o = _mm(Dm1, p_all[:, 0:4]) + p_all[:, 4:8] + _mm(Dp1, p_all[:, 8:12])  # [B*Tf, 4]

    # ---- ConvSNN block 2 on a spatially constant field: one matmul over the 9
    #      border/interior cases + case-weighted reduction, then temporal conv. ----
    z2 = jnp.maximum((_mm(c1o, r["S2big"][...]) + r["c2_b72"][...]) * BN_SCALE, 0.0)
    sp2 = _mm(z2, r["CW_mat"][...])                            # [B*Tf, 8]
    p2_all = _mm(sp2, r["Wt2"][...])                           # [B*Tf, 24]
    c2o = _mm(Dm1, p2_all[:, 0:8]) + p2_all[:, 8:16] + _mm(Dp1, p2_all[:, 16:24])

    # ---- patch embeds + merge projection (block form of the concat matmul) ----
    xfe = _mm(xf, r["pef_w"][...]) + r["pef_b"][...]           # [B*Tf, E]
    xce = _mm(xcu, r["pec_w"][...]) + r["pec_b"][...]
    fpe = _mm(r["frame"][...], r["ef_w"][...]) + r["ef_b"][...]          # [B, E]
    fpe_full = _mm(r["Rep"][...], fpe)                                   # [B*Tf, E]
    cfe = _mm(c2o, r["cp_w"][...]) + r["cp_b"][...]
    mg_w = r["mg_w"][...]
    feats = (_mm(xfe, mg_w[0 * EMBED:1 * EMBED]) + _mm(xce, mg_w[1 * EMBED:2 * EMBED])
             + _mm(fpe_full, mg_w[2 * EMBED:3 * EMBED])
             + _mm(cfe, mg_w[3 * EMBED:4 * EMBED]) + r["mg_b"][...])      # [B*Tf, E]

    Bmean = r["Bmean"][...]
    o["early_mid"][...] = _mm(_mm(Bmean, feats), r["em_w"][...]) + r["em_b"][...]

    # ---- liquid block 1: [B, E] state, one 8-step recurrence for both batches ----
    feats_tm = _mm(r["P_bm2tm"][...], feats)                   # time-major rows (t, b)
    ptau1 = _mm(feats_tm, r["l1_wx"][...])
    pmem1 = _mm(feats_tm, r["l1_wmem"][...]) + r["l1_bmem"][...]
    l1_wt, l1_btau = r["l1_wt"][...], r["l1_btau"][...]
    thr1 = jax.nn.sigmoid(r["l1_logth"][...])
    tau = jnp.ones((B, EMBED), jnp.float32)
    v = jnp.zeros((B, EMBED), jnp.float32)
    s1_rows = []
    for t in range(Tf):
        sl = slice(t * B, (t + 1) * B)
        tau = jax.nn.sigmoid(ptau1[sl] + _mm(tau, l1_wt) + l1_btau)
        # approximate EUP reciprocal: negligible deviation from exact 1/x
        alpha = jnp.exp(-pl.reciprocal(tau + 1e-6, approx=True))
        v = alpha * v + (1.0 - alpha) * pmem1[sl]
        fired = v >= thr1
        s1_rows.append(fired.astype(jnp.float32))
        v = jnp.where(fired, 0.0, v)
    spikes1_tm = jnp.concatenate(s1_rows, axis=0)              # [B*Tf, E] time-major

    # ---- neuromodulation gate (couples the two batches) ----
    row_act = jnp.mean(spikes1_tm, axis=-1, keepdims=True)     # [B*Tf, 1]
    gsa = _mm(r["GSel"][...], row_act)                         # [B, 1] per-batch activity
    hvec = jnp.maximum(_mm(gsa, r["nm1_w"][...]) + r["nm1_b"][...], 0.0)  # [B, 16]
    gate = jnp.mean(_mm(hvec, r["nm2_w"][...]) + r["nm2_b"][...],
                    axis=0, keepdims=True)                     # [1, E]
    thr2 = jax.nn.sigmoid(r["l2_logth"][...] + gate)
    o["threshold"][...] = thr2

    # ---- liquid block 2 (neuromodulated threshold) ----
    ptau2 = _mm(spikes1_tm, r["l2_wx"][...])
    pmem2 = _mm(spikes1_tm, r["l2_wmem"][...]) + r["l2_bmem"][...]
    l2_wt, l2_btau = r["l2_wt"][...], r["l2_btau"][...]
    tau2 = jnp.ones((B, EMBED), jnp.float32)
    v2 = jnp.zeros((B, EMBED), jnp.float32)
    s2_rows = []
    for t in range(Tf):
        sl = slice(t * B, (t + 1) * B)
        tau2 = jax.nn.sigmoid(ptau2[sl] + _mm(tau2, l2_wt) + l2_btau)
        alpha = jnp.exp(-pl.reciprocal(tau2 + 1e-6, approx=True))
        v2 = alpha * v2 + (1.0 - alpha) * pmem2[sl]
        fired = v2 >= thr2
        s2_rows.append(fired.astype(jnp.float32))
        v2 = jnp.where(fired, 0.0, v2)
    spikes2_tm = jnp.concatenate(s2_rows, axis=0)
    spikes2_bm = _mm(r["P_tm2bm"][...], spikes2_tm)            # back to batch-major (exact, 0/1 values)
    o["spikes"][...] = spikes2_bm
    o["membrane"][...] = v2

    # ---- key-padding biases (per batch, key/lane orientation, finite mask) ----
    # TODO(synk): a fully masked sequence yields uniform attention here, whereas
    # PyTorch's all -inf row would produce NaN; -1e30 keeps the math finite.
    ones_1e = jnp.ones((1, EMBED), jnp.float32)
    biases = []
    for b in range(B):
        ksum = jnp.einsum("qd,kd->qk", ones_1e, spikes2_bm[b * Tf:(b + 1) * Tf],
                          preferred_element_type=jnp.float32)  # [1, Tf]
        biases.append(jnp.where(ksum > 0.0, 0.0, NEG_MASK))

    # ---- transformer encoder layers (post-norm, relu FFN).  All dense matmuls
    #      run batched on [B*Tf, E]; only score/softmax is per batch / head. ----
    # TODO(synk): PyTorch's nested-tensor fast path of TransformerEncoder is not
    # reproduced; standard masked-attention math is used.
    def tx_layer(x_bm, pfx):
        g = lambda nm: r[pfx + nm][...]
        qkv = _mm(x_bm, g("w_qkv")) + g("b_qkv")               # [B*Tf, 3E] (Q pre-scaled)
        head_pv = [[None] * B for _ in range(NHEAD)]
        for b in range(B):
            qkv_b = qkv[b * Tf:(b + 1) * Tf]                   # [Tf, 3E]
            for h in range(NHEAD):
                lo = h * DHEAD
                qh = qkv_b[:, lo:lo + DHEAD]
                kh = qkv_b[:, EMBED + lo:EMBED + lo + DHEAD]
                vh = qkv_b[:, 2 * EMBED + lo:2 * EMBED + lo + DHEAD]
                sc = jnp.einsum("qd,kd->qk", qh, kh,
                                preferred_element_type=jnp.float32) + biases[b]
                sc = sc - jnp.max(sc, axis=-1, keepdims=True)
                ex = jnp.exp(sc)
                pm = ex / jnp.sum(ex, axis=-1, keepdims=True)
                head_pv[h][b] = _mm(pm, vh)                    # [Tf, DHEAD]
        w_out = g("w_out")
        attn = g("b_out")
        for h in range(NHEAD):
            lo = h * DHEAD
            ho = jnp.concatenate(head_pv[h], axis=0)           # [B*Tf, DHEAD] (row concat)
            attn = attn + _mm(ho, w_out[lo:lo + DHEAD, :])
        y = _ln_rows(x_bm + attn) * g("ln1_w") + g("ln1_b")
        ff = jnp.maximum(_mm(y, g("w_ff1")) + g("b_ff1"), 0.0)
        ff = _mm(ff, g("w_ff2")) + g("b_ff2")
        return _ln_rows(y + ff) * g("ln2_w") + g("ln2_b")

    t1 = tx_layer(spikes2_bm, "t1_")
    t2 = tx_layer(t1, "t2_")
    o["feats"][...] = t2

    # ---- output heads ----
    t2m = _mm(Bmean, t2)                                       # [B, E]
    o["logits"][...] = _mm(t2m, r["head_w"][...]) + r["head_b"][...]
    o["early_final"][...] = _mm(t2m, r["efn_w"][...]) + r["efn_b"][...]


# ---------------- host-side constant operators ----------------
def _gaussian_smooth_matrix(num_bins, k=SMOOTH_K):
    pad = k // 2
    coords = np.arange(k) - pad
    sigma = k / 6.0
    g = np.exp(-coords ** 2 / (2.0 * sigma ** 2))
    g = g / g.sum()
    S = np.zeros((num_bins, num_bins), np.float32)
    for t in range(num_bins):
        for kk in range(k):
            s = t + kk - pad
            if 0 <= s < num_bins:
                S[t, s] = g[kk]
    return S


def _upsample_matrix(t_out, t_in):
    """F.interpolate(mode='linear', align_corners=True) along time, as a matrix."""
    U = np.zeros((t_out, t_in), np.float32)
    if t_in == 1:
        U[:, 0] = 1.0
        return U
    pos = np.arange(t_out, dtype=np.float64) * (t_in - 1) / (t_out - 1)
    lo = np.floor(pos).astype(np.int64)
    hi = np.minimum(lo + 1, t_in - 1)
    wgt = (pos - lo).astype(np.float32)
    for t in range(t_out):
        U[t, lo[t]] += 1.0 - wgt[t]
        U[t, hi[t]] += wgt[t]
    return U


def _block_diag(m, reps):
    r0, c0 = m.shape
    out = np.zeros((r0 * reps, c0 * reps), np.float32)
    for i in range(reps):
        out[i * r0:(i + 1) * r0, i * c0:(i + 1) * c0] = m
    return out


def _shift_matrix(delta):
    """(M @ x)[t] = x[t + delta] within each batch's Tf block, zero outside."""
    m = np.zeros((M_IMG, M_IMG), np.float32)
    for b in range(B):
        for t in range(FINE_BINS):
            s = t + delta
            if 0 <= s < FINE_BINS:
                m[b * FINE_BINS + t, b * FINE_BINS + s] = 1.0
    return m


_SF_BLOCK = _block_diag(_gaussian_smooth_matrix(FINE_BINS), B)          # [16,16]
_SC_BLOCK = _block_diag(_gaussian_smooth_matrix(COARSE_BINS), B)        # [8,8]
_U_BLOCK = _block_diag(_upsample_matrix(FINE_BINS, COARSE_BINS), B)     # [16,8]
_GAVG_F = _block_diag(np.full((FINE_BINS, FINE_BINS), 1.0 / FINE_BINS, np.float32), B)
_GAVG_C = _block_diag(np.full((COARSE_BINS, COARSE_BINS), 1.0 / COARSE_BINS, np.float32), B)
_DM1 = _shift_matrix(-1)          # selects x[t-1]
_DP1 = _shift_matrix(+1)          # selects x[t+1]

_P_BM2TM = np.zeros((M_IMG, M_IMG), np.float32)     # batch-major -> time-major rows
_REP = np.zeros((M_IMG, B), np.float32)             # repeat per-batch row over Tf
_BMEAN = np.zeros((B, M_IMG), np.float32)           # per-batch mean over Tf (batch-major)
_GSEL = np.zeros((B, M_IMG), np.float32)            # per-batch mean over Tf (time-major)
for _b in range(B):
    _REP[_b * FINE_BINS:(_b + 1) * FINE_BINS, _b] = 1.0
    _BMEAN[_b, _b * FINE_BINS:(_b + 1) * FINE_BINS] = 1.0 / FINE_BINS
    for _t in range(FINE_BINS):
        _P_BM2TM[_t * B + _b, _b * FINE_BINS + _t] = 1.0
        _GSEL[_b, _t * B + _b] = 1.0 / FINE_BINS
_P_TM2BM = np.ascontiguousarray(_P_BM2TM.T)

_CW_MAT = np.zeros((9 * 8, 8), np.float32)          # case-weighted reduction [72, 8]
for _x in range(9):
    for _c in range(8):
        _CW_MAT[_x * 8 + _c, _c] = CASE_WEIGHTS[_x]


def _case_masks():
    def mk(ki_set, kj_set):
        m = np.zeros((3, 3), np.float32)
        for a in ki_set:
            for c in kj_set:
                m[a, c] = 1.0
        return m
    return np.stack([
        mk((0, 1, 2), (0, 1, 2)),   # interior
        mk((1, 2), (0, 1, 2)),      # top row
        mk((0, 1), (0, 1, 2)),      # bottom row
        mk((0, 1, 2), (1, 2)),      # left column
        mk((0, 1, 2), (0, 1)),      # right column
        mk((1, 2), (1, 2)),         # top-left
        mk((1, 2), (0, 1)),         # top-right
        mk((0, 1), (1, 2)),         # bottom-left
        mk((0, 1), (0, 1)),         # bottom-right
    ])


_CASE_MASKS = _case_masks()


# ---------------- data-dependent scatters (plain JAX) ----------------
# TODO(synk): event scatter-add histograms / frames / rasters stay in plain JAX
# (no clean Pallas gather/scatter on TPU).
def spike_histogram(events, num_bins):
    xs = jnp.clip(events[..., 0].astype(jnp.int32), 0, H - 1)
    ys = jnp.clip(events[..., 1].astype(jnp.int32), 0, W - 1)
    ts = jnp.clip(events[..., 2], 0.0, 1.0)
    edges = jnp.linspace(0.0, 1.0, num_bins + 1)[1:-1]
    bin_idx = jnp.searchsorted(edges, ts, side="right").astype(jnp.int32)
    pix = xs * W + ys
    bidx = jnp.broadcast_to(jnp.arange(events.shape[0])[:, None], pix.shape)
    counts = jnp.zeros((events.shape[0], num_bins, P), jnp.float32)
    return counts.at[bidx, bin_idx, pix].add(1.0)


def event_frame(events):
    xs = jnp.clip(events[..., 0].astype(jnp.int32), 0, H - 1)
    ys = jnp.clip(events[..., 1].astype(jnp.int32), 0, W - 1)
    pix = xs * W + ys
    bidx = jnp.broadcast_to(jnp.arange(events.shape[0])[:, None], pix.shape)
    return jnp.zeros((events.shape[0], P), jnp.float32).at[bidx, pix].add(1.0)


def time_rasters(events, T):
    ts = events[..., 2]
    xs = jnp.clip(events[..., 0].astype(jnp.int32), 0, H - 1)
    ys = jnp.clip(events[..., 1].astype(jnp.int32), 0, W - 1)
    starts = jnp.arange(T, dtype=jnp.float32) / T
    bins = jnp.sum(ts[..., None] >= starts[None, None, :], axis=-1).astype(jnp.int32) - 1
    valid = (bins >= 0) & (ts < 1.0)     # events with ts >= 1.0 are dropped (torch parity)
    upd = jnp.where(valid, 1.0, 0.0)
    bclip = jnp.clip(bins, 0, T - 1)
    bidx = jnp.broadcast_to(jnp.arange(events.shape[0])[:, None], ts.shape)
    rasters = jnp.zeros((events.shape[0], T, H, W), jnp.float32)
    return rasters.at[bidx, bclip, xs, ys].add(upd)


# ---------------- parameters (deterministic init) ----------------
def init_params(key):
    ks = iter(jax.random.split(key, 64))

    def lin(fan_in, fan_out):
        bound = 1.0 / math.sqrt(fan_in)
        w = jax.random.uniform(next(ks), (fan_in, fan_out), jnp.float32, -bound, bound)
        b = jax.random.uniform(next(ks), (fan_out,), jnp.float32, -bound, bound)
        return w, b

    def conv2d(cin, cout):
        bound = 1.0 / math.sqrt(cin * 9)
        w = jax.random.uniform(next(ks), (cout, cin, 3, 3), jnp.float32, -bound, bound)
        b = jax.random.uniform(next(ks), (cout,), jnp.float32, -bound, bound)
        return w, b

    def conv1d(c, k):
        bound = 1.0 / math.sqrt(c * k)
        return jax.random.uniform(next(ks), (c, c, k), jnp.float32, -bound, bound)

    p = {}
    p["ef_w"], p["ef_b"] = lin(P, EMBED)
    p["c1_sw"], p["c1_sb"] = conv2d(1, 4)
    p["c1_tw"] = conv1d(4, 3)
    p["c2_sw"], p["c2_sb"] = conv2d(4, 8)
    p["c2_tw"] = conv1d(8, 3)
    p["cp_w"], p["cp_b"] = lin(8, EMBED)
    p["pef_w"], p["pef_b"] = lin(P, EMBED)
    p["pec_w"], p["pec_b"] = lin(P, EMBED)
    p["mg_w"], p["mg_b"] = lin(4 * EMBED, EMBED)
    p["l1_wtau"], p["l1_btau"] = lin(2 * EMBED, EMBED)
    p["l1_wmem"], p["l1_bmem"] = lin(EMBED, EMBED)
    p["l1_logth"] = jnp.zeros((EMBED,), jnp.float32)
    p["l2_wtau"], p["l2_btau"] = lin(2 * EMBED, EMBED)
    p["l2_wmem"], p["l2_bmem"] = lin(EMBED, EMBED)
    p["l2_logth"] = jnp.zeros((EMBED,), jnp.float32)
    p["nm1_w"], p["nm1_b"] = lin(1, 16)
    p["nm2_w"], p["nm2_b"] = lin(16, EMBED)
    for name in ("t1", "t2"):
        w_qkv, b_qkv = lin(EMBED, 3 * EMBED)
        w_out, b_out = lin(EMBED, EMBED)
        w_ff1, b_ff1 = lin(EMBED, 4 * EMBED)
        w_ff2, b_ff2 = lin(4 * EMBED, EMBED)
        p[name] = {
            "w_qkv": w_qkv, "b_qkv": b_qkv, "w_out": w_out, "b_out": b_out,
            "ln1_w": jnp.ones((EMBED,), jnp.float32), "ln1_b": jnp.zeros((EMBED,), jnp.float32),
            "ln2_w": jnp.ones((EMBED,), jnp.float32), "ln2_b": jnp.zeros((EMBED,), jnp.float32),
            "w_ff1": w_ff1, "b_ff1": b_ff1, "w_ff2": w_ff2, "b_ff2": b_ff2,
        }
    p["head_w"], p["head_b"] = lin(EMBED, NUM_CLASSES)
    p["em_w"], p["em_b"] = lin(EMBED, NUM_CLASSES)
    p["efn_w"], p["efn_b"] = lin(EMBED, NUM_CLASSES)
    return p


# ---------------- forward ----------------
@jax.jit
def forward(events, params):
    counts_fine = spike_histogram(events, FINE_BINS).reshape(M_IMG, P)
    counts_coarse = spike_histogram(events, COARSE_BINS).reshape(B * COARSE_BINS, P)
    frame = event_frame(events)                                  # [B, P]
    rasters = time_rasters(events, FINE_BINS).reshape(M_IMG, H, W)
    rpad = jnp.pad(rasters, ((0, 0), (1, 1), (1, 1)))
    # nine 3x3 shifted windows, lane-dense [9, B*Tf, H*W]
    wins = jnp.stack([rpad[:, ki:ki + H, kj:kj + W].reshape(M_IMG, P)
                      for ki in range(3) for kj in range(3)], axis=0)

    # conv2's 9 border/interior case kernels summed over valid taps
    s2cases = jnp.einsum("oikl,xkl->xio", params["c2_sw"], jnp.asarray(_CASE_MASKS))
    s2big = jnp.transpose(s2cases, (1, 0, 2)).reshape(4, 72)     # [Cin, 9*Cout]
    c2_b72 = jnp.tile(params["c2_sb"], 9).reshape(1, 72)

    row = lambda v: v.reshape(1, -1).astype(jnp.float32)
    # fold the attention scale into the Q columns of the in-projection
    qscale = jnp.concatenate([jnp.full((EMBED,), ATTN_SCALE, jnp.float32),
                              jnp.ones((2 * EMBED,), jnp.float32)])

    kin = {
        "counts_fine": counts_fine, "counts_coarse": counts_coarse,
        "frame": frame, "wins": wins,
        "Sf_block": _SF_BLOCK, "Sc_block": _SC_BLOCK, "U_block": _U_BLOCK,
        "Gavg_f": _GAVG_F, "Gavg_c": _GAVG_C,
        "Dm1": _DM1, "Dp1": _DP1,
        "P_bm2tm": _P_BM2TM, "P_tm2bm": _P_TM2BM,
        "Rep": _REP, "Bmean": _BMEAN, "GSel": _GSEL,
        "Wt1": jnp.transpose(params["c1_tw"], (1, 2, 0)).reshape(4, 12),
        "S2big": s2big, "c2_b72": c2_b72, "CW_mat": _CW_MAT,
        "Wt2": jnp.transpose(params["c2_tw"], (1, 2, 0)).reshape(8, 24),
        "cp_w": params["cp_w"], "cp_b": row(params["cp_b"]),
        "ef_w": params["ef_w"], "ef_b": row(params["ef_b"]),
        "pef_w": params["pef_w"], "pef_b": row(params["pef_b"]),
        "pec_w": params["pec_w"], "pec_b": row(params["pec_b"]),
        "mg_w": params["mg_w"], "mg_b": row(params["mg_b"]),
        "em_w": params["em_w"], "em_b": row(params["em_b"]),
        "l1_wx": params["l1_wtau"][:EMBED], "l1_wt": params["l1_wtau"][EMBED:],
        "l1_btau": row(params["l1_btau"]),
        "l1_wmem": params["l1_wmem"], "l1_bmem": row(params["l1_bmem"]),
        "l1_logth": row(params["l1_logth"]),
        "nm1_w": params["nm1_w"].reshape(1, -1), "nm1_b": row(params["nm1_b"]),
        "nm2_w": params["nm2_w"], "nm2_b": row(params["nm2_b"]),
        "l2_wx": params["l2_wtau"][:EMBED], "l2_wt": params["l2_wtau"][EMBED:],
        "l2_btau": row(params["l2_btau"]),
        "l2_wmem": params["l2_wmem"], "l2_bmem": row(params["l2_bmem"]),
        "l2_logth": row(params["l2_logth"]),
        "head_w": params["head_w"], "head_b": row(params["head_b"]),
        "efn_w": params["efn_w"], "efn_b": row(params["efn_b"]),
        "c1_sw_s": params["c1_sw"].reshape(-1).astype(jnp.float32),   # SMEM scalars
        "c1_sb_s": params["c1_sb"].astype(jnp.float32),               # SMEM scalars
    }
    for pname, pref in (("t1", "t1_"), ("t2", "t2_")):
        for k in _TX_KEYS:
            v = params[pname][k]
            if k == "w_qkv":
                v = v * qscale[None, :]
            elif k == "b_qkv":
                v = v * qscale
            kin[pref + k] = v if v.ndim == 2 else row(v)

    args = [jnp.asarray(kin[n], jnp.float32) for n in IN_NAMES]
    n_vmem = len(IN_NAMES) - 2

    out_shapes = (
        jax.ShapeDtypeStruct((B, NUM_CLASSES), jnp.float32),         # logits
        jax.ShapeDtypeStruct((B, NUM_CLASSES), jnp.float32),         # early_mid
        jax.ShapeDtypeStruct((B, NUM_CLASSES), jnp.float32),         # early_final
        jax.ShapeDtypeStruct((M_IMG, EMBED), jnp.float32),           # spikes (batch-major rows)
        jax.ShapeDtypeStruct((B, EMBED), jnp.float32),               # membrane
        jax.ShapeDtypeStruct((1, EMBED), jnp.float32),               # threshold
        jax.ShapeDtypeStruct((M_IMG, EMBED), jnp.float32),           # feats (batch-major rows)
    )
    outs = pl.pallas_call(
        _net_kernel,
        out_shape=out_shapes,
        in_specs=[VMEM_SPEC] * n_vmem + [SMEM_SPEC] * 2,
        out_specs=tuple([VMEM_SPEC] * len(OUT_NAMES)),
    )(*args)
    logits, early_mid, early_final, spikes, membrane, threshold, feats = outs
    return {
        "logits": logits, "early_mid": early_mid, "early_final": early_final,
        "spikes": spikes.reshape(B, FINE_BINS, EMBED),
        "membrane": membrane,
        "threshold": threshold.reshape(EMBED),
        "feats": feats.reshape(B, FINE_BINS, EMBED),
    }


if __name__ == "__main__":
    key = jax.random.PRNGKey(0)
    kparam, kev = jax.random.split(key)
    params = init_params(kparam)

    kx, ky, kt, kpol = jax.random.split(kev, 4)
    ev_x = jax.random.uniform(kx, (B, N_EV), jnp.float32, 0.0, H - 1)
    ev_y = jax.random.uniform(ky, (B, N_EV), jnp.float32, 0.0, W - 1)
    ev_t = jax.random.uniform(kt, (B, N_EV), jnp.float32, 0.0, 1.0)
    ev_p = jnp.where(jax.random.uniform(kpol, (B, N_EV)) > 0.5, 1.0, -1.0)
    events = jnp.stack([ev_x, ev_y, ev_t, ev_p], axis=-1)   # [B, N, 4]

    out = forward(events, params)
    out = jax.tree_util.tree_map(jax.block_until_ready, out)

    assert out["logits"].shape == (B, NUM_CLASSES)
    assert out["early_mid"].shape == (B, NUM_CLASSES)
    assert out["early_final"].shape == (B, NUM_CLASSES)
    assert out["spikes"].shape == (B, FINE_BINS, EMBED)
    assert out["membrane"].shape == (B, EMBED)
    assert out["threshold"].shape == (EMBED,)
    assert out["feats"].shape == (B, FINE_BINS, EMBED)
    assert bool(jnp.all(jnp.isfinite(out["logits"])))
    assert bool(jnp.all(jnp.isfinite(out["feats"])))
    print("KERNEL_OK")
</pallas_src>

<mosaic_0001>
module attributes {stable_mosaic.version = 11 : i64} {
  func.func private @main(%arg0: i32) attributes {dimension_semantics = [#tpu.dimension_semantics<core_parallel>], iteration_bounds = array<i64: 2>, tpu.core_type = #tpu.core_type<sc_scalar_subcore>, window_params = []} {
    return
  }
}

module attributes {stable_mosaic.version = 11 : i64} {
  func.func private @main(%arg0: i32) attributes {dimension_semantics = [#tpu.dimension_semantics<core_parallel>], iteration_bounds = array<i64: 2>, tpu.core_type = #tpu.core_type<sc_scalar_subcore>, window_params = []} {
    return
  }
}

module attributes {stable_mosaic.version = 11 : i64} {
  func.func @_net_kernel(%arg0: memref<16x256xf32, #tpu.memory_space<vmem>>, %arg1: memref<8x256xf32, #tpu.memory_space<vmem>>, %arg2: memref<2x256xf32, #tpu.memory_space<vmem>>, %arg3: memref<9x16x256xf32, #tpu.memory_space<vmem>>, %arg4: memref<16x16xf32, #tpu.memory_space<vmem>>, %arg5: memref<8x8xf32, #tpu.memory_space<vmem>>, %arg6: memref<16x8xf32, #tpu.memory_space<vmem>>, %arg7: memref<16x16xf32, #tpu.memory_space<vmem>>, %arg8: memref<8x8xf32, #tpu.memory_space<vmem>>, %arg9: memref<16x16xf32, #tpu.memory_space<vmem>>, %arg10: memref<16x16xf32, #tpu.memory_space<vmem>>, %arg11: memref<16x16xf32, #tpu.memory_space<vmem>>, %arg12: memref<16x16xf32, #tpu.memory_space<vmem>>, %arg13: memref<16x2xf32, #tpu.memory_space<vmem>>, %arg14: memref<2x16xf32, #tpu.memory_space<vmem>>, %arg15: memref<2x16xf32, #tpu.memory_space<vmem>>, %arg16: memref<4x12xf32, #tpu.memory_space<vmem>>, %arg17: memref<4x72xf32, #tpu.memory_space<vmem>>, %arg18: memref<1x72xf32, #tpu.memory_space<vmem>>, %arg19: memref<72x8xf32, #tpu.memory_space<vmem>>, %arg20: memref<8x24xf32, #tpu.memory_space<vmem>>, %arg21: memref<8x32xf32, #tpu.memory_space<vmem>>, %arg22: memref<1x32xf32, #tpu.memory_space<vmem>>, %arg23: memref<256x32xf32, #tpu.memory_space<vmem>>, %arg24: memref<1x32xf32, #tpu.memory_space<vmem>>, %arg25: memref<256x32xf32, #tpu.memory_space<vmem>>, %arg26: memref<1x32xf32, #tpu.memory_space<vmem>>, %arg27: memref<256x32xf32, #tpu.memory_space<vmem>>, %arg28: memref<1x32xf32, #tpu.memory_space<vmem>>, %arg29: memref<128x32xf32, #tpu.memory_space<vmem>>, %arg30: memref<1x32xf32, #tpu.memory_space<vmem>>, %arg31: memref<32x10xf32, #tpu.memory_space<vmem>>, %arg32: memref<1x10xf32, #tpu.memory_space<vmem>>, %arg33: memref<32x32xf32, #tpu.memory_space<vmem>>, %arg34: memref<32x32xf32, #tpu.memory_space<vmem>>, %arg35: memref<1x32xf32, #tpu.memory_space<vmem>>, %arg36: memref<32x32xf32, #tpu.memory_space<vmem>>, %arg37: memref<1x32xf32, #tpu.memory_space<vmem>>, %arg38: memref<1x32xf32, #tpu.memory_space<vmem>>, %arg39: memref<1x16xf32, #tpu.memory_space<vmem>>, %arg40: memref<1x16xf32, #tpu.memory_space<vmem>>, %arg41: memref<16x32xf32, #tpu.memory_space<vmem>>, %arg42: memref<1x32xf32, #tpu.memory_space<vmem>>, %arg43: memref<32x32xf32, #tpu.memory_space<vmem>>, %arg44: memref<32x32xf32, #tpu.memory_space<vmem>>, %arg45: memref<1x32xf32, #tpu.memory_space<vmem>>, %arg46: memref<32x32xf32, #tpu.memory_space<vmem>>, %arg47: memref<1x32xf32, #tpu.memory_space<vmem>>, %arg48: memref<1x32xf32, #tpu.memory_space<vmem>>, %arg49: memref<32x96xf32, #tpu.memory_space<vmem>>, %arg50: memref<1x96xf32, #tpu.memory_space<vmem>>, %arg51: memref<32x32xf32, #tpu.memory_space<vmem>>, %arg52: memref<1x32xf32, #tpu.memory_space<vmem>>, %arg53: memref<1x32xf32, #tpu.memory_space<vmem>>, %arg54: memref<1x32xf32, #tpu.memory_space<vmem>>, %arg55: memref<32x128xf32, #tpu.memory_space<vmem>>, %arg56: memref<1x128xf32, #tpu.memory_space<vmem>>, %arg57: memref<128x32xf32, #tpu.memory_space<vmem>>, %arg58: memref<1x32xf32, #tpu.memory_space<vmem>>, %arg59: memref<1x32xf32, #tpu.memory_space<vmem>>, %arg60: memref<1x32xf32, #tpu.memory_space<vmem>>, %arg61: memref<32x96xf32, #tpu.memory_space<vmem>>, %arg62: memref<1x96xf32, #tpu.memory_space<vmem>>, %arg63: memref<32x32xf32, #tpu.memory_space<vmem>>, %arg64: memref<1x32xf32, #tpu.memory_space<vmem>>, %arg65: memref<1x32xf32, #tpu.memory_space<vmem>>, %arg66: memref<1x32xf32, #tpu.memory_space<vmem>>, %arg67: memref<32x128xf32, #tpu.memory_space<vmem>>, %arg68: memref<1x128xf32, #tpu.memory_space<vmem>>, %arg69: memref<128x32xf32, #tpu.memory_space<vmem>>, %arg70: memref<1x32xf32, #tpu.memory_space<vmem>>, %arg71: memref<1x32xf32, #tpu.memory_space<vmem>>, %arg72: memref<1x32xf32, #tpu.memory_space<vmem>>, %arg73: memref<32x10xf32, #tpu.memory_space<vmem>>, %arg74: memref<1x10xf32, #tpu.memory_space<vmem>>, %arg75: memref<32x10xf32, #tpu.memory_space<vmem>>, %arg76: memref<1x10xf32, #tpu.memory_space<vmem>>, %arg77: memref<36xf32, #tpu.memory_space<smem>>, %arg78: memref<4xf32, #tpu.memory_space<smem>>, %arg79: memref<2x10xf32, #tpu.memory_space<vmem>>, %arg80: memref<2x10xf32, #tpu.memory_space<vmem>>, %arg81: memref<2x10xf32, #tpu.memory_space<vmem>>, %arg82: memref<16x32xf32, #tpu.memory_space<vmem>>, %arg83: memref<2x32xf32, #tpu.memory_space<vmem>>, %arg84: memref<1x32xf32, #tpu.memory_space<vmem>>, %arg85: memref<16x32xf32, #tpu.memory_space<vmem>>) attributes {dimension_semantics = [], scalar_prefetch = 0 : i64, scratch_operands = 0 : i64, tpu.core_type = #tpu.core_type<tc>} {
    %c0 = arith.constant 0 : index
    %c0_0 = arith.constant 0 : index
    %0 = vector.load %arg4[%c0, %c0_0] : memref<16x16xf32, #tpu.memory_space<vmem>>, vector<16x16xf32>
    %c0_1 = arith.constant 0 : index
    %c0_2 = arith.constant 0 : index
    %1 = vector.load %arg0[%c0_1, %c0_2] : memref<16x256xf32, #tpu.memory_space<vmem>>, vector<16x256xf32>
    %cst = arith.constant dense<0.000000e+00> : vector<16x256xf32>
    %2 = tpu.matmul %0, %1, %cst {dimension_numbers = #tpu.dot_dimension_numbers<[1], [0], [0], [1], [0, 0, 1, 1], [], []>} : vector<16x16xf32>, vector<16x256xf32>, vector<16x256xf32> -> vector<16x256xf32>
    %cst_3 = arith.constant dense<0.000000e+00> : vector<16xf32>
    %3 = vector.multi_reduction <add>, %2, %cst_3 [1] : vector<16x256xf32> to vector<16xf32>
    %4 = vector.shape_cast %3 : vector<16xf32> to vector<16x1xf32>
    %cst_4 = arith.constant 2.560000e+02 : f32
    %5 = vector.broadcast %cst_4 : f32 to vector<16x1xf32>
    %6 = arith.divf %4, %5 : vector<16x1xf32>
    %7 = vector.broadcast %6 : vector<16x1xf32> to vector<16x256xf32>
    %8 = arith.subf %2, %7 : vector<16x256xf32>
    %9 = arith.mulf %8, %8 : vector<16x256xf32>
    %cst_5 = arith.constant dense<0.000000e+00> : vector<16xf32>
    %10 = vector.multi_reduction <add>, %9, %cst_5 [1] : vector<16x256xf32> to vector<16xf32>
    %11 = vector.shape_cast %10 : vector<16xf32> to vector<16x1xf32>
    %cst_6 = arith.constant 2.560000e+02 : f32
    %12 = vector.broadcast %cst_6 : f32 to vector<16x1xf32>
    %13 = arith.divf %11, %12 : vector<16x1xf32>
    %14 = vector.broadcast %6 : vector<16x1xf32> to vector<16x256xf32>
    %15 = arith.subf %2, %14 : vector<16x256xf32>
    %cst_7 = arith.constant 9.99999974E-6 : f32
    %16 = vector.broadcast %cst_7 : f32 to vector<16x1xf32>
    %17 = arith.addf %13, %16 : vector<16x1xf32>
    %18 = math.rsqrt %17 : vector<16x1xf32>
    %19 = vector.broadcast %18 : vector<16x1xf32> to vector<16x256xf32>
    %20 = arith.mulf %15, %19 : vector<16x256xf32>
    %c0_8 = arith.constant 0 : index
    %c0_9 = arith.constant 0 : index
    %21 = vector.load %arg7[%c0_8, %c0_9] : memref<16x16xf32, #tpu.memory_space<vmem>>, vector<16x16xf32>
    %cst_10 = arith.constant dense<0.000000e+00> : vector<16xf32>
    %22 = vector.multi_reduction <add>, %20, %cst_10 [1] : vector<16x256xf32> to vector<16xf32>
    %23 = vector.shape_cast %22 : vector<16xf32> to vector<16x1xf32>
    %cst_11 = arith.constant 2.560000e+02 : f32
    %24 = vector.broadcast %cst_11 : f32 to vector<16x1xf32>
    %25 = arith.divf %23, %24 : vector<16x1xf32>
    %cst_12 = arith.constant dense<0.000000e+00> : vector<16x1xf32>
    %26 = tpu.matmul %21, %25, %cst_12 {dimension_numbers = #tpu.dot_dimension_numbers<[1], [0], [0], [1], [0, 0, 1, 1], [], []>} : vector<16x16xf32>, vector<16x1xf32>, vector<16x1xf32> -> vector<16x1xf32>
    %27 = vector.broadcast %26 : vector<16x1xf32> to vector<16x256xf32>
    %28 = arith.subf %20, %27 : vector<16x256xf32>
    %29 = arith.mulf %28, %28 : vector<16x256xf32>
    %cst_13 = arith.constant dense<0.000000e+00> : vector<16xf32>
    %30 = vector.multi_reduction <add>, %29, %cst_13 [1] : vector<16x256xf32> to vector<16xf32>
    %31 = vector.shape_cast %30 : vector<16xf32> to vector<16x1xf32>
    %cst_14 = arith.constant 2.560000e+02 : f32
    %32 = vector.broadcast %cst_14 : f32 to vector<16x1xf32>
    %33 = arith.divf %31, %32 : vector<16x1xf32>
    %cst_15 = arith.constant dense<0.000000e+00> : vector<16x1xf32>
    %34 = tpu.matmul %21, %33, %cst_15 {dimension_numbers = #tpu.dot_dimension_numbers<[1], [0], [0], [1], [0, 0, 1, 1], [], []>} : vector<16x16xf32>, vector<16x1xf32>, vector<16x1xf32> -> vector<16x1xf32>
    %cst_16 = arith.constant 9.99999974E-6 : f32
    %35 = vector.broadcast %cst_16 : f32 to vector<16x1xf32>
    %36 = arith.addf %34, %35 : vector<16x1xf32>
    %37 = math.rsqrt %36 : vector<16x1xf32>
    %38 = vector.broadcast %37 : vector<16x1xf32> to vector<16x256xf32>
    %39 = arith.mulf %28, %38 : vector<16x256xf32>
    %c0_17 = arith.constant 0 : index
    %c0_18 = arith.constant 0 : index
    %40 = vector.load %arg5[%c0_17, %c0_18] : memref<8x8xf32, #tpu.memory_space<vmem>>, vector<8x8xf32>
    %c0_19 = arith.constant 0 : index
    %c0_20 = arith.constant 0 : index
    %41 = vector.load %arg1[%c0_19, %c0_20] : memref<8x256xf32, #tpu.memory_space<vmem>>, vector<8x256xf32>
    %cst_21 = arith.constant dense<0.000000e+00> : vector<8x256xf32>
    %42 = tpu.matmul %40, %41, %cst_21 {dimension_numbers = #tpu.dot_dimension_numbers<[1], [0], [0], [1], [0, 0, 1, 1], [], []>} : vector<8x8xf32>, vector<8x256xf32>, vector<8x256xf32> -> vector<8x256xf32>
    %cst_22 = arith.constant dense<0.000000e+00> : vector<8xf32>
    %43 = vector.multi_reduction <add>, %42, %cst_22 [1] : vector<8x256xf32> to vector<8xf32>
    %44 = vector.shape_cast %43 : vector<8xf32> to vector<8x1xf32>
    %cst_23 = arith.constant 2.560000e+02 : f32
    %45 = vector.broadcast %cst_23 : f32 to vector<8x1xf32>
    %46 = arith.divf %44, %45 : vector<8x1xf32>
    %47 = vector.broadcast %46 : vector<8x1xf32> to vector<8x256xf32>
    %48 = arith.subf %42, %47 : vector<8x256xf32>
    %49 = arith.mulf %48, %48 : vector<8x256xf32>
    %cst_24 = arith.constant dense<0.000000e+00> : vector<8xf32>
    %50 = vector.multi_reduction <add>, %49, %cst_24 [1] : vector<8x256xf32> to vector<8xf32>
    %51 = vector.shape_cast %50 : vector<8xf32> to vector<8x1xf32>
    %cst_25 = arith.constant 2.560000e+02 : f32
    %52 = vector.broadcast %cst_25 : f32 to vector<8x1xf32>
    %53 = arith.divf %51, %52 : vector<8x1xf32>
    %54 = vector.broadcast %46 : vector<8x1xf32> to vector<8x256xf32>
    %55 = arith.subf %42, %54 : vector<8x256xf32>
    %cst_26 = arith.constant 9.99999974E-6 : f32
    %56 = vector.broadcast %cst_26 : f32 to vector<8x1xf32>
    %57 = arith.addf %53, %56 : vector<8x1xf32>
    %58 = math.rsqrt %57 : vector<8x1xf32>
    %59 = vector.broadcast %58 : vector<8x1xf32> to vector<8x256xf32>
    %60 = arith.mulf %55, %59 : vector<8x256xf32>
    %c0_27 = arith.constant 0 : index
    %c0_28 = arith.constant 0 : index
    %61 = vector.load %arg8[%c0_27, %c0_28] : memref<8x8xf32, #tpu.memory_space<vmem>>, vector<8x8xf32>
    %cst_29 = arith.constant dense<0.000000e+00> : vector<8xf32>
    %62 = vector.multi_reduction <add>, %60, %cst_29 [1] : vector<8x256xf32> to vector<8xf32>
    %63 = vector.shape_cast %62 : vector<8xf32> to vector<8x1xf32>
    %cst_30 = arith.constant 2.560000e+02 : f32
    %64 = vector.broadcast %cst_30 : f32 to vector<8x1xf32>
    %65 = arith.divf %63, %64 : vector<8x1xf32>
    %cst_31 = arith.constant dense<0.000000e+00> : vector<8x1xf32>
    %66 = tpu.matmul %61, %65, %cst_31 {dimension_numbers = #tpu.dot_dimension_numbers<[1], [0], [0], [1], [0, 0, 1, 1], [], []>} : vector<8x8xf32>, vector<8x1xf32>, vector<8x1xf32> -> vector<8x1xf32>
    %67 = vector.broadcast %66 : vector<8x1xf32> to vector<8x256xf32>
    %68 = arith.subf %60, %67 : vector<8x256xf32>
    %69 = arith.mulf %68, %68 : vector<8x256xf32>
    %cst_32 = arith.constant dense<0.000000e+00> : vector<8xf32>
    %70 = vector.multi_reduction <add>, %69, %cst_32 [1] : vector<8x256xf32> to vector<8xf32>
    %71 = vector.shape_cast %70 : vector<8xf32> to vector<8x1xf32>
    %cst_33 = arith.constant 2.560000e+02 : f32
    %72 = vector.broadcast %cst_33 : f32 to vector<8x1xf32>
    %73 = arith.divf %71, %72 : vector<8x1xf32>
    %cst_34 = arith.constant dense<0.000000e+00> : vector<8x1xf32>
    %74 = tpu.matmul %61, %73, %cst_34 {dimension_numbers = #tpu.dot_dimension_numbers<[1], [0], [0], [1], [0, 0, 1, 1], [], []>} : vector<8x8xf32>, vector<8x1xf32>, vector<8x1xf32> -> vector<8x1xf32>
    %cst_35 = arith.constant 9.99999974E-6 : f32
    %75 = vector.broadcast %cst_35 : f32 to vector<8x1xf32>
    %76 = arith.addf %74, %75 : vector<8x1xf32>
    %77 = math.rsqrt %76 : vector<8x1xf32>
    %78 = vector.broadcast %77 : vector<8x1xf32> to vector<8x256xf32>
    %79 = arith.mulf %68, %78 : vector<8x256xf32>
    %c0_36 = arith.constant 0 : index
    %c0_37 = arith.constant 0 : index
    %80 = vector.load %arg6[%c0_36, %c0_37] : memref<16x8xf32, #tpu.memory_space<vmem>>, vector<16x8xf32>
    %cst_38 = arith.constant dense<0.000000e+00> : vector<16x256xf32>
    %81 = tpu.matmul %80, %79, %cst_38 {dimension_numbers = #tpu.dot_dimension_numbers<[1], [0], [0], [1], [0, 0, 1, 1], [], []>} : vector<16x8xf32>, vector<8x256xf32>, vector<16x256xf32> -> vector<16x256xf32>
    %c0_39 = arith.constant 0 : index
    %c0_40 = arith.constant 0 : index
    %c0_41 = arith.constant 0 : index
    %82 = vector.load %arg3[%c0_39, %c0_40, %c0_41] : memref<9x16x256xf32, #tpu.memory_space<vmem>>, vector<1x16x256xf32>
    %83 = vector.shape_cast %82 : vector<1x16x256xf32> to vector<16x256xf32>
    %c0_42 = arith.constant 0 : index
    %84 = memref.load %arg77[%c0_42] : memref<36xf32, #tpu.memory_space<smem>>
    %85 = vector.broadcast %84 : f32 to vector<16x256xf32>
    %86 = arith.mulf %85, %83 : vector<16x256xf32>
    %c9 = arith.constant 9 : index
    %87 = memref.load %arg77[%c9] : memref<36xf32, #tpu.memory_space<smem>>
    %88 = vector.broadcast %87 : f32 to vector<16x256xf32>
    %89 = arith.mulf %88, %83 : vector<16x256xf32>
    %c18 = arith.constant 18 : index
    %90 = memref.load %arg77[%c18] : memref<36xf32, #tpu.memory_space<smem>>
    %91 = vector.broadcast %90 : f32 to vector<16x256xf32>
    %92 = arith.mulf %91, %83 : vector<16x256xf32>
    %c27 = arith.constant 27 : index
    %93 = memref.load %arg77[%c27] : memref<36xf32, #tpu.memory_space<smem>>
    %94 = vector.broadcast %93 : f32 to vector<16x256xf32>
    %95 = arith.mulf %94, %83 : vector<16x256xf32>
    %c1 = arith.constant 1 : index
    %c0_43 = arith.constant 0 : index
    %c0_44 = arith.constant 0 : index
    %96 = vector.load %arg3[%c1, %c0_43, %c0_44] : memref<9x16x256xf32, #tpu.memory_space<vmem>>, vector<1x16x256xf32>
    %97 = vector.shape_cast %96 : vector<1x16x256xf32> to vector<16x256xf32>
    %c1_45 = arith.constant 1 : index
    %98 = memref.load %arg77[%c1_45] : memref<36xf32, #tpu.memory_space<smem>>
    %99 = vector.broadcast %98 : f32 to vector<16x256xf32>
    %100 = arith.mulf %99, %97 : vector<16x256xf32>
    %101 = arith.addf %86, %100 : vector<16x256xf32>
    %c10 = arith.constant 10 : index
    %102 = memref.load %arg77[%c10] : memref<36xf32, #tpu.memory_space<smem>>
    %103 = vector.broadcast %102 : f32 to vector<16x256xf32>
    %104 = arith.mulf %103, %97 : vector<16x256xf32>
    %105 = arith.addf %89, %104 : vector<16x256xf32>
    %c19 = arith.constant 19 : index
    %106 = memref.load %arg77[%c19] : memref<36xf32, #tpu.memory_space<smem>>
    %107 = vector.broadcast %106 : f32 to vector<16x256xf32>
    %108 = arith.mulf %107, %97 : vector<16x256xf32>
    %109 = arith.addf %92, %108 : vector<16x256xf32>
    %c28 = arith.constant 28 : index
    %110 = memref.load %arg77[%c28] : memref<36xf32, #tpu.memory_space<smem>>
    %111 = vector.broadcast %110 : f32 to vector<16x256xf32>
    %112 = arith.mulf %111, %97 : vector<16x256xf32>
    %113 = arith.addf %95, %112 : vector<16x256xf32>
    %c2 = arith.constant 2 : index
    %c0_46 = arith.constant 0 : index
    %c0_47 = arith.constant 0 : index
    %114 = vector.load %arg3[%c2, %c0_46, %c0_47] : memref<9x16x256xf32, #tpu.memory_space<vmem>>, vector<1x16x256xf32>
    %115 = vector.shape_cast %114 : vector<1x16x256xf32> to vector<16x256xf32>
    %c2_48 = arith.constant 2 : index
    %116 = memref.load %arg77[%c2_48] : memref<36xf32, #tpu.memory_space<smem>>
    %117 = vector.broadcast %116 : f32 to vector<16x256xf32>
    %118 = arith.mulf %117, %115 : vector<16x256xf32>
    %119 = arith.addf %101, %118 : vector<16x256xf32>
    %c11 = arith.constant 11 : index
    %120 = memref.load %arg77[%c11] : memref<36xf32, #tpu.memory_space<smem>>
    %121 = vector.broadcast %120 : f32 to vector<16x256xf32>
    %122 = arith.mulf %121, %115 : vector<16x256xf32>
    %123 = arith.addf %105, %122 : vector<16x256xf32>
    %c20 = arith.constant 20 : index
    %124 = memref.load %arg77[%c20] : memref<36xf32, #tpu.memory_space<smem>>
    %125 = vector.broadcast %124 : f32 to vector<16x256xf32>
    %126 = arith.mulf %125, %115 : vector<16x256xf32>
    %127 = arith.addf %109, %126 : vector<16x256xf32>
    %c29 = arith.constant 29 : index
    %128 = memref.load %arg77[%c29] : memref<36xf32, #tpu.memory_space<smem>>
    %129 = vector.broadcast %128 : f32 to vector<16x256xf32>
    %130 = arith.mulf %129, %115 : vector<16x256xf32>
    %131 = arith.addf %113, %130 : vector<16x256xf32>
    %c3 = arith.constant 3 : index
    %c0_49 = arith.constant 0 : index
    %c0_50 = arith.constant 0 : index
    %132 = vector.load %arg3[%c3, %c0_49, %c0_50] : memref<9x16x256xf32, #tpu.memory_space<vmem>>, vector<1x16x256xf32>
    %133 = vector.shape_cast %132 : vector<1x16x256xf32> to vector<16x256xf32>
    %c3_51 = arith.constant 3 : index
    %134 = memref.load %arg77[%c3_51] : memref<36xf32, #tpu.memory_space<smem>>
    %135 = vector.broadcast %134 : f32 to vector<16x256xf32>
    %136 = arith.mulf %135, %133 : vector<16x256xf32>
    %137 = arith.addf %119, %136 : vector<16x256xf32>
    %c12 = arith.constant 12 : index
    %138 = memref.load %arg77[%c12] : memref<36xf32, #tpu.memory_space<smem>>
    %139 = vector.broadcast %138 : f32 to vector<16x256xf32>
    %140 = arith.mulf %139, %133 : vector<16x256xf32>
    %141 = arith.addf %123, %140 : vector<16x256xf32>
    %c21 = arith.constant 21 : index
    %142 = memref.load %arg77[%c21] : memref<36xf32, #tpu.memory_space<smem>>
    %143 = vector.broadcast %142 : f32 to vector<16x256xf32>
    %144 = arith.mulf %143, %133 : vector<16x256xf32>
    %145 = arith.addf %127, %144 : vector<16x256xf32>
    %c30 = arith.constant 30 : index
    %146 = memref.load %arg77[%c30] : memref<36xf32, #tpu.memory_space<smem>>
    %147 = vector.broadcast %146 : f32 to vector<16x256xf32>
    %148 = arith.mulf %147, %133 : vector<16x256xf32>
    %149 = arith.addf %131, %148 : vector<16x256xf32>
    %c4 = arith.constant 4 : index
    %c0_52 = arith.constant 0 : index
    %c0_53 = arith.constant 0 : index
    %150 = vector.load %arg3[%c4, %c0_52, %c0_53] : memref<9x16x256xf32, #tpu.memory_space<vmem>>, vector<1x16x256xf32>
    %151 = vector.shape_cast %150 : vector<1x16x256xf32> to vector<16x256xf32>
    %c4_54 = arith.constant 4 : index
    %152 = memref.load %arg77[%c4_54] : memref<36xf32, #tpu.memory_space<smem>>
    %153 = vector.broadcast %152 : f32 to vector<16x256xf32>
    %154 = arith.mulf %153, %151 : vector<16x256xf32>
    %155 = arith.addf %137, %154 : vector<16x256xf32>
    %c13 = arith.constant 13 : index
    %156 = memref.load %arg77[%c13] : memref<36xf32, #tpu.memory_space<smem>>
    %157 = vector.broadcast %156 : f32 to vector<16x256xf32>
    %158 = arith.mulf %157, %151 : vector<16x256xf32>
    %159 = arith.addf %141, %158 : vector<16x256xf32>
    %c22 = arith.constant 22 : index
    %160 = memref.load %arg77[%c22] : memref<36xf32, #tpu.memory_space<smem>>
    %161 = vector.broadcast %160 : f32 to vector<16x256xf32>
    %162 = arith.mulf %161, %151 : vector<16x256xf32>
    %163 = arith.addf %145, %162 : vector<16x256xf32>
    %c31 = arith.constant 31 : index
    %164 = memref.load %arg77[%c31] : memref<36xf32, #tpu.memory_space<smem>>
    %165 = vector.broadcast %164 : f32 to vector<16x256xf32>
    %166 = arith.mulf %165, %151 : vector<16x256xf32>
    %167 = arith.addf %149, %166 : vector<16x256xf32>
    %c5 = arith.constant 5 : index
    %c0_55 = arith.constant 0 : index
    %c0_56 = arith.constant 0 : index
    %168 = vector.load %arg3[%c5, %c0_55, %c0_56] : memref<9x16x256xf32, #tpu.memory_space<vmem>>, vector<1x16x256xf32>
    %169 = vector.shape_cast %168 : vector<1x16x256xf32> to vector<16x256xf32>
    %c5_57 = arith.constant 5 : index
    %170 = memref.load %arg77[%c5_57] : memref<36xf32, #tpu.memory_space<smem>>
    %171 = vector.broadcast %170 : f32 to vector<16x256xf32>
    %172 = arith.mulf %171, %169 : vector<16x256xf32>
    %173 = arith.addf %155, %172 : vector<16x256xf32>
    %c14 = arith.constant 14 : index
    %174 = memref.load %arg77[%c14] : memref<36xf32, #tpu.memory_space<smem>>
    %175 = vector.broadcast %174 : f32 to vector<16x256xf32>
    %176 = arith.mulf %175, %169 : vector<16x256xf32>
    %177 = arith.addf %159, %176 : vector<16x256xf32>
    %c23 = arith.constant 23 : index
    %178 = memref.load %arg77[%c23] : memref<36xf32, #tpu.memory_space<smem>>
    %179 = vector.broadcast %178 : f32 to vector<16x256xf32>
    %180 = arith.mulf %179, %169 : vector<16x256xf32>
    %181 = arith.addf %163, %180 : vector<16x256xf32>
    %c32 = arith.constant 32 : index
    %182 = memref.load %arg77[%c32] : memref<36xf32, #tpu.memory_space<smem>>
    %183 = vector.broadcast %182 : f32 to vector<16x256xf32>
    %184 = arith.mulf %183, %169 : vector<16x256xf32>
    %185 = arith.addf %167, %184 : vector<16x256xf32>
    %c6 = arith.constant 6 : index
    %c0_58 = arith.constant 0 : index
    %c0_59 = arith.constant 0 : index
    %186 = vector.load %arg3[%c6, %c0_58, %c0_59] : memref<9x16x256xf32, #tpu.memory_space<vmem>>, vector<1x16x256xf32>
    %187 = vector.shape_cast %186 : vector<1x16x256xf32> to vector<16x256xf32>
    %c6_60 = arith.constant 6 : index
    %188 = memref.load %arg77[%c6_60] : memref<36xf32, #tpu.memory_space<smem>>
    %189 = vector.broadcast %188 : f32 to vector<16x256xf32>
    %190 = arith.mulf %189, %187 : vector<16x256xf32>
    %191 = arith.addf %173, %190 : vector<16x256xf32>
    %c15 = arith.constant 15 : index
    %192 = memref.load %arg77[%c15] : memref<36xf32, #tpu.memory_space<smem>>
    %193 = vector.broadcast %192 : f32 to vector<16x256xf32>
    %194 = arith.mulf %193, %187 : vector<16x256xf32>
    %195 = arith.addf %177, %194 : vector<16x256xf32>
    %c24 = arith.constant 24 : index
    %196 = memref.load %arg77[%c24] : memref<36xf32, #tpu.memory_space<smem>>
    %197 = vector.broadcast %196 : f32 to vector<16x256xf32>
    %198 = arith.mulf %197, %187 : vector<16x256xf32>
    %199 = arith.addf %181, %198 : vector<16x256xf32>
    %c33 = arith.constant 33 : index
    %200 = memref.load %arg77[%c33] : memref<36xf32, #tpu.memory_space<smem>>
    %201 = vector.broadcast %200 : f32 to vector<16x256xf32>
    %202 = arith.mulf %201, %187 : vector<16x256xf32>
    %203 = arith.addf %185, %202 : vector<16x256xf32>
    %c7 = arith.constant 7 : index
    %c0_61 = arith.constant 0 : index
    %c0_62 = arith.constant 0 : index
    %204 = vector.load %arg3[%c7, %c0_61, %c0_62] : memref<9x16x256xf32, #tpu.memory_space<vmem>>, vector<1x16x256xf32>
    %205 = vector.shape_cast %204 : vector<1x16x256xf32> to vector<16x256xf32>
    %c7_63 = arith.constant 7 : index
    %206 = memref.load %arg77[%c7_63] : memref<36xf32, #tpu.memory_space<smem>>
    %207 = vector.broadcast %206 : f32 to vector<16x256xf32>
    %208 = arith.mulf %207, %205 : vector<16x256xf32>
    %209 = arith.addf %191, %208 : vector<16x256xf32>
    %c16 = arith.constant 16 : index
    %210 = memref.load %arg77[%c16] : memref<36xf32, #tpu.memory_space<smem>>
    %211 = vector.broadcast %210 : f32 to vector<16x256xf32>
    %212 = arith.mulf %211, %205 : vector<16x256xf32>
    %213 = arith.addf %195, %212 : vector<16x256xf32>
    %c25 = arith.constant 25 : index
    %214 = memref.load %arg77[%c25] : memref<36xf32, #tpu.memory_space<smem>>
    %215 = vector.broadcast %214 : f32 to vector<16x256xf32>
    %216 = arith.mulf %215, %205 : vector<16x256xf32>
    %217 = arith.addf %199, %216 : vector<16x256xf32>
    %c34 = arith.constant 34 : index
    %218 = memref.load %arg77[%c34] : memref<36xf32, #tpu.memory_space<smem>>
    %219 = vector.broadcast %218 : f32 to vector<16x256xf32>
    %220 = arith.mulf %219, %205 : vector<16x256xf32>
    %221 = arith.addf %203, %220 : vector<16x256xf32>
    %c8 = arith.constant 8 : index
    %c0_64 = arith.constant 0 : index
    %c0_65 = arith.constant 0 : index
    %222 = vector.load %arg3[%c8, %c0_64, %c0_65] : memref<9x16x256xf32, #tpu.memory_space<vmem>>, vector<1x16x256xf32>
    %223 = vector.shape_cast %222 : vector<1x16x256xf32> to vector<16x256xf32>
    %c8_66 = arith.constant 8 : index
    %224 = memref.load %arg77[%c8_66] : memref<36xf32, #tpu.memory_space<smem>>
    %225 = vector.broadcast %224 : f32 to vector<16x256xf32>
    %226 = arith.mulf %225, %223 : vector<16x256xf32>
    %227 = arith.addf %209, %226 : vector<16x256xf32>
    %c17 = arith.constant 17 : index
    %228 = memref.load %arg77[%c17] : memref<36xf32, #tpu.memory_space<smem>>
    %229 = vector.broadcast %228 : f32 to vector<16x256xf32>
    %230 = arith.mulf %229, %223 : vector<16x256xf32>
    %231 = arith.addf %213, %230 : vector<16x256xf32>
    %c26 = arith.constant 26 : index
    %232 = memref.load %arg77[%c26] : memref<36xf32, #tpu.memory_space<smem>>
    %233 = vector.broadcast %232 : f32 to vector<16x256xf32>
    %234 = arith.mulf %233, %223 : vector<16x256xf32>
    %235 = arith.addf %217, %234 : vector<16x256xf32>
    %c35 = arith.constant 35 : index
    %236 = memref.load %arg77[%c35] : memref<36xf32, #tpu.memory_space<smem>>
    %237 = vector.broadcast %236 : f32 to vector<16x256xf32>
    %238 = arith.mulf %237, %223 : vector<16x256xf32>
    %239 = arith.addf %221, %238 : vector<16x256xf32>
    %c0_67 = arith.constant 0 : index
    %c0_68 = arith.constant 0 : index
    %240 = vector.load %arg16[%c0_67, %c0_68] : memref<4x12xf32, #tpu.memory_space<vmem>>, vector<4x12xf32>
    %c0_69 = arith.constant 0 : index
    %241 = memref.load %arg78[%c0_69] : memref<4xf32, #tpu.memory_space<smem>>
    %242 = vector.broadcast %241 : f32 to vector<16x256xf32>
    %243 = arith.addf %227, %242 : vector<16x256xf32>
    %cst_70 = arith.constant 0.999994993 : f32
    %244 = vector.broadcast %cst_70 : f32 to vector<16x256xf32>
    %245 = arith.mulf %243, %244 : vector<16x256xf32>
    %cst_71 = arith.constant 0.000000e+00 : f32
    %246 = vector.broadcast %cst_71 : f32 to vector<16x256xf32>
    %247 = arith.maximumf %245, %246 : vector<16x256xf32>
    %cst_72 = arith.constant dense<0.000000e+00> : vector<16xf32>
    %248 = vector.multi_reduction <add>, %247, %cst_72 [1] : vector<16x256xf32> to vector<16xf32>
    %249 = vector.shape_cast %248 : vector<16xf32> to vector<16x1xf32>
    %cst_73 = arith.constant 3.906250e-03 : f32
    %250 = vector.broadcast %cst_73 : f32 to vector<16x1xf32>
    %251 = arith.mulf %249, %250 : vector<16x1xf32>
    %252 = vector.extract_strided_slice %240 {offsets = [0, 0], sizes = [1, 12], strides = [1, 1]} : vector<4x12xf32> to vector<1x12xf32>
    %253 = vector.broadcast %251 : vector<16x1xf32> to vector<16x12xf32>
    %254 = vector.broadcast %252 : vector<1x12xf32> to vector<16x12xf32>
    %255 = arith.mulf %253, %254 : vector<16x12xf32>
    %c1_74 = arith.constant 1 : index
    %256 = memref.load %arg78[%c1_74] : memref<4xf32, #tpu.memory_space<smem>>
    %257 = vector.broadcast %256 : f32 to vector<16x256xf32>
    %258 = arith.addf %231, %257 : vector<16x256xf32>
    %cst_75 = arith.constant 0.999994993 : f32
    %259 = vector.broadcast %cst_75 : f32 to vector<16x256xf32>
    %260 = arith.mulf %258, %259 : vector<16x256xf32>
    %cst_76 = arith.constant 0.000000e+00 : f32
    %261 = vector.broadcast %cst_76 : f32 to vector<16x256xf32>
    %262 = arith.maximumf %260, %261 : vector<16x256xf32>
    %cst_77 = arith.constant dense<0.000000e+00> : vector<16xf32>
    %263 = vector.multi_reduction <add>, %262, %cst_77 [1] : vector<16x256xf32> to vector<16xf32>
    %264 = vector.shape_cast %263 : vector<16xf32> to vector<16x1xf32>
    %cst_78 = arith.constant 3.906250e-03 : f32
    %265 = vector.broadcast %cst_78 : f32 to vector<16x1xf32>
    %266 = arith.mulf %264, %265 : vector<16x1xf32>
    %267 = vector.extract_strided_slice %240 {offsets = [1, 0], sizes = [1, 12], strides = [1, 1]} : vector<4x12xf32> to vector<1x12xf32>
    %268 = vector.broadcast %266 : vector<16x1xf32> to vector<16x12xf32>
    %269 = vector.broadcast %267 : vector<1x12xf32> to vector<16x12xf32>
    %270 = arith.mulf %268, %269 : vector<16x12xf32>
    %271 = arith.addf %255, %270 : vector<16x12xf32>
    %c2_79 = arith.constant 2 : index
    %272 = memref.load %arg78[%c2_79] : memref<4xf32, #tpu.memory_space<smem>>
    %273 = vector.broadcast %272 : f32 to vector<16x256xf32>
    %274 = arith.addf %235, %273 : vector<16x256xf32>
    %cst_80 = arith.constant 0.999994993 : f32
    %275 = vector.broadcast %cst_80 : f32 to vector<16x256xf32>
    %276 = arith.mulf %274, %275 : vector<16x256xf32>
    %cst_81 = arith.constant 0.000000e+00 : f32
    %277 = vector.broadcast %cst_81 : f32 to vector<16x256xf32>
    %278 = arith.maximumf %276, %277 : vector<16x256xf32>
    %cst_82 = arith.constant dense<0.000000e+00> : vector<16xf32>
    %279 = vector.multi_reduction <add>, %278, %cst_82 [1] : vector<16x256xf32> to vector<16xf32>
    %280 = vector.shape_cast %279 : vector<16xf32> to vector<16x1xf32>
    %cst_83 = arith.constant 3.906250e-03 : f32
    %281 = vector.broadcast %cst_83 : f32 to vector<16x1xf32>
    %282 = arith.mulf %280, %281 : vector<16x1xf32>
    %283 = vector.extract_strided_slice %240 {offsets = [2, 0], sizes = [1, 12], strides = [1, 1]} : vector<4x12xf32> to vector<1x12xf32>
    %284 = vector.broadcast %282 : vector<16x1xf32> to vector<16x12xf32>
    %285 = vector.broadcast %283 : vector<1x12xf32> to vector<16x12xf32>
    %286 = arith.mulf %284, %285 : vector<16x12xf32>
    %287 = arith.addf %271, %286 : vector<16x12xf32>
    %c3_84 = arith.constant 3 : index
    %288 = memref.load %arg78[%c3_84] : memref<4xf32, #tpu.memory_space<smem>>
    %289 = vector.broadcast %288 : f32 to vector<16x256xf32>
    %290 = arith.addf %239, %289 : vector<16x256xf32>
    %cst_85 = arith.constant 0.999994993 : f32
    %291 = vector.broadcast %cst_85 : f32 to vector<16x256xf32>
    %292 = arith.mulf %290, %291 : vector<16x256xf32>
    %cst_86 = arith.constant 0.000000e+00 : f32
    %293 = vector.broadcast %cst_86 : f32 to vector<16x256xf32>
    %294 = arith.maximumf %292, %293 : vector<16x256xf32>
    %cst_87 = arith.constant dense<0.000000e+00> : vector<16xf32>
    %295 = vector.multi_reduction <add>, %294, %cst_87 [1] : vector<16x256xf32> to vector<16xf32>
    %296 = vector.shape_cast %295 : vector<16xf32> to vector<16x1xf32>
    %cst_88 = arith.constant 3.906250e-03 : f32
    %297 = vector.broadcast %cst_88 : f32 to vector<16x1xf32>
    %298 = arith.mulf %296, %297 : vector<16x1xf32>
    %299 = vector.extract_strided_slice %240 {offsets = [3, 0], sizes = [1, 12], strides = [1, 1]} : vector<4x12xf32> to vector<1x12xf32>
    %300 = vector.broadcast %298 : vector<16x1xf32> to vector<16x12xf32>
    %301 = vector.broadcast %299 : vector<1x12xf32> to vector<16x12xf32>
    %302 = arith.mulf %300, %301 : vector<16x12xf32>
    %303 = arith.addf %287, %302 : vector<16x12xf32>
    %c0_89 = arith.constant 0 : index
    %c0_90 = arith.constant 0 : index
    %304 = vector.load %arg9[%c0_89, %c0_90] : memref<16x16xf32, #tpu.memory_space<vmem>>, vector<16x16xf32>
    %c0_91 = arith.constant 0 : index
    %c0_92 = arith.constant 0 : index
    %305 = vector.load %arg10[%c0_91, %c0_92] : memref<16x16xf32, #tpu.memory_space<vmem>>, vector<16x16xf32>
    %306 = vector.extract_strided_slice %303 {offsets = [0, 0], sizes = [16, 4], strides = [1, 1]} : vector<16x12xf32> to vector<16x4xf32>
    %cst_93 = arith.constant dense<0.000000e+00> : vector<16x4xf32>
    %307 = tpu.matmul %304, %306, %cst_93 {dimension_numbers = #tpu.dot_dimension_numbers<[1], [0], [0], [1], [0, 0, 1, 1], [], []>} : vector<16x16xf32>, vector<16x4xf32>, vector<16x4xf32> -> vector<16x4xf32>
    %308 = vector.extract_strided_slice %303 {offsets = [0, 4], sizes = [16, 4], strides = [1, 1]} : vector<16x12xf32> to vector<16x4xf32>
    %309 = arith.addf %307, %308 : vector<16x4xf32>
    %310 = vector.extract_strided_slice %303 {offsets = [0, 8], sizes = [16, 4], strides = [1, 1]} : vector<16x12xf32> to vector<16x4xf32>
    %cst_94 = arith.constant dense<0.000000e+00> : vector<16x4xf32>
    %311 = tpu.matmul %305, %310, %cst_94 {dimension_numbers = #tpu.dot_dimension_numbers<[1], [0], [0], [1], [0, 0, 1, 1], [], []>} : vector<16x16xf32>, vector<16x4xf32>, vector<16x4xf32> -> vector<16x4xf32>
    %312 = arith.addf %309, %311 : vector<16x4xf32>
    %c0_95 = arith.constant 0 : index
    %c0_96 = arith.constant 0 : index
    %313 = vector.load %arg17[%c0_95, %c0_96] : memref<4x72xf32, #tpu.memory_space<vmem>>, vector<4x72xf32>
    %cst_97 = arith.constant dense<0.000000e+00> : vector<16x72xf32>
    %314 = tpu.matmul %312, %313, %cst_97 {dimension_numbers = #tpu.dot_dimension_numbers<[1], [0], [0], [1], [0, 0, 1, 1], [], []>} : vector<16x4xf32>, vector<4x72xf32>, vector<16x72xf32> -> vector<16x72xf32>
    %c0_98 = arith.constant 0 : index
    %c0_99 = arith.constant 0 : index
    %315 = vector.load %arg18[%c0_98, %c0_99] : memref<1x72xf32, #tpu.memory_space<vmem>>, vector<1x72xf32>
    %316 = vector.broadcast %315 : vector<1x72xf32> to vector<16x72xf32>
    %317 = arith.addf %314, %316 : vector<16x72xf32>
    %cst_100 = arith.constant 0.999994993 : f32
    %318 = vector.broadcast %cst_100 : f32 to vector<16x72xf32>
    %319 = arith.mulf %317, %318 : vector<16x72xf32>
    %cst_101 = arith.constant 0.000000e+00 : f32
    %320 = vector.broadcast %cst_101 : f32 to vector<16x72xf32>
    %321 = arith.maximumf %319, %320 : vector<16x72xf32>
    %c0_102 = arith.constant 0 : index
    %c0_103 = arith.constant 0 : index
    %322 = vector.load %arg19[%c0_102, %c0_103] : memref<72x8xf32, #tpu.memory_space<vmem>>, vector<72x8xf32>
    %cst_104 = arith.constant dense<0.000000e+00> : vector<16x8xf32>
    %323 = tpu.matmul %321, %322, %cst_104 {dimension_numbers = #tpu.dot_dimension_numbers<[1], [0], [0], [1], [0, 0, 1, 1], [], []>} : vector<16x72xf32>, vector<72x8xf32>, vector<16x8xf32> -> vector<16x8xf32>
    %c0_105 = arith.constant 0 : index
    %c0_106 = arith.constant 0 : index
    %324 = vector.load %arg20[%c0_105, %c0_106] : memref<8x24xf32, #tpu.memory_space<vmem>>, vector<8x24xf32>
    %cst_107 = arith.constant dense<0.000000e+00> : vector<16x24xf32>
    %325 = tpu.matmul %323, %324, %cst_107 {dimension_numbers = #tpu.dot_dimension_numbers<[1], [0], [0], [1], [0, 0, 1, 1], [], []>} : vector<16x8xf32>, vector<8x24xf32>, vector<16x24xf32> -> vector<16x24xf32>
    %326 = vector.extract_strided_slice %325 {offsets = [0, 0], sizes = [16, 8], strides = [1, 1]} : vector<16x24xf32> to vector<16x8xf32>
    %cst_108 = arith.constant dense<0.000000e+00> : vector<16x8xf32>
    %327 = tpu.matmul %304, %326, %cst_108 {dimension_numbers = #tpu.dot_dimension_numbers<[1], [0], [0], [1], [0, 0, 1, 1], [], []>} : vector<16x16xf32>, vector<16x8xf32>, vector<16x8xf32> -> vector<16x8xf32>
    %328 = vector.extract_strided_slice %325 {offsets = [0, 8], sizes = [16, 8], strides = [1, 1]} : vector<16x24xf32> to vector<16x8xf32>
    %329 = arith.addf %327, %328 : vector<16x8xf32>
    %330 = vector.extract_strided_slice %325 {offsets = [0, 16], sizes = [16, 8], strides = [1, 1]} : vector<16x24xf32> to vector<16x8xf32>
    %cst_109 = arith.constant dense<0.000000e+00> : vector<16x8xf32>
    %331 = tpu.matmul %305, %330, %cst_109 {dimension_numbers = #tpu.dot_dimension_numbers<[1], [0], [0], [1], [0, 0, 1, 1], [], []>} : vector<16x16xf32>, vector<16x8xf32>, vector<16x8xf32> -> vector<16x8xf32>
    %332 = arith.addf %329, %331 : vector<16x8xf32>
    %c0_110 = arith.constant 0 : index
    %c0_111 = arith.constant 0 : index
    %333 = vector.load %arg25[%c0_110, %c0_111] : memref<256x32xf32, #tpu.memory_space<vmem>>, vector<256x32xf32>
    %cst_112 = arith.constant dense<0.000000e+00> : vector<16x32xf32>
    %334 = tpu.matmul %39, %333, %cst_112 {dimension_numbers = #tpu.dot_dimension_numbers<[1], [0], [0], [1], [0, 0, 1, 1], [], []>} : vector<16x256xf32>, vector<256x32xf32>, vector<16x32xf32> -> vector<16x32xf32>
    %c0_113 = arith.constant 0 : index
    %c0_114 = arith.constant 0 : index
    %335 = vector.load %arg26[%c0_113, %c0_114] : memref<1x32xf32, #tpu.memory_space<vmem>>, vector<1x32xf32>
    %336 = vector.broadcast %335 : vector<1x32xf32> to vector<16x32xf32>
    %337 = arith.addf %334, %336 : vector<16x32xf32>
    %c0_115 = arith.constant 0 : index
    %c0_116 = arith.constant 0 : index
    %338 = vector.load %arg27[%c0_115, %c0_116] : memref<256x32xf32, #tpu.memory_space<vmem>>, vector<256x32xf32>
    %cst_117 = arith.constant dense<0.000000e+00> : vector<16x32xf32>
    %339 = tpu.matmul %81, %338, %cst_117 {dimension_numbers = #tpu.dot_dimension_numbers<[1], [0], [0], [1], [0, 0, 1, 1], [], []>} : vector<16x256xf32>, vector<256x32xf32>, vector<16x32xf32> -> vector<16x32xf32>
    %c0_118 = arith.constant 0 : index
    %c0_119 = arith.constant 0 : index
    %340 = vector.load %arg28[%c0_118, %c0_119] : memref<1x32xf32, #tpu.memory_space<vmem>>, vector<1x32xf32>
    %341 = vector.broadcast %340 : vector<1x32xf32> to vector<16x32xf32>
    %342 = arith.addf %339, %341 : vector<16x32xf32>
    %c0_120 = arith.constant 0 : index
    %c0_121 = arith.constant 0 : index
    %343 = vector.load %arg2[%c0_120, %c0_121] : memref<2x256xf32, #tpu.memory_space<vmem>>, vector<2x256xf32>
    %c0_122 = arith.constant 0 : index
    %c0_123 = arith.constant 0 : index
    %344 = vector.load %arg23[%c0_122, %c0_123] : memref<256x32xf32, #tpu.memory_space<vmem>>, vector<256x32xf32>
    %cst_124 = arith.constant dense<0.000000e+00> : vector<2x32xf32>
    %345 = tpu.matmul %343, %344, %cst_124 {dimension_numbers = #tpu.dot_dimension_numbers<[1], [0], [0], [1], [0, 0, 1, 1], [], []>} : vector<2x256xf32>, vector<256x32xf32>, vector<2x32xf32> -> vector<2x32xf32>
    %c0_125 = arith.constant 0 : index
    %c0_126 = arith.constant 0 : index
    %346 = vector.load %arg24[%c0_125, %c0_126] : memref<1x32xf32, #tpu.memory_space<vmem>>, vector<1x32xf32>
    %347 = vector.broadcast %346 : vector<1x32xf32> to vector<2x32xf32>
    %348 = arith.addf %345, %347 : vector<2x32xf32>
    %c0_127 = arith.constant 0 : index
    %c0_128 = arith.constant 0 : index
    %349 = vector.load %arg13[%c0_127, %c0_128] : memref<16x2xf32, #tpu.memory_space<vmem>>, vector<16x2xf32>
    %cst_129 = arith.constant dense<0.000000e+00> : vector<16x32xf32>
    %350 = tpu.matmul %349, %348, %cst_129 {dimension_numbers = #tpu.dot_dimension_numbers<[1], [0], [0], [1], [0, 0, 1, 1], [], []>} : vector<16x2xf32>, vector<2x32xf32>, vector<16x32xf32> -> vector<16x32xf32>
    %c0_130 = arith.constant 0 : index
    %c0_131 = arith.constant 0 : index
    %351 = vector.load %arg21[%c0_130, %c0_131] : memref<8x32xf32, #tpu.memory_space<vmem>>, vector<8x32xf32>
    %cst_132 = arith.constant dense<0.000000e+00> : vector<16x32xf32>
    %352 = tpu.matmul %332, %351, %cst_132 {dimension_numbers = #tpu.dot_dimension_numbers<[1], [0], [0], [1], [0, 0, 1, 1], [], []>} : vector<16x8xf32>, vector<8x32xf32>, vector<16x32xf32> -> vector<16x32xf32>
    %c0_133 = arith.constant 0 : index
    %c0_134 = arith.constant 0 : index
    %353 = vector.load %arg22[%c0_133, %c0_134] : memref<1x32xf32, #tpu.memory_space<vmem>>, vector<1x32xf32>
    %354 = vector.broadcast %353 : vector<1x32xf32> to vector<16x32xf32>
    %355 = arith.addf %352, %354 : vector<16x32xf32>
    %c0_135 = arith.constant 0 : index
    %c0_136 = arith.constant 0 : index
    %356 = vector.load %arg29[%c0_135, %c0_136] : memref<128x32xf32, #tpu.memory_space<vmem>>, vector<128x32xf32>
    %357 = vector.extract_strided_slice %356 {offsets = [0, 0], sizes = [32, 32], strides = [1, 1]} : vector<128x32xf32> to vector<32x32xf32>
    %cst_137 = arith.constant dense<0.000000e+00> : vector<16x32xf32>
    %358 = tpu.matmul %337, %357, %cst_137 {dimension_numbers = #tpu.dot_dimension_numbers<[1], [0], [0], [1], [0, 0, 1, 1], [], []>} : vector<16x32xf32>, vector<32x32xf32>, vector<16x32xf32> -> vector<16x32xf32>
    %359 = vector.extract_strided_slice %356 {offsets = [32, 0], sizes = [32, 32], strides = [1, 1]} : vector<128x32xf32> to vector<32x32xf32>
    %cst_138 = arith.constant dense<0.000000e+00> : vector<16x32xf32>
    %360 = tpu.matmul %342, %359, %cst_138 {dimension_numbers = #tpu.dot_dimension_numbers<[1], [0], [0], [1], [0, 0, 1, 1], [], []>} : vector<16x32xf32>, vector<32x32xf32>, vector<16x32xf32> -> vector<16x32xf32>
    %361 = arith.addf %358, %360 : vector<16x32xf32>
    %362 = vector.extract_strided_slice %356 {offsets = [64, 0], sizes = [32, 32], strides = [1, 1]} : vector<128x32xf32> to vector<32x32xf32>
    %cst_139 = arith.constant dense<0.000000e+00> : vector<16x32xf32>
    %363 = tpu.matmul %350, %362, %cst_139 {dimension_numbers = #tpu.dot_dimension_numbers<[1], [0], [0], [1], [0, 0, 1, 1], [], []>} : vector<16x32xf32>, vector<32x32xf32>, vector<16x32xf32> -> vector<16x32xf32>
    %364 = arith.addf %361, %363 : vector<16x32xf32>
    %365 = vector.extract_strided_slice %356 {offsets = [96, 0], sizes = [32, 32], strides = [1, 1]} : vector<128x32xf32> to vector<32x32xf32>
    %cst_140 = arith.constant dense<0.000000e+00> : vector<16x32xf32>
    %366 = tpu.matmul %355, %365, %cst_140 {dimension_numbers = #tpu.dot_dimension_numbers<[1], [0], [0], [1], [0, 0, 1, 1], [], []>} : vector<16x32xf32>, vector<32x32xf32>, vector<16x32xf32> -> vector<16x32xf32>
    %367 = arith.addf %364, %366 : vector<16x32xf32>
    %c0_141 = arith.constant 0 : index
    %c0_142 = arith.constant 0 : index
    %368 = vector.load %arg30[%c0_141, %c0_142] : memref<1x32xf32, #tpu.memory_space<vmem>>, vector<1x32xf32>
    %369 = vector.broadcast %368 : vector<1x32xf32> to vector<16x32xf32>
    %370 = arith.addf %367, %369 : vector<16x32xf32>
    %c0_143 = arith.constant 0 : index
    %c0_144 = arith.constant 0 : index
    %371 = vector.load %arg14[%c0_143, %c0_144] : memref<2x16xf32, #tpu.memory_space<vmem>>, vector<2x16xf32>
    %cst_145 = arith.constant dense<0.000000e+00> : vector<2x32xf32>
    %372 = tpu.matmul %371, %370, %cst_145 {dimension_numbers = #tpu.dot_dimension_numbers<[1], [0], [0], [1], [0, 0, 1, 1], [], []>} : vector<2x16xf32>, vector<16x32xf32>, vector<2x32xf32> -> vector<2x32xf32>
    %c0_146 = arith.constant 0 : index
    %c0_147 = arith.constant 0 : index
    %373 = vector.load %arg31[%c0_146, %c0_147] : memref<32x10xf32, #tpu.memory_space<vmem>>, vector<32x10xf32>
    %cst_148 = arith.constant dense<0.000000e+00> : vector<2x10xf32>
    %374 = tpu.matmul %372, %373, %cst_148 {dimension_numbers = #tpu.dot_dimension_numbers<[1], [0], [0], [1], [0, 0, 1, 1], [], []>} : vector<2x32xf32>, vector<32x10xf32>, vector<2x10xf32> -> vector<2x10xf32>
    %c0_149 = arith.constant 0 : index
    %c0_150 = arith.constant 0 : index
    %375 = vector.load %arg32[%c0_149, %c0_150] : memref<1x10xf32, #tpu.memory_space<vmem>>, vector<1x10xf32>
    %376 = vector.broadcast %375 : vector<1x10xf32> to vector<2x10xf32>
    %377 = arith.addf %374, %376 : vector<2x10xf32>
    %c0_151 = arith.constant 0 : index
    %c0_152 = arith.constant 0 : index
    %378 = vector.load %arg80[%c0_151, %c0_152] : memref<2x10xf32, #tpu.memory_space<vmem>>, vector<2x10xf32>
    tpu.vector_store %arg80[%c0_151, %c0_152], %377 {strides = array<i32>} : memref<2x10xf32, #tpu.memory_space<vmem>>, vector<2x10xf32>,
    %c0_153 = arith.constant 0 : index
    %c0_154 = arith.constant 0 : index
    %379 = vector.load %arg11[%c0_153, %c0_154] : memref<16x16xf32, #tpu.memory_space<vmem>>, vector<16x16xf32>
    %cst_155 = arith.constant dense<0.000000e+00> : vector<16x32xf32>
    %380 = tpu.matmul %379, %370, %cst_155 {dimension_numbers = #tpu.dot_dimension_numbers<[1], [0], [0], [1], [0, 0, 1, 1], [], []>} : vector<16x16xf32>, vector<16x32xf32>, vector<16x32xf32> -> vector<16x32xf32>
    %c0_156 = arith.constant 0 : index
    %c0_157 = arith.constant 0 : index
    %381 = vector.load %arg33[%c0_156, %c0_157] : memref<32x32xf32, #tpu.memory_space<vmem>>, vector<32x32xf32>
    %cst_158 = arith.constant dense<0.000000e+00> : vector<16x32xf32>
    %382 = tpu.matmul %380, %381, %cst_158 {dimension_numbers = #tpu.dot_dimension_numbers<[1], [0], [0], [1], [0, 0, 1, 1], [], []>} : vector<16x32xf32>, vector<32x32xf32>, vector<16x32xf32> -> vector<16x32xf32>
    %c0_159 = arith.constant 0 : index
    %c0_160 = arith.constant 0 : index
    %383 = vector.load %arg36[%c0_159, %c0_160] : memref<32x32xf32, #tpu.memory_space<vmem>>, vector<32x32xf32>
    %cst_161 = arith.constant dense<0.000000e+00> : vector<16x32xf32>
    %384 = tpu.matmul %380, %383, %cst_161 {dimension_numbers = #tpu.dot_dimension_numbers<[1], [0], [0], [1], [0, 0, 1, 1], [], []>} : vector<16x32xf32>, vector<32x32xf32>, vector<16x32xf32> -> vector<16x32xf32>
    %c0_162 = arith.constant 0 : index
    %c0_163 = arith.constant 0 : index
    %385 = vector.load %arg37[%c0_162, %c0_163] : memref<1x32xf32, #tpu.memory_space<vmem>>, vector<1x32xf32>
    %386 = vector.broadcast %385 : vector<1x32xf32> to vector<16x32xf32>
    %387 = arith.addf %384, %386 : vector<16x32xf32>
    %c0_164 = arith.constant 0 : index
    %c0_165 = arith.constant 0 : index
    %388 = vector.load %arg34[%c0_164, %c0_165] : memref<32x32xf32, #tpu.memory_space<vmem>>, vector<32x32xf32>
    %c0_166 = arith.constant 0 : index
    %c0_167 = arith.constant 0 : index
    %389 = vector.load %arg35[%c0_166, %c0_167] : memref<1x32xf32, #tpu.memory_space<vmem>>, vector<1x32xf32>
    %c0_168 = arith.constant 0 : index
    %c0_169 = arith.constant 0 : index
    %390 = vector.load %arg38[%c0_168, %c0_169] : memref<1x32xf32, #tpu.memory_space<vmem>>, vector<1x32xf32>
    %391 = arith.negf %390 : vector<1x32xf32>
    %392 = math.exp %391 : vector<1x32xf32>
    %cst_170 = arith.constant 1.000000e+00 : f32
    %393 = vector.broadcast %cst_170 : f32 to vector<1x32xf32>
    %394 = arith.addf %393, %392 : vector<1x32xf32>
    %395 = arith.divf %393, %394 : vector<1x32xf32>
    %cst_171 = arith.constant 1.000000e+00 : f32
    %396 = vector.broadcast %cst_171 : f32 to vector<2x32xf32>
    %cst_172 = arith.constant 0.000000e+00 : f32
    %397 = vector.broadcast %cst_172 : f32 to vector<2x32xf32>
    %398 = vector.extract_strided_slice %382 {offsets = [0, 0], sizes = [2, 32], strides = [1, 1]} : vector<16x32xf32> to vector<2x32xf32>
    %cst_173 = arith.constant dense<0.000000e+00> : vector<2x32xf32>
    %399 = tpu.matmul %396, %388, %cst_173 {dimension_numbers = #tpu.dot_dimension_numbers<[1], [0], [0], [1], [0, 0, 1, 1], [], []>} : vector<2x32xf32>, vector<32x32xf32>, vector<2x32xf32> -> vector<2x32xf32>
    %400 = arith.addf %398, %399 : vector<2x32xf32>
    %401 = vector.broadcast %389 : vector<1x32xf32> to vector<2x32xf32>
    %402 = arith.addf %400, %401 : vector<2x32xf32>
    %403 = arith.negf %402 : vector<2x32xf32>
    %404 = math.exp %403 : vector<2x32xf32>
    %cst_174 = arith.constant 1.000000e+00 : f32
    %405 = vector.broadcast %cst_174 : f32 to vector<2x32xf32>
    %406 = arith.addf %405, %404 : vector<2x32xf32>
    %407 = arith.divf %405, %406 : vector<2x32xf32>
    %cst_175 = arith.constant 9.99999997E-7 : f32
    %408 = vector.broadcast %cst_175 : f32 to vector<2x32xf32>
    %409 = arith.addf %407, %408 : vector<2x32xf32>
    %410 = tpu.reciprocal %409 {approx = true} : vector<2x32xf32> -> vector<2x32xf32>
    %cst_176 = arith.constant 0.000000e+00 : f32
    %411 = vector.broadcast %cst_176 : f32 to vector<2x32xf32>
    %412 = arith.subf %411, %410 : vector<2x32xf32>
    %413 = math.exp %412 : vector<2x32xf32>
    %414 = arith.mulf %413, %397 : vector<2x32xf32>
    %cst_177 = arith.constant 1.000000e+00 : f32
    %415 = vector.broadcast %cst_177 : f32 to vector<2x32xf32>
    %416 = arith.subf %415, %413 : vector<2x32xf32>
    %417 = vector.extract_strided_slice %387 {offsets = [0, 0], sizes = [2, 32], strides = [1, 1]} : vector<16x32xf32> to vector<2x32xf32>
    %418 = arith.mulf %416, %417 : vector<2x32xf32>
    %419 = arith.addf %414, %418 : vector<2x32xf32>
    %420 = vector.broadcast %395 : vector<1x32xf32> to vector<2x32xf32>
    %421 = arith.cmpf oge, %419, %420 : vector<2x32xf32>
    %422 = arith.extui %421 : vector<2x32xi1> to vector<2x32xi32>
    %423 = arith.sitofp %422 : vector<2x32xi32> to vector<2x32xf32>
    %cst_178 = arith.constant 0.000000e+00 : f32
    %424 = vector.broadcast %cst_178 : f32 to vector<2x32xf32>
    %425 = arith.select %421, %424, %419 : vector<2x32xi1>, vector<2x32xf32>
    %426 = vector.extract_strided_slice %382 {offsets = [2, 0], sizes = [2, 32], strides = [1, 1]} : vector<16x32xf32> to vector<2x32xf32>
    %cst_179 = arith.constant dense<0.000000e+00> : vector<2x32xf32>
    %427 = tpu.matmul %407, %388, %cst_179 {dimension_numbers = #tpu.dot_dimension_numbers<[1], [0], [0], [1], [0, 0, 1, 1], [], []>} : vector<2x32xf32>, vector<32x32xf32>, vector<2x32xf32> -> vector<2x32xf32>
    %428 = arith.addf %426, %427 : vector<2x32xf32>
    %429 = vector.broadcast %389 : vector<1x32xf32> to vector<2x32xf32>
    %430 = arith.addf %428, %429 : vector<2x32xf32>
    %431 = arith.negf %430 : vector<2x32xf32>
    %432 = math.exp %431 : vector<2x32xf32>
    %cst_180 = arith.constant 1.000000e+00 : f32
    %433 = vector.broadcast %cst_180 : f32 to vector<2x32xf32>
    %434 = arith.addf %433, %432 : vector<2x32xf32>
    %435 = arith.divf %433, %434 : vector<2x32xf32>
    %cst_181 = arith.constant 9.99999997E-7 : f32
    %436 = vector.broadcast %cst_181 : f32 to vector<2x32xf32>
    %437 = arith.addf %435, %436 : vector<2x32xf32>
    %438 = tpu.reciprocal %437 {approx = true} : vector<2x32xf32> -> vector<2x32xf32>
    %cst_182 = arith.constant 0.000000e+00 : f32
    %439 = vector.broadcast %cst_182 : f32 to vector<2x32xf32>
    %440 = arith.subf %439, %438 : vector<2x32xf32>
    %441 = math.exp %440 : vector<2x32xf32>
    %442 = arith.mulf %441, %425 : vector<2x32xf32>
    %cst_183 = arith.constant 1.000000e+00 : f32
    %443 = vector.broadcast %cst_183 : f32 to vector<2x32xf32>
    %444 = arith.subf %443, %441 : vector<2x32xf32>
    %445 = vector.extract_strided_slice %387 {offsets = [2, 0], sizes = [2, 32], strides = [1, 1]} : vector<16x32xf32> to vector<2x32xf32>
    %446 = arith.mulf %444, %445 : vector<2x32xf32>
    %447 = arith.addf %442, %446 : vector<2x32xf32>
    %448 = vector.broadcast %395 : vector<1x32xf32> to vector<2x32xf32>
    %449 = arith.cmpf oge, %447, %448 : vector<2x32xf32>
    %450 = arith.extui %449 : vector<2x32xi1> to vector<2x32xi32>
    %451 = arith.sitofp %450 : vector<2x32xi32> to vector<2x32xf32>
    %cst_184 = arith.constant 0.000000e+00 : f32
    %452 = vector.broadcast %cst_184 : f32 to vector<2x32xf32>
    %453 = arith.select %449, %452, %447 : vector<2x32xi1>, vector<2x32xf32>
    %454 = vector.extract_strided_slice %382 {offsets = [4, 0], sizes = [2, 32], strides = [1, 1]} : vector<16x32xf32> to vector<2x32xf32>
    %cst_185 = arith.constant dense<0.000000e+00> : vector<2x32xf32>
    %455 = tpu.matmul %435, %388, %cst_185 {dimension_numbers = #tpu.dot_dimension_numbers<[1], [0], [0], [1], [0, 0, 1, 1], [], []>} : vector<2x32xf32>, vector<32x32xf32>, vector<2x32xf32> -> vector<2x32xf32>
    %456 = arith.addf %454, %455 : vector<2x32xf32>
    %457 = vector.broadcast %389 : vector<1x32xf32> to vector<2x32xf32>
    %458 = arith.addf %456, %457 : vector<2x32xf32>
    %459 = arith.negf %458 : vector<2x32xf32>
    %460 = math.exp %459 : vector<2x32xf32>
    %cst_186 = arith.constant 1.000000e+00 : f32
    %461 = vector.broadcast %cst_186 : f32 to vector<2x32xf32>
    %462 = arith.addf %461, %460 : vector<2x32xf32>
    %463 = arith.divf %461, %462 : vector<2x32xf32>
    %cst_187 = arith.constant 9.99999997E-7 : f32
    %464 = vector.broadcast %cst_187 : f32 to vector<2x32xf32>
    %465 = arith.addf %463, %464 : vector<2x32xf32>
    %466 = tpu.reciprocal %465 {approx = true} : vector<2x32xf32> -> vector<2x32xf32>
    %cst_188 = arith.constant 0.000000e+00 : f32
    %467 = vector.broadcast %cst_188 : f32 to vector<2x32xf32>
    %468 = arith.subf %467, %466 : vector<2x32xf32>
    %469 = math.exp %468 : vector<2x32xf32>
    %470 = arith.mulf %469, %453 : vector<2x32xf32>
    %cst_189 = arith.constant 1.000000e+00 : f32
    %471 = vector.broadcast %cst_189 : f32 to vector<2x32xf32>
    %472 = arith.subf %471, %469 : vector<2x32xf32>
    %473 = vector.extract_strided_slice %387 {offsets = [4, 0], sizes = [2, 32], strides = [1, 1]} : vector<16x32xf32> to vector<2x32xf32>
    %474 = arith.mulf %472, %473 : vector<2x32xf32>
    %475 = arith.addf %470, %474 : vector<2x32xf32>
    %476 = vector.broadcast %395 : vector<1x32xf32> to vector<2x32xf32>
    %477 = arith.cmpf oge, %475, %476 : vector<2x32xf32>
    %478 = arith.extui %477 : vector<2x32xi1> to vector<2x32xi32>
    %479 = arith.sitofp %478 : vector<2x32xi32> to vector<2x32xf32>
    %cst_190 = arith.constant 0.000000e+00 : f32
    %480 = vector.broadcast %cst_190 : f32 to vector<2x32xf32>
    %481 = arith.select %477, %480, %475 : vector<2x32xi1>, vector<2x32xf32>
    %482 = vector.extract_strided_slice %382 {offsets = [6, 0], sizes = [2, 32], strides = [1, 1]} : vector<16x32xf32> to vector<2x32xf32>
    %cst_191 = arith.constant dense<0.000000e+00> : vector<2x32xf32>
    %483 = tpu.matmul %463, %388, %cst_191 {dimension_numbers = #tpu.dot_dimension_numbers<[1], [0], [0], [1], [0, 0, 1, 1], [], []>} : vector<2x32xf32>, vector<32x32xf32>, vector<2x32xf32> -> vector<2x32xf32>
    %484 = arith.addf %482, %483 : vector<2x32xf32>
    %485 = vector.broadcast %389 : vector<1x32xf32> to vector<2x32xf32>
    %486 = arith.addf %484, %485 : vector<2x32xf32>
    %487 = arith.negf %486 : vector<2x32xf32>
    %488 = math.exp %487 : vector<2x32xf32>
    %cst_192 = arith.constant 1.000000e+00 : f32
    %489 = vector.broadcast %cst_192 : f32 to vector<2x32xf32>
    %490 = arith.addf %489, %488 : vector<2x32xf32>
    %491 = arith.divf %489, %490 : vector<2x32xf32>
    %cst_193 = arith.constant 9.99999997E-7 : f32
    %492 = vector.broadcast %cst_193 : f32 to vector<2x32xf32>
    %493 = arith.addf %491, %492 : vector<2x32xf32>
    %494 = tpu.reciprocal %493 {approx = true} : vector<2x32xf32> -> vector<2x32xf32>
    %cst_194 = arith.constant 0.000000e+00 : f32
    %495 = vector.broadcast %cst_194 : f32 to vector<2x32xf32>
    %496 = arith.subf %495, %494 : vector<2x32xf32>
    %497 = math.exp %496 : vector<2x32xf32>
    %498 = arith.mulf %497, %481 : vector<2x32xf32>
    %cst_195 = arith.constant 1.000000e+00 : f32
    %499 = vector.broadcast %cst_195 : f32 to vector<2x32xf32>
    %500 = arith.subf %499, %497 : vector<2x32xf32>
    %501 = vector.extract_strided_slice %387 {offsets = [6, 0], sizes = [2, 32], strides = [1, 1]} : vector<16x32xf32> to vector<2x32xf32>
    %502 = arith.mulf %500, %501 : vector<2x32xf32>
    %503 = arith.addf %498, %502 : vector<2x32xf32>
    %504 = vector.broadcast %395 : vector<1x32xf32> to vector<2x32xf32>
    %505 = arith.cmpf oge, %503, %504 : vector<2x32xf32>
    %506 = arith.extui %505 : vector<2x32xi1> to vector<2x32xi32>
    %507 = arith.sitofp %506 : vector<2x32xi32> to vector<2x32xf32>
    %cst_196 = arith.constant 0.000000e+00 : f32
    %508 = vector.broadcast %cst_196 : f32 to vector<2x32xf32>
    %509 = arith.select %505, %508, %503 : vector<2x32xi1>, vector<2x32xf32>
    %510 = vector.extract_strided_slice %382 {offsets = [8, 0], sizes = [2, 32], strides = [1, 1]} : vector<16x32xf32> to vector<2x32xf32>
    %cst_197 = arith.constant dense<0.000000e+00> : vector<2x32xf32>
    %511 = tpu.matmul %491, %388, %cst_197 {dimension_numbers = #tpu.dot_dimension_numbers<[1], [0], [0], [1], [0, 0, 1, 1], [], []>} : vector<2x32xf32>, vector<32x32xf32>, vector<2x32xf32> -> vector<2x32xf32>
    %512 = arith.addf %510, %511 : vector<2x32xf32>
    %513 = vector.broadcast %389 : vector<1x32xf32> to vector<2x32xf32>
    %514 = arith.addf %512, %513 : vector<2x32xf32>
    %515 = arith.negf %514 : vector<2x32xf32>
    %516 = math.exp %515 : vector<2x32xf32>
    %cst_198 = arith.constant 1.000000e+00 : f32
    %517 = vector.broadcast %cst_198 : f32 to vector<2x32xf32>
    %518 = arith.addf %517, %516 : vector<2x32xf32>
    %519 = arith.divf %517, %518 : vector<2x32xf32>
    %cst_199 = arith.constant 9.99999997E-7 : f32
    %520 = vector.broadcast %cst_199 : f32 to vector<2x32xf32>
    %521 = arith.addf %519, %520 : vector<2x32xf32>
    %522 = tpu.reciprocal %521 {approx = true} : vector<2x32xf32> -> vector<2x32xf32>
    %cst_200 = arith.constant 0.000000e+00 : f32
    %523 = vector.broadcast %cst_200 : f32 to vector<2x32xf32>
    %524 = arith.subf %523, %522 : vector<2x32xf32>
    %525 = math.exp %524 : vector<2x32xf32>
    %526 = arith.mulf %525, %509 : vector<2x32xf32>
    %cst_201 = arith.constant 1.000000e+00 : f32
    %527 = vector.broadcast %cst_201 : f32 to vector<2x32xf32>
    %528 = arith.subf %527, %525 : vector<2x32xf32>
    %529 = vector.extract_strided_slice %387 {offsets = [8, 0], sizes = [2, 32], strides = [1, 1]} : vector<16x32xf32> to vector<2x32xf32>
    %530 = arith.mulf %528, %529 : vector<2x32xf32>
    %531 = arith.addf %526, %530 : vector<2x32xf32>
    %532 = vector.broadcast %395 : vector<1x32xf32> to vector<2x32xf32>
    %533 = arith.cmpf oge, %531, %532 : vector<2x32xf32>
    %534 = arith.extui %533 : vector<2x32xi1> to vector<2x32xi32>
    %535 = arith.sitofp %534 : vector<2x32xi32> to vector<2x32xf32>
    %cst_202 = arith.constant 0.000000e+00 : f32
    %536 = vector.broadcast %cst_202 : f32 to vector<2x32xf32>
    %537 = arith.select %533, %536, %531 : vector<2x32xi1>, vector<2x32xf32>
    %538 = vector.extract_strided_slice %382 {offsets = [10, 0], sizes = [2, 32], strides = [1, 1]} : vector<16x32xf32> to vector<2x32xf32>
    %cst_203 = arith.constant dense<0.000000e+00> : vector<2x32xf32>
    %539 = tpu.matmul %519, %388, %cst_203 {dimension_numbers = #tpu.dot_dimension_numbers<[1], [0], [0], [1], [0, 0, 1, 1], [], []>} : vector<2x32xf32>, vector<32x32xf32>, vector<2x32xf32> -> vector<2x32xf32>
    %540 = arith.addf %538, %539 : vector<2x32xf32>
    %541 = vector.broadcast %389 : vector<1x32xf32> to vector<2x32xf32>
    %542 = arith.addf %540, %541 : vector<2x32xf32>
    %543 = arith.negf %542 : vector<2x32xf32>
    %544 = math.exp %543 : vector<2x32xf32>
    %cst_204 = arith.constant 1.000000e+00 : f32
    %545 = vector.broadcast %cst_204 : f32 to vector<2x32xf32>
    %546 = arith.addf %545, %544 : vector<2x32xf32>
    %547 = arith.divf %545, %546 : vector<2x32xf32>
    %cst_205 = arith.constant 9.99999997E-7 : f32
    %548 = vector.broadcast %cst_205 : f32 to vector<2x32xf32>
    %549 = arith.addf %547, %548 : vector<2x32xf32>
    %550 = tpu.reciprocal %549 {approx = true} : vector<2x32xf32> -> vector<2x32xf32>
    %cst_206 = arith.constant 0.000000e+00 : f32
    %551 = vector.broadcast %cst_206 : f32 to vector<2x32xf32>
    %552 = arith.subf %551, %550 : vector<2x32xf32>
    %553 = math.exp %552 : vector<2x32xf32>
    %554 = arith.mulf %553, %537 : vector<2x32xf32>
    %cst_207 = arith.constant 1.000000e+00 : f32
    %555 = vector.broadcast %cst_207 : f32 to vector<2x32xf32>
    %556 = arith.subf %555, %553 : vector<2x32xf32>
    %557 = vector.extract_strided_slice %387 {offsets = [10, 0], sizes = [2, 32], strides = [1, 1]} : vector<16x32xf32> to vector<2x32xf32>
    %558 = arith.mulf %556, %557 : vector<2x32xf32>
    %559 = arith.addf %554, %558 : vector<2x32xf32>
    %560 = vector.broadcast %395 : vector<1x32xf32> to vector<2x32xf32>
    %561 = arith.cmpf oge, %559, %560 : vector<2x32xf32>
    %562 = arith.extui %561 : vector<2x32xi1> to vector<2x32xi32>
    %563 = arith.sitofp %562 : vector<2x32xi32> to vector<2x32xf32>
    %cst_208 = arith.constant 0.000000e+00 : f32
    %564 = vector.broadcast %cst_208 : f32 to vector<2x32xf32>
    %565 = arith.select %561, %564, %559 : vector<2x32xi1>, vector<2x32xf32>
    %566 = vector.extract_strided_slice %382 {offsets = [12, 0], sizes = [2, 32], strides = [1, 1]} : vector<16x32xf32> to vector<2x32xf32>
    %cst_209 = arith.constant dense<0.000000e+00> : vector<2x32xf32>
    %567 = tpu.matmul %547, %388, %cst_209 {dimension_numbers = #tpu.dot_dimension_numbers<[1], [0], [0], [1], [0, 0, 1, 1], [], []>} : vector<2x32xf32>, vector<32x32xf32>, vector<2x32xf32> -> vector<2x32xf32>
    %568 = arith.addf %566, %567 : vector<2x32xf32>
    %569 = vector.broadcast %389 : vector<1x32xf32> to vector<2x32xf32>
    %570 = arith.addf %568, %569 : vector<2x32xf32>
    %571 = arith.negf %570 : vector<2x32xf32>
    %572 = math.exp %571 : vector<2x32xf32>
    %cst_210 = arith.constant 1.000000e+00 : f32
    %573 = vector.broadcast %cst_210 : f32 to vector<2x32xf32>
    %574 = arith.addf %573, %572 : vector<2x32xf32>
    %575 = arith.divf %573, %574 : vector<2x32xf32>
    %cst_211 = arith.constant 9.99999997E-7 : f32
    %576 = vector.broadcast %cst_211 : f32 to vector<2x32xf32>
    %577 = arith.addf %575, %576 : vector<2x32xf32>
    %578 = tpu.reciprocal %577 {approx = true} : vector<2x32xf32> -> vector<2x32xf32>
    %cst_212 = arith.constant 0.000000e+00 : f32
    %579 = vector.broadcast %cst_212 : f32 to vector<2x32xf32>
    %580 = arith.subf %579, %578 : vector<2x32xf32>
    %581 = math.exp %580 : vector<2x32xf32>
    %582 = arith.mulf %581, %565 : vector<2x32xf32>
    %cst_213 = arith.constant 1.000000e+00 : f32
    %583 = vector.broadcast %cst_213 : f32 to vector<2x32xf32>
    %584 = arith.subf %583, %581 : vector<2x32xf32>
    %585 = vector.extract_strided_slice %387 {offsets = [12, 0], sizes = [2, 32], strides = [1, 1]} : vector<16x32xf32> to vector<2x32xf32>
    %586 = arith.mulf %584, %585 : vector<2x32xf32>
    %587 = arith.addf %582, %586 : vector<2x32xf32>
    %588 = vector.broadcast %395 : vector<1x32xf32> to vector<2x32xf32>
    %589 = arith.cmpf oge, %587, %588 : vector<2x32xf32>
    %590 = arith.extui %589 : vector<2x32xi1> to vector<2x32xi32>
    %591 = arith.sitofp %590 : vector<2x32xi32> to vector<2x32xf32>
    %cst_214 = arith.constant 0.000000e+00 : f32
    %592 = vector.broadcast %cst_214 : f32 to vector<2x32xf32>
    %593 = arith.select %589, %592, %587 : vector<2x32xi1>, vector<2x32xf32>
    %594 = vector.extract_strided_slice %382 {offsets = [14, 0], sizes = [2, 32], strides = [1, 1]} : vector<16x32xf32> to vector<2x32xf32>
    %cst_215 = arith.constant dense<0.000000e+00> : vector<2x32xf32>
    %595 = tpu.matmul %575, %388, %cst_215 {dimension_numbers = #tpu.dot_dimension_numbers<[1], [0], [0], [1], [0, 0, 1, 1], [], []>} : vector<2x32xf32>, vector<32x32xf32>, vector<2x32xf32> -> vector<2x32xf32>
    %596 = arith.addf %594, %595 : vector<2x32xf32>
    %597 = vector.broadcast %389 : vector<1x32xf32> to vector<2x32xf32>
    %598 = arith.addf %596, %597 : vector<2x32xf32>
    %599 = arith.negf %598 : vector<2x32xf32>
    %600 = math.exp %599 : vector<2x32xf32>
    %cst_216 = arith.constant 1.000000e+00 : f32
    %601 = vector.broadcast %cst_216 : f32 to vector<2x32xf32>
    %602 = arith.addf %601, %600 : vector<2x32xf32>
    %603 = arith.divf %601, %602 : vector<2x32xf32>
    %cst_217 = arith.constant 9.99999997E-7 : f32
    %604 = vector.broadcast %cst_217 : f32 to vector<2x32xf32>
    %605 = arith.addf %603, %604 : vector<2x32xf32>
    %606 = tpu.reciprocal %605 {approx = true} : vector<2x32xf32> -> vector<2x32xf32>
    %cst_218 = arith.constant 0.000000e+00 : f32
    %607 = vector.broadcast %cst_218 : f32 to vector<2x32xf32>
    %608 = arith.subf %607, %606 : vector<2x32xf32>
    %609 = math.exp %608 : vector<2x32xf32>
    %610 = arith.mulf %609, %593 : vector<2x32xf32>
    %cst_219 = arith.constant 1.000000e+00 : f32
    %611 = vector.broadcast %cst_219 : f32 to vector<2x32xf32>
    %612 = arith.subf %611, %609 : vector<2x32xf32>
    %613 = vector.extract_strided_slice %387 {offsets = [14, 0], sizes = [2, 32], strides = [1, 1]} : vector<16x32xf32> to vector<2x32xf32>
    %614 = arith.mulf %612, %613 : vector<2x32xf32>
    %615 = arith.addf %610, %614 : vector<2x32xf32>
    %616 = vector.broadcast %395 : vector<1x32xf32> to vector<2x32xf32>
    %617 = arith.cmpf oge, %615, %616 : vector<2x32xf32>
    %618 = arith.extui %617 : vector<2x32xi1> to vector<2x32xi32>
    %619 = arith.sitofp %618 : vector<2x32xi32> to vector<2x32xf32>
    %620 = tpu.concatenate %423, %451, %479, %507, %535, %563, %591, %619 in 0 : vector<2x32xf32>, vector<2x32xf32>, vector<2x32xf32>, vector<2x32xf32>, vector<2x32xf32>, vector<2x32xf32>, vector<2x32xf32>, vector<2x32xf32> -> vector<16x32xf32>
    %cst_220 = arith.constant dense<0.000000e+00> : vector<16xf32>
    %621 = vector.multi_reduction <add>, %620, %cst_220 [1] : vector<16x32xf32> to vector<16xf32>
    %622 = vector.shape_cast %621 : vector<16xf32> to vector<16x1xf32>
    %cst_221 = arith.constant 3.200000e+01 : f32
    %623 = vector.broadcast %cst_221 : f32 to vector<16x1xf32>
    %624 = arith.divf %622, %623 : vector<16x1xf32>
    %c0_222 = arith.constant 0 : index
    %c0_223 = arith.constant 0 : index
    %625 = vector.load %arg15[%c0_222, %c0_223] : memref<2x16xf32, #tpu.memory_space<vmem>>, vector<2x16xf32>
    %cst_224 = arith.constant dense<0.000000e+00> : vector<2x1xf32>
    %626 = tpu.matmul %625, %624, %cst_224 {dimension_numbers = #tpu.dot_dimension_numbers<[1], [0], [0], [1], [0, 0, 1, 1], [], []>} : vector<2x16xf32>, vector<16x1xf32>, vector<2x1xf32> -> vector<2x1xf32>
    %c0_225 = arith.constant 0 : index
    %c0_226 = arith.constant 0 : index
    %627 = vector.load %arg39[%c0_225, %c0_226] : memref<1x16xf32, #tpu.memory_space<vmem>>, vector<1x16xf32>
    %cst_227 = arith.constant dense<0.000000e+00> : vector<2x16xf32>
    %628 = tpu.matmul %626, %627, %cst_227 {dimension_numbers = #tpu.dot_dimension_numbers<[1], [0], [0], [1], [0, 0, 1, 1], [], []>} : vector<2x1xf32>, vector<1x16xf32>, vector<2x16xf32> -> vector<2x16xf32>
    %c0_228 = arith.constant 0 : index
    %c0_229 = arith.constant 0 : index
    %629 = vector.load %arg40[%c0_228, %c0_229] : memref<1x16xf32, #tpu.memory_space<vmem>>, vector<1x16xf32>
    %630 = vector.broadcast %629 : vector<1x16xf32> to vector<2x16xf32>
    %631 = arith.addf %628, %630 : vector<2x16xf32>
    %cst_230 = arith.constant 0.000000e+00 : f32
    %632 = vector.broadcast %cst_230 : f32 to vector<2x16xf32>
    %633 = arith.maximumf %631, %632 : vector<2x16xf32>
    %c0_231 = arith.constant 0 : index
    %c0_232 = arith.constant 0 : index
    %634 = vector.load %arg41[%c0_231, %c0_232] : memref<16x32xf32, #tpu.memory_space<vmem>>, vector<16x32xf32>
    %cst_233 = arith.constant dense<0.000000e+00> : vector<2x32xf32>
    %635 = tpu.matmul %633, %634, %cst_233 {dimension_numbers = #tpu.dot_dimension_numbers<[1], [0], [0], [1], [0, 0, 1, 1], [], []>} : vector<2x16xf32>, vector<16x32xf32>, vector<2x32xf32> -> vector<2x32xf32>
    %c0_234 = arith.constant 0 : index
    %c0_235 = arith.constant 0 : index
    %636 = vector.load %arg42[%c0_234, %c0_235] : memref<1x32xf32, #tpu.memory_space<vmem>>, vector<1x32xf32>
    %637 = vector.broadcast %636 : vector<1x32xf32> to vector<2x32xf32>
    %638 = arith.addf %635, %637 : vector<2x32xf32>
    %cst_236 = arith.constant dense<0.000000e+00> : vector<32xf32>
    %639 = vector.multi_reduction <add>, %638, %cst_236 [0] : vector<2x32xf32> to vector<32xf32>
    %640 = vector.shape_cast %639 : vector<32xf32> to vector<1x32xf32>
    %cst_237 = arith.constant 2.000000e+00 : f32
    %641 = vector.broadcast %cst_237 : f32 to vector<1x32xf32>
    %642 = arith.divf %640, %641 : vector<1x32xf32>
    %c0_238 = arith.constant 0 : index
    %c0_239 = arith.constant 0 : index
    %643 = vector.load %arg48[%c0_238, %c0_239] : memref<1x32xf32, #tpu.memory_space<vmem>>, vector<1x32xf32>
    %644 = arith.addf %643, %642 : vector<1x32xf32>
    %645 = arith.negf %644 : vector<1x32xf32>
    %646 = math.exp %645 : vector<1x32xf32>
    %cst_240 = arith.constant 1.000000e+00 : f32
    %647 = vector.broadcast %cst_240 : f32 to vector<1x32xf32>
    %648 = arith.addf %647, %646 : vector<1x32xf32>
    %649 = arith.divf %647, %648 : vector<1x32xf32>
    %c0_241 = arith.constant 0 : index
    %c0_242 = arith.constant 0 : index
    %650 = vector.load %arg84[%c0_241, %c0_242] : memref<1x32xf32, #tpu.memory_space<vmem>>, vector<1x32xf32>
    tpu.vector_store %arg84[%c0_241, %c0_242], %649 {strides = array<i32>} : memref<1x32xf32, #tpu.memory_space<vmem>>, vector<1x32xf32>,
    %c0_243 = arith.constant 0 : index
    %c0_244 = arith.constant 0 : index
    %651 = vector.load %arg43[%c0_243, %c0_244] : memref<32x32xf32, #tpu.memory_space<vmem>>, vector<32x32xf32>
    %cst_245 = arith.constant dense<0.000000e+00> : vector<16x32xf32>
    %652 = tpu.matmul %620, %651, %cst_245 {dimension_numbers = #tpu.dot_dimension_numbers<[1], [0], [0], [1], [0, 0, 1, 1], [], []>} : vector<16x32xf32>, vector<32x32xf32>, vector<16x32xf32> -> vector<16x32xf32>
    %c0_246 = arith.constant 0 : index
    %c0_247 = arith.constant 0 : index
    %653 = vector.load %arg46[%c0_246, %c0_247] : memref<32x32xf32, #tpu.memory_space<vmem>>, vector<32x32xf32>
    %cst_248 = arith.constant dense<0.000000e+00> : vector<16x32xf32>
    %654 = tpu.matmul %620, %653, %cst_248 {dimension_numbers = #tpu.dot_dimension_numbers<[1], [0], [0], [1], [0, 0, 1, 1], [], []>} : vector<16x32xf32>, vector<32x32xf32>, vector<16x32xf32> -> vector<16x32xf32>
    %c0_249 = arith.constant 0 : index
    %c0_250 = arith.constant 0 : index
    %655 = vector.load %arg47[%c0_249, %c0_250] : memref<1x32xf32, #tpu.memory_space<vmem>>, vector<1x32xf32>
    %656 = vector.broadcast %655 : vector<1x32xf32> to vector<16x32xf32>
    %657 = arith.addf %654, %656 : vector<16x32xf32>
    %c0_251 = arith.constant 0 : index
    %c0_252 = arith.constant 0 : index
    %658 = vector.load %arg44[%c0_251, %c0_252] : memref<32x32xf32, #tpu.memory_space<vmem>>, vector<32x32xf32>
    %c0_253 = arith.constant 0 : index
    %c0_254 = arith.constant 0 : index
    %659 = vector.load %arg45[%c0_253, %c0_254] : memref<1x32xf32, #tpu.memory_space<vmem>>, vector<1x32xf32>
    %cst_255 = arith.constant 1.000000e+00 : f32
    %660 = vector.broadcast %cst_255 : f32 to vector<2x32xf32>
    %cst_256 = arith.constant 0.000000e+00 : f32
    %661 = vector.broadcast %cst_256 : f32 to vector<2x32xf32>
    %662 = vector.extract_strided_slice %652 {offsets = [0, 0], sizes = [2, 32], strides = [1, 1]} : vector<16x32xf32> to vector<2x32xf32>
    %cst_257 = arith.constant dense<0.000000e+00> : vector<2x32xf32>
    %663 = tpu.matmul %660, %658, %cst_257 {dimension_numbers = #tpu.dot_dimension_numbers<[1], [0], [0], [1], [0, 0, 1, 1], [], []>} : vector<2x32xf32>, vector<32x32xf32>, vector<2x32xf32> -> vector<2x32xf32>
    %664 = arith.addf %662, %663 : vector<2x32xf32>
    %665 = vector.broadcast %659 : vector<1x32xf32> to vector<2x32xf32>
    %666 = arith.addf %664, %665 : vector<2x32xf32>
    %667 = arith.negf %666 : vector<2x32xf32>
    %668 = math.exp %667 : vector<2x32xf32>
    %cst_258 = arith.constant 1.000000e+00 : f32
    %669 = vector.broadcast %cst_258 : f32 to vector<2x32xf32>
    %670 = arith.addf %669, %668 : vector<2x32xf32>
    %671 = arith.divf %669, %670 : vector<2x32xf32>
    %cst_259 = arith.constant 9.99999997E-7 : f32
    %672 = vector.broadcast %cst_259 : f32 to vector<2x32xf32>
    %673 = arith.addf %671, %672 : vector<2x32xf32>
    %674 = tpu.reciprocal %673 {approx = true} : vector<2x32xf32> -> vector<2x32xf32>
    %cst_260 = arith.constant 0.000000e+00 : f32
    %675 = vector.broadcast %cst_260 : f32 to vector<2x32xf32>
    %676 = arith.subf %675, %674 : vector<2x32xf32>
    %677 = math.exp %676 : vector<2x32xf32>
    %678 = arith.mulf %677, %661 : vector<2x32xf32>
    %cst_261 = arith.constant 1.000000e+00 : f32
    %679 = vector.broadcast %cst_261 : f32 to vector<2x32xf32>
    %680 = arith.subf %679, %677 : vector<2x32xf32>
    %681 = vector.extract_strided_slice %657 {offsets = [0, 0], sizes = [2, 32], strides = [1, 1]} : vector<16x32xf32> to vector<2x32xf32>
    %682 = arith.mulf %680, %681 : vector<2x32xf32>
    %683 = arith.addf %678, %682 : vector<2x32xf32>
    %684 = vector.broadcast %649 : vector<1x32xf32> to vector<2x32xf32>
    %685 = arith.cmpf oge, %683, %684 : vector<2x32xf32>
    %686 = arith.extui %685 : vector<2x32xi1> to vector<2x32xi32>
    %687 = arith.sitofp %686 : vector<2x32xi32> to vector<2x32xf32>
    %cst_262 = arith.constant 0.000000e+00 : f32
    %688 = vector.broadcast %cst_262 : f32 to vector<2x32xf32>
    %689 = arith.select %685, %688, %683 : vector<2x32xi1>, vector<2x32xf32>
    %690 = vector.extract_strided_slice %652 {offsets = [2, 0], sizes = [2, 32], strides = [1, 1]} : vector<16x32xf32> to vector<2x32xf32>
    %cst_263 = arith.constant dense<0.000000e+00> : vector<2x32xf32>
    %691 = tpu.matmul %671, %658, %cst_263 {dimension_numbers = #tpu.dot_dimension_numbers<[1], [0], [0], [1], [0, 0, 1, 1], [], []>} : vector<2x32xf32>, vector<32x32xf32>, vector<2x32xf32> -> vector<2x32xf32>
    %692 = arith.addf %690, %691 : vector<2x32xf32>
    %693 = vector.broadcast %659 : vector<1x32xf32> to vector<2x32xf32>
    %694 = arith.addf %692, %693 : vector<2x32xf32>
    %695 = arith.negf %694 : vector<2x32xf32>
    %696 = math.exp %695 : vector<2x32xf32>
    %cst_264 = arith.constant 1.000000e+00 : f32
    %697 = vector.broadcast %cst_264 : f32 to vector<2x32xf32>
    %698 = arith.addf %697, %696 : vector<2x32xf32>
    %699 = arith.divf %697, %698 : vector<2x32xf32>
    %cst_265 = arith.constant 9.99999997E-7 : f32
    %700 = vector.broadcast %cst_265 : f32 to vector<2x32xf32>
    %701 = arith.addf %699, %700 : vector<2x32xf32>
    %702 = tpu.reciprocal %701 {approx = true} : vector<2x32xf32> -> vector<2x32xf32>
    %cst_266 = arith.constant 0.000000e+00 : f32
    %703 = vector.broadcast %cst_266 : f32 to vector<2x32xf32>
    %704 = arith.subf %703, %702 : vector<2x32xf32>
    %705 = math.exp %704 : vector<2x32xf32>
    %706 = arith.mulf %705, %689 : vector<2x32xf32>
    %cst_267 = arith.constant 1.000000e+00 : f32
    %707 = vector.broadcast %cst_267 : f32 to vector<2x32xf32>
    %708 = arith.subf %707, %705 : vector<2x32xf32>
    %709 = vector.extract_strided_slice %657 {offsets = [2, 0], sizes = [2, 32], strides = [1, 1]} : vector<16x32xf32> to vector<2x32xf32>
    %710 = arith.mulf %708, %709 : vector<2x32xf32>
    %711 = arith.addf %706, %710 : vector<2x32xf32>
    %712 = vector.broadcast %649 : vector<1x32xf32> to vector<2x32xf32>
    %713 = arith.cmpf oge, %711, %712 : vector<2x32xf32>
    %714 = arith.extui %713 : vector<2x32xi1> to vector<2x32xi32>
    %715 = arith.sitofp %714 : vector<2x32xi32> to vector<2x32xf32>
    %cst_268 = arith.constant 0.000000e+00 : f32
    %716 = vector.broadcast %cst_268 : f32 to vector<2x32xf32>
    %717 = arith.select %713, %716, %711 : vector<2x32xi1>, vector<2x32xf32>
    %718 = vector.extract_strided_slice %652 {offsets = [4, 0], sizes = [2, 32], strides = [1, 1]} : vector<16x32xf32> to vector<2x32xf32>
    %cst_269 = arith.constant dense<0.000000e+00> : vector<2x32xf32>
    %719 = tpu.matmul %699, %658, %cst_269 {dimension_numbers = #tpu.dot_dimension_numbers<[1], [0], [0], [1], [0, 0, 1, 1], [], []>} : vector<2x32xf32>, vector<32x32xf32>, vector<2x32xf32> -> vector<2x32xf32>
    %720 = arith.addf %718, %719 : vector<2x32xf32>
    %721 = vector.broadcast %659 : vector<1x32xf32> to vector<2x32xf32>
    %722 = arith.addf %720, %721 : vector<2x32xf32>
    %723 = arith.negf %722 : vector<2x32xf32>
    %724 = math.exp %723 : vector<2x32xf32>
    %cst_270 = arith.constant 1.000000e+00 : f32
    %725 = vector.broadcast %cst_270 : f32 to vector<2x32xf32>
    %726 = arith.addf %725, %724 : vector<2x32xf32>
    %727 = arith.divf %725, %726 : vector<2x32xf32>
    %cst_271 = arith.constant 9.99999997E-7 : f32
    %728 = vector.broadcast %cst_271 : f32 to vector<2x32xf32>
    %729 = arith.addf %727, %728 : vector<2x32xf32>
    %730 = tpu.reciprocal %729 {approx = true} : vector<2x32xf32> -> vector<2x32xf32>
    %cst_272 = arith.constant 0.000000e+00 : f32
    %731 = vector.broadcast %cst_272 : f32 to vector<2x32xf32>
    %732 = arith.subf %731, %730 : vector<2x32xf32>
    %733 = math.exp %732 : vector<2x32xf32>
    %734 = arith.mulf %733, %717 : vector<2x32xf32>
    %cst_273 = arith.constant 1.000000e+00 : f32
    %735 = vector.broadcast %cst_273 : f32 to vector<2x32xf32>
    %736 = arith.subf %735, %733 : vector<2x32xf32>
    %737 = vector.extract_strided_slice %657 {offsets = [4, 0], sizes = [2, 32], strides = [1, 1]} : vector<16x32xf32> to vector<2x32xf32>
    %738 = arith.mulf %736, %737 : vector<2x32xf32>
    %739 = arith.addf %734, %738 : vector<2x32xf32>
    %740 = vector.broadcast %649 : vector<1x32xf32> to vector<2x32xf32>
    %741 = arith.cmpf oge, %739, %740 : vector<2x32xf32>
    %742 = arith.extui %741 : vector<2x32xi1> to vector<2x32xi32>
    %743 = arith.sitofp %742 : vector<2x32xi32> to vector<2x32xf32>
    %cst_274 = arith.constant 0.000000e+00 : f32
    %744 = vector.broadcast %cst_274 : f32 to vector<2x32xf32>
    %745 = arith.select %741, %744, %739 : vector<2x32xi1>, vector<2x32xf32>
    %746 = vector.extract_strided_slice %652 {offsets = [6, 0], sizes = [2, 32], strides = [1, 1]} : vector<16x32xf32> to vector<2x32xf32>
    %cst_275 = arith.constant dense<0.000000e+00> : vector<2x32xf32>
    %747 = tpu.matmul %727, %658, %cst_275 {dimension_numbers = #tpu.dot_dimension_numbers<[1], [0], [0], [1], [0, 0, 1, 1], [], []>} : vector<2x32xf32>, vector<32x32xf32>, vector<2x32xf32> -> vector<2x32xf32>
    %748 = arith.addf %746, %747 : vector<2x32xf32>
    %749 = vector.broadcast %659 : vector<1x32xf32> to vector<2x32xf32>
    %750 = arith.addf %748, %749 : vector<2x32xf32>
    %751 = arith.negf %750 : vector<2x32xf32>
    %752 = math.exp %751 : vector<2x32xf32>
    %cst_276 = arith.constant 1.000000e+00 : f32
    %753 = vector.broadcast %cst_276 : f32 to vector<2x32xf32>
    %754 = arith.addf %753, %752 : vector<2x32xf32>
    %755 = arith.divf %753, %754 : vector<2x32xf32>
    %cst_277 = arith.constant 9.99999997E-7 : f32
    %756 = vector.broadcast %cst_277 : f32 to vector<2x32xf32>
    %757 = arith.addf %755, %756 : vector<2x32xf32>
    %758 = tpu.reciprocal %757 {approx = true} : vector<2x32xf32> -> vector<2x32xf32>
    %cst_278 = arith.constant 0.000000e+00 : f32
    %759 = vector.broadcast %cst_278 : f32 to vector<2x32xf32>
    %760 = arith.subf %759, %758 : vector<2x32xf32>
    %761 = math.exp %760 : vector<2x32xf32>
    %762 = arith.mulf %761, %745 : vector<2x32xf32>
    %cst_279 = arith.constant 1.000000e+00 : f32
    %763 = vector.broadcast %cst_279 : f32 to vector<2x32xf32>
    %764 = arith.subf %763, %761 : vector<2x32xf32>
    %765 = vector.extract_strided_slice %657 {offsets = [6, 0], sizes = [2, 32], strides = [1, 1]} : vector<16x32xf32> to vector<2x32xf32>
    %766 = arith.mulf %764, %765 : vector<2x32xf32>
    %767 = arith.addf %762, %766 : vector<2x32xf32>
    %768 = vector.broadcast %649 : vector<1x32xf32> to vector<2x32xf32>
    %769 = arith.cmpf oge, %767, %768 : vector<2x32xf32>
    %770 = arith.extui %769 : vector<2x32xi1> to vector<2x32xi32>
    %771 = arith.sitofp %770 : vector<2x32xi32> to vector<2x32xf32>
    %cst_280 = arith.constant 0.000000e+00 : f32
    %772 = vector.broadcast %cst_280 : f32 to vector<2x32xf32>
    %773 = arith.select %769, %772, %767 : vector<2x32xi1>, vector<2x32xf32>
    %774 = vector.extract_strided_slice %652 {offsets = [8, 0], sizes = [2, 32], strides = [1, 1]} : vector<16x32xf32> to vector<2x32xf32>
    %cst_281 = arith.constant dense<0.000000e+00> : vector<2x32xf32>
    %775 = tpu.matmul %755, %658, %cst_281 {dimension_numbers = #tpu.dot_dimension_numbers<[1], [0], [0], [1], [0, 0, 1, 1], [], []>} : vector<2x32xf32>, vector<32x32xf32>, vector<2x32xf32> -> vector<2x32xf32>
    %776 = arith.addf %774, %775 : vector<2x32xf32>
    %777 = vector.broadcast %659 : vector<1x32xf32> to vector<2x32xf32>
    %778 = arith.addf %776, %777 : vector<2x32xf32>
    %779 = arith.negf %778 : vector<2x32xf32>
    %780 = math.exp %779 : vector<2x32xf32>
    %cst_282 = arith.constant 1.000000e+00 : f32
    %781 = vector.broadcast %cst_282 : f32 to vector<2x32xf32>
    %782 = arith.addf %781, %780 : vector<2x32xf32>
    %783 = arith.divf %781, %782 : vector<2x32xf32>
    %cst_283 = arith.constant 9.99999997E-7 : f32
    %784 = vector.broadcast %cst_283 : f32 to vector<2x32xf32>
    %785 = arith.addf %783, %784 : vector<2x32xf32>
    %786 = tpu.reciprocal %785 {approx = true} : vector<2x32xf32> -> vector<2x32xf32>
    %cst_284 = arith.constant 0.000000e+00 : f32
    %787 = vector.broadcast %cst_284 : f32 to vector<2x32xf32>
    %788 = arith.subf %787, %786 : vector<2x32xf32>
    %789 = math.exp %788 : vector<2x32xf32>
    %790 = arith.mulf %789, %773 : vector<2x32xf32>
    %cst_285 = arith.constant 1.000000e+00 : f32
    %791 = vector.broadcast %cst_285 : f32 to vector<2x32xf32>
    %792 = arith.subf %791, %789 : vector<2x32xf32>
    %793 = vector.extract_strided_slice %657 {offsets = [8, 0], sizes = [2, 32], strides = [1, 1]} : vector<16x32xf32> to vector<2x32xf32>
    %794 = arith.mulf %792, %793 : vector<2x32xf32>
    %795 = arith.addf %790, %794 : vector<2x32xf32>
    %796 = vector.broadcast %649 : vector<1x32xf32> to vector<2x32xf32>
    %797 = arith.cmpf oge, %795, %796 : vector<2x32xf32>
    %798 = arith.extui %797 : vector<2x32xi1> to vector<2x32xi32>
    %799 = arith.sitofp %798 : vector<2x32xi32> to vector<2x32xf32>
    %cst_286 = arith.constant 0.000000e+00 : f32
    %800 = vector.broadcast %cst_286 : f32 to vector<2x32xf32>
    %801 = arith.select %797, %800, %795 : vector<2x32xi1>, vector<2x32xf32>
    %802 = vector.extract_strided_slice %652 {offsets = [10, 0], sizes = [2, 32], strides = [1, 1]} : vector<16x32xf32> to vector<2x32xf32>
    %cst_287 = arith.constant dense<0.000000e+00> : vector<2x32xf32>
    %803 = tpu.matmul %783, %658, %cst_287 {dimension_numbers = #tpu.dot_dimension_numbers<[1], [0], [0], [1], [0, 0, 1, 1], [], []>} : vector<2x32xf32>, vector<32x32xf32>, vector<2x32xf32> -> vector<2x32xf32>
    %804 = arith.addf %802, %803 : vector<2x32xf32>
    %805 = vector.broadcast %659 : vector<1x32xf32> to vector<2x32xf32>
    %806 = arith.addf %804, %805 : vector<2x32xf32>
    %807 = arith.negf %806 : vector<2x32xf32>
    %808 = math.exp %807 : vector<2x32xf32>
    %cst_288 = arith.constant 1.000000e+00 : f32
    %809 = vector.broadcast %cst_288 : f32 to vector<2x32xf32>
    %810 = arith.addf %809, %808 : vector<2x32xf32>
    %811 = arith.divf %809, %810 : vector<2x32xf32>
    %cst_289 = arith.constant 9.99999997E-7 : f32
    %812 = vector.broadcast %cst_289 : f32 to vector<2x32xf32>
    %813 = arith.addf %811, %812 : vector<2x32xf32>
    %814 = tpu.reciprocal %813 {approx = true} : vector<2x32xf32> -> vector<2x32xf32>
    %cst_290 = arith.constant 0.000000e+00 : f32
    %815 = vector.broadcast %cst_290 : f32 to vector<2x32xf32>
    %816 = arith.subf %815, %814 : vector<2x32xf32>
    %817 = math.exp %816 : vector<2x32xf32>
    %818 = arith.mulf %817, %801 : vector<2x32xf32>
    %cst_291 = arith.constant 1.000000e+00 : f32
    %819 = vector.broadcast %cst_291 : f32 to vector<2x32xf32>
    %820 = arith.subf %819, %817 : vector<2x32xf32>
    %821 = vector.extract_strided_slice %657 {offsets = [10, 0], sizes = [2, 32], strides = [1, 1]} : vector<16x32xf32> to vector<2x32xf32>
    %822 = arith.mulf %820, %821 : vector<2x32xf32>
    %823 = arith.addf %818, %822 : vector<2x32xf32>
    %824 = vector.broadcast %649 : vector<1x32xf32> to vector<2x32xf32>
    %825 = arith.cmpf oge, %823, %824 : vector<2x32xf32>
    %826 = arith.extui %825 : vector<2x32xi1> to vector<2x32xi32>
    %827 = arith.sitofp %826 : vector<2x32xi32> to vector<2x32xf32>
    %cst_292 = arith.constant 0.000000e+00 : f32
    %828 = vector.broadcast %cst_292 : f32 to vector<2x32xf32>
    %829 = arith.select %825, %828, %823 : vector<2x32xi1>, vector<2x32xf32>
    %830 = vector.extract_strided_slice %652 {offsets = [12, 0], sizes = [2, 32], strides = [1, 1]} : vector<16x32xf32> to vector<2x32xf32>
    %cst_293 = arith.constant dense<0.000000e+00> : vector<2x32xf32>
    %831 = tpu.matmul %811, %658, %cst_293 {dimension_numbers = #tpu.dot_dimension_numbers<[1], [0], [0], [1], [0, 0, 1, 1], [], []>} : vector<2x32xf32>, vector<32x32xf32>, vector<2x32xf32> -> vector<2x32xf32>
    %832 = arith.addf %830, %831 : vector<2x32xf32>
    %833 = vector.broadcast %659 : vector<1x32xf32> to vector<2x32xf32>
    %834 = arith.addf %832, %833 : vector<2x32xf32>
    %835 = arith.negf %834 : vector<2x32xf32>
    %836 = math.exp %835 : vector<2x32xf32>
    %cst_294 = arith.constant 1.000000e+00 : f32
    %837 = vector.broadcast %cst_294 : f32 to vector<2x32xf32>
    %838 = arith.addf %837, %836 : vector<2x32xf32>
    %839 = arith.divf %837, %838 : vector<2x32xf32>
    %cst_295 = arith.constant 9.99999997E-7 : f32
    %840 = vector.broadcast %cst_295 : f32 to vector<2x32xf32>
    %841 = arith.addf %839, %840 : vector<2x32xf32>
    %842 = tpu.reciprocal %841 {approx = true} : vector<2x32xf32> -> vector<2x32xf32>
    %cst_296 = arith.constant 0.000000e+00 : f32
    %843 = vector.broadcast %cst_296 : f32 to vector<2x32xf32>
    %844 = arith.subf %843, %842 : vector<2x32xf32>
    %845 = math.exp %844 : vector<2x32xf32>
    %846 = arith.mulf %845, %829 : vector<2x32xf32>
    %cst_297 = arith.constant 1.000000e+00 : f32
    %847 = vector.broadcast %cst_297 : f32 to vector<2x32xf32>
    %848 = arith.subf %847, %845 : vector<2x32xf32>
    %849 = vector.extract_strided_slice %657 {offsets = [12, 0], sizes = [2, 32], strides = [1, 1]} : vector<16x32xf32> to vector<2x32xf32>
    %850 = arith.mulf %848, %849 : vector<2x32xf32>
    %851 = arith.addf %846, %850 : vector<2x32xf32>
    %852 = vector.broadcast %649 : vector<1x32xf32> to vector<2x32xf32>
    %853 = arith.cmpf oge, %851, %852 : vector<2x32xf32>
    %854 = arith.extui %853 : vector<2x32xi1> to vector<2x32xi32>
    %855 = arith.sitofp %854 : vector<2x32xi32> to vector<2x32xf32>
    %cst_298 = arith.constant 0.000000e+00 : f32
    %856 = vector.broadcast %cst_298 : f32 to vector<2x32xf32>
    %857 = arith.select %853, %856, %851 : vector<2x32xi1>, vector<2x32xf32>
    %858 = vector.extract_strided_slice %652 {offsets = [14, 0], sizes = [2, 32], strides = [1, 1]} : vector<16x32xf32> to vector<2x32xf32>
    %cst_299 = arith.constant dense<0.000000e+00> : vector<2x32xf32>
    %859 = tpu.matmul %839, %658, %cst_299 {dimension_numbers = #tpu.dot_dimension_numbers<[1], [0], [0], [1], [0, 0, 1, 1], [], []>} : vector<2x32xf32>, vector<32x32xf32>, vector<2x32xf32> -> vector<2x32xf32>
    %860 = arith.addf %858, %859 : vector<2x32xf32>
    %861 = vector.broadcast %659 : vector<1x32xf32> to vector<2x32xf32>
    %862 = arith.addf %860, %861 : vector<2x32xf32>
    %863 = arith.negf %862 : vector<2x32xf32>
    %864 = math.exp %863 : vector<2x32xf32>
    %cst_300 = arith.constant 1.000000e+00 : f32
    %865 = vector.broadcast %cst_300 : f32 to vector<2x32xf32>
    %866 = arith.addf %865, %864 : vector<2x32xf32>
    %867 = arith.divf %865, %866 : vector<2x32xf32>
    %cst_301 = arith.constant 9.99999997E-7 : f32
    %868 = vector.broadcast %cst_301 : f32 to vector<2x32xf32>
    %869 = arith.addf %867, %868 : vector<2x32xf32>
    %870 = tpu.reciprocal %869 {approx = true} : vector<2x32xf32> -> vector<2x32xf32>
    %cst_302 = arith.constant 0.000000e+00 : f32
    %871 = vector.broadcast %cst_302 : f32 to vector<2x32xf32>
    %872 = arith.subf %871, %870 : vector<2x32xf32>
    %873 = math.exp %872 : vector<2x32xf32>
    %874 = arith.mulf %873, %857 : vector<2x32xf32>
    %cst_303 = arith.constant 1.000000e+00 : f32
    %875 = vector.broadcast %cst_303 : f32 to vector<2x32xf32>
    %876 = arith.subf %875, %873 : vector<2x32xf32>
    %877 = vector.extract_strided_slice %657 {offsets = [14, 0], sizes = [2, 32], strides = [1, 1]} : vector<16x32xf32> to vector<2x32xf32>
    %878 = arith.mulf %876, %877 : vector<2x32xf32>
    %879 = arith.addf %874, %878 : vector<2x32xf32>
    %880 = vector.broadcast %649 : vector<1x32xf32> to vector<2x32xf32>
    %881 = arith.cmpf oge, %879, %880 : vector<2x32xf32>
    %882 = arith.extui %881 : vector<2x32xi1> to vector<2x32xi32>
    %883 = arith.sitofp %882 : vector<2x32xi32> to vector<2x32xf32>
    %cst_304 = arith.constant 0.000000e+00 : f32
    %884 = vector.broadcast %cst_304 : f32 to vector<2x32xf32>
    %885 = arith.select %881, %884, %879 : vector<2x32xi1>, vector<2x32xf32>
    %886 = tpu.concatenate %687, %715, %743, %771, %799, %827, %855, %883 in 0 : vector<2x32xf32>, vector<2x32xf32>, vector<2x32xf32>, vector<2x32xf32>, vector<2x32xf32>, vector<2x32xf32>, vector<2x32xf32>, vector<2x32xf32> -> vector<16x32xf32>
    %c0_305 = arith.constant 0 : index
    %c0_306 = arith.constant 0 : index
    %887 = vector.load %arg12[%c0_305, %c0_306] : memref<16x16xf32, #tpu.memory_space<vmem>>, vector<16x16xf32>
    %cst_307 = arith.constant dense<0.000000e+00> : vector<16x32xf32>
    %888 = tpu.matmul %887, %886, %cst_307 {dimension_numbers = #tpu.dot_dimension_numbers<[1], [0], [0], [1], [0, 0, 1, 1], [], []>} : vector<16x16xf32>, vector<16x32xf32>, vector<16x32xf32> -> vector<16x32xf32>
    %c0_308 = arith.constant 0 : index
    %c0_309 = arith.constant 0 : index
    %889 = vector.load %arg82[%c0_308, %c0_309] : memref<16x32xf32, #tpu.memory_space<vmem>>, vector<16x32xf32>
    tpu.vector_store %arg82[%c0_308, %c0_309], %888 {strides = array<i32>} : memref<16x32xf32, #tpu.memory_space<vmem>>, vector<16x32xf32>,
    %c0_310 = arith.constant 0 : index
    %c0_311 = arith.constant 0 : index
    %890 = vector.load %arg83[%c0_310, %c0_311] : memref<2x32xf32, #tpu.memory_space<vmem>>, vector<2x32xf32>
    tpu.vector_store %arg83[%c0_310, %c0_311], %885 {strides = array<i32>} : memref<2x32xf32, #tpu.memory_space<vmem>>, vector<2x32xf32>,
    %cst_312 = arith.constant 1.000000e+00 : f32
    %891 = vector.broadcast %cst_312 : f32 to vector<1x32xf32>
    %892 = vector.extract_strided_slice %888 {offsets = [0, 0], sizes = [8, 32], strides = [1, 1]} : vector<16x32xf32> to vector<8x32xf32>
    "tpu.trace_start"() <{level = 10 : i32, message = "qd,kd->qk"}> : () -> ()
    %cst_313 = arith.constant dense<0.000000e+00> : vector<1x8xf32>
    %893 = tpu.matmul %891, %892, %cst_313 {dimension_numbers = #tpu.dot_dimension_numbers<[1], [1], [0], [0], [0, 0, 1, 0], [], []>} : vector<1x32xf32>, vector<8x32xf32>, vector<1x8xf32> -> vector<1x8xf32>
    %cst_314 = arith.constant 0.000000e+00 : f32
    "tpu.trace_stop"() : () -> ()
    %894 = vector.broadcast %cst_314 : f32 to vector<1x8xf32>
    %895 = arith.cmpf ogt, %893, %894 : vector<1x8xf32>
    %cst_315 = arith.constant 0.000000e+00 : f32
    %cst_316 = arith.constant -1.000000e+30 : f32
    %896 = vector.broadcast %cst_315 : f32 to vector<1x8xf32>
    %897 = vector.broadcast %cst_316 : f32 to vector<1x8xf32>
    %898 = arith.select %895, %896, %897 : vector<1x8xi1>, vector<1x8xf32>
    %899 = vector.extract_strided_slice %888 {offsets = [8, 0], sizes = [8, 32], strides = [1, 1]} : vector<16x32xf32> to vector<8x32xf32>
    "tpu.trace_start"() <{level = 10 : i32, message = "qd,kd->qk"}> : () -> ()
    %cst_317 = arith.constant dense<0.000000e+00> : vector<1x8xf32>
    %900 = tpu.matmul %891, %899, %cst_317 {dimension_numbers = #tpu.dot_dimension_numbers<[1], [1], [0], [0], [0, 0, 1, 0], [], []>} : vector<1x32xf32>, vector<8x32xf32>, vector<1x8xf32> -> vector<1x8xf32>
    %cst_318 = arith.constant 0.000000e+00 : f32
    "tpu.trace_stop"() : () -> ()
    %901 = vector.broadcast %cst_318 : f32 to vector<1x8xf32>
    %902 = arith.cmpf ogt, %900, %901 : vector<1x8xf32>
    %cst_319 = arith.constant 0.000000e+00 : f32
    %cst_320 = arith.constant -1.000000e+30 : f32
    %903 = vector.broadcast %cst_319 : f32 to vector<1x8xf32>
    %904 = vector.broadcast %cst_320 : f32 to vector<1x8xf32>
    %905 = arith.select %902, %903, %904 : vector<1x8xi1>, vector<1x8xf32>
    %c0_321 = arith.constant 0 : index
    %c0_322 = arith.constant 0 : index
    %906 = vector.load %arg49[%c0_321, %c0_322] : memref<32x96xf32, #tpu.memory_space<vmem>>, vector<32x96xf32>
    %cst_323 = arith.constant dense<0.000000e+00> : vector<16x96xf32>
    %907 = tpu.matmul %888, %906, %cst_323 {dimension_numbers = #tpu.dot_dimension_numbers<[1], [0], [0], [1], [0, 0, 1, 1], [], []>} : vector<16x32xf32>, vector<32x96xf32>, vector<16x96xf32> -> vector<16x96xf32>
    %c0_324 = arith.constant 0 : index
    %c0_325 = arith.constant 0 : index
    %908 = vector.load %arg50[%c0_324, %c0_325] : memref<1x96xf32, #tpu.memory_space<vmem>>, vector<1x96xf32>
    %909 = vector.broadcast %908 : vector<1x96xf32> to vector<16x96xf32>
    %910 = arith.addf %907, %909 : vector<16x96xf32>
    %911 = vector.extract_strided_slice %910 {offsets = [0, 0], sizes = [8, 96], strides = [1, 1]} : vector<16x96xf32> to vector<8x96xf32>
    %912 = vector.extract_strided_slice %911 {offsets = [0, 0], sizes = [8, 8], strides = [1, 1]} : vector<8x96xf32> to vector<8x8xf32>
    %913 = vector.extract_strided_slice %911 {offsets = [0, 32], sizes = [8, 8], strides = [1, 1]} : vector<8x96xf32> to vector<8x8xf32>
    %914 = vector.extract_strided_slice %911 {offsets = [0, 64], sizes = [8, 8], strides = [1, 1]} : vector<8x96xf32> to vector<8x8xf32>
    "tpu.trace_start"() <{level = 10 : i32, message = "qd,kd->qk"}> : () -> ()
    %cst_326 = arith.constant dense<0.000000e+00> : vector<8x8xf32>
    %915 = tpu.matmul %912, %913, %cst_326 {dimension_numbers = #tpu.dot_dimension_numbers<[1], [1], [0], [0], [0, 0, 1, 0], [], []>} : vector<8x8xf32>, vector<8x8xf32>, vector<8x8xf32> -> vector<8x8xf32>
    "tpu.trace_stop"() : () -> ()
    %916 = vector.broadcast %898 : vector<1x8xf32> to vector<8x8xf32>
    %917 = arith.addf %915, %916 : vector<8x8xf32>
    %cst_327 = arith.constant dense<0xFF800000> : vector<8xf32>
    %918 = vector.multi_reduction <maximumf>, %917, %cst_327 [1] : vector<8x8xf32> to vector<8xf32>
    %919 = vector.shape_cast %918 : vector<8xf32> to vector<8x1xf32>
    %920 = vector.broadcast %919 : vector<8x1xf32> to vector<8x8xf32>
    %921 = arith.subf %917, %920 : vector<8x8xf32>
    %922 = math.exp %921 : vector<8x8xf32>
    %cst_328 = arith.constant dense<0.000000e+00> : vector<8xf32>
    %923 = vector.multi_reduction <add>, %922, %cst_328 [1] : vector<8x8xf32> to vector<8xf32>
    %924 = vector.shape_cast %923 : vector<8xf32> to vector<8x1xf32>
    %925 = vector.broadcast %924 : vector<8x1xf32> to vector<8x8xf32>
    %926 = arith.divf %922, %925 : vector<8x8xf32>
    %cst_329 = arith.constant dense<0.000000e+00> : vector<8x8xf32>
    %927 = tpu.matmul %926, %914, %cst_329 {dimension_numbers = #tpu.dot_dimension_numbers<[1], [0], [0], [1], [0, 0, 1, 1], [], []>} : vector<8x8xf32>, vector<8x8xf32>, vector<8x8xf32> -> vector<8x8xf32>
    %928 = vector.extract_strided_slice %911 {offsets = [0, 8], sizes = [8, 8], strides = [1, 1]} : vector<8x96xf32> to vector<8x8xf32>
    %929 = vector.extract_strided_slice %911 {offsets = [0, 40], sizes = [8, 8], strides = [1, 1]} : vector<8x96xf32> to vector<8x8xf32>
    %930 = vector.extract_strided_slice %911 {offsets = [0, 72], sizes = [8, 8], strides = [1, 1]} : vector<8x96xf32> to vector<8x8xf32>
    "tpu.trace_start"() <{level = 10 : i32, message = "qd,kd->qk"}> : () -> ()
    %cst_330 = arith.constant dense<0.000000e+00> : vector<8x8xf32>
    %931 = tpu.matmul %928, %929, %cst_330 {dimension_numbers = #tpu.dot_dimension_numbers<[1], [1], [0], [0], [0, 0, 1, 0], [], []>} : vector<8x8xf32>, vector<8x8xf32>, vector<8x8xf32> -> vector<8x8xf32>
    "tpu.trace_stop"() : () -> ()
    %932 = vector.broadcast %898 : vector<1x8xf32> to vector<8x8xf32>
    %933 = arith.addf %931, %932 : vector<8x8xf32>
    %cst_331 = arith.constant dense<0xFF800000> : vector<8xf32>
    %934 = vector.multi_reduction <maximumf>, %933, %cst_331 [1] : vector<8x8xf32> to vector<8xf32>
    %935 = vector.shape_cast %934 : vector<8xf32> to vector<8x1xf32>
    %936 = vector.broadcast %935 : vector<8x1xf32> to vector<8x8xf32>
    %937 = arith.subf %933, %936 : vector<8x8xf32>
    %938 = math.exp %937 : vector<8x8xf32>
    %cst_332 = arith.constant dense<0.000000e+00> : vector<8xf32>
    %939 = vector.multi_reduction <add>, %938, %cst_332 [1] : vector<8x8xf32> to vector<8xf32>
    %940 = vector.shape_cast %939 : vector<8xf32> to vector<8x1xf32>
    %941 = vector.broadcast %940 : vector<8x1xf32> to vector<8x8xf32>
    %942 = arith.divf %938, %941 : vector<8x8xf32>
    %cst_333 = arith.constant dense<0.000000e+00> : vector<8x8xf32>
    %943 = tpu.matmul %942, %930, %cst_333 {dimension_numbers = #tpu.dot_dimension_numbers<[1], [0], [0], [1], [0, 0, 1, 1], [], []>} : vector<8x8xf32>, vector<8x8xf32>, vector<8x8xf32> -> vector<8x8xf32>
    %944 = vector.extract_strided_slice %911 {offsets = [0, 16], sizes = [8, 8], strides = [1, 1]} : vector<8x96xf32> to vector<8x8xf32>
    %945 = vector.extract_strided_slice %911 {offsets = [0, 48], sizes = [8, 8], strides = [1, 1]} : vector<8x96xf32> to vector<8x8xf32>
    %946 = vector.extract_strided_slice %911 {offsets = [0, 80], sizes = [8, 8], strides = [1, 1]} : vector<8x96xf32> to vector<8x8xf32>
    "tpu.trace_start"() <{level = 10 : i32, message = "qd,kd->qk"}> : () -> ()
    %cst_334 = arith.constant dense<0.000000e+00> : vector<8x8xf32>
    %947 = tpu.matmul %944, %945, %cst_334 {dimension_numbers = #tpu.dot_dimension_numbers<[1], [1], [0], [0], [0, 0, 1, 0], [], []>} : vector<8x8xf32>, vector<8x8xf32>, vector<8x8xf32> -> vector<8x8xf32>
    "tpu.trace_stop"() : () -> ()
    %948 = vector.broadcast %898 : vector<1x8xf32> to vector<8x8xf32>
    %949 = arith.addf %947, %948 : vector<8x8xf32>
    %cst_335 = arith.constant dense<0xFF800000> : vector<8xf32>
    %950 = vector.multi_reduction <maximumf>, %949, %cst_335 [1] : vector<8x8xf32> to vector<8xf32>
    %951 = vector.shape_cast %950 : vector<8xf32> to vector<8x1xf32>
    %952 = vector.broadcast %951 : vector<8x1xf32> to vector<8x8xf32>
    %953 = arith.subf %949, %952 : vector<8x8xf32>
    %954 = math.exp %953 : vector<8x8xf32>
    %cst_336 = arith.constant dense<0.000000e+00> : vector<8xf32>
    %955 = vector.multi_reduction <add>, %954, %cst_336 [1] : vector<8x8xf32> to vector<8xf32>
    %956 = vector.shape_cast %955 : vector<8xf32> to vector<8x1xf32>
    %957 = vector.broadcast %956 : vector<8x1xf32> to vector<8x8xf32>
    %958 = arith.divf %954, %957 : vector<8x8xf32>
    %cst_337 = arith.constant dense<0.000000e+00> : vector<8x8xf32>
    %959 = tpu.matmul %958, %946, %cst_337 {dimension_numbers = #tpu.dot_dimension_numbers<[1], [0], [0], [1], [0, 0, 1, 1], [], []>} : vector<8x8xf32>, vector<8x8xf32>, vector<8x8xf32> -> vector<8x8xf32>
    %960 = vector.extract_strided_slice %911 {offsets = [0, 24], sizes = [8, 8], strides = [1, 1]} : vector<8x96xf32> to vector<8x8xf32>
    %961 = vector.extract_strided_slice %911 {offsets = [0, 56], sizes = [8, 8], strides = [1, 1]} : vector<8x96xf32> to vector<8x8xf32>
    %962 = vector.extract_strided_slice %911 {offsets = [0, 88], sizes = [8, 8], strides = [1, 1]} : vector<8x96xf32> to vector<8x8xf32>
    "tpu.trace_start"() <{level = 10 : i32, message = "qd,kd->qk"}> : () -> ()
    %cst_338 = arith.constant dense<0.000000e+00> : vector<8x8xf32>
    %963 = tpu.matmul %960, %961, %cst_338 {dimension_numbers = #tpu.dot_dimension_numbers<[1], [1], [0], [0], [0, 0, 1, 0], [], []>} : vector<8x8xf32>, vector<8x8xf32>, vector<8x8xf32> -> vector<8x8xf32>
    "tpu.trace_stop"() : () -> ()
    %964 = vector.broadcast %898 : vector<1x8xf32> to vector<8x8xf32>
    %965 = arith.addf %963, %964 : vector<8x8xf32>
    %cst_339 = arith.constant dense<0xFF800000> : vector<8xf32>
    %966 = vector.multi_reduction <maximumf>, %965, %cst_339 [1] : vector<8x8xf32> to vector<8xf32>
    %967 = vector.shape_cast %966 : vector<8xf32> to vector<8x1xf32>
    %968 = vector.broadcast %967 : vector<8x1xf32> to vector<8x8xf32>
    %969 = arith.subf %965, %968 : vector<8x8xf32>
    %970 = math.exp %969 : vector<8x8xf32>
    %cst_340 = arith.constant dense<0.000000e+00> : vector<8xf32>
    %971 = vector.multi_reduction <add>, %970, %cst_340 [1] : vector<8x8xf32> to vector<8xf32>
    %972 = vector.shape_cast %971 : vector<8xf32> to vector<8x1xf32>
    %973 = vector.broadcast %972 : vector<8x1xf32> to vector<8x8xf32>
    %974 = arith.divf %970, %973 : vector<8x8xf32>
    %cst_341 = arith.constant dense<0.000000e+00> : vector<8x8xf32>
    %975 = tpu.matmul %974, %962, %cst_341 {dimension_numbers = #tpu.dot_dimension_numbers<[1], [0], [0], [1], [0, 0, 1, 1], [], []>} : vector<8x8xf32>, vector<8x8xf32>, vector<8x8xf32> -> vector<8x8xf32>
    %976 = vector.extract_strided_slice %910 {offsets = [8, 0], sizes = [8, 96], strides = [1, 1]} : vector<16x96xf32> to vector<8x96xf32>
    %977 = vector.extract_strided_slice %976 {offsets = [0, 0], sizes = [8, 8], strides = [1, 1]} : vector<8x96xf32> to vector<8x8xf32>
    %978 = vector.extract_strided_slice %976 {offsets = [0, 32], sizes = [8, 8], strides = [1, 1]} : vector<8x96xf32> to vector<8x8xf32>
    %979 = vector.extract_strided_slice %976 {offsets = [0, 64], sizes = [8, 8], strides = [1, 1]} : vector<8x96xf32> to vector<8x8xf32>
    "tpu.trace_start"() <{level = 10 : i32, message = "qd,kd->qk"}> : () -> ()
    %cst_342 = arith.constant dense<0.000000e+00> : vector<8x8xf32>
    %980 = tpu.matmul %977, %978, %cst_342 {dimension_numbers = #tpu.dot_dimension_numbers<[1], [1], [0], [0], [0, 0, 1, 0], [], []>} : vector<8x8xf32>, vector<8x8xf32>, vector<8x8xf32> -> vector<8x8xf32>
    "tpu.trace_stop"() : () -> ()
    %981 = vector.broadcast %905 : vector<1x8xf32> to vector<8x8xf32>
    %982 = arith.addf %980, %981 : vector<8x8xf32>
    %cst_343 = arith.constant dense<0xFF800000> : vector<8xf32>
    %983 = vector.multi_reduction <maximumf>, %982, %cst_343 [1] : vector<8x8xf32> to vector<8xf32>
    %984 = vector.shape_cast %983 : vector<8xf32> to vector<8x1xf32>
    %985 = vector.broadcast %984 : vector<8x1xf32> to vector<8x8xf32>
    %986 = arith.subf %982, %985 : vector<8x8xf32>
    %987 = math.exp %986 : vector<8x8xf32>
    %cst_344 = arith.constant dense<0.000000e+00> : vector<8xf32>
    %988 = vector.multi_reduction <add>, %987, %cst_344 [1] : vector<8x8xf32> to vector<8xf32>
    %989 = vector.shape_cast %988 : vector<8xf32> to vector<8x1xf32>
    %990 = vector.broadcast %989 : vector<8x1xf32> to vector<8x8xf32>
    %991 = arith.divf %987, %990 : vector<8x8xf32>
    %cst_345 = arith.constant dense<0.000000e+00> : vector<8x8xf32>
    %992 = tpu.matmul %991, %979, %cst_345 {dimension_numbers = #tpu.dot_dimension_numbers<[1], [0], [0], [1], [0, 0, 1, 1], [], []>} : vector<8x8xf32>, vector<8x8xf32>, vector<8x8xf32> -> vector<8x8xf32>
    %993 = vector.extract_strided_slice %976 {offsets = [0, 8], sizes = [8, 8], strides = [1, 1]} : vector<8x96xf32> to vector<8x8xf32>
    %994 = vector.extract_strided_slice %976 {offsets = [0, 40], sizes = [8, 8], strides = [1, 1]} : vector<8x96xf32> to vector<8x8xf32>
    %995 = vector.extract_strided_slice %976 {offsets = [0, 72], sizes = [8, 8], strides = [1, 1]} : vector<8x96xf32> to vector<8x8xf32>
    "tpu.trace_start"() <{level = 10 : i32, message = "qd,kd->qk"}> : () -> ()
    %cst_346 = arith.constant dense<0.000000e+00> : vector<8x8xf32>
    %996 = tpu.matmul %993, %994, %cst_346 {dimension_numbers = #tpu.dot_dimension_numbers<[1], [1], [0], [0], [0, 0, 1, 0], [], []>} : vector<8x8xf32>, vector<8x8xf32>, vector<8x8xf32> -> vector<8x8xf32>
    "tpu.trace_stop"() : () -> ()
    %997 = vector.broadcast %905 : vector<1x8xf32> to vector<8x8xf32>
    %998 = arith.addf %996, %997 : vector<8x8xf32>
    %cst_347 = arith.constant dense<0xFF800000> : vector<8xf32>
    %999 = vector.multi_reduction <maximumf>, %998, %cst_347 [1] : vector<8x8xf32> to vector<8xf32>
    %1000 = vector.shape_cast %999 : vector<8xf32> to vector<8x1xf32>
    %1001 = vector.broadcast %1000 : vector<8x1xf32> to vector<8x8xf32>
    %1002 = arith.subf %998, %1001 : vector<8x8xf32>
    %1003 = math.exp %1002 : vector<8x8xf32>
    %cst_348 = arith.constant dense<0.000000e+00> : vector<8xf32>
    %1004 = vector.multi_reduction <add>, %1003, %cst_348 [1] : vector<8x8xf32> to vector<8xf32>
    %1005 = vector.shape_cast %1004 : vector<8xf32> to vector<8x1xf32>
    %1006 = vector.broadcast %1005 : vector<8x1xf32> to vector<8x8xf32>
    %1007 = arith.divf %1003, %1006 : vector<8x8xf32>
    %cst_349 = arith.constant dense<0.000000e+00> : vector<8x8xf32>
    %1008 = tpu.matmul %1007, %995, %cst_349 {dimension_numbers = #tpu.dot_dimension_numbers<[1], [0], [0], [1], [0, 0, 1, 1], [], []>} : vector<8x8xf32>, vector<8x8xf32>, vector<8x8xf32> -> vector<8x8xf32>
    %1009 = vector.extract_strided_slice %976 {offsets = [0, 16], sizes = [8, 8], strides = [1, 1]} : vector<8x96xf32> to vector<8x8xf32>
    %1010 = vector.extract_strided_slice %976 {offsets = [0, 48], sizes = [8, 8], strides = [1, 1]} : vector<8x96xf32> to vector<8x8xf32>
    %1011 = vector.extract_strided_slice %976 {offsets = [0, 80], sizes = [8, 8], strides = [1, 1]} : vector<8x96xf32> to vector<8x8xf32>
    "tpu.trace_start"() <{level = 10 : i32, message = "qd,kd->qk"}> : () -> ()
    %cst_350 = arith.constant dense<0.000000e+00> : vector<8x8xf32>
    %1012 = tpu.matmul %1009, %1010, %cst_350 {dimension_numbers = #tpu.dot_dimension_numbers<[1], [1], [0], [0], [0, 0, 1, 0], [], []>} : vector<8x8xf32>, vector<8x8xf32>, vector<8x8xf32> -> vector<8x8xf32>
    "tpu.trace_stop"() : () -> ()
    %1013 = vector.broadcast %905 : vector<1x8xf32> to vector<8x8xf32>
    %1014 = arith.addf %1012, %1013 : vector<8x8xf32>
    %cst_351 = arith.constant dense<0xFF800000> : vector<8xf32>
    %1015 = vector.multi_reduction <maximumf>, %1014, %cst_351 [1] : vector<8x8xf32> to vector<8xf32>
    %1016 = vector.shape_cast %1015 : vector<8xf32> to vector<8x1xf32>
    %1017 = vector.broadcast %1016 : vector<8x1xf32> to vector<8x8xf32>
    %1018 = arith.subf %1014, %1017 : vector<8x8xf32>
    %1019 = math.exp %1018 : vector<8x8xf32>
    %cst_352 = arith.constant dense<0.000000e+00> : vector<8xf32>
    %1020 = vector.multi_reduction <add>, %1019, %cst_352 [1] : vector<8x8xf32> to vector<8xf32>
    %1021 = vector.shape_cast %1020 : vector<8xf32> to vector<8x1xf32>
    %1022 = vector.broadcast %1021 : vector<8x1xf32> to vector<8x8xf32>
    %1023 = arith.divf %1019, %1022 : vector<8x8xf32>
    %cst_353 = arith.constant dense<0.000000e+00> : vector<8x8xf32>
    %1024 = tpu.matmul %1023, %1011, %cst_353 {dimension_numbers = #tpu.dot_dimension_numbers<[1], [0], [0], [1], [0, 0, 1, 1], [], []>} : vector<8x8xf32>, vector<8x8xf32>, vector<8x8xf32> -> vector<8x8xf32>
    %1025 = vector.extract_strided_slice %976 {offsets = [0, 24], sizes = [8, 8], strides = [1, 1]} : vector<8x96xf32> to vector<8x8xf32>
    %1026 = vector.extract_strided_slice %976 {offsets = [0, 56], sizes = [8, 8], strides = [1, 1]} : vector<8x96xf32> to vector<8x8xf32>
    %1027 = vector.extract_strided_slice %976 {offsets = [0, 88], sizes = [8, 8], strides = [1, 1]} : vector<8x96xf32> to vector<8x8xf32>
    "tpu.trace_start"() <{level = 10 : i32, message = "qd,kd->qk"}> : () -> ()
    %cst_354 = arith.constant dense<0.000000e+00> : vector<8x8xf32>
    %1028 = tpu.matmul %1025, %1026, %cst_354 {dimension_numbers = #tpu.dot_dimension_numbers<[1], [1], [0], [0], [0, 0, 1, 0], [], []>} : vector<8x8xf32>, vector<8x8xf32>, vector<8x8xf32> -> vector<8x8xf32>
    "tpu.trace_stop"() : () -> ()
    %1029 = vector.broadcast %905 : vector<1x8xf32> to vector<8x8xf32>
    %1030 = arith.addf %1028, %1029 : vector<8x8xf32>
    %cst_355 = arith.constant dense<0xFF800000> : vector<8xf32>
    %1031 = vector.multi_reduction <maximumf>, %1030, %cst_355 [1] : vector<8x8xf32> to vector<8xf32>
    %1032 = vector.shape_cast %1031 : vector<8xf32> to vector<8x1xf32>
    %1033 = vector.broadcast %1032 : vector<8x1xf32> to vector<8x8xf32>
    %1034 = arith.subf %1030, %1033 : vector<8x8xf32>
    %1035 = math.exp %1034 : vector<8x8xf32>
    %cst_356 = arith.constant dense<0.000000e+00> : vector<8xf32>
    %1036 = vector.multi_reduction <add>, %1035, %cst_356 [1] : vector<8x8xf32> to vector<8xf32>
    %1037 = vector.shape_cast %1036 : vector<8xf32> to vector<8x1xf32>
    %1038 = vector.broadcast %1037 : vector<8x1xf32> to vector<8x8xf32>
    %1039 = arith.divf %1035, %1038 : vector<8x8xf32>
    %cst_357 = arith.constant dense<0.000000e+00> : vector<8x8xf32>
    %1040 = tpu.matmul %1039, %1027, %cst_357 {dimension_numbers = #tpu.dot_dimension_numbers<[1], [0], [0], [1], [0, 0, 1, 1], [], []>} : vector<8x8xf32>, vector<8x8xf32>, vector<8x8xf32> -> vector<8x8xf32>
    %c0_358 = arith.constant 0 : index
    %c0_359 = arith.constant 0 : index
    %1041 = vector.load %arg51[%c0_358, %c0_359] : memref<32x32xf32, #tpu.memory_space<vmem>>, vector<32x32xf32>
    %c0_360 = arith.constant 0 : index
    %c0_361 = arith.constant 0 : index
    %1042 = vector.load %arg52[%c0_360, %c0_361] : memref<1x32xf32, #tpu.memory_space<vmem>>, vector<1x32xf32>
    %1043 = tpu.concatenate %927, %992 in 0 : vector<8x8xf32>, vector<8x8xf32> -> vector<16x8xf32>
    %1044 = vector.extract_strided_slice %1041 {offsets = [0, 0], sizes = [8, 32], strides = [1, 1]} : vector<32x32xf32> to vector<8x32xf32>
    %cst_362 = arith.constant dense<0.000000e+00> : vector<16x32xf32>
    %1045 = tpu.matmul %1043, %1044, %cst_362 {dimension_numbers = #tpu.dot_dimension_numbers<[1], [0], [0], [1], [0, 0, 1, 1], [], []>} : vector<16x8xf32>, vector<8x32xf32>, vector<16x32xf32> -> vector<16x32xf32>
    %1046 = vector.broadcast %1042 : vector<1x32xf32> to vector<16x32xf32>
    %1047 = arith.addf %1046, %1045 : vector<16x32xf32>
    %1048 = tpu.concatenate %943, %1008 in 0 : vector<8x8xf32>, vector<8x8xf32> -> vector<16x8xf32>
    %1049 = vector.extract_strided_slice %1041 {offsets = [8, 0], sizes = [8, 32], strides = [1, 1]} : vector<32x32xf32> to vector<8x32xf32>
    %cst_363 = arith.constant dense<0.000000e+00> : vector<16x32xf32>
    %1050 = tpu.matmul %1048, %1049, %cst_363 {dimension_numbers = #tpu.dot_dimension_numbers<[1], [0], [0], [1], [0, 0, 1, 1], [], []>} : vector<16x8xf32>, vector<8x32xf32>, vector<16x32xf32> -> vector<16x32xf32>
    %1051 = arith.addf %1047, %1050 : vector<16x32xf32>
    %1052 = tpu.concatenate %959, %1024 in 0 : vector<8x8xf32>, vector<8x8xf32> -> vector<16x8xf32>
    %1053 = vector.extract_strided_slice %1041 {offsets = [16, 0], sizes = [8, 32], strides = [1, 1]} : vector<32x32xf32> to vector<8x32xf32>
    %cst_364 = arith.constant dense<0.000000e+00> : vector<16x32xf32>
    %1054 = tpu.matmul %1052, %1053, %cst_364 {dimension_numbers = #tpu.dot_dimension_numbers<[1], [0], [0], [1], [0, 0, 1, 1], [], []>} : vector<16x8xf32>, vector<8x32xf32>, vector<16x32xf32> -> vector<16x32xf32>
    %1055 = arith.addf %1051, %1054 : vector<16x32xf32>
    %1056 = tpu.concatenate %975, %1040 in 0 : vector<8x8xf32>, vector<8x8xf32> -> vector<16x8xf32>
    %1057 = vector.extract_strided_slice %1041 {offsets = [24, 0], sizes = [8, 32], strides = [1, 1]} : vector<32x32xf32> to vector<8x32xf32>
    %cst_365 = arith.constant dense<0.000000e+00> : vector<16x32xf32>
    %1058 = tpu.matmul %1056, %1057, %cst_365 {dimension_numbers = #tpu.dot_dimension_numbers<[1], [0], [0], [1], [0, 0, 1, 1], [], []>} : vector<16x8xf32>, vector<8x32xf32>, vector<16x32xf32> -> vector<16x32xf32>
    %1059 = arith.addf %1055, %1058 : vector<16x32xf32>
    %1060 = arith.addf %888, %1059 : vector<16x32xf32>
    %cst_366 = arith.constant dense<0.000000e+00> : vector<16xf32>
    %1061 = vector.multi_reduction <add>, %1060, %cst_366 [1] : vector<16x32xf32> to vector<16xf32>
    %1062 = vector.shape_cast %1061 : vector<16xf32> to vector<16x1xf32>
    %cst_367 = arith.constant 3.200000e+01 : f32
    %1063 = vector.broadcast %cst_367 : f32 to vector<16x1xf32>
    %1064 = arith.divf %1062, %1063 : vector<16x1xf32>
    %1065 = vector.broadcast %1064 : vector<16x1xf32> to vector<16x32xf32>
    %1066 = arith.subf %1060, %1065 : vector<16x32xf32>
    %1067 = arith.mulf %1066, %1066 : vector<16x32xf32>
    %cst_368 = arith.constant dense<0.000000e+00> : vector<16xf32>
    %1068 = vector.multi_reduction <add>, %1067, %cst_368 [1] : vector<16x32xf32> to vector<16xf32>
    %1069 = vector.shape_cast %1068 : vector<16xf32> to vector<16x1xf32>
    %cst_369 = arith.constant 3.200000e+01 : f32
    %1070 = vector.broadcast %cst_369 : f32 to vector<16x1xf32>
    %1071 = arith.divf %1069, %1070 : vector<16x1xf32>
    %1072 = vector.broadcast %1064 : vector<16x1xf32> to vector<16x32xf32>
    %1073 = arith.subf %1060, %1072 : vector<16x32xf32>
    %cst_370 = arith.constant 9.99999974E-6 : f32
    %1074 = vector.broadcast %cst_370 : f32 to vector<16x1xf32>
    %1075 = arith.addf %1071, %1074 : vector<16x1xf32>
    %1076 = math.rsqrt %1075 : vector<16x1xf32>
    %1077 = vector.broadcast %1076 : vector<16x1xf32> to vector<16x32xf32>
    %1078 = arith.mulf %1073, %1077 : vector<16x32xf32>
    %c0_371 = arith.constant 0 : index
    %c0_372 = arith.constant 0 : index
    %1079 = vector.load %arg53[%c0_371, %c0_372] : memref<1x32xf32, #tpu.memory_space<vmem>>, vector<1x32xf32>
    %1080 = vector.broadcast %1079 : vector<1x32xf32> to vector<16x32xf32>
    %1081 = arith.mulf %1078, %1080 : vector<16x32xf32>
    %c0_373 = arith.constant 0 : index
    %c0_374 = arith.constant 0 : index
    %1082 = vector.load %arg54[%c0_373, %c0_374] : memref<1x32xf32, #tpu.memory_space<vmem>>, vector<1x32xf32>
    %1083 = vector.broadcast %1082 : vector<1x32xf32> to vector<16x32xf32>
    %1084 = arith.addf %1081, %1083 : vector<16x32xf32>
    %c0_375 = arith.constant 0 : index
    %c0_376 = arith.constant 0 : index
    %1085 = vector.load %arg55[%c0_375, %c0_376] : memref<32x128xf32, #tpu.memory_space<vmem>>, vector<32x128xf32>
    %cst_377 = arith.constant dense<0.000000e+00> : vector<16x128xf32>
    %1086 = tpu.matmul %1084, %1085, %cst_377 {dimension_numbers = #tpu.dot_dimension_numbers<[1], [0], [0], [1], [0, 0, 1, 1], [], []>} : vector<16x32xf32>, vector<32x128xf32>, vector<16x128xf32> -> vector<16x128xf32>
    %c0_378 = arith.constant 0 : index
    %c0_379 = arith.constant 0 : index
    %1087 = vector.load %arg56[%c0_378, %c0_379] : memref<1x128xf32, #tpu.memory_space<vmem>>, vector<1x128xf32>
    %1088 = vector.broadcast %1087 : vector<1x128xf32> to vector<16x128xf32>
    %1089 = arith.addf %1086, %1088 : vector<16x128xf32>
    %cst_380 = arith.constant 0.000000e+00 : f32
    %1090 = vector.broadcast %cst_380 : f32 to vector<16x128xf32>
    %1091 = arith.maximumf %1089, %1090 : vector<16x128xf32>
    %c0_381 = arith.constant 0 : index
    %c0_382 = arith.constant 0 : index
    %1092 = vector.load %arg57[%c0_381, %c0_382] : memref<128x32xf32, #tpu.memory_space<vmem>>, vector<128x32xf32>
    %cst_383 = arith.constant dense<0.000000e+00> : vector<16x32xf32>
    %1093 = tpu.matmul %1091, %1092, %cst_383 {dimension_numbers = #tpu.dot_dimension_numbers<[1], [0], [0], [1], [0, 0, 1, 1], [], []>} : vector<16x128xf32>, vector<128x32xf32>, vector<16x32xf32> -> vector<16x32xf32>
    %c0_384 = arith.constant 0 : index
    %c0_385 = arith.constant 0 : index
    %1094 = vector.load %arg58[%c0_384, %c0_385] : memref<1x32xf32, #tpu.memory_space<vmem>>, vector<1x32xf32>
    %1095 = vector.broadcast %1094 : vector<1x32xf32> to vector<16x32xf32>
    %1096 = arith.addf %1093, %1095 : vector<16x32xf32>
    %1097 = arith.addf %1084, %1096 : vector<16x32xf32>
    %cst_386 = arith.constant dense<0.000000e+00> : vector<16xf32>
    %1098 = vector.multi_reduction <add>, %1097, %cst_386 [1] : vector<16x32xf32> to vector<16xf32>
    %1099 = vector.shape_cast %1098 : vector<16xf32> to vector<16x1xf32>
    %cst_387 = arith.constant 3.200000e+01 : f32
    %1100 = vector.broadcast %cst_387 : f32 to vector<16x1xf32>
    %1101 = arith.divf %1099, %1100 : vector<16x1xf32>
    %1102 = vector.broadcast %1101 : vector<16x1xf32> to vector<16x32xf32>
    %1103 = arith.subf %1097, %1102 : vector<16x32xf32>
    %1104 = arith.mulf %1103, %1103 : vector<16x32xf32>
    %cst_388 = arith.constant dense<0.000000e+00> : vector<16xf32>
    %1105 = vector.multi_reduction <add>, %1104, %cst_388 [1] : vector<16x32xf32> to vector<16xf32>
    %1106 = vector.shape_cast %1105 : vector<16xf32> to vector<16x1xf32>
    %cst_389 = arith.constant 3.200000e+01 : f32
    %1107 = vector.broadcast %cst_389 : f32 to vector<16x1xf32>
    %1108 = arith.divf %1106, %1107 : vector<16x1xf32>
    %1109 = vector.broadcast %1101 : vector<16x1xf32> to vector<16x32xf32>
    %1110 = arith.subf %1097, %1109 : vector<16x32xf32>
    %cst_390 = arith.constant 9.99999974E-6 : f32
    %1111 = vector.broadcast %cst_390 : f32 to vector<16x1xf32>
    %1112 = arith.addf %1108, %1111 : vector<16x1xf32>
    %1113 = math.rsqrt %1112 : vector<16x1xf32>
    %1114 = vector.broadcast %1113 : vector<16x1xf32> to vector<16x32xf32>
    %1115 = arith.mulf %1110, %1114 : vector<16x32xf32>
    %c0_391 = arith.constant 0 : index
    %c0_392 = arith.constant 0 : index
    %1116 = vector.load %arg59[%c0_391, %c0_392] : memref<1x32xf32, #tpu.memory_space<vmem>>, vector<1x32xf32>
    %1117 = vector.broadcast %1116 : vector<1x32xf32> to vector<16x32xf32>
    %1118 = arith.mulf %1115, %1117 : vector<16x32xf32>
    %c0_393 = arith.constant 0 : index
    %c0_394 = arith.constant 0 : index
    %1119 = vector.load %arg60[%c0_393, %c0_394] : memref<1x32xf32, #tpu.memory_space<vmem>>, vector<1x32xf32>
    %1120 = vector.broadcast %1119 : vector<1x32xf32> to vector<16x32xf32>
    %1121 = arith.addf %1118, %1120 : vector<16x32xf32>
    %c0_395 = arith.constant 0 : index
    %c0_396 = arith.constant 0 : index
    %1122 = vector.load %arg61[%c0_395, %c0_396] : memref<32x96xf32, #tpu.memory_space<vmem>>, vector<32x96xf32>
    %cst_397 = arith.constant dense<0.000000e+00> : vector<16x96xf32>
    %1123 = tpu.matmul %1121, %1122, %cst_397 {dimension_numbers = #tpu.dot_dimension_numbers<[1], [0], [0], [1], [0, 0, 1, 1], [], []>} : vector<16x32xf32>, vector<32x96xf32>, vector<16x96xf32> -> vector<16x96xf32>
    %c0_398 = arith.constant 0 : index
    %c0_399 = arith.constant 0 : index
    %1124 = vector.load %arg62[%c0_398, %c0_399] : memref<1x96xf32, #tpu.memory_space<vmem>>, vector<1x96xf32>
    %1125 = vector.broadcast %1124 : vector<1x96xf32> to vector<16x96xf32>
    %1126 = arith.addf %1123, %1125 : vector<16x96xf32>
    %1127 = vector.extract_strided_slice %1126 {offsets = [0, 0], sizes = [8, 96], strides = [1, 1]} : vector<16x96xf32> to vector<8x96xf32>
    %1128 = vector.extract_strided_slice %1127 {offsets = [0, 0], sizes = [8, 8], strides = [1, 1]} : vector<8x96xf32> to vector<8x8xf32>
    %1129 = vector.extract_strided_slice %1127 {offsets = [0, 32], sizes = [8, 8], strides = [1, 1]} : vector<8x96xf32> to vector<8x8xf32>
    %1130 = vector.extract_strided_slice %1127 {offsets = [0, 64], sizes = [8, 8], strides = [1, 1]} : vector<8x96xf32> to vector<8x8xf32>
    "tpu.trace_start"() <{level = 10 : i32, message = "qd,kd->qk"}> : () -> ()
    %cst_400 = arith.constant dense<0.000000e+00> : vector<8x8xf32>
    %1131 = tpu.matmul %1128, %1129, %cst_400 {dimension_numbers = #tpu.dot_dimension_numbers<[1], [1], [0], [0], [0, 0, 1, 0], [], []>} : vector<8x8xf32>, vector<8x8xf32>, vector<8x8xf32> -> vector<8x8xf32>
    "tpu.trace_stop"() : () -> ()
    %1132 = vector.broadcast %898 : vector<1x8xf32> to vector<8x8xf32>
    %1133 = arith.addf %1131, %1132 : vector<8x8xf32>
    %cst_401 = arith.constant dense<0xFF800000> : vector<8xf32>
    %1134 = vector.multi_reduction <maximumf>, %1133, %cst_401 [1] : vector<8x8xf32> to vector<8xf32>
    %1135 = vector.shape_cast %1134 : vector<8xf32> to vector<8x1xf32>
    %1136 = vector.broadcast %1135 : vector<8x1xf32> to vector<8x8xf32>
    %1137 = arith.subf %1133, %1136 : vector<8x8xf32>
    %1138 = math.exp %1137 : vector<8x8xf32>
    %cst_402 = arith.constant dense<0.000000e+00> : vector<8xf32>
    %1139 = vector.multi_reduction <add>, %1138, %cst_402 [1] : vector<8x8xf32> to vector<8xf32>
    %1140 = vector.shape_cast %1139 : vector<8xf32> to vector<8x1xf32>
    %1141 = vector.broadcast %1140 : vector<8x1xf32> to vector<8x8xf32>
    %1142 = arith.divf %1138, %1141 : vector<8x8xf32>
    %cst_403 = arith.constant dense<0.000000e+00> : vector<8x8xf32>
    %1143 = tpu.matmul %1142, %1130, %cst_403 {dimension_numbers = #tpu.dot_dimension_numbers<[1], [0], [0], [1], [0, 0, 1, 1], [], []>} : vector<8x8xf32>, vector<8x8xf32>, vector<8x8xf32> -> vector<8x8xf32>
    %1144 = vector.extract_strided_slice %1127 {offsets = [0, 8], sizes = [8, 8], strides = [1, 1]} : vector<8x96xf32> to vector<8x8xf32>
    %1145 = vector.extract_strided_slice %1127 {offsets = [0, 40], sizes = [8, 8], strides = [1, 1]} : vector<8x96xf32> to vector<8x8xf32>
    %1146 = vector.extract_strided_slice %1127 {offsets = [0, 72], sizes = [8, 8], strides = [1, 1]} : vector<8x96xf32> to vector<8x8xf32>
    "tpu.trace_start"() <{level = 10 : i32, message = "qd,kd->qk"}> : () -> ()
    %cst_404 = arith.constant dense<0.000000e+00> : vector<8x8xf32>
    %1147 = tpu.matmul %1144, %1145, %cst_404 {dimension_numbers = #tpu.dot_dimension_numbers<[1], [1], [0], [0], [0, 0, 1, 0], [], []>} : vector<8x8xf32>, vector<8x8xf32>, vector<8x8xf32> -> vector<8x8xf32>
    "tpu.trace_stop"() : () -> ()
    %1148 = vector.broadcast %898 : vector<1x8xf32> to vector<8x8xf32>
    %1149 = arith.addf %1147, %1148 : vector<8x8xf32>
    %cst_405 = arith.constant dense<0xFF800000> : vector<8xf32>
    %1150 = vector.multi_reduction <maximumf>, %1149, %cst_405 [1] : vector<8x8xf32> to vector<8xf32>
    %1151 = vector.shape_cast %1150 : vector<8xf32> to vector<8x1xf32>
    %1152 = vector.broadcast %1151 : vector<8x1xf32> to vector<8x8xf32>
    %1153 = arith.subf %1149, %1152 : vector<8x8xf32>
    %1154 = math.exp %1153 : vector<8x8xf32>
    %cst_406 = arith.constant dense<0.000000e+00> : vector<8xf32>
    %1155 = vector.multi_reduction <add>, %1154, %cst_406 [1] : vector<8x8xf32> to vector<8xf32>
    %1156 = vector.shape_cast %1155 : vector<8xf32> to vector<8x1xf32>
    %1157 = vector.broadcast %1156 : vector<8x1xf32> to vector<8x8xf32>
    %1158 = arith.divf %1154, %1157 : vector<8x8xf32>
    %cst_407 = arith.constant dense<0.000000e+00> : vector<8x8xf32>
    %1159 = tpu.matmul %1158, %1146, %cst_407 {dimension_numbers = #tpu.dot_dimension_numbers<[1], [0], [0], [1], [0, 0, 1, 1], [], []>} : vector<8x8xf32>, vector<8x8xf32>, vector<8x8xf32> -> vector<8x8xf32>
    %1160 = vector.extract_strided_slice %1127 {offsets = [0, 16], sizes = [8, 8], strides = [1, 1]} : vector<8x96xf32> to vector<8x8xf32>
    %1161 = vector.extract_strided_slice %1127 {offsets = [0, 48], sizes = [8, 8], strides = [1, 1]} : vector<8x96xf32> to vector<8x8xf32>
    %1162 = vector.extract_strided_slice %1127 {offsets = [0, 80], sizes = [8, 8], strides = [1, 1]} : vector<8x96xf32> to vector<8x8xf32>
    "tpu.trace_start"() <{level = 10 : i32, message = "qd,kd->qk"}> : () -> ()
    %cst_408 = arith.constant dense<0.000000e+00> : vector<8x8xf32>
    %1163 = tpu.matmul %1160, %1161, %cst_408 {dimension_numbers = #tpu.dot_dimension_numbers<[1], [1], [0], [0], [0, 0, 1, 0], [], []>} : vector<8x8xf32>, vector<8x8xf32>, vector<8x8xf32> -> vector<8x8xf32>
    "tpu.trace_stop"() : () -> ()
    %1164 = vector.broadcast %898 : vector<1x8xf32> to vector<8x8xf32>
    %1165 = arith.addf %1163, %1164 : vector<8x8xf32>
    %cst_409 = arith.constant dense<0xFF800000> : vector<8xf32>
    %1166 = vector.multi_reduction <maximumf>, %1165, %cst_409 [1] : vector<8x8xf32> to vector<8xf32>
    %1167 = vector.shape_cast %1166 : vector<8xf32> to vector<8x1xf32>
    %1168 = vector.broadcast %1167 : vector<8x1xf32> to vector<8x8xf32>
    %1169 = arith.subf %1165, %1168 : vector<8x8xf32>
    %1170 = math.exp %1169 : vector<8x8xf32>
    %cst_410 = arith.constant dense<0.000000e+00> : vector<8xf32>
    %1171 = vector.multi_reduction <add>, %1170, %cst_410 [1] : vector<8x8xf32> to vector<8xf32>
    %1172 = vector.shape_cast %1171 : vector<8xf32> to vector<8x1xf32>
    %1173 = vector.broadcast %1172 : vector<8x1xf32> to vector<8x8xf32>
    %1174 = arith.divf %1170, %1173 : vector<8x8xf32>
    %cst_411 = arith.constant dense<0.000000e+00> : vector<8x8xf32>
    %1175 = tpu.matmul %1174, %1162, %cst_411 {dimension_numbers = #tpu.dot_dimension_numbers<[1], [0], [0], [1], [0, 0, 1, 1], [], []>} : vector<8x8xf32>, vector<8x8xf32>, vector<8x8xf32> -> vector<8x8xf32>
    %1176 = vector.extract_strided_slice %1127 {offsets = [0, 24], sizes = [8, 8], strides = [1, 1]} : vector<8x96xf32> to vector<8x8xf32>
    %1177 = vector.extract_strided_slice %1127 {offsets = [0, 56], sizes = [8, 8], strides = [1, 1]} : vector<8x96xf32> to vector<8x8xf32>
    %1178 = vector.extract_strided_slice %1127 {offsets = [0, 88], sizes = [8, 8], strides = [1, 1]} : vector<8x96xf32> to vector<8x8xf32>
    "tpu.trace_start"() <{level = 10 : i32, message = "qd,kd->qk"}> : () -> ()
    %cst_412 = arith.constant dense<0.000000e+00> : vector<8x8xf32>
    %1179 = tpu.matmul %1176, %1177, %cst_412 {dimension_numbers = #tpu.dot_dimension_numbers<[1], [1], [0], [0], [0, 0, 1, 0], [], []>} : vector<8x8xf32>, vector<8x8xf32>, vector<8x8xf32> -> vector<8x8xf32>
    "tpu.trace_stop"() : () -> ()
    %1180 = vector.broadcast %898 : vector<1x8xf32> to vector<8x8xf32>
    %1181 = arith.addf %1179, %1180 : vector<8x8xf32>
    %cst_413 = arith.constant dense<0xFF800000> : vector<8xf32>
    %1182 = vector.multi_reduction <maximumf>, %1181, %cst_413 [1] : vector<8x8xf32> to vector<8xf32>
    %1183 = vector.shape_cast %1182 : vector<8xf32> to vector<8x1xf32>
    %1184 = vector.broadcast %1183 : vector<8x1xf32> to vector<8x8xf32>
    %1185 = arith.subf %1181, %1184 : vector<8x8xf32>
    %1186 = math.exp %1185 : vector<8x8xf32>
    %cst_414 = arith.constant dense<0.000000e+00> : vector<8xf32>
    %1187 = vector.multi_reduction <add>, %1186, %cst_414 [1] : vector<8x8xf32> to vector<8xf32>
    %1188 = vector.shape_cast %1187 : vector<8xf32> to vector<8x1xf32>
    %1189 = vector.broadcast %1188 : vector<8x1xf32> to vector<8x8xf32>
    %1190 = arith.divf %1186, %1189 : vector<8x8xf32>
    %cst_415 = arith.constant dense<0.000000e+00> : vector<8x8xf32>
    %1191 = tpu.matmul %1190, %1178, %cst_415 {dimension_numbers = #tpu.dot_dimension_numbers<[1], [0], [0], [1], [0, 0, 1, 1], [], []>} : vector<8x8xf32>, vector<8x8xf32>, vector<8x8xf32> -> vector<8x8xf32>
    %1192 = vector.extract_strided_slice %1126 {offsets = [8, 0], sizes = [8, 96], strides = [1, 1]} : vector<16x96xf32> to vector<8x96xf32>
    %1193 = vector.extract_strided_slice %1192 {offsets = [0, 0], sizes = [8, 8], strides = [1, 1]} : vector<8x96xf32> to vector<8x8xf32>
    %1194 = vector.extract_strided_slice %1192 {offsets = [0, 32], sizes = [8, 8], strides = [1, 1]} : vector<8x96xf32> to vector<8x8xf32>
    %1195 = vector.extract_strided_slice %1192 {offsets = [0, 64], sizes = [8, 8], strides = [1, 1]} : vector<8x96xf32> to vector<8x8xf32>
    "tpu.trace_start"() <{level = 10 : i32, message = "qd,kd->qk"}> : () -> ()
    %cst_416 = arith.constant dense<0.000000e+00> : vector<8x8xf32>
    %1196 = tpu.matmul %1193, %1194, %cst_416 {dimension_numbers = #tpu.dot_dimension_numbers<[1], [1], [0], [0], [0, 0, 1, 0], [], []>} : vector<8x8xf32>, vector<8x8xf32>, vector<8x8xf32> -> vector<8x8xf32>
    "tpu.trace_stop"() : () -> ()
    %1197 = vector.broadcast %905 : vector<1x8xf32> to vector<8x8xf32>
    %1198 = arith.addf %1196, %1197 : vector<8x8xf32>
    %cst_417 = arith.constant dense<0xFF800000> : vector<8xf32>
    %1199 = vector.multi_reduction <maximumf>, %1198, %cst_417 [1] : vector<8x8xf32> to vector<8xf32>
    %1200 = vector.shape_cast %1199 : vector<8xf32> to vector<8x1xf32>
    %1201 = vector.broadcast %1200 : vector<8x1xf32> to vector<8x8xf32>
    %1202 = arith.subf %1198, %1201 : vector<8x8xf32>
    %1203 = math.exp %1202 : vector<8x8xf32>
    %cst_418 = arith.constant dense<0.000000e+00> : vector<8xf32>
    %1204 = vector.multi_reduction <add>, %1203, %cst_418 [1] : vector<8x8xf32> to vector<8xf32>
    %1205 = vector.shape_cast %1204 : vector<8xf32> to vector<8x1xf32>
    %1206 = vector.broadcast %1205 : vector<8x1xf32> to vector<8x8xf32>
    %1207 = arith.divf %1203, %1206 : vector<8x8xf32>
    %cst_419 = arith.constant dense<0.000000e+00> : vector<8x8xf32>
    %1208 = tpu.matmul %1207, %1195, %cst_419 {dimension_numbers = #tpu.dot_dimension_numbers<[1], [0], [0], [1], [0, 0, 1, 1], [], []>} : vector<8x8xf32>, vector<8x8xf32>, vector<8x8xf32> -> vector<8x8xf32>
    %1209 = vector.extract_strided_slice %1192 {offsets = [0, 8], sizes = [8, 8], strides = [1, 1]} : vector<8x96xf32> to vector<8x8xf32>
    %1210 = vector.extract_strided_slice %1192 {offsets = [0, 40], sizes = [8, 8], strides = [1, 1]} : vector<8x96xf32> to vector<8x8xf32>
    %1211 = vector.extract_strided_slice %1192 {offsets = [0, 72], sizes = [8, 8], strides = [1, 1]} : vector<8x96xf32> to vector<8x8xf32>
    "tpu.trace_start"() <{level = 10 : i32, message = "qd,kd->qk"}> : () -> ()
    %cst_420 = arith.constant dense<0.000000e+00> : vector<8x8xf32>
    %1212 = tpu.matmul %1209, %1210, %cst_420 {dimension_numbers = #tpu.dot_dimension_numbers<[1], [1], [0], [0], [0, 0, 1, 0], [], []>} : vector<8x8xf32>, vector<8x8xf32>, vector<8x8xf32> -> vector<8x8xf32>
    "tpu.trace_stop"() : () -> ()
    %1213 = vector.broadcast %905 : vector<1x8xf32> to vector<8x8xf32>
    %1214 = arith.addf %1212, %1213 : vector<8x8xf32>
    %cst_421 = arith.constant dense<0xFF800000> : vector<8xf32>
    %1215 = vector.multi_reduction <maximumf>, %1214, %cst_421 [1] : vector<8x8xf32> to vector<8xf32>
    %1216 = vector.shape_cast %1215 : vector<8xf32> to vector<8x1xf32>
    %1217 = vector.broadcast %1216 : vector<8x1xf32> to vector<8x8xf32>
    %1218 = arith.subf %1214, %1217 : vector<8x8xf32>
    %1219 = math.exp %1218 : vector<8x8xf32>
    %cst_422 = arith.constant dense<0.000000e+00> : vector<8xf32>
    %1220 = vector.multi_reduction <add>, %1219, %cst_422 [1] : vector<8x8xf32> to vector<8xf32>
    %1221 = vector.shape_cast %1220 : vector<8xf32> to vector<8x1xf32>
    %1222 = vector.broadcast %1221 : vector<8x1xf32> to vector<8x8xf32>
    %1223 = arith.divf %1219, %1222 : vector<8x8xf32>
    %cst_423 = arith.constant dense<0.000000e+00> : vector<8x8xf32>
    %1224 = tpu.matmul %1223, %1211, %cst_423 {dimension_numbers = #tpu.dot_dimension_numbers<[1], [0], [0], [1], [0, 0, 1, 1], [], []>} : vector<8x8xf32>, vector<8x8xf32>, vector<8x8xf32> -> vector<8x8xf32>
    %1225 = vector.extract_strided_slice %1192 {offsets = [0, 16], sizes = [8, 8], strides = [1, 1]} : vector<8x96xf32> to vector<8x8xf32>
    %1226 = vector.extract_strided_slice %1192 {offsets = [0, 48], sizes = [8, 8], strides = [1, 1]} : vector<8x96xf32> to vector<8x8xf32>
    %1227 = vector.extract_strided_slice %1192 {offsets = [0, 80], sizes = [8, 8], strides = [1, 1]} : vector<8x96xf32> to vector<8x8xf32>
    "tpu.trace_start"() <{level = 10 : i32, message = "qd,kd->qk"}> : () -> ()
    %cst_424 = arith.constant dense<0.000000e+00> : vector<8x8xf32>
    %1228 = tpu.matmul %1225, %1226, %cst_424 {dimension_numbers = #tpu.dot_dimension_numbers<[1], [1], [0], [0], [0, 0, 1, 0], [], []>} : vector<8x8xf32>, vector<8x8xf32>, vector<8x8xf32> -> vector<8x8xf32>
    "tpu.trace_stop"() : () -> ()
    %1229 = vector.broadcast %905 : vector<1x8xf32> to vector<8x8xf32>
    %1230 = arith.addf %1228, %1229 : vector<8x8xf32>
    %cst_425 = arith.constant dense<0xFF800000> : vector<8xf32>
    %1231 = vector.multi_reduction <maximumf>, %1230, %cst_425 [1] : vector<8x8xf32> to vector<8xf32>
    %1232 = vector.shape_cast %1231 : vector<8xf32> to vector<8x1xf32>
    %1233 = vector.broadcast %1232 : vector<8x1xf32> to vector<8x8xf32>
    %1234 = arith.subf %1230, %1233 : vector<8x8xf32>
    %1235 = math.exp %1234 : vector<8x8xf32>
    %cst_426 = arith.constant dense<0.000000e+00> : vector<8xf32>
    %1236 = vector.multi_reduction <add>, %1235, %cst_426 [1] : vector<8x8xf32> to vector<8xf32>
    %1237 = vector.shape_cast %1236 : vector<8xf32> to vector<8x1xf32>
    %1238 = vector.broadcast %1237 : vector<8x1xf32> to vector<8x8xf32>
    %1239 = arith.divf %1235, %1238 : vector<8x8xf32>
    %cst_427 = arith.constant dense<0.000000e+00> : vector<8x8xf32>
    %1240 = tpu.matmul %1239, %1227, %cst_427 {dimension_numbers = #tpu.dot_dimension_numbers<[1], [0], [0], [1], [0, 0, 1, 1], [], []>} : vector<8x8xf32>, vector<8x8xf32>, vector<8x8xf32> -> vector<8x8xf32>
    %1241 = vector.extract_strided_slice %1192 {offsets = [0, 24], sizes = [8, 8], strides = [1, 1]} : vector<8x96xf32> to vector<8x8xf32>
    %1242 = vector.extract_strided_slice %1192 {offsets = [0, 56], sizes = [8, 8], strides = [1, 1]} : vector<8x96xf32> to vector<8x8xf32>
    %1243 = vector.extract_strided_slice %1192 {offsets = [0, 88], sizes = [8, 8], strides = [1, 1]} : vector<8x96xf32> to vector<8x8xf32>
    "tpu.trace_start"() <{level = 10 : i32, message = "qd,kd->qk"}> : () -> ()
    %cst_428 = arith.constant dense<0.000000e+00> : vector<8x8xf32>
    %1244 = tpu.matmul %1241, %1242, %cst_428 {dimension_numbers = #tpu.dot_dimension_numbers<[1], [1], [0], [0], [0, 0, 1, 0], [], []>} : vector<8x8xf32>, vector<8x8xf32>, vector<8x8xf32> -> vector<8x8xf32>
    "tpu.trace_stop"() : () -> ()
    %1245 = vector.broadcast %905 : vector<1x8xf32> to vector<8x8xf32>
    %1246 = arith.addf %1244, %1245 : vector<8x8xf32>
    %cst_429 = arith.constant dense<0xFF800000> : vector<8xf32>
    %1247 = vector.multi_reduction <maximumf>, %1246, %cst_429 [1] : vector<8x8xf32> to vector<8xf32>
    %1248 = vector.shape_cast %1247 : vector<8xf32> to vector<8x1xf32>
    %1249 = vector.broadcast %1248 : vector<8x1xf32> to vector<8x8xf32>
    %1250 = arith.subf %1246, %1249 : vector<8x8xf32>
    %1251 = math.exp %1250 : vector<8x8xf32>
    %cst_430 = arith.constant dense<0.000000e+00> : vector<8xf32>
    %1252 = vector.multi_reduction <add>, %1251, %cst_430 [1] : vector<8x8xf32> to vector<8xf32>
    %1253 = vector.shape_cast %1252 : vector<8xf32> to vector<8x1xf32>
    %1254 = vector.broadcast %1253 : vector<8x1xf32> to vector<8x8xf32>
    %1255 = arith.divf %1251, %1254 : vector<8x8xf32>
    %cst_431 = arith.constant dense<0.000000e+00> : vector<8x8xf32>
    %1256 = tpu.matmul %1255, %1243, %cst_431 {dimension_numbers = #tpu.dot_dimension_numbers<[1], [0], [0], [1], [0, 0, 1, 1], [], []>} : vector<8x8xf32>, vector<8x8xf32>, vector<8x8xf32> -> vector<8x8xf32>
    %c0_432 = arith.constant 0 : index
    %c0_433 = arith.constant 0 : index
    %1257 = vector.load %arg63[%c0_432, %c0_433] : memref<32x32xf32, #tpu.memory_space<vmem>>, vector<32x32xf32>
    %c0_434 = arith.constant 0 : index
    %c0_435 = arith.constant 0 : index
    %1258 = vector.load %arg64[%c0_434, %c0_435] : memref<1x32xf32, #tpu.memory_space<vmem>>, vector<1x32xf32>
    %1259 = tpu.concatenate %1143, %1208 in 0 : vector<8x8xf32>, vector<8x8xf32> -> vector<16x8xf32>
    %1260 = vector.extract_strided_slice %1257 {offsets = [0, 0], sizes = [8, 32], strides = [1, 1]} : vector<32x32xf32> to vector<8x32xf32>
    %cst_436 = arith.constant dense<0.000000e+00> : vector<16x32xf32>
    %1261 = tpu.matmul %1259, %1260, %cst_436 {dimension_numbers = #tpu.dot_dimension_numbers<[1], [0], [0], [1], [0, 0, 1, 1], [], []>} : vector<16x8xf32>, vector<8x32xf32>, vector<16x32xf32> -> vector<16x32xf32>
    %1262 = vector.broadcast %1258 : vector<1x32xf32> to vector<16x32xf32>
    %1263 = arith.addf %1262, %1261 : vector<16x32xf32>
    %1264 = tpu.concatenate %1159, %1224 in 0 : vector<8x8xf32>, vector<8x8xf32> -> vector<16x8xf32>
    %1265 = vector.extract_strided_slice %1257 {offsets = [8, 0], sizes = [8, 32], strides = [1, 1]} : vector<32x32xf32> to vector<8x32xf32>
    %cst_437 = arith.constant dense<0.000000e+00> : vector<16x32xf32>
    %1266 = tpu.matmul %1264, %1265, %cst_437 {dimension_numbers = #tpu.dot_dimension_numbers<[1], [0], [0], [1], [0, 0, 1, 1], [], []>} : vector<16x8xf32>, vector<8x32xf32>, vector<16x32xf32> -> vector<16x32xf32>
    %1267 = arith.addf %1263, %1266 : vector<16x32xf32>
    %1268 = tpu.concatenate %1175, %1240 in 0 : vector<8x8xf32>, vector<8x8xf32> -> vector<16x8xf32>
    %1269 = vector.extract_strided_slice %1257 {offsets = [16, 0], sizes = [8, 32], strides = [1, 1]} : vector<32x32xf32> to vector<8x32xf32>
    %cst_438 = arith.constant dense<0.000000e+00> : vector<16x32xf32>
    %1270 = tpu.matmul %1268, %1269, %cst_438 {dimension_numbers = #tpu.dot_dimension_numbers<[1], [0], [0], [1], [0, 0, 1, 1], [], []>} : vector<16x8xf32>, vector<8x32xf32>, vector<16x32xf32> -> vector<16x32xf32>
    %1271 = arith.addf %1267, %1270 : vector<16x32xf32>
    %1272 = tpu.concatenate %1191, %1256 in 0 : vector<8x8xf32>, vector<8x8xf32> -> vector<16x8xf32>
    %1273 = vector.extract_strided_slice %1257 {offsets = [24, 0], sizes = [8, 32], strides = [1, 1]} : vector<32x32xf32> to vector<8x32xf32>
    %cst_439 = arith.constant dense<0.000000e+00> : vector<16x32xf32>
    %1274 = tpu.matmul %1272, %1273, %cst_439 {dimension_numbers = #tpu.dot_dimension_numbers<[1], [0], [0], [1], [0, 0, 1, 1], [], []>} : vector<16x8xf32>, vector<8x32xf32>, vector<16x32xf32> -> vector<16x32xf32>
    %1275 = arith.addf %1271, %1274 : vector<16x32xf32>
    %1276 = arith.addf %1121, %1275 : vector<16x32xf32>
    %cst_440 = arith.constant dense<0.000000e+00> : vector<16xf32>
    %1277 = vector.multi_reduction <add>, %1276, %cst_440 [1] : vector<16x32xf32> to vector<16xf32>
    %1278 = vector.shape_cast %1277 : vector<16xf32> to vector<16x1xf32>
    %cst_441 = arith.constant 3.200000e+01 : f32
    %1279 = vector.broadcast %cst_441 : f32 to vector<16x1xf32>
    %1280 = arith.divf %1278, %1279 : vector<16x1xf32>
    %1281 = vector.broadcast %1280 : vector<16x1xf32> to vector<16x32xf32>
    %1282 = arith.subf %1276, %1281 : vector<16x32xf32>
    %1283 = arith.mulf %1282, %1282 : vector<16x32xf32>
    %cst_442 = arith.constant dense<0.000000e+00> : vector<16xf32>
    %1284 = vector.multi_reduction <add>, %1283, %cst_442 [1] : vector<16x32xf32> to vector<16xf32>
    %1285 = vector.shape_cast %1284 : vector<16xf32> to vector<16x1xf32>
    %cst_443 = arith.constant 3.200000e+01 : f32
    %1286 = vector.broadcast %cst_443 : f32 to vector<16x1xf32>
    %1287 = arith.divf %1285, %1286 : vector<16x1xf32>
    %1288 = vector.broadcast %1280 : vector<16x1xf32> to vector<16x32xf32>
    %1289 = arith.subf %1276, %1288 : vector<16x32xf32>
    %cst_444 = arith.constant 9.99999974E-6 : f32
    %1290 = vector.broadcast %cst_444 : f32 to vector<16x1xf32>
    %1291 = arith.addf %1287, %1290 : vector<16x1xf32>
    %1292 = math.rsqrt %1291 : vector<16x1xf32>
    %1293 = vector.broadcast %1292 : vector<16x1xf32> to vector<16x32xf32>
    %1294 = arith.mulf %1289, %1293 : vector<16x32xf32>
    %c0_445 = arith.constant 0 : index
    %c0_446 = arith.constant 0 : index
    %1295 = vector.load %arg65[%c0_445, %c0_446] : memref<1x32xf32, #tpu.memory_space<vmem>>, vector<1x32xf32>
    %1296 = vector.broadcast %1295 : vector<1x32xf32> to vector<16x32xf32>
    %1297 = arith.mulf %1294, %1296 : vector<16x32xf32>
    %c0_447 = arith.constant 0 : index
    %c0_448 = arith.constant 0 : index
    %1298 = vector.load %arg66[%c0_447, %c0_448] : memref<1x32xf32, #tpu.memory_space<vmem>>, vector<1x32xf32>
    %1299 = vector.broadcast %1298 : vector<1x32xf32> to vector<16x32xf32>
    %1300 = arith.addf %1297, %1299 : vector<16x32xf32>
    %c0_449 = arith.constant 0 : index
    %c0_450 = arith.constant 0 : index
    %1301 = vector.load %arg67[%c0_449, %c0_450] : memref<32x128xf32, #tpu.memory_space<vmem>>, vector<32x128xf32>
    %cst_451 = arith.constant dense<0.000000e+00> : vector<16x128xf32>
    %1302 = tpu.matmul %1300, %1301, %cst_451 {dimension_numbers = #tpu.dot_dimension_numbers<[1], [0], [0], [1], [0, 0, 1, 1], [], []>} : vector<16x32xf32>, vector<32x128xf32>, vector<16x128xf32> -> vector<16x128xf32>
    %c0_452 = arith.constant 0 : index
    %c0_453 = arith.constant 0 : index
    %1303 = vector.load %arg68[%c0_452, %c0_453] : memref<1x128xf32, #tpu.memory_space<vmem>>, vector<1x128xf32>
    %1304 = vector.broadcast %1303 : vector<1x128xf32> to vector<16x128xf32>
    %1305 = arith.addf %1302, %1304 : vector<16x128xf32>
    %cst_454 = arith.constant 0.000000e+00 : f32
    %1306 = vector.broadcast %cst_454 : f32 to vector<16x128xf32>
    %1307 = arith.maximumf %1305, %1306 : vector<16x128xf32>
    %c0_455 = arith.constant 0 : index
    %c0_456 = arith.constant 0 : index
    %1308 = vector.load %arg69[%c0_455, %c0_456] : memref<128x32xf32, #tpu.memory_space<vmem>>, vector<128x32xf32>
    %cst_457 = arith.constant dense<0.000000e+00> : vector<16x32xf32>
    %1309 = tpu.matmul %1307, %1308, %cst_457 {dimension_numbers = #tpu.dot_dimension_numbers<[1], [0], [0], [1], [0, 0, 1, 1], [], []>} : vector<16x128xf32>, vector<128x32xf32>, vector<16x32xf32> -> vector<16x32xf32>
    %c0_458 = arith.constant 0 : index
    %c0_459 = arith.constant 0 : index
    %1310 = vector.load %arg70[%c0_458, %c0_459] : memref<1x32xf32, #tpu.memory_space<vmem>>, vector<1x32xf32>
    %1311 = vector.broadcast %1310 : vector<1x32xf32> to vector<16x32xf32>
    %1312 = arith.addf %1309, %1311 : vector<16x32xf32>
    %1313 = arith.addf %1300, %1312 : vector<16x32xf32>
    %cst_460 = arith.constant dense<0.000000e+00> : vector<16xf32>
    %1314 = vector.multi_reduction <add>, %1313, %cst_460 [1] : vector<16x32xf32> to vector<16xf32>
    %1315 = vector.shape_cast %1314 : vector<16xf32> to vector<16x1xf32>
    %cst_461 = arith.constant 3.200000e+01 : f32
    %1316 = vector.broadcast %cst_461 : f32 to vector<16x1xf32>
    %1317 = arith.divf %1315, %1316 : vector<16x1xf32>
    %1318 = vector.broadcast %1317 : vector<16x1xf32> to vector<16x32xf32>
    %1319 = arith.subf %1313, %1318 : vector<16x32xf32>
    %1320 = arith.mulf %1319, %1319 : vector<16x32xf32>
    %cst_462 = arith.constant dense<0.000000e+00> : vector<16xf32>
    %1321 = vector.multi_reduction <add>, %1320, %cst_462 [1] : vector<16x32xf32> to vector<16xf32>
    %1322 = vector.shape_cast %1321 : vector<16xf32> to vector<16x1xf32>
    %cst_463 = arith.constant 3.200000e+01 : f32
    %1323 = vector.broadcast %cst_463 : f32 to vector<16x1xf32>
    %1324 = arith.divf %1322, %1323 : vector<16x1xf32>
    %1325 = vector.broadcast %1317 : vector<16x1xf32> to vector<16x32xf32>
    %1326 = arith.subf %1313, %1325 : vector<16x32xf32>
    %cst_464 = arith.constant 9.99999974E-6 : f32
    %1327 = vector.broadcast %cst_464 : f32 to vector<16x1xf32>
    %1328 = arith.addf %1324, %1327 : vector<16x1xf32>
    %1329 = math.rsqrt %1328 : vector<16x1xf32>
    %1330 = vector.broadcast %1329 : vector<16x1xf32> to vector<16x32xf32>
    %1331 = arith.mulf %1326, %1330 : vector<16x32xf32>
    %c0_465 = arith.constant 0 : index
    %c0_466 = arith.constant 0 : index
    %1332 = vector.load %arg71[%c0_465, %c0_466] : memref<1x32xf32, #tpu.memory_space<vmem>>, vector<1x32xf32>
    %1333 = vector.broadcast %1332 : vector<1x32xf32> to vector<16x32xf32>
    %1334 = arith.mulf %1331, %1333 : vector<16x32xf32>
    %c0_467 = arith.constant 0 : index
    %c0_468 = arith.constant 0 : index
    %1335 = vector.load %arg72[%c0_467, %c0_468] : memref<1x32xf32, #tpu.memory_space<vmem>>, vector<1x32xf32>
    %1336 = vector.broadcast %1335 : vector<1x32xf32> to vector<16x32xf32>
    %1337 = arith.addf %1334, %1336 : vector<16x32xf32>
    %c0_469 = arith.constant 0 : index
    %c0_470 = arith.constant 0 : index
    %1338 = vector.load %arg85[%c0_469, %c0_470] : memref<16x32xf32, #tpu.memory_space<vmem>>, vector<16x32xf32>
    tpu.vector_store %arg85[%c0_469, %c0_470], %1337 {strides = array<i32>} : memref<16x32xf32, #tpu.memory_space<vmem>>, vector<16x32xf32>,
    %cst_471 = arith.constant dense<0.000000e+00> : vector<2x32xf32>
    %1339 = tpu.matmul %371, %1337, %cst_471 {dimension_numbers = #tpu.dot_dimension_numbers<[1], [0], [0], [1], [0, 0, 1, 1], [], []>} : vector<2x16xf32>, vector<16x32xf32>, vector<2x32xf32> -> vector<2x32xf32>
    %c0_472 = arith.constant 0 : index
    %c0_473 = arith.constant 0 : index
    %1340 = vector.load %arg73[%c0_472, %c0_473] : memref<32x10xf32, #tpu.memory_space<vmem>>, vector<32x10xf32>
    %cst_474 = arith.constant dense<0.000000e+00> : vector<2x10xf32>
    %1341 = tpu.matmul %1339, %1340, %cst_474 {dimension_numbers = #tpu.dot_dimension_numbers<[1], [0], [0], [1], [0, 0, 1, 1], [], []>} : vector<2x32xf32>, vector<32x10xf32>, vector<2x10xf32> -> vector<2x10xf32>
    %c0_475 = arith.constant 0 : index
    %c0_476 = arith.constant 0 : index
    %1342 = vector.load %arg74[%c0_475, %c0_476] : memref<1x10xf32, #tpu.memory_space<vmem>>, vector<1x10xf32>
    %1343 = vector.broadcast %1342 : vector<1x10xf32> to vector<2x10xf32>
    %1344 = arith.addf %1341, %1343 : vector<2x10xf32>
    %c0_477 = arith.constant 0 : index
    %c0_478 = arith.constant 0 : index
    %1345 = vector.load %arg79[%c0_477, %c0_478] : memref<2x10xf32, #tpu.memory_space<vmem>>, vector<2x10xf32>
    tpu.vector_store %arg79[%c0_477, %c0_478], %1344 {strides = array<i32>} : memref<2x10xf32, #tpu.memory_space<vmem>>, vector<2x10xf32>,
    %c0_479 = arith.constant 0 : index
    %c0_480 = arith.constant 0 : index
    %1346 = vector.load %arg75[%c0_479, %c0_480] : memref<32x10xf32, #tpu.memory_space<vmem>>, vector<32x10xf32>
    %cst_481 = arith.constant dense<0.000000e+00> : vector<2x10xf32>
    %1347 = tpu.matmul %1339, %1346, %cst_481 {dimension_numbers = #tpu.dot_dimension_numbers<[1], [0], [0], [1], [0, 0, 1, 1], [], []>} : vector<2x32xf32>, vector<32x10xf32>, vector<2x10xf32> -> vector<2x10xf32>
    %c0_482 = arith.constant 0 : index
    %c0_483 = arith.constant 0 : index
    %1348 = vector.load %arg76[%c0_482, %c0_483] : memref<1x10xf32, #tpu.memory_space<vmem>>, vector<1x10xf32>
    %1349 = vector.broadcast %1348 : vector<1x10xf32> to vector<2x10xf32>
    %1350 = arith.addf %1347, %1349 : vector<2x10xf32>
    %c0_484 = arith.constant 0 : index
    %c0_485 = arith.constant 0 : index
    %1351 = vector.load %arg81[%c0_484, %c0_485] : memref<2x10xf32, #tpu.memory_space<vmem>>, vector<2x10xf32>
    tpu.vector_store %arg81[%c0_484, %c0_485], %1350 {strides = array<i32>} : memref<2x10xf32, #tpu.memory_space<vmem>>, vector<2x10xf32>,
    return
  }
}

</mosaic_0001>

<bundles_post_ra>
// kernel: custom-call.8
= control target key start
LH: loop header
LB: loop body
LE: loop exit
PB: predicated region body
PF: predicated region fallthrough
CT: control target
= control target key end

     0   :  { %s6_s0 = inlined_call_operand.vmem [shape: u32[2,64], index: 0, kind: output, shape index: {}]  }

// kernel: squeeze.14
= control target key start
LH: loop header
LB: loop body
LE: loop exit
PB: predicated region body
PF: predicated region fallthrough
CT: control target
= control target key end

     0   :  { %vm7_vm0 = vcmask 523264   ;;  %s39_s0 = inlined_call_operand.vmem [shape: f32[128], index: 0, kind: input, shape index: {}]   ;;  %s40_s1 = inlined_call_operand.vmem [shape: f32[2,64], index: 1, kind: output, shape index: {}]  }
   0x1   :  { %v4_v0 = vld [vmem:[%s39_s0] sm:$0x1]  ;;  %s22_s0 = smov 64  }
   0x2   :  { %5 = vst [vmem:[#allocation1] sm:$0x1] %v4_v0 }
   0x9   :  { %v9_v1 = vld [vmem:[#allocation1] sm:$0x1]  }
   0xa   :  { %v6_v2 = vld [vmem:[#allocation1] sm:$0x1]   ;;  %10 = vrot.lane.b32.xlu0 %v9_v1, %s22_s0 }
   0xb   :  { %8 = vst.msk [vmem:[#allocation0] sm:$0x1] %vm7_vm0, %v6_v2  }
  0x7c   :  { %v11_v3 = vpop.permute.xlu0 %10  }
  0x7d   :  { %14 = vst.msk [vmem:[#allocation0 + $0x1] sm:$0x1] %vm7_vm0, %v11_v3  }
  0x84   :  { %v18_v4 = vld [vmem:[#allocation0] sm:$0x3] }
  0x85   :  { %20 = vst [vmem:[%s40_s1] sm:$0x3] %v18_v4 }

// kernel: tile.8
= control target key start
LH: loop header
LB: loop body
LE: loop exit
PB: predicated region body
PF: predicated region fallthrough
CT: control target
= control target key end

     0   :  { %s28_s0 = inlined_call_operand.vmem [shape: f32[8], index: 0, kind: input, shape index: {}]   ;;  %s29_s1 = inlined_call_operand.vmem [shape: f32[9,8], index: 1, kind: output, shape index: {}]  }
   0x1   :  { %v4_v0 = vld [vmem:[%s28_s0] ss:$0 sm:$0xff] }
   0x2   :  { %5 = vst [vmem:[%s29_s1] sm:$0xff] %v4_v0  ;;  %8 = vst [vmem:[%s29_s1 + $0x8] sm:$0xff] %v4_v0 }

// kernel: tile.9
= control target key start
LH: loop header
LB: loop body
LE: loop exit
PB: predicated region body
PF: predicated region fallthrough
CT: control target
= control target key end

     0   :  { %s75_s10 = smov 64   ;;  %s76_s11 = smov 48   ;;  %vm3_vm0 = vcmask 64512   ;;  %vm9_vm1 = vcmask 589312   ;;  %vm15_vm2 = vcmask 523712   ;;  %vm21_vm3 = vcmask 458112   ;;  %s123_s0 = inlined_call_operand.vmem [shape: f32[9,8], index: 0, kind: input, shape index: {}]   ;;  %s124_s1 = inlined_call_operand.vmem [shape: f32[1,72], index: 1, kind: output, shape index: {}]  }
   0x1   :  { %v59_v0 = vld [vmem:[%s123_s0 + $0x8] sm:$0x1]   ;;  %v61_v1 = vld [vmem:[%s123_s0 + $0x6] sm:$0x1]   ;;  %v60_v2 = vld [vmem:[%s123_s0 + $0x7] sm:$0x1]  }
   0x2   :  { %7 = vrot.lane.b32.xlu0 %v59_v0, %s75_s10  ;;  %19 = vrot.lane.b32.xlu1 %v61_v1, %s76_s11  ;;  %v62_v3 = vld [vmem:[%s123_s0 + $0x5] sm:$0x1]   ;;  %v2_v4 = vld [vmem:[%s123_s0] sm:$0x1]   ;;  %s77_s18 = smov 56   ;;  %s78_s19 = smov 40  }
   0x3   :  { %4 = vst.msk [vmem:[#allocation0] sm:$0x1] %vm3_vm0, %v2_v4   ;;  %v63_v5 = vld [vmem:[%s123_s0 + $0x4] sm:$0x1]   ;;  %v64_v6 = vld [vmem:[%s123_s0 + $0x3] sm:$0x1]  }
   0x4   :  { %s79_s24 = smov 32   ;;  %s80_s25 = smov 24   ;;  %v65_v7 = vld [vmem:[%s123_s0 + $0x2] sm:$0x1]   ;;  %v66_v8 = vld [vmem:[%s123_s0 + $0x1] sm:$0x1]  }
   0x5   :  { %s81_s0 = smov 16   ;;  %s82_s30 = smov 8   ;;  %vm27_vm4 = vcmask 392512   ;;  %vm33_vm5 = vcmask 326912   ;;  %vm39_vm6 = vcmask 261312   ;;  %vm45_vm7 = vcmask 195712  }
   0x6   :  { %13 = vrot.lane.b32.xlu0 %v60_v2, %s77_s18  ;;  %25 = vrot.lane.b32.xlu1 %v62_v3, %s78_s19  ;;  %vm51_vm8 = vcmask 130112  }
   0xa   :  { %31 = vrot.lane.b32.xlu0 %v63_v5, %s79_s24  ;;  %37 = vrot.lane.b32.xlu1 %v64_v6, %s80_s25 }
   0xe   :  { %43 = vrot.lane.b32.xlu0 %v65_v7, %s81_s0  ;;  %49 = vrot.lane.b32.xlu1 %v66_v8, %s82_s30 }
  0x74   :  { %v8_v9 = vpop.permute.xlu0 %7   ;;  %v20_v10 = vpop.permute.xlu1 %19  }
  0x75   :  { %10 = vst.msk [vmem:[#allocation0] sm:$0x1] %vm9_vm1, %v8_v9  }
  0x78   :  { %v14_v11 = vpop.permute.xlu0 %13   ;;  %v26_v12 = vpop.permute.xlu1 %25  }
  0x79   :  { %16 = vst.msk [vmem:[#allocation0] sm:$0x1] %vm15_vm2, %v14_v11  }
  0x7a   :  { %22 = vst.msk [vmem:[#allocation0] sm:$0x1] %vm21_vm3, %v20_v10  }
  0x7b   :  { %28 = vst.msk [vmem:[#allocation0] sm:$0x1] %vm27_vm4, %v26_v12  }
  0x7c   :  { %v32_v13 = vpop.permute.xlu0 %31   ;;  %v38_v14 = vpop.permute.xlu1 %37  }
  0x7d   :  { %34 = vst.msk [vmem:[#allocation0] sm:$0x1] %vm33_vm5, %v32_v13  }
  0x7e   :  { %40 = vst.msk [vmem:[#allocation0] sm:$0x1] %vm39_vm6, %v38_v14  }
  0x80   :  { %v44_v15 = vpop.permute.xlu0 %43   ;;  %v50_v16 = vpop.permute.xlu1 %49  }
  0x81   :  { %46 = vst.msk [vmem:[#allocation0] sm:$0x1] %vm45_vm7, %v44_v15  }
  0x82   :  { %52 = vst.msk [vmem:[#allocation0] sm:$0x1] %vm51_vm8, %v50_v16  }
  0x89   :  { %v56_v17 = vld [vmem:[#allocation0] sm:$0x1] }
  0x8a   :  { %58 = vst [vmem:[%s124_s1] sm:$0x1] %v56_v17 }

// kernel: forward.1
= control target key start
LH: loop header
LB: loop body
LE: loop exit
PB: predicated region body
PF: predicated region fallthrough
CT: control target
= control target key end

     0   :  { %s13329_s6 = smov 1   ;;  %s13330_s10 = smov 2   ;;  %s15567_s0 = inlined_call_operand.smem [shape: u32[86], index: -1, kind: input, shape index: {}] }
   0x1   :  { %s13465_s5 = sld [smem:[%s15567_s0]]   ;;  %s13331_s14 = smov 3  }
   0x2   :  { %s13470_s9 = sld [smem:[%s15567_s0 + %s13329_s6]]   ;;  %s13332_s18 = smov 4  }
   0x3   :  { %s13475_s13 = sld [smem:[%s15567_s0 + %s13330_s10]]   ;;  %s13333_s22 = smov 5  }
   0x4   :  { %s13480_s17 = sld [smem:[%s15567_s0 + %s13331_s14]]   ;;  %s13334_s26 = smov 6  }
   0x5   :  { %s13485_s21 = sld [smem:[%s15567_s0 + %s13332_s18]]   ;;  %s13335_s30 = smov 7  }
   0x6   :  { %s13490_s25 = sld [smem:[%s15567_s0 + %s13333_s22]]   ;;  %s13336_s4 = smov 8  }
   0x7   :  { %15630 = sst [smem:[#allocation53_spill]] %s13465_s5  ;;  %s13337_s10 = smov 9  }
   0x8   :  { %15631 = sst [smem:[#allocation54_spill]] %s13470_s9  ;;  %s13338_s15 = smov 10  }
   0x9   :  { %15632 = sst [smem:[#allocation55_spill]] %s13475_s13  ;;  %s13339_s20 = smov 11  }
   0xa   :  { %15633 = sst [smem:[#allocation56_spill]] %s13480_s17  ;;  %s13341_s1 = smov 13  }
   0xb   :  { %15634 = sst [smem:[#allocation57_spill]] %s13485_s21  ;;  %s13342_s7 = smov 14  }
   0xc   :  { %15635 = sst [smem:[#allocation58_spill]] %s13490_s25  ;;  %s13344_s22 = smov 16  }
   0xd   :  { %s13495_s29 = sld [smem:[%s15567_s0 + %s13334_s26]]   ;;  %s13340_s26 = smov 12  }
   0xe   :  { %s13500_s3 = sld [smem:[%s15567_s0 + %s13335_s30]]   ;;  %s13345_s28 = smov 17  }
   0xf   :  { %s13505_s8 = sld [smem:[%s15567_s0 + %s13336_s4]]  }
  0x10   :  { %s13510_s14 = sld [smem:[%s15567_s0 + %s13337_s10]]  }
  0x11   :  { %s13515_s19 = sld [smem:[%s15567_s0 + %s13338_s15]]   ;;  %s13343_s15 = smov 15  }
  0x12   :  { %s13520_s24 = sld [smem:[%s15567_s0 + %s13339_s20]]  }
  0x13   :  { %15636 = sst [smem:[#allocation59_spill]] %s13495_s29 }
  0x14   :  { %15637 = sst [smem:[#allocation60_spill]] %s13500_s3 }
  0x15   :  { %15638 = sst [smem:[#allocation61_spill]] %s13505_s8 }
  0x16   :  { %15639 = sst [smem:[#allocation62_spill]] %s13510_s14 }
  0x17   :  { %15640 = sst [smem:[#allocation63_spill]] %s13515_s19 }
  0x18   :  { %15641 = sst [smem:[#allocation64_spill]] %s13520_s24 }
  0x19   :  { %s13525_s30 = sld [smem:[%s15567_s0 + %s13340_s26]]  }
  0x1a   :  { %s13530_s6 = sld [smem:[%s15567_s0 + %s13341_s1]]  }
  0x1b   :  { %s13535_s12 = sld [smem:[%s15567_s0 + %s13342_s7]]   ;;  %s13346_s7 = smov 18  }
  0x1c   :  { %s13540_s20 = sld [smem:[%s15567_s0 + %s13343_s15]]   ;;  %s13347_s15 = smov 19  }
  0x1d   :  { %s13545_s27 = sld [smem:[%s15567_s0 + %s13344_s22]]   ;;  %s13348_s22 = smov 20  }
  0x1e   :  { %s13550_s4 = sld [smem:[%s15567_s0 + %s13345_s28]]   ;;  %s13349_s28 = smov 21  }
  0x1f   :  { %15642 = sst [smem:[#allocation65_spill]] %s13525_s30 }
  0x20   :  { %15643 = sst [smem:[#allocation66_spill]] %s13530_s6 }
  0x21   :  { %15644 = sst [smem:[#allocation67_spill]] %s13535_s12 }
  0x22   :  { %15645 = sst [smem:[#allocation68_spill]] %s13540_s20 }
  0x23   :  { %15646 = sst [smem:[#allocation69_spill]] %s13545_s27 }
  0x24   :  { %15647 = sst [smem:[#allocation70_spill]] %s13550_s4 }
  0x25   :  { %s13555_s30 = sld [smem:[%s15567_s0 + %s13346_s7]]   ;;  %s13350_s7 = smov 22  }
  0x26   :  { %s13560_s20 = sld [smem:[%s15567_s0 + %s13347_s15]]   ;;  %s13351_s15 = smov 23  }
  0x27   :  { %s13565_s24 = sld [smem:[%s15567_s0 + %s13348_s22]]   ;;  %s13352_s22 = smov 24  }
  0x28   :  { %s13570_s12 = sld [smem:[%s15567_s0 + %s13349_s28]]   ;;  %s13353_s28 = smov 25  }
  0x29   :  { %s13575_s6 = sld [smem:[%s15567_s0 + %s13350_s7]]   ;;  %s13354_s7 = smov 26  }
  0x2a   :  { %s13580_s13 = sld [smem:[%s15567_s0 + %s13351_s15]]   ;;  %s13355_s15 = smov 27  }
  0x2b   :  { %15648 = sst [smem:[#allocation71_spill]] %s13555_s30 }
  0x2c   :  { %15649 = sst [smem:[#allocation72_spill]] %s13560_s20 }
  0x2d   :  { %15650 = sst [smem:[#allocation73_spill]] %s13565_s24 }
  0x2e   :  { %15651 = sst [smem:[#allocation74_spill]] %s13570_s12 }
  0x2f   :  { %15652 = sst [smem:[#allocation75_spill]] %s13575_s6 }
  0x30   :  { %15653 = sst [smem:[#allocation76_spill]] %s13580_s13 }
  0x31   :  { %s13585_s24 = sld [smem:[%s15567_s0 + %s13352_s22]]   ;;  %s13356_s22 = smov 28  }
  0x32   :  { %s13590_s12 = sld [smem:[%s15567_s0 + %s13353_s28]]   ;;  %s13357_s28 = smov 29  }
  0x33   :  { %s13595_s6 = sld [smem:[%s15567_s0 + %s13354_s7]]   ;;  %s13358_s7 = smov 30  }
  0x34   :  { %s13600_s13 = sld [smem:[%s15567_s0 + %s13355_s15]]   ;;  %s13359_s15 = smov 31  }
  0x35   :  { %s13620_s30 = sld [smem:[%s15567_s0 + %s13359_s15]]   ;;  %s13363_s15 = smov 35  }
  0x37   :  { %15654 = sst [smem:[#allocation77_spill]] %s13585_s24 }
  0x38   :  { %15655 = sst [smem:[#allocation78_spill]] %s13590_s12 }
  0x39   :  { %15656 = sst [smem:[#allocation79_spill]] %s13595_s6 }
  0x3a   :  { %15657 = sst [smem:[#allocation80_spill]] %s13600_s13 }
  0x3b   :  { %s13605_s24 = sld [smem:[%s15567_s0 + %s13356_s22]]   ;;  %s13360_s22 = smov 32  }
  0x3c   :  { %s13610_s12 = sld [smem:[%s15567_s0 + %s13357_s28]]   ;;  %s13361_s28 = smov 33  }
  0x3d   :  { %s13615_s6 = sld [smem:[%s15567_s0 + %s13358_s7]]   ;;  %s13362_s7 = smov 34  }
  0x3e   :  { %15661 = sst [smem:[#allocation84_spill]] %s13620_s30 }
  0x3f   :  { %s13640_s30 = sld [smem:[%s15567_s0 + %s13363_s15]]   ;;  %s13367_s15 = smov 39  }
  0x41   :  { %15658 = sst [smem:[#allocation81_spill]] %s13605_s24 }
  0x42   :  { %15659 = sst [smem:[#allocation82_spill]] %s13610_s12 }
  0x43   :  { %15660 = sst [smem:[#allocation83_spill]] %s13615_s6 }
  0x44   :  { %s13625_s24 = sld [smem:[%s15567_s0 + %s13360_s22]]   ;;  %s13364_s22 = smov 36  }
  0x45   :  { %s13630_s12 = sld [smem:[%s15567_s0 + %s13361_s28]]   ;;  %s13365_s28 = smov 37  }
  0x46   :  { %s13635_s6 = sld [smem:[%s15567_s0 + %s13362_s7]]   ;;  %s13366_s7 = smov 38  }
  0x47   :  { %15665 = sst [smem:[#allocation88_spill]] %s13640_s30 }
  0x48   :  { %s13660_s30 = sld [smem:[%s15567_s0 + %s13367_s15]]   ;;  %s13371_s15 = smov 43  }
  0x4a   :  { %15662 = sst [smem:[#allocation85_spill]] %s13625_s24 }
  0x4b   :  { %15663 = sst [smem:[#allocation86_spill]] %s13630_s12 }
  0x4c   :  { %15664 = sst [smem:[#allocation87_spill]] %s13635_s6 }
  0x4d   :  { %s13645_s24 = sld [smem:[%s15567_s0 + %s13364_s22]]   ;;  %s13368_s22 = smov 40  }
  0x4e   :  { %s13650_s12 = sld [smem:[%s15567_s0 + %s13365_s28]]   ;;  %s13369_s28 = smov 41  }
  0x4f   :  { %s13655_s6 = sld [smem:[%s15567_s0 + %s13366_s7]]   ;;  %s13370_s7 = smov 42  }
  0x50   :  { %15669 = sst [smem:[#allocation92_spill]] %s13660_s30 }
  0x51   :  { %s13680_s30 = sld [smem:[%s15567_s0 + %s13371_s15]]   ;;  %s13375_s15 = smov 47  }
  0x53   :  { %15666 = sst [smem:[#allocation89_spill]] %s13645_s24 }
  0x54   :  { %15667 = sst [smem:[#allocation90_spill]] %s13650_s12 }
  0x55   :  { %15668 = sst [smem:[#allocation91_spill]] %s13655_s6 }
  0x56   :  { %s13665_s24 = sld [smem:[%s15567_s0 + %s13368_s22]]   ;;  %s13372_s22 = smov 44  }
  0x57   :  { %s13670_s12 = sld [smem:[%s15567_s0 + %s13369_s28]]   ;;  %s13373_s28 = smov 45  }
  0x58   :  { %s13675_s6 = sld [smem:[%s15567_s0 + %s13370_s7]]   ;;  %s13374_s7 = smov 46  }
  0x59   :  { %15673 = sst [smem:[#allocation96_spill]] %s13680_s30 }
  0x5a   :  { %s13700_s30 = sld [smem:[%s15567_s0 + %s13375_s15]]   ;;  %s13379_s15 = smov 51  }
  0x5c   :  { %15670 = sst [smem:[#allocation93_spill]] %s13665_s24 }
  0x5d   :  { %15671 = sst [smem:[#allocation94_spill]] %s13670_s12 }
  0x5e   :  { %15672 = sst [smem:[#allocation95_spill]] %s13675_s6 }
  0x5f   :  { %s13685_s24 = sld [smem:[%s15567_s0 + %s13372_s22]]   ;;  %s13376_s22 = smov 48  }
  0x60   :  { %s13690_s12 = sld [smem:[%s15567_s0 + %s13373_s28]]   ;;  %s13377_s28 = smov 49  }
  0x61   :  { %s13695_s6 = sld [smem:[%s15567_s0 + %s13374_s7]]   ;;  %s13378_s7 = smov 50  }
  0x62   :  { %15677 = sst [smem:[#allocation100_spill]] %s13700_s30 }
  0x63   :  { %s13720_s30 = sld [smem:[%s15567_s0 + %s13379_s15]]   ;;  %s13383_s15 = smov 55  }
  0x65   :  { %15674 = sst [smem:[#allocation97_spill]] %s13685_s24 }
  0x66   :  { %15675 = sst [smem:[#allocation98_spill]] %s13690_s12 }
  0x67   :  { %15676 = sst [smem:[#allocation99_spill]] %s13695_s6 }
  0x68   :  { %s13705_s24 = sld [smem:[%s15567_s0 + %s13376_s22]]   ;;  %s13380_s22 = smov 52  }
  0x69   :  { %s13710_s12 = sld [smem:[%s15567_s0 + %s13377_s28]]   ;;  %s13381_s28 = smov 53  }
  0x6a   :  { %s13715_s6 = sld [smem:[%s15567_s0 + %s13378_s7]]   ;;  %s13382_s7 = smov 54  }
  0x6b   :  { %15681 = sst [smem:[#allocation104_spill]] %s13720_s30 }
  0x6c   :  { %s13740_s30 = sld [smem:[%s15567_s0 + %s13383_s15]]   ;;  %s13387_s15 = smov 59  }
  0x6e   :  { %15678 = sst [smem:[#allocation101_spill]] %s13705_s24 }
  0x6f   :  { %15679 = sst [smem:[#allocation102_spill]] %s13710_s12 }
  0x70   :  { %15680 = sst [smem:[#allocation103_spill]] %s13715_s6 }
  0x71   :  { %s13725_s24 = sld [smem:[%s15567_s0 + %s13380_s22]]   ;;  %s13384_s22 = smov 56  }
  0x72   :  { %s13730_s12 = sld [smem:[%s15567_s0 + %s13381_s28]]   ;;  %s13385_s28 = smov 57  }
  0x73   :  { %s13735_s6 = sld [smem:[%s15567_s0 + %s13382_s7]]   ;;  %s13386_s7 = smov 58  }
  0x74   :  { %15684 = sst [smem:[#allocation107_spill]] %s13740_s30 }
  0x75   :  { %s13755_s13 = sld [smem:[%s15567_s0 + %s13386_s7]]   ;;  %s13390_s7 = smov 62  }
  0x76   :  { %s13760_s30 = sld [smem:[%s15567_s0 + %s13387_s15]]   ;;  %s13391_s15 = smov 63  }
  0x77   :  { %15682 = sst [smem:[#allocation105_spill]] %s13725_s24 }
  0x78   :  { %15683 = sst [smem:[#allocation106_spill]] %s13730_s12 }
  0x79   :  { %s13745_s24 = sld [smem:[%s15567_s0 + %s13384_s22]]   ;;  %s13388_s22 = smov 60  }
  0x7a   :  { %s13750_s12 = sld [smem:[%s15567_s0 + %s13385_s28]]   ;;  %s13389_s28 = smov 61  }
  0x7b   :  { %s13765_s4 = sld [smem:[%s15567_s0 + %s13388_s22]]   ;;  %s13392_s22 = smov 64  }
  0x7c   :  { %s13775_s29 = sld [smem:[%s15567_s0 + %s13390_s7]]   ;;  %s13394_s7 = smov 66  }
  0x7d   :  { %s13780_s20 = sld [smem:[%s15567_s0 + %s13391_s15]]   ;;  %s13395_s15 = smov 67  }
  0x7e   :  { %s13785_s19 = sld [smem:[%s15567_s0 + %s13392_s22]]   ;;  %s13396_s22 = smov 68  }
  0x7f   :  { %s13805_s14 = sld [smem:[%s15567_s0 + %s13396_s22]]   ;;  %s13400_s22 = smov 72  }
  0x80   :  { %15685 = sst [smem:[#allocation108_spill]] %s13750_s12 }
  0x81   :  { %s13770_s12 = sld [smem:[%s15567_s0 + %s13389_s28]]   ;;  %s13393_s28 = smov 65  }
  0x82   :  { %15687 = sst [smem:[#allocation110_spill]] %s13775_s29 }
  0x83   :  { %15688 = sst [smem:[#allocation111_spill]] %s13780_s20 }
  0x84   :  { %s13795_s29 = sld [smem:[%s15567_s0 + %s13394_s7]]   ;;  %s13398_s7 = smov 70  }
  0x85   :  { %s13800_s20 = sld [smem:[%s15567_s0 + %s13395_s15]]   ;;  %s13399_s15 = smov 71  }
  0x86   :  { %s13815_s8 = sld [smem:[%s15567_s0 + %s13398_s7]]   ;;  %s13402_s7 = smov 74  }
  0x87   :  { %15686 = sst [smem:[#allocation109_spill]] %s13770_s12 }
  0x88   :  { %s13790_s12 = sld [smem:[%s15567_s0 + %s13393_s28]]   ;;  %s13397_s28 = smov 69  }
  0x89   :  { %s13810_s27 = sld [smem:[%s15567_s0 + %s13397_s28]]   ;;  %s13401_s28 = smov 73  }
  0x8a   :  { %s13825_s17 = sld [smem:[%s15567_s0 + %s13400_s22]]   ;;  %s13404_s22 = smov 76  }
  0x8b   :  { %15689 = sst [smem:[#allocation112_spill]] %s13800_s20 }
  0x8c   :  { %s13820_s20 = sld [smem:[%s15567_s0 + %s13399_s15]]   ;;  %s13403_s15 = smov 75  }
  0x8d   :  { %s13835_s3 = sld [smem:[%s15567_s0 + %s13402_s7]]   ;;  %s13406_s7 = smov 78  }
  0x8e   :  { %s13840_s25 = sld [smem:[%s15567_s0 + %s13403_s15]]   ;;  %s13407_s15 = smov 79  }
  0x8f   :  { %15690 = sst [smem:[#allocation113_spill]] %s13810_s27 }
  0x90   :  { %s13830_s27 = sld [smem:[%s15567_s0 + %s13401_s28]]   ;;  %s13405_s28 = smov 77  }
  0x91   :  { %s13845_s9 = sld [smem:[%s15567_s0 + %s13404_s22]]   ;;  %s13408_s22 = smov 80  }
  0x92   :  { %s13855_s21 = sld [smem:[%s15567_s0 + %s13406_s7]]   ;;  %s13410_s7 = smov 82  }
  0x93   :  { %s13865_s5 = sld [smem:[%s15567_s0 + %s13408_s22]]   ;;  %s13412_s22 = smov 84  }
  0x94   :  { %15692 = sst [smem:[#allocation115_spill]] %s13840_s25 }
  0x95   :  { %s13860_s25 = sld [smem:[%s15567_s0 + %s13407_s15]]   ;;  %s13411_s15 = smov 83  }
  0x96   :  { %15691 = sst [smem:[#allocation114_spill]] %s13830_s27 }
  0x97   :  { %s13850_s27 = sld [smem:[%s15567_s0 + %s13405_s28]]   ;;  %s13409_s28 = smov 81  }
  0x98   :  { %15694 = sst [smem:[#allocation117_spill]] %s13855_s21 }
  0x99   :  { %15696 = sst [smem:[#allocation119_spill]] %s13865_s5 }
  0x9a   :  { %s13875_s21 = sld [smem:[%s15567_s0 + %s13410_s7]]  }
  0x9b   :  { %15695 = sst [smem:[#allocation118_spill]] %s13860_s25 }
  0x9c   :  { %s13880_s25 = sld [smem:[%s15567_s0 + %s13411_s15]]  }
  0x9d   :  { %15693 = sst [smem:[#allocation116_spill]] %s13850_s27 }
  0x9e   :  { %s13870_s27 = sld [smem:[%s15567_s0 + %s13409_s28]]   ;;  %s13413_s28 = smov 85  }
  0x9f   :  { %s13885_s5 = sld [smem:[%s15567_s0 + %s13412_s22]]  }
  0xa4   :  { %15697 = sst [smem:[#allocation120_spill]] %s13870_s27 }
  0xa5   :  { %s13890_s27 = sld [smem:[%s15567_s0 + %s13413_s28]]  }
  0xa6   :  { %177 = vsyncpa [#allocation3], 0 }
  0xa7   :  { %178 = vsyncpa [#allocation8], 0 }
  0xa8   :  { %179 = vsyncpa [#allocation11], 0 }
  0xa9   :  { %180 = vsyncpa [#allocation14], 0 }
  0xaa   :  { %181 = vsyncpa [#allocation17], 0 }
  0xab   :  { %182 = vsyncpa [#allocation20], 0 }
  0xac   :  { %183 = vsyncpa [#allocation23], 0 }
  0xad   :  { %184 = vsyncpa [#allocation26], 0 }
  0xae   :  { %185 = vsyncpa [#allocation6], 0 }
  0xaf   :  { %186 = vsyncpa [#allocation5], 0 }
  0xb0   :  { %187 = vsyncpa [#allocation4], 0 }
  0xb1   :  { %188 = vsyncpa [#allocation31], 0 }
  0xb2   :  { %189 = vsyncpa [#allocation34], 0 }
  0xb3   :  { %190 = vsyncpa [#allocation37], 0  ;;  %s13414_s7 = smov [#allocation7]   ;;  %s13415_s10 = smov [#allocation10]  }
  0xb4   :  { %s317_s0 = sshll.u32 %s13414_s7, 4  ;;  %s339_s11 = sshll.u32 %s13415_s10, 4  ;;  %s318_s0 = int_to_ptr.vmem [resolvable:$true] %s317_s0  ;;  %s340_s11 = int_to_ptr.vmem [resolvable:$true] %s339_s11 }
  0xb5   :  { %s12817_s15 = scalar_lea.hbm %s13745_s24, 16 }
  0xb6   :  { %p12818_p0 = scmp.ne.s32.totalorder %s13745_s24, %s12817_s15  ;;  %p12821_p1 = scmp.lt.u32.totalorder %s12817_s15, %s13745_s24 }
  0xb8   :  { %p12823_p2 = pnand %p12821_p1, %p12818_p0 }
  0xba   :  { %12826 = shalt.err (!%p12823_p2)
}
  0xbb   :  { %s12827_s16 = scalar_lea.vmem %s318_s0, 16  ;;  %s12831_s18 = scalar_lea.vmem %s318_s0, 32 }
  0xbc   :  { %p12828_p3 = scmp.ne.s32.totalorder %s318_s0, %s12827_s16  ;;  %p12832_p4 = scmp.lt.s32.totalorder %s318_s0, %s318_s0 }
  0xbd   :  { %p12833_p5 = scmp.lt.s32.totalorder %s12831_s18, %s12827_s16 }
  0xbf   :  { %p12834_p6 = por %p12833_p5, %p12832_p4 }
  0xc1   :  { %p12835_p7 = pnand %p12834_p6, %p12828_p3 }
  0xc3   :  { %12838 = shalt.err (!%p12835_p7)
}
  0xc4   :  { %320 = dma.hbm_to_vmem [thread:$0]  %s13745_s24, 16, %s318_s0, [#allocation8]  }
  0xc5   :  { %s12839_s22 = scalar_lea.hbm %s13760_s30, 16 }
  0xc6   :  { %p12840_p8 = scmp.ne.s32.totalorder %s13760_s30, %s12839_s22  ;;  %p12843_p9 = scmp.lt.u32.totalorder %s12839_s22, %s13760_s30 }
  0xc8   :  { %p12845_p10 = pnand %p12843_p9, %p12840_p8 }
  0xca   :  { %12848 = shalt.err (!%p12845_p10)
}
  0xcb   :  { %s12849_s23 = scalar_lea.vmem %s340_s11, 16  ;;  %s12853_s26 = scalar_lea.vmem %s340_s11, 32 }
  0xcc   :  { %p12850_p11 = scmp.ne.s32.totalorder %s340_s11, %s12849_s23  ;;  %p12854_p12 = scmp.lt.s32.totalorder %s340_s11, %s340_s11 }
  0xcd   :  { %p12855_p13 = scmp.lt.s32.totalorder %s12853_s26, %s12849_s23 }
  0xcf   :  { %p12856_p0 = por %p12855_p13, %p12854_p12 }
  0xd1   :  { %p12857_p1 = pnand %p12856_p0, %p12850_p11 }
  0xd3   :  { %12860 = shalt.err (!%p12857_p1)
}
  0xd4   :  { %342 = dma.hbm_to_vmem [thread:$0]  %s13760_s30, 16, %s340_s11, [#allocation11]  }
  0xd5   :  { %s13416_s28 = smov [#allocation13]   ;;  %s13417_s1 = smov [#allocation16]  }
  0xd6   :  { %s365_s24 = sshll.u32 %s13416_s28, 4  ;;  %s385_s2 = sshll.u32 %s13417_s1, 4  ;;  %s366_s24 = int_to_ptr.vmem [resolvable:$true] %s365_s24  ;;  %s386_s2 = int_to_ptr.vmem [resolvable:$true] %s385_s2 }
  0xd7   :  { %s12861_s7 = scalar_lea.hbm %s13785_s19, 16 }
  0xd8   :  { %p12862_p2 = scmp.ne.s32.totalorder %s13785_s19, %s12861_s7  ;;  %p12865_p3 = scmp.lt.u32.totalorder %s12861_s7, %s13785_s19 }
  0xda   :  { %p12867_p4 = pnand %p12865_p3, %p12862_p2 }
  0xdc   :  { %12870 = shalt.err (!%p12867_p4)
}
  0xdd   :  { %s12871_s0 = scalar_lea.vmem %s366_s24, 16  ;;  %s12875_s10 = scalar_lea.vmem %s366_s24, 32 }
  0xde   :  { %p12872_p5 = scmp.ne.s32.totalorder %s366_s24, %s12871_s0  ;;  %p12876_p6 = scmp.lt.s32.totalorder %s366_s24, %s366_s24 }
  0xdf   :  { %p12877_p7 = scmp.lt.s32.totalorder %s12875_s10, %s12871_s0 }
  0xe1   :  { %p12878_p8 = por %p12877_p7, %p12876_p6 }
  0xe3   :  { %p12879_p9 = pnand %p12878_p8, %p12872_p5 }
  0xe5   :  { %12882 = shalt.err (!%p12879_p9)
}
  0xe6   :  { %368 = dma.hbm_to_vmem [thread:$0]  %s13785_s19, 16, %s366_s24, [#allocation14]  }
  0xe7   :  { %s12883_s30 = scalar_lea.hbm %s13795_s29, 16 }
  0xe8   :  { %p12884_p10 = scmp.ne.s32.totalorder %s13795_s29, %s12883_s30  ;;  %p12887_p11 = scmp.lt.u32.totalorder %s12883_s30, %s13795_s29 }
  0xea   :  { %p12889_p12 = pnand %p12887_p11, %p12884_p10 }
  0xec   :  { %12892 = shalt.err (!%p12889_p12)
}
  0xed   :  { %s12893_s11 = scalar_lea.vmem %s386_s2, 16  ;;  %s12897_s15 = scalar_lea.vmem %s386_s2, 32 }
  0xee   :  { %p12894_p13 = scmp.ne.s32.totalorder %s386_s2, %s12893_s11  ;;  %p12898_p0 = scmp.lt.s32.totalorder %s386_s2, %s386_s2 }
  0xef   :  { %p12899_p1 = scmp.lt.s32.totalorder %s12897_s15, %s12893_s11 }
  0xf1   :  { %p12900_p2 = por %p12899_p1, %p12898_p0 }
  0xf3   :  { %p12901_p3 = pnand %p12900_p2, %p12894_p13 }
  0xf5   :  { %12904 = shalt.err (!%p12901_p3)
}
  0xf6   :  { %388 = dma.hbm_to_vmem [thread:$0]  %s13795_s29, 16, %s386_s2, [#allocation17]  }
  0xf7   :  { %s13418_s16 = smov [#allocation19]   ;;  %s13419_s18 = smov [#allocation22]  }
  0xf8   :  { %s409_s19 = sshll.u32 %s13418_s16, 4  ;;  %s429_s22 = sshll.u32 %s13419_s18, 4  ;;  %s410_s19 = int_to_ptr.vmem [resolvable:$true] %s409_s19  ;;  %s430_s22 = int_to_ptr.vmem [resolvable:$true] %s429_s22 }
  0xf9   :  { %s12905_s23 = scalar_lea.hbm %s13815_s8, 16 }
  0xfa   :  { %p12906_p4 = scmp.ne.s32.totalorder %s13815_s8, %s12905_s23  ;;  %p12909_p5 = scmp.lt.u32.totalorder %s12905_s23, %s13815_s8 }
  0xfc   :  { %p12911_p6 = pnand %p12909_p5, %p12906_p4 }
  0xfe   :  { %12914 = shalt.err (!%p12911_p6)
}
  0xff   :  { %s12915_s26 = scalar_lea.vmem %s410_s19, 16  ;;  %s12919_s28 = scalar_lea.vmem %s410_s19, 32 }
 0x100   :  { %p12916_p7 = scmp.ne.s32.totalorder %s410_s19, %s12915_s26  ;;  %p12920_p8 = scmp.lt.s32.totalorder %s410_s19, %s410_s19 }
 0x101   :  { %p12921_p9 = scmp.lt.s32.totalorder %s12919_s28, %s12915_s26 }
 0x103   :  { %p12922_p10 = por %p12921_p9, %p12920_p8 }
 0x105   :  { %p12923_p11 = pnand %p12922_p10, %p12916_p7 }
 0x107   :  { %12926 = shalt.err (!%p12923_p11)
}
 0x108   :  { %412 = dma.hbm_to_vmem [thread:$0]  %s13815_s8, 16, %s410_s19, [#allocation20]  }
 0x109   :  { %s12927_s29 = scalar_lea.hbm %s13825_s17, 16 }
 0x10a   :  { %p12928_p12 = scmp.ne.s32.totalorder %s13825_s17, %s12927_s29  ;;  %p12931_p13 = scmp.lt.u32.totalorder %s12927_s29, %s13825_s17 }
 0x10c   :  { %p12933_p0 = pnand %p12931_p13, %p12928_p12 }
 0x10e   :  { %12936 = shalt.err (!%p12933_p0)
}
 0x10f   :  { %s12937_s24 = scalar_lea.vmem %s430_s22, 16  ;;  %s12941_s1 = scalar_lea.vmem %s430_s22, 32 }
 0x110   :  { %p12938_p1 = scmp.ne.s32.totalorder %s430_s22, %s12937_s24  ;;  %p12942_p2 = scmp.lt.s32.totalorder %s430_s22, %s430_s22 }
 0x111   :  { %p12943_p3 = scmp.lt.s32.totalorder %s12941_s1, %s12937_s24 }
 0x113   :  { %p12944_p4 = por %p12943_p3, %p12942_p2 }
 0x115   :  { %p12945_p5 = pnand %p12944_p4, %p12938_p1 }
 0x117   :  { %12948 = shalt.err (!%p12945_p5)
}
 0x118   :  { %432 = dma.hbm_to_vmem [thread:$0]  %s13825_s17, 16, %s430_s22, [#allocation23]  }
 0x119   :  { %s13420_s2 = smov [#allocation2]   ;;  %s13421_s7 = smov [#allocation9]  }
 0x11a   :  { %s305_s8 = sshll.u32 %s13420_s2, 4  ;;  %s329_s0 = sshll.u32 %s13421_s7, 4  ;;  %s306_s8 = int_to_ptr.vmem [resolvable:$true] %s305_s8  ;;  %s330_s0 = int_to_ptr.vmem [resolvable:$true] %s329_s0 }
 0x11b   :  { %s12949_s10 = scalar_lea.hbm %s13735_s6, 16 }
 0x11c   :  { %p12950_p6 = scmp.ne.s32.totalorder %s13735_s6, %s12949_s10  ;;  %p12953_p7 = scmp.lt.u32.totalorder %s12949_s10, %s13735_s6 }
 0x11e   :  { %p12955_p8 = pnand %p12953_p7, %p12950_p6 }
 0x120   :  { %12958 = shalt.err (!%p12955_p8)
}
 0x121   :  { %s12959_s30 = scalar_lea.vmem %s306_s8, 16  ;;  %s12963_s11 = scalar_lea.vmem %s306_s8, 32 }
 0x122   :  { %p12960_p9 = scmp.ne.s32.totalorder %s306_s8, %s12959_s30  ;;  %p12964_p10 = scmp.lt.s32.totalorder %s306_s8, %s306_s8 }
 0x123   :  { %p12965_p11 = scmp.lt.s32.totalorder %s12963_s11, %s12959_s30 }
 0x125   :  { %p12966_p12 = por %p12965_p11, %p12964_p10 }
 0x127   :  { %p12967_p13 = pnand %p12966_p12, %p12960_p9 }
 0x129   :  { %12970 = shalt.err (!%p12967_p13)
}
 0x12a   :  { %308 = dma.hbm_to_vmem [thread:$0]  %s13735_s6, 16, %s306_s8, [#allocation3]  }
 0x12b   :  { %s12971_s17 = scalar_lea.hbm %s13755_s13, 16 }
 0x12c   :  { %p12972_p0 = scmp.ne.s32.totalorder %s13755_s13, %s12971_s17  ;;  %p12975_p1 = scmp.lt.u32.totalorder %s12971_s17, %s13755_s13 }
 0x12e   :  { %p12977_p2 = pnand %p12975_p1, %p12972_p0 }
 0x130   :  { %12980 = shalt.err (!%p12977_p2)
}
 0x131   :  { %s12981_s15 = scalar_lea.vmem %s330_s0, 16  ;;  %s12985_s16 = scalar_lea.vmem %s330_s0, 32 }
 0x132   :  { %p12982_p3 = scmp.ne.s32.totalorder %s330_s0, %s12981_s15  ;;  %p12986_p4 = scmp.lt.s32.totalorder %s330_s0, %s330_s0 }
 0x133   :  { %p12987_p5 = scmp.lt.s32.totalorder %s12985_s16, %s12981_s15 }
 0x135   :  { %p12988_p6 = por %p12987_p5, %p12986_p4 }
 0x137   :  { %p12989_p7 = pnand %p12988_p6, %p12982_p3 }
 0x139   :  { %12992 = shalt.err (!%p12989_p7)
}
 0x13a   :  { %332 = dma.hbm_to_vmem [thread:$0]  %s13755_s13, 16, %s330_s0, [#allocation8]  }
 0x13b   :  { %s13422_s19 = smov [#allocation12]   ;;  %s13423_s18 = smov [#allocation15]  }
 0x13c   :  { %s349_s6 = sshll.u32 %s13422_s19, 4  ;;  %s375_s22 = sshll.u32 %s13423_s18, 4  ;;  %s350_s6 = int_to_ptr.vmem [resolvable:$true] %s349_s6  ;;  %s376_s22 = int_to_ptr.vmem [resolvable:$true] %s375_s22 }
 0x13d   :  { %s12993_s23 = scalar_lea.hbm %s13765_s4, 16 }
 0x13e   :  { %p12994_p8 = scmp.ne.s32.totalorder %s13765_s4, %s12993_s23  ;;  %p12997_p9 = scmp.lt.u32.totalorder %s12993_s23, %s13765_s4 }
 0x140   :  { %p12999_p10 = pnand %p12997_p9, %p12994_p8 }
 0x142   :  { %13002 = shalt.err (!%p12999_p10)
}
 0x143   :  { %s13003_s26 = scalar_lea.vmem %s350_s6, 16  ;;  %s13007_s28 = scalar_lea.vmem %s350_s6, 32 }
 0x144   :  { %p13004_p11 = scmp.ne.s32.totalorder %s350_s6, %s13003_s26  ;;  %p13008_p12 = scmp.lt.s32.totalorder %s350_s6, %s350_s6 }
 0x145   :  { %p13009_p13 = scmp.lt.s32.totalorder %s13007_s28, %s13003_s26 }
 0x147   :  { %p13010_p0 = por %p13009_p13, %p13008_p12 }
 0x149   :  { %p13011_p1 = pnand %p13010_p0, %p13004_p11 }
 0x14b   :  { %13014 = shalt.err (!%p13011_p1)
}
 0x14c   :  { %352 = dma.hbm_to_vmem [thread:$0]  %s13765_s4, 16, %s350_s6, [#allocation11]  }
 0x14d   :  { %s13015_s13 = scalar_lea.hbm %s13790_s12, 16 }
 0x14e   :  { %p13016_p2 = scmp.ne.s32.totalorder %s13790_s12, %s13015_s13  ;;  %p13019_p3 = scmp.lt.u32.totalorder %s13015_s13, %s13790_s12 }
 0x150   :  { %p13021_p4 = pnand %p13019_p3, %p13016_p2 }
 0x152   :  { %13024 = shalt.err (!%p13021_p4)
}
 0x153   :  { %s13025_s29 = scalar_lea.vmem %s376_s22, 16  ;;  %s13029_s24 = scalar_lea.vmem %s376_s22, 32 }
 0x154   :  { %p13026_p5 = scmp.ne.s32.totalorder %s376_s22, %s13025_s29  ;;  %p13030_p6 = scmp.lt.s32.totalorder %s376_s22, %s376_s22 }
 0x155   :  { %p13031_p7 = scmp.lt.s32.totalorder %s13029_s24, %s13025_s29 }
 0x157   :  { %p13032_p8 = por %p13031_p7, %p13030_p6 }
 0x159   :  { %p13033_p9 = pnand %p13032_p8, %p13026_p5 }
 0x15b   :  { %13036 = shalt.err (!%p13033_p9)
}
 0x15c   :  { %378 = dma.hbm_to_vmem [thread:$0]  %s13790_s12, 16, %s376_s22, [#allocation14]  }
 0x15d   :  { %s13424_s1 = smov [#allocation18]   ;;  %s13425_s2 = smov [#allocation21]  }
 0x15e   :  { %s397_s4 = sshll.u32 %s13424_s1, 4  ;;  %s419_s8 = sshll.u32 %s13425_s2, 4  ;;  %s398_s4 = int_to_ptr.vmem [resolvable:$true] %s397_s4  ;;  %s420_s8 = int_to_ptr.vmem [resolvable:$true] %s419_s8 }
 0x15f   :  { %s13037_s7 = scalar_lea.hbm %s13805_s14, 16 }
 0x160   :  { %p13038_p10 = scmp.ne.s32.totalorder %s13805_s14, %s13037_s7  ;;  %p13041_p11 = scmp.lt.u32.totalorder %s13037_s7, %s13805_s14 }
 0x162   :  { %p13043_p12 = pnand %p13041_p11, %p13038_p10 }
 0x164   :  { %13046 = shalt.err (!%p13043_p12)
}
 0x165   :  { %s13047_s0 = scalar_lea.vmem %s398_s4, 16  ;;  %s13051_s10 = scalar_lea.vmem %s398_s4, 32 }
 0x166   :  { %p13048_p13 = scmp.ne.s32.totalorder %s398_s4, %s13047_s0  ;;  %p13052_p0 = scmp.lt.s32.totalorder %s398_s4, %s398_s4 }
 0x167   :  { %p13053_p1 = scmp.lt.s32.totalorder %s13051_s10, %s13047_s0 }
 0x169   :  { %p13054_p2 = por %p13053_p1, %p13052_p0 }
 0x16b   :  { %p13055_p3 = pnand %p13054_p2, %p13048_p13 }
 0x16d   :  { %13058 = shalt.err (!%p13055_p3)
}
 0x16e   :  { %400 = dma.hbm_to_vmem [thread:$0]  %s13805_s14, 16, %s398_s4, [#allocation17]  }
 0x16f   :  { %s13059_s12 = scalar_lea.hbm %s13820_s20, 16 }
 0x170   :  { %p13060_p4 = scmp.ne.s32.totalorder %s13820_s20, %s13059_s12  ;;  %p13063_p5 = scmp.lt.u32.totalorder %s13059_s12, %s13820_s20 }
 0x172   :  { %p13065_p6 = pnand %p13063_p5, %p13060_p4 }
 0x174   :  { %13068 = shalt.err (!%p13065_p6)
}
 0x175   :  { %s13069_s30 = scalar_lea.vmem %s420_s8, 16  ;;  %s13073_s11 = scalar_lea.vmem %s420_s8, 32 }
 0x176   :  { %p13070_p7 = scmp.ne.s32.totalorder %s420_s8, %s13069_s30  ;;  %p13074_p8 = scmp.lt.s32.totalorder %s420_s8, %s420_s8 }
 0x177   :  { %p13075_p9 = scmp.lt.s32.totalorder %s13073_s11, %s13069_s30 }
 0x179   :  { %p13076_p10 = por %p13075_p9, %p13074_p8 }
 0x17b   :  { %p13077_p11 = pnand %p13076_p10, %p13070_p7 }
 0x17d   :  { %13080 = shalt.err (!%p13077_p11)
}
 0x17e   :  { %422 = dma.hbm_to_vmem [thread:$0]  %s13820_s20, 16, %s420_s8, [#allocation20]  }
 0x17f   :  { %s13426_s17 = smov [#allocation24]   ;;  %s13427_s15 = smov [#allocation25]  }
 0x180   :  { %s441_s14 = sshll.u32 %s13426_s17, 4  ;;  %s453_s16 = sshll.u32 %s13427_s15, 4  ;;  %s442_s14 = int_to_ptr.vmem [resolvable:$true] %s441_s14  ;;  %s454_s16 = int_to_ptr.vmem [resolvable:$true] %s453_s16 }
 0x181   :  { %s13081_s19 = scalar_lea.hbm %s13835_s3, 16 }
 0x182   :  { %p13082_p12 = scmp.ne.s32.totalorder %s13835_s3, %s13081_s19  ;;  %p13085_p13 = scmp.lt.u32.totalorder %s13081_s19, %s13835_s3 }
 0x184   :  { %p13087_p0 = pnand %p13085_p13, %p13082_p12 }
 0x186   :  { %13090 = shalt.err (!%p13087_p0)
}
 0x187   :  { %s13091_s6 = scalar_lea.vmem %s442_s14, 16  ;;  %s13095_s18 = scalar_lea.vmem %s442_s14, 32 }
 0x188   :  { %p13092_p1 = scmp.ne.s32.totalorder %s442_s14, %s13091_s6  ;;  %p13096_p2 = scmp.lt.s32.totalorder %s442_s14, %s442_s14 }
 0x189   :  { %p13097_p3 = scmp.lt.s32.totalorder %s13095_s18, %s13091_s6 }
 0x18b   :  { %p13098_p4 = por %p13097_p3, %p13096_p2 }
 0x18d   :  { %p13099_p5 = pnand %p13098_p4, %p13092_p1 }
 0x18f   :  { %13102 = shalt.err (!%p13099_p5)
}
 0x190   :  { %444 = dma.hbm_to_vmem [thread:$0]  %s13835_s3, 16, %s442_s14, [#allocation23]  }
 0x191   :  { %s13103_s20 = scalar_lea.hbm %s13845_s9, 16 }
 0x192   :  { %p13104_p6 = scmp.ne.s32.totalorder %s13845_s9, %s13103_s20  ;;  %p13107_p7 = scmp.lt.u32.totalorder %s13103_s20, %s13845_s9 }
 0x194   :  { %p13109_p8 = pnand %p13107_p7, %p13104_p6 }
 0x196   :  { %13112 = shalt.err (!%p13109_p8)
}
 0x197   :  { %s13113_s22 = scalar_lea.vmem %s454_s16, 16  ;;  %s13117_s23 = scalar_lea.vmem %s454_s16, 32 }
 0x198   :  { %p13114_p9 = scmp.ne.s32.totalorder %s454_s16, %s13113_s22  ;;  %p13118_p10 = scmp.lt.s32.totalorder %s454_s16, %s454_s16 }
 0x199   :  { %p13119_p11 = scmp.lt.s32.totalorder %s13117_s23, %s13113_s22 }
 0x19b   :  { %p13120_p12 = por %p13119_p11, %p13118_p10 }
 0x19d   :  { %p13121_p13 = pnand %p13120_p12, %p13114_p9 }
 0x19f   :  { %13124 = shalt.err (!%p13121_p13)
}
 0x1a0   :  { %s15698_s26 = sld [smem:[#allocation116_spill]] }
 0x1a1   :  { %456 = dma.hbm_to_vmem [thread:$0]  %s13845_s9, 16, %s454_s16, [#allocation26]  }
 0x1a6   :  { %s463_s28 = sshll.u32 %s15698_s26, 4  ;;  %s464_s28 = int_to_ptr.vmem [resolvable:$true] %s463_s28 }
 0x1a7   :  { %s13125_s13 = scalar_lea.vmem %s464_s28, 16  ;;  %p13130_p1 = scmp.lt.s32.totalorder %s464_s28, %s464_s28 }
 0x1a8   :  { %p13126_p0 = scmp.ne.s32.totalorder %s464_s28, %s13125_s13  ;;  %p13131_p2 = scmp.lt.s32.totalorder %s13125_s13, %s13125_s13 }
 0x1aa   :  { %p13132_p3 = por %p13131_p2, %p13130_p1 }
 0x1ac   :  { %p13133_p4 = pnand %p13132_p3, %p13126_p0 }
 0x1ae   :  { %13136 = shalt.err (!%p13133_p4)
}
 0x1af   :  { %s13428_s3 = smov [#allocation27]   ;;  %s15699_s29 = sld [smem:[#allocation117_spill]] }
 0x1b0   :  { %466 = dma.vmem_to_smem %s464_s28, 16, %s13428_s3, [#allocation6]  }
 0x1b5   :  { %s13137_s24 = scalar_lea.hbm %s15699_s29, 16 }
 0x1b6   :  { %p13138_p5 = scmp.ne.s32.totalorder %s15699_s29, %s13137_s24  ;;  %p13141_p6 = scmp.lt.u32.totalorder %s13137_s24, %s15699_s29 }
 0x1b8   :  { %p13143_p7 = pnand %p13141_p6, %p13138_p5 }
 0x1ba   :  { %13146 = shalt.err (!%p13143_p7)
}
 0x1bb   :  { %s13429_s9 = smov [#allocation28]  }
 0x1bc   :  { %474 = dma.hbm_to_smem %s15699_s29, 16, %s13429_s9, [#allocation5]  }
 0x1bd   :  { %13301 = dma.done.wait [#allocation3], 16  }
 0x1be   :  { %13302 = vsyncadd [#allocation3], 4294967280 }
 0x1bf   :  { %13303 = dma.done.wait [#allocation8], 32  }
 0x1c0   :  { %13304 = vsyncadd [#allocation8], 4294967264 }
 0x1c1   :  { %13305 = dma.done.wait [#allocation11], 32  }
 0x1c2   :  { %13306 = vsyncadd [#allocation11], 4294967264 }
 0x1c3   :  { %13307 = dma.done.wait [#allocation14], 32  }
 0x1c4   :  { %13308 = vsyncadd [#allocation14], 4294967264 }
 0x1c5   :  { %13309 = dma.done.wait [#allocation17], 32  }
 0x1c6   :  { %13310 = vsyncadd [#allocation17], 4294967264 }
 0x1c7   :  { %13311 = dma.done.wait [#allocation20], 32  }
 0x1c8   :  { %13312 = vsyncadd [#allocation20], 4294967264 }
 0x1c9   :  { %13313 = dma.done.wait [#allocation23], 32  }
 0x1ca   :  { %13314 = vsyncadd [#allocation23], 4294967264 }
 0x1cb   :  { %13315 = dma.done.wait [#allocation26], 16  }
 0x1cc   :  { %13316 = vsyncadd [#allocation26], 4294967280 }
 0x1cd   :  { %13317 = dma.done.wait [#allocation6], 16  }
 0x1ce   :  { %13318 = vsyncadd [#allocation6], 4294967280 }
 0x1cf   :  { %13319 = dma.done.wait [#allocation5], 16  }
 0x1d0   :  { %13320 = vsyncadd [#allocation5], 4294967280 }
 0x1d1   :  { %523 = sfence }
 0x1d2   :  { %s15700_s1 = sld [smem:[#allocation53_spill]]  ;;  %s15701_s4 = sld [smem:[#allocation57_spill]]  ;;  %v15607_v5 = vmov 0.0   ;;  %vm530_vm0 = vcmask 130048   ;;  %vm858_vm1 = vcmask 64512   ;;  %v13431_v63 = vmov 0  }
 0x1d3   :  { %s15702_s2 = sld [smem:[#allocation54_spill]]  ;;  %s15703_s8 = sld [smem:[#allocation58_spill]]  ;;  %601 = vmatprep.mubr.f32.mxu0 %v15607_v5  ;;  %607 = vmatprep.mubr.f32.mxu1 %v15607_v5  ;;  %vm13432_vm2 = vmmov 0   ;;  %vm1907_vm3 = vcmask 1043456   ;;  %vm1900_vm4 = vcmask 31744   ;;  %vm1999_vm5 = vcmask 588800  }
 0x1d4   :  { %s15704_s7 = sld [smem:[#allocation60_spill]]  ;;  %12577 = vset.pattern.permute.xlu1 %v13431_v63  ;;  %12576 = vset.pattern.permute.xlu0 %v13431_v63  ;;  %s15710_s0 = sld [smem:[#allocation56_spill]]  ;;  %vm2680_vm6 = vcmask 15360   ;;  %vm2687_vm7 = vcmask 1041408   ;;  %vm2871_vm8 = vcmask 261120   ;;  %vm3367_vm9 = vcmask 74752  }
 0x1d5   :  { %s1207_s10 = sld [smem:[#allocation27]]  ;;  %s10472_s12 = sld [smem:[#allocation27 + $0x1]]  ;;  %vm4444_vm13 = vcmask 1045504  }
 0x1d6   :  { %s10480_s30 = sld [smem:[#allocation27 + $0x2]]  ;;  %s10488_s11 = sld [smem:[#allocation27 + $0x3]] }
 0x1d7   :  { %s14004_s17 = sld [smem:[#allocation27 + $0x4]]  ;;  %s14015_s14 = sld [smem:[#allocation27 + $0x5]] }
 0x1d8   :  { %v527_v0 = vld [vmem:[%s15700_s1 + $0x8] sm:$0xff]  ;;  %v529_v1 = vld [vmem:[%s15700_s1 + $0x18] sm:$0xff]  ;;  %v526_v2 = vld [vmem:[%s15700_s1] sm:$0xff]  ;;  %s14023_s15 = sld [smem:[#allocation27 + $0x6]]  ;;  %s14025_s16 = sld [smem:[#allocation27 + $0x7]] }
 0x1d9   :  { %v11982_v3 = vpack.c.bf16 %v529_v1, %v527_v0  ;;  %v528_v4 = vld [vmem:[%s15700_s1 + $0x10] sm:$0xff]  ;;  %v524_v7 = vld [vmem:[%s15701_s4] sm:$0xff]  ;;  %v525_v8 = vld [vmem:[%s15701_s4 + $0x8] sm:$0xff]  ;;  %s14033_s19 = sld [smem:[#allocation27 + $0x8]]  ;;  %s14122_s18 = sld [smem:[#allocation27 + $0x9]] }
 0x1da   :  { %v11984_v6 = vpack.c.bf16 %v528_v4, %v526_v2  ;;  %v857_v9 = vld [vmem:[%s15702_s2 + $0x8] sm:$0xff]  ;;  %v856_v10 = vld [vmem:[%s15702_s2] sm:$0xff]  ;;  %s14035_s6 = sld [smem:[#allocation28]]  ;;  %s14124_s20 = sld [smem:[#allocation27 + $0xa]] }
 0x1db   :  { %11983 = vmatprep.subr.bf16.mxu0 %v11982_v3  ;;  %12416 = vmatprep.subr.bf16.mxu1 %v11982_v3  ;;  %v855_v11 = vld [vmem:[%s15703_s8] sm:$0xff]  ;;  %v13972_v61 = vld [vmem:[%s15704_s7 + $0x8] sm:$0xff]  ;;  %s14157_s22 = sld [smem:[#allocation27 + $0xb]]  ;;  %s14159_s23 = sld [smem:[#allocation27 + $0xc]] }
 0x1dc   :  { %11985 = vmatpush1.bf16.msra.mxu0 %v11984_v6  ;;  %12417 = vmatpush1.bf16.msra.mxu1 %v11984_v6  ;;  %v647_v49 = vld [vmem:[%s15704_s7] sm:$0xff]  ;;  %15705 = vst [vmem:[#allocation121_spill] sm:$0xff] %v13972_v61  ;;  %s14179_s26 = sld [smem:[#allocation27 + $0xd]]  ;;  %s14181_s28 = sld [smem:[#allocation27 + $0xe]] }
 0x1dd   :  { %862 = vmatprep.subr.mxu0 %v857_v9  ;;  %s14193_s13 = sld [smem:[#allocation27 + $0xf]]  ;;  %s14201_s3 = sld [smem:[#allocation27 + $0x10]] }
 0x1de   :  { %s14203_s29 = sld [smem:[#allocation27 + $0x11]]  ;;  %s14243_s9 = sld [smem:[#allocation27 + $0x12]] }
 0x1df   :  { %10454 = vmatmul.mubr.msk.f32.vlgmr.msra.gmra.mrb[0].mxu0 %vm530_vm0, %v524_v7  ;;  %10455 = vmatmul.mubr.msk.f32.vlgmr.msra.gmra.mrb[0].mxu1 %vm530_vm0, %v525_v8  ;;  %s14215_s24 = sld [smem:[#allocation28 + $0x1]]  ;;  %s14245_s1 = sld [smem:[#allocation27 + $0x13]] }
 0x1e0   :  { %926 = vmatprep.mubr.f32.mxu0 %v15607_v5  ;;  %863 = vmatpush1.msra.mxu0 %v856_v10  ;;  %s14255_s4 = sld [smem:[#allocation27 + $0x14]]  ;;  %s14259_s2 = sld [smem:[#allocation27 + $0x15]] }
 0x1e1   :  { %11240 = vmatprep.subr.mxu0 %v15607_v5  ;;  %11225 = vmatprep.mubr.msk.f32.mxu1 %vm530_vm0, %v647_v49  ;;  %s14261_s8 = sld [smem:[#allocation27 + $0x16]]  ;;  %s14271_s7 = sld [smem:[#allocation27 + $0x17]] }
 0x1e3   :  { %10460 = vmatmul.mubr.msk.f32.vlgmr.msra.gmra.mrb[2].mxu0 %vm858_vm1, %v855_v11 }
 0x1e4   :  { %11242 = vmatprep.mubr.msk.f32.mxu0 %vm13432_vm2, %v15607_v5  ;;  %v14132_v5 = vld [vmem:[%s15710_s0 + $0xb0] sm:$0xff] }
 0x1e5   :  { %15720 = vst [vmem:[#allocation135_spill] sm:$0xff] %v14132_v5 }
 0x2b2   :  { %v603_v12 = vpop.f32.mrb[0].mxu0  ;;  %v609_v13 = vpop.f32.mrb[0].mxu1 }
 0x2b3   :  { %v605_v14 = vpop.f32.mrb[1].mxu0  ;;  %v611_v15 = vpop.f32.mrb[1].mxu1 }
 0x2b4   :  { %v614_v16 = vadd.f32 %v605_v14, %v603_v12  ;;  %v617_v17 = vadd.f32 %v611_v15, %v609_v13 }
 0x2b6   :  { %615 = vadd.xlane.f32.xlu0 %v614_v16  ;;  %v928_v32 = vpop.f32.mrb[2].mxu0 }
 0x2b7   :  { %v930_v33 = vpop.f32.mrb[3].mxu0 }
 0x2b8   :  { %v933_v34 = vadd.f32 %v930_v33, %v928_v32 }
 0x2ba   :  { %618 = vadd.xlane.f32.xlu0 %v617_v17 }
 0x343   :  { %v616_v18 = vpop.xlane.xlu0 %615 }
 0x344   :  { %v621_v19 = vmul.f32 0.00390625, %v616_v18 }
 0x346   :  { %v623_v20 = vsub.f32 %v603_v12, %v621_v19  ;;  %v624_v21 = vsub.f32 %v605_v14, %v621_v19 }
 0x347   :  { %v619_v22 = vpop.xlane.xlu0 %618 }
 0x348   :  { %v622_v23 = vmul.f32 0.00390625, %v619_v22  ;;  %v627_v24 = vmul.f32 %v623_v20, %v623_v20  ;;  %v628_v25 = vmul.f32 %v624_v21, %v624_v21  ;;  %v14002_v22 = vld [vmem:[%s15710_s0] sm:$0xff] }
 0x34a   :  { %v625_v26 = vsub.f32 %v609_v13, %v622_v23  ;;  %v626_v27 = vsub.f32 %v611_v15, %v622_v23  ;;  %v631_v28 = vadd.f32 %v628_v25, %v627_v24  ;;  %v14007_v23 = vld [vmem:[%s15710_s0 + $0x8] sm:$0xff]  ;;  %v14010_v24 = vld [vmem:[%s15710_s0 + $0x20] sm:$0xff] }
 0x34b   :  { %v14013_v25 = vld [vmem:[%s15710_s0 + $0x28] sm:$0xff] }
 0x34c   :  { %632 = vadd.xlane.f32.xlu1 %v631_v28  ;;  %v629_v29 = vmul.f32 %v625_v26, %v625_v26  ;;  %v630_v30 = vmul.f32 %v626_v27, %v626_v27  ;;  %15713 = vst [vmem:[#allocation128_spill] sm:$0xff] %v14013_v25  ;;  %v1208_v28 = vstv %s1207_s10  ;;  %s14287_s10 = sld [smem:[#allocation27 + $0x19]] }
 0x34e   :  { %v634_v31 = vadd.f32 %v630_v30, %v629_v29  ;;  %v14028_v29 = vld [vmem:[%s15710_s0 + $0x60] sm:$0xff]  ;;  %v14031_v30 = vld [vmem:[%s15710_s0 + $0x68] sm:$0xff] }
 0x34f   :  { %15714 = vst [vmem:[#allocation129_spill] sm:$0xff] %v14031_v30 }
 0x350   :  { %635 = vadd.xlane.f32.xlu1 %v634_v31  ;;  %v1209_v31 = vmul.f32 %v1208_v28, %v14002_v22 }
 0x3d9   :  { %v633_v35 = vpop.xlane.xlu1 %632 }
 0x3da   :  { %v637_v36 = vmul.f32 0.00390625, %v633_v35  ;;  %v14043_v35 = vld [vmem:[%s15710_s0 + $0x88] sm:$0xff] }
 0x3db   :  { %15715 = vst [vmem:[#allocation130_spill] sm:$0xff] %v14043_v35 }
 0x3dc   :  { %v639_v37 = vadd.f32 1e-05, %v637_v36 }
 0x3dd   :  { %v636_v38 = vpop.xlane.xlu1 %635 }
 0x3de   :  { %12588 = vrsqrt.f32 %v639_v37  ;;  %v638_v39 = vmul.f32 0.00390625, %v636_v38  ;;  %v1282_v38 = vstv %s10480_s30  ;;  %s14300_s30 = sld [smem:[#allocation28 + $0x2]] }
 0x3e0   :  { %v640_v40 = vadd.f32 1e-05, %v638_v39  ;;  %v1327_v39 = vstv %s10488_s11  ;;  %s14327_s11 = sld [smem:[#allocation27 + $0x1b]] }
 0x3e2   :  { %12590 = vrsqrt.f32 %v640_v40  ;;  %v14048_v40 = vld [vmem:[%s15710_s0 + $0xa0] sm:$0xff] }
 0x3e8   :  { %v12589_v41 = vpop.eup %12588 }
 0x3e9   :  { %v643_v42 = vmul.f32 %v12589_v41, %v623_v20  ;;  %v644_v43 = vmul.f32 %v12589_v41, %v624_v21  ;;  %v14051_v41 = vld [vmem:[%s15710_s0 + $0xa8] sm:$0xff] }
 0x3eb   :  { %v649_v44 = vadd.f32 %v644_v43, %v643_v42 }
 0x3ec   :  { %v12591_v45 = vpop.eup %12590 }
 0x3ed   :  { %650 = vadd.xlane.f32.xlu0 %v649_v44  ;;  %v645_v46 = vmul.f32 %v12591_v45, %v625_v26  ;;  %v646_v47 = vmul.f32 %v12591_v45, %v626_v27  ;;  %v14018_v26 = vld [vmem:[%s15710_s0 + $0x40] sm:$0xff]  ;;  %v14021_v27 = vld [vmem:[%s15710_s0 + $0x48] sm:$0xff]  ;;  %v1328_v44 = vmul.f32 %v14028_v29, %v1327_v39  ;;  %v1329_v45 = vmul.f32 %v14031_v30, %v1327_v39 }
 0x3ef   :  { %v652_v48 = vadd.f32 %v646_v47, %v645_v46 }
 0x3f1   :  { %934 = vadd.xlane.f32.xlu0 %v933_v34  ;;  %653 = vadd.xlane.f32.xlu1 %v652_v48  ;;  %v14040_v34 = vld [vmem:[%s15710_s0 + $0x80] sm:$0xff] }
 0x47a   :  { %v651_v50 = vpop.xlane.xlu0 %650 }
 0x47b   :  { %v655_v53 = vmul.f32 0.00390625, %v651_v50  ;;  %v1372_v50 = vstv %s14004_s17  ;;  %s14334_s17 = sld [smem:[#allocation27 + $0x1c]] }
 0x47e   :  { %v654_v51 = vpop.xlane.xlu1 %653  ;;  %v935_v52 = vpop.xlane.xlu0 %934 }
 0x47f   :  { %v656_v54 = vmul.f32 0.00390625, %v654_v51  ;;  %v936_v55 = vmul.f32 0.00390625, %v935_v52  ;;  %v1417_v51 = vstv %s14015_s14  ;;  %v14066_v52 = vld [vmem:[%s15710_s0 + $0xe0] sm:$0xff]  ;;  %s14336_s14 = sld [smem:[#allocation27 + $0x1d]] }
 0x481   :  { %v11986_v56 = vpack.c.bf16 %v656_v54, %v655_v53  ;;  %v937_v57 = vsub.f32 %v928_v32, %v936_v55  ;;  %v938_v58 = vsub.f32 %v930_v33, %v936_v55  ;;  %v1210_v32 = vmul.f32 %v1208_v28, %v14007_v23  ;;  %v14069_v53 = vld [vmem:[%s15710_s0 + $0xe8] sm:$0xff] }
 0x482   :  { %v1237_v33 = vstv %s10472_s12  ;;  %v1373_v54 = vmul.f32 %v14040_v34, %v1372_v50  ;;  %v1374_v55 = vmul.f32 %v14043_v35, %v1372_v50  ;;  %s14289_s12 = sld [smem:[#allocation27 + $0x1a]] }
 0x483   :  { %11987 = vmatprep.subr.bf16.mxu1 %v11986_v56  ;;  %v939_v59 = vmul.f32 %v937_v57, %v937_v57  ;;  %v940_v60 = vmul.f32 %v938_v58, %v938_v58  ;;  %v1238_v36 = vmul.f32 %v14010_v24, %v1237_v33  ;;  %v1239_v37 = vmul.f32 %v14013_v25, %v1237_v33 }
 0x484   :  { %11989 = vmatpush3.bf16.msra.mxu1 %v11986_v56  ;;  %v1418_v56 = vmul.f32 %v14048_v40, %v1417_v51 }
 0x485   :  { %v941_v62 = vadd.f32 %v940_v60, %v939_v59  ;;  %v1242_v48 = vadd.f32 %v1238_v36, %v1209_v31  ;;  %v14079_v59 = vld [vmem:[%s15710_s0 + $0x108] sm:$0xff]  ;;  %v14082_v60 = vld [vmem:[%s15710_s0 + $0x10] sm:$0xff] }
 0x486   :  { %v14110_v31 = vld [vmem:[%s15710_s0 + $0x70] sm:$0xff] }
 0x487   :  { %11226 = vmatmul.mubr.msk.f32.vlgmr.msra.gmra.mrb[2].mxu1 %vm530_vm0, %v13972_v61  ;;  %942 = vadd.xlane.f32.xlu1 %v941_v62  ;;  %15718 = vst [vmem:[#allocation133_spill] sm:$0xff] %v14110_v31  ;;  %v14151_v61 = vld [vmem:[%s15710_s0 + $0xf8] sm:$0xff] }
 0x488   :  { %11232 = vmatprep.mubr.msk.f32.mxu1 %vm530_vm0, %v647_v49  ;;  %v1243_v49 = vadd.f32 %v1239_v37, %v1210_v32  ;;  %v14113_v32 = vld [vmem:[%s15710_s0 + $0x78] sm:$0xff] }
 0x489   :  { %15719 = vst [vmem:[#allocation134_spill] sm:$0xff] %v14113_v32 }
 0x514   :  { %v943_v2 = vpop.xlane.xlu1 %942 }
 0x515   :  { %v944_v3 = vmul.f32 0.00390625, %v943_v2  ;;  %v14087_v2 = vld [vmem:[%s15710_s0 + $0x18] sm:$0xff] }
 0x517   :  { %v945_v4 = vadd.f32 1e-05, %v944_v3  ;;  %v14090_v3 = vld [vmem:[%s15710_s0 + $0x30] sm:$0xff] }
 0x519   :  { %12592 = vrsqrt.f32 %v945_v4 }
 0x523   :  { %v12593_v12 = vpop.eup %12592 }
 0x524   :  { %v13993_v19 = vmul.f32 %v12593_v12, %v937_v57  ;;  %v13995_v20 = vmul.f32 %v12593_v12, %v938_v58  ;;  %v1419_v57 = vmul.f32 %v14051_v41, %v1417_v51  ;;  %v14076_v58 = vld [vmem:[%s15710_s0 + $0x100] sm:$0xff] }
 0x526   :  { %15711 = vst [vmem:[#allocation126_spill] sm:$0xff] %v13993_v19  ;;  %15712 = vst [vmem:[#allocation127_spill] sm:$0xff] %v13995_v20  ;;  %v950_v21 = vadd.f32 %v13995_v20, %v13993_v19  ;;  %v14145_v20 = vld [vmem:[%s15710_s0 + $0xd8] sm:$0xff]  ;;  %v14148_v19 = vld [vmem:[%s15710_s0 + $0xf0] sm:$0xff] }
 0x55a   :  { %v11227_v0 = vpop.f32.mrb[2].mxu1 }
 0x55b   :  { %v729_v1 = vpop.f32.mrb[3].mxu1  ;;  %745 = vperm.xlu1 %12577, %v11227_v0   ;;  %v1462_v0 = vstv %s14023_s15  ;;  %s14345_s15 = sld [smem:[#allocation27 + $0x1e]] }
 0x55c   :  { %740 = vperm.xlu0 %12576, %v729_v1   ;;  %v1507_v1 = vstv %s14025_s16  ;;  %s14353_s16 = sld [smem:[#allocation27 + $0x1f]] }
 0x55d   :  { %v1509_v12 = vmul.f32 %v14069_v53, %v1507_v1 }
 0x5da   :  { %v746_v6 = vpop.permute.xlu1 %745 }
 0x5db   :  { %v13977_v7 = vsub.f32 %v645_v46, %v746_v6  ;;  %v13979_v8 = vsub.f32 %v646_v47, %v746_v6  ;;  %v741_v9 = vpop.permute.xlu0 %740  ;;  %v14058_v46 = vld [vmem:[%s15710_s0 + $0xc0] sm:$0xff]  ;;  %v14061_v47 = vld [vmem:[%s15710_s0 + $0xc8] sm:$0xff] }
 0x5dc   :  { %v13981_v10 = vsub.f32 %v643_v42, %v741_v9  ;;  %v13983_v11 = vsub.f32 %v644_v43, %v741_v9  ;;  %v1283_v42 = vmul.f32 %v14018_v26, %v1282_v38  ;;  %v1284_v43 = vmul.f32 %v14021_v27, %v1282_v38  ;;  %15716 = vst [vmem:[#allocation131_spill] sm:$0xff] %v14058_v46 }
 0x5dd   :  { %15706 = vst [vmem:[#allocation122_spill] sm:$0xff] %v13977_v7  ;;  %15707 = vst [vmem:[#allocation123_spill] sm:$0xff] %v13979_v8  ;;  %v754_v13 = vmul.f32 %v13977_v7, %v13977_v7  ;;  %v755_v14 = vmul.f32 %v13979_v8, %v13979_v8  ;;  %v1463_v4 = vmul.f32 %v14058_v46, %v1462_v0 }
 0x5de   :  { %15708 = vst [vmem:[#allocation124_spill] sm:$0xff] %v13981_v10  ;;  %15709 = vst [vmem:[#allocation125_spill] sm:$0xff] %v13983_v11  ;;  %v752_v15 = vmul.f32 %v13981_v10, %v13981_v10  ;;  %v753_v16 = vmul.f32 %v13983_v11, %v13983_v11  ;;  %v1287_v62 = vadd.f32 %v1283_v42, %v1242_v48 }
 0x5df   :  { %v759_v17 = vadd.f32 %v755_v14, %v754_v13  ;;  %15717 = vst [vmem:[#allocation132_spill] sm:$0xff] %v14061_v47  ;;  %v1288_v63 = vadd.f32 %v1284_v43, %v1243_v49  ;;  %v1464_v6 = vmul.f32 %v14061_v47, %v1462_v0  ;;  %v1508_v9 = vmul.f32 %v14066_v52, %v1507_v1  ;;  %v14097_v13 = vld [vmem:[%s15710_s0 + $0x38] sm:$0xff]  ;;  %v14100_v14 = vld [vmem:[%s15710_s0 + $0x50] sm:$0xff] }
 0x5e0   :  { %v756_v18 = vadd.f32 %v753_v16, %v752_v15  ;;  %v14103_v15 = vld [vmem:[%s15710_s0 + $0x58] sm:$0xff]  ;;  %v1332_v16 = vadd.f32 %v1328_v44, %v1287_v62  ;;  %v1211_v42 = vmul.f32 %v1208_v28, %v14082_v60  ;;  %v1212_v43 = vmul.f32 %v1208_v28, %v14087_v2  ;;  %v14120_v44 = vld [vmem:[%s15710_s0 + $0x90] sm:$0xff] }
 0x5e1   :  { %760 = vadd.xlane.f32.xlu0 %v759_v17  ;;  %v1333_v17 = vadd.f32 %v1329_v45, %v1288_v63  ;;  %v1240_v49 = vmul.f32 %v14090_v3, %v1237_v33  ;;  %v1241_v62 = vmul.f32 %v14097_v13, %v1237_v33  ;;  %v14129_v63 = vld [vmem:[%s15710_s0 + $0x98] sm:$0xff]  ;;  %v1285_v7 = vmul.f32 %v14100_v14, %v1282_v38 }
 0x5e2   :  { %757 = vadd.xlane.f32.xlu1 %v756_v18  ;;  %v1552_v18 = vstv %s14033_s19  ;;  %v1377_v45 = vadd.f32 %v1373_v54, %v1332_v16  ;;  %v14135_v28 = vld [vmem:[%s15710_s0 + $0xb8] sm:$0xff]  ;;  %v1286_v8 = vmul.f32 %v14103_v15, %v1282_v38  ;;  %v1330_v54 = vmul.f32 %v14110_v31, %v1327_v39  ;;  %v14142_v16 = vld [vmem:[%s15710_s0 + $0xd0] sm:$0xff]  ;;  %s14355_s19 = sld [smem:[#allocation27 + $0x20]] }
 0x5e3   :  { %v1553_v36 = vmul.f32 %v14076_v58, %v1552_v18  ;;  %v1554_v37 = vmul.f32 %v14079_v59, %v1552_v18  ;;  %v1378_v48 = vadd.f32 %v1374_v55, %v1333_v17  ;;  %15721 = vst [vmem:[#allocation136_spill] sm:$0xff] %v14135_v28  ;;  %v1331_v55 = vmul.f32 %v14113_v32, %v1327_v39 }
 0x5e4   :  { %v1422_v17 = vadd.f32 %v1418_v56, %v1377_v45  ;;  %v1244_v33 = vadd.f32 %v1240_v49, %v1211_v42  ;;  %v1245_v11 = vadd.f32 %v1241_v62, %v1212_v43  ;;  %v1375_v38 = vmul.f32 %v14120_v44, %v1372_v50  ;;  %v14162_v45 = vld [vmem:[%s15710_s0 + $0x110] sm:$0xff] }
 0x5e5   :  { %v1423_v10 = vadd.f32 %v1419_v57, %v1378_v48  ;;  %v1376_v31 = vmul.f32 %v14129_v63, %v1372_v50  ;;  %v1420_v39 = vmul.f32 %v14132_v5, %v1417_v51  ;;  %v1421_v32 = vmul.f32 %v14135_v28, %v1417_v51  ;;  %v14165_v48 = vld [vmem:[%s15710_s0 + $0x118] sm:$0xff]  ;;  %s14275_s0 = sld [smem:[#allocation27 + $0x18]] }
 0x5e6   :  { %951 = vadd.xlane.f32.xlu1 %v950_v21  ;;  %v14107_v21 = vstv %s14035_s6  ;;  %v1467_v56 = vadd.f32 %v1463_v4, %v1422_v17  ;;  %v1289_v42 = vadd.f32 %v1285_v7, %v1244_v33  ;;  %v1290_v43 = vadd.f32 %v1286_v8, %v1245_v11  ;;  %s14370_s6 = sld [smem:[#allocation27 + $0x21]] }
 0x5e7   :  { %v1468_v57 = vadd.f32 %v1464_v6, %v1423_v10  ;;  %v1465_v50 = vmul.f32 %v14142_v16, %v1462_v0  ;;  %v1466_v49 = vmul.f32 %v14145_v20, %v1462_v0  ;;  %v1510_v51 = vmul.f32 %v14148_v19, %v1507_v1 }
 0x5e8   :  { %v1511_v62 = vmul.f32 %v14151_v61, %v1507_v1  ;;  %v1512_v28 = vadd.f32 %v1508_v9, %v1467_v56  ;;  %v1334_v4 = vadd.f32 %v1330_v54, %v1289_v42  ;;  %v1335_v17 = vadd.f32 %v1331_v55, %v1290_v43 }
 0x5e9   :  { %v1513_v5 = vadd.f32 %v1509_v12, %v1468_v57  ;;  %v1555_v10 = vmul.f32 %v14162_v45, %v1552_v18  ;;  %v1556_v7 = vmul.f32 %v14165_v48, %v1552_v18  ;;  %v14174_v8 = vstv %s14122_s18  ;;  %s14372_s18 = sld [smem:[#allocation27 + $0x22]] }
 0x5ea   :  { %v14177_v11 = vstv %s14124_s20  ;;  %v1557_v0 = vadd.f32 %v1553_v36, %v1512_v28  ;;  %v1379_v6 = vadd.f32 %v1375_v38, %v1334_v4  ;;  %v1380_v9 = vadd.f32 %v1376_v31, %v1335_v17  ;;  %s14381_s20 = sld [smem:[#allocation27 + $0x23]] }
 0x5eb   :  { %v1558_v1 = vadd.f32 %v1554_v37, %v1513_v5  ;;  %v1215_v12 = vmul.f32 %v14174_v8, %v14002_v22  ;;  %v1216_v18 = vmul.f32 %v14174_v8, %v14007_v23  ;;  %v1248_v54 = vmul.f32 %v14010_v24, %v14177_v11 }
 0x5ec   :  { %v1249_v55 = vmul.f32 %v14013_v25, %v14177_v11  ;;  %v1594_v33 = vadd.f32 %v14107_v21, %v1557_v0  ;;  %v1424_v28 = vadd.f32 %v1420_v39, %v1379_v6  ;;  %v1425_v5 = vadd.f32 %v1421_v32, %v1380_v9 }
 0x5ed   :  { %v1595_v36 = vadd.f32 %v14107_v21, %v1558_v1  ;;  %v1252_v31 = vadd.f32 %v1248_v54, %v1215_v12  ;;  %v14196_v38 = vstv %s14157_s22  ;;  %v14199_v56 = vstv %s14159_s23  ;;  %s14383_s22 = sld [smem:[#allocation28 + $0x3]]  ;;  %s15732_s23 = sld [smem:[#allocation61_spill]] }
 0x5ee   :  { %v1253_v37 = vadd.f32 %v1249_v55, %v1216_v18  ;;  %v1598_v57 = vmul.f32 0.999995, %v1594_v33  ;;  %v1469_v43 = vadd.f32 %v1465_v50, %v1424_v28  ;;  %v1470_v4 = vadd.f32 %v1466_v49, %v1425_v5 }
 0x5ef   :  { %v1599_v42 = vmul.f32 0.999995, %v1595_v36  ;;  %v1293_v32 = vmul.f32 %v14018_v26, %v14196_v38  ;;  %v1294_v39 = vmul.f32 %v14021_v27, %v14196_v38  ;;  %v1338_v17 = vmul.f32 %v14028_v29, %v14199_v56 }
 0x5f0   :  { %v1339_v0 = vmul.f32 %v14031_v30, %v14199_v56  ;;  %v1602_v1 = vmax.f32 %v1598_v57, 0.0  ;;  %v1514_v9 = vadd.f32 %v1510_v51, %v1469_v43  ;;  %v1515_v12 = vadd.f32 %v1511_v62, %v1470_v4 }
 0x5f1   :  { %v1603_v6 = vmax.f32 %v1599_v42, 0.0  ;;  %v1297_v50 = vadd.f32 %v1293_v32, %v1252_v31  ;;  %v1298_v49 = vadd.f32 %v1294_v39, %v1253_v37  ;;  %v1382_v18 = vstv %s14179_s26  ;;  %s15735_s26 = sld [smem:[#allocation69_spill]] }
 0x5f2   :  { %v1427_v54 = vstv %s14181_s28  ;;  %v1559_v33 = vadd.f32 %v1555_v10, %v1514_v9  ;;  %v1560_v36 = vadd.f32 %v1556_v7, %v1515_v12  ;;  %v1383_v28 = vmul.f32 %v14040_v34, %v1382_v18  ;;  %s13433_s28 = smov 120  }
 0x5f3   :  { %v1606_v55 = vadd.f32 %v1603_v6, %v1602_v1  ;;  %v1342_v5 = vadd.f32 %v1338_v17, %v1297_v50  ;;  %v1343_v30 = vadd.f32 %v1339_v0, %v1298_v49  ;;  %v1384_v57 = vmul.f32 %v14043_v35, %v1382_v18 }
 0x5f4   :  { %v1428_v51 = vmul.f32 %v14048_v40, %v1427_v54  ;;  %v1596_v62 = vadd.f32 %v14107_v21, %v1559_v33  ;;  %v1597_v31 = vadd.f32 %v14107_v21, %v1560_v36  ;;  %v1429_v37 = vmul.f32 %v14051_v41, %v1427_v54 }
 0x5f5   :  { %1607 = vadd.xlane.f32.xlu0 %v1606_v55  ;;  %v1472_v42 = vstv %s14193_s13  ;;  %v1387_v10 = vadd.f32 %v1383_v28, %v1342_v5  ;;  %v1388_v7 = vadd.f32 %v1384_v57, %v1343_v30  ;;  %v1517_v17 = vstv %s14201_s3  ;;  %s13434_s13 = smov 124   ;;  %s15736_s3 = sld [smem:[#allocation62_spill]] }
 0x5f6   :  { %v1473_v43 = vmul.f32 %v14058_v46, %v1472_v42  ;;  %v1474_v4 = vmul.f32 %v14061_v47, %v1472_v42  ;;  %v1600_v32 = vmul.f32 0.999995, %v1596_v62  ;;  %v1601_v39 = vmul.f32 0.999995, %v1597_v31 }
 0x5f7   :  { %v1562_v0 = vstv %s14203_s29  ;;  %v1432_v1 = vadd.f32 %v1428_v51, %v1387_v10  ;;  %v1433_v6 = vadd.f32 %v1429_v37, %v1388_v7  ;;  %v1518_v9 = vmul.f32 %v14066_v52, %v1517_v17  ;;  %s15739_s29 = sld [smem:[#allocation63_spill]] }
 0x5f8   :  { %v1519_v21 = vmul.f32 %v14069_v53, %v1517_v17  ;;  %v1604_v12 = vmax.f32 %v1600_v32, 0.0  ;;  %v1605_v50 = vmax.f32 %v1601_v39, 0.0  ;;  %v1563_v49 = vmul.f32 %v14076_v58, %v1562_v0 }
 0x5f9   :  { %v1564_v30 = vmul.f32 %v14079_v59, %v1562_v0  ;;  %v1477_v55 = vadd.f32 %v1473_v43, %v1432_v1  ;;  %v1478_v33 = vadd.f32 %v1474_v4, %v1433_v6  ;;  %v14233_v36 = vstv %s14215_s24  ;;  %v15722_v4 = vld [vmem:[#allocation133_spill] sm:$0xff]  ;;  %s15740_s24 = sld [smem:[#allocation72_spill]] }
 0x5fa   :  { %v1217_v28 = vmul.f32 %v14174_v8, %v14082_v60  ;;  %v1609_v5 = vadd.f32 %v1605_v50, %v1604_v12  ;;  %v1218_v57 = vmul.f32 %v14174_v8, %v14087_v2  ;;  %v1250_v51 = vmul.f32 %v14090_v3, %v14177_v11  ;;  %v15724_v50 = vld [vmem:[#allocation135_spill] sm:$0xff] }
 0x5fb   :  { %v1251_v62 = vmul.f32 %v14097_v13, %v14177_v11  ;;  %v1522_v31 = vadd.f32 %v1518_v9, %v1477_v55  ;;  %v1523_v37 = vadd.f32 %v1519_v21, %v1478_v33  ;;  %v1295_v10 = vmul.f32 %v14100_v14, %v14196_v38  ;;  %v15723_v11 = vld [vmem:[#allocation134_spill] sm:$0xff]  ;;  %v15725_v33 = vld [vmem:[#allocation136_spill] sm:$0xff] }
 0x5fc   :  { %v1296_v7 = vmul.f32 %v14103_v15, %v14196_v38  ;;  %1610 = vadd.xlane.f32.xlu0 %v1609_v5  ;;  %v1254_v8 = vadd.f32 %v1250_v51, %v1217_v28  ;;  %v1340_v32 = vmul.f32 %v15722_v4, %v14199_v56  ;;  %v1341_v39 = vmul.f32 %v15723_v11, %v14199_v56 }
 0x5fd   :  { %v1255_v43 = vadd.f32 %v1251_v62, %v1218_v57  ;;  %v1567_v1 = vadd.f32 %v1563_v49, %v1522_v31  ;;  %v1568_v6 = vadd.f32 %v1564_v30, %v1523_v37  ;;  %v1385_v9 = vmul.f32 %v14120_v44, %v1382_v18 }
 0x5fe   :  { %v1386_v21 = vmul.f32 %v14129_v63, %v1382_v18  ;;  %v1299_v38 = vadd.f32 %v1295_v10, %v1254_v8  ;;  %v1430_v55 = vmul.f32 %v15724_v50, %v1427_v54  ;;  %v1431_v28 = vmul.f32 %v15725_v33, %v1427_v54 }
 0x5ff   :  { %v1300_v12 = vadd.f32 %v1296_v7, %v1255_v43  ;;  %v1622_v56 = vadd.f32 %v14233_v36, %v1567_v1  ;;  %v1623_v49 = vadd.f32 %v14233_v36, %v1568_v6  ;;  %v1475_v30 = vmul.f32 %v14142_v16, %v1472_v42 }
 0x600   :  { %v1476_v18 = vmul.f32 %v14145_v20, %v1472_v42  ;;  %v1344_v5 = vadd.f32 %v1340_v32, %v1299_v38  ;;  %v1520_v51 = vmul.f32 %v14148_v19, %v1517_v17  ;;  %v1521_v62 = vmul.f32 %v14151_v61, %v1517_v17 }
 0x601   :  { %v1345_v57 = vadd.f32 %v1341_v39, %v1300_v12  ;;  %v1626_v31 = vmul.f32 0.999995, %v1622_v56  ;;  %v1627_v54 = vmul.f32 0.999995, %v1623_v49  ;;  %v1565_v37 = vmul.f32 %v14162_v45, %v1562_v0 }
 0x602   :  { %v1566_v10 = vmul.f32 %v14165_v48, %v1562_v0  ;;  %v1389_v7 = vadd.f32 %v1385_v9, %v1344_v5  ;;  %v1220_v8 = vstv %s14243_s9  ;;  %v14279_v43 = vstv %s14245_s1  ;;  %s15741_s9 = sld [smem:[#allocation59_spill]]  ;;  %s15742_s1 = sld [smem:[#allocation70_spill]] }
 0x603   :  { %v1390_v42 = vadd.f32 %v1386_v21, %v1345_v57  ;;  %v1630_v32 = vmax.f32 %v1626_v31, 0.0  ;;  %v1631_v17 = vmax.f32 %v1627_v54, 0.0  ;;  %v1221_v39 = vmul.f32 %v1220_v8, %v14002_v22 }
 0x604   :  { %v1222_v1 = vmul.f32 %v1220_v8, %v14007_v23  ;;  %v1434_v6 = vadd.f32 %v1430_v55, %v1389_v7  ;;  %v1258_v0 = vmul.f32 %v14010_v24, %v14279_v43  ;;  %v1259_v9 = vmul.f32 %v14013_v25, %v14279_v43 }
 0x605   :  { %v1435_v38 = vadd.f32 %v1431_v28, %v1390_v42  ;;  %v1634_v21 = vadd.f32 %v1631_v17, %v1630_v32  ;;  %v1302_v12 = vstv %s14255_s4  ;;  %v1347_v56 = vstv %s14259_s2  ;;  %v15726_v42 = vld [vmem:[#allocation129_spill] sm:$0xff]  ;;  %s15743_s4 = sld [smem:[#allocation80_spill]]  ;;  %s15744_s2 = sld [smem:[#allocation71_spill]] }
 0x606   :  { %v14294_v49 = vstv %s14261_s8  ;;  %v1479_v5 = vadd.f32 %v1475_v30, %v1434_v6  ;;  %v1262_v55 = vadd.f32 %v1258_v0, %v1221_v39  ;;  %v1263_v28 = vadd.f32 %v1259_v9, %v1222_v1  ;;  %s15745_s8 = sld [smem:[#allocation73_spill]] }
 0x607   :  { %v1480_v57 = vadd.f32 %v1476_v18, %v1435_v38  ;;  %1635 = vadd.xlane.f32.xlu0 %v1634_v21  ;;  %v1303_v31 = vmul.f32 %v14018_v26, %v1302_v12  ;;  %v1304_v54 = vmul.f32 %v14021_v27, %v1302_v12  ;;  %v1348_v7 = vmul.f32 %v14028_v29, %v1347_v56 }
 0x608   :  { %v1349_v25 = vmul.f32 %v15726_v42, %v1347_v56  ;;  %v1524_v32 = vadd.f32 %v1520_v51, %v1479_v5  ;;  %v1393_v30 = vmul.f32 %v14040_v34, %v14294_v49  ;;  %v1394_v18 = vmul.f32 %v14043_v35, %v14294_v49 }
 0x609   :  { %v1525_v17 = vadd.f32 %v1521_v62, %v1480_v57  ;;  %v1307_v39 = vadd.f32 %v1303_v31, %v1262_v55  ;;  %v1308_v1 = vadd.f32 %v1304_v54, %v1263_v28  ;;  %v1437_v6 = vstv %s14271_s7  ;;  %s15746_s7 = sld [smem:[#allocation78_spill]] }
 0x60a   :  { %v1482_v38 = vstv %s14275_s0  ;;  %v1569_v0 = vadd.f32 %v1565_v37, %v1524_v32  ;;  %v1438_v21 = vmul.f32 %v14048_v40, %v1437_v6  ;;  %v1439_v42 = vmul.f32 %v14051_v41, %v1437_v6  ;;  %s13435_s0 = smov 112  }
 0x60b   :  { %v1570_v9 = vadd.f32 %v1566_v10, %v1525_v17  ;;  %v1352_v51 = vadd.f32 %v1348_v7, %v1307_v39  ;;  %v1353_v62 = vadd.f32 %v1349_v25, %v1308_v1  ;;  %v1483_v5 = vmul.f32 %v14058_v46, %v1482_v38 }
 0x60c   :  { %v1484_v57 = vmul.f32 %v14061_v47, %v1482_v38  ;;  %v1624_v35 = vadd.f32 %v14233_v36, %v1569_v0  ;;  %v1527_v28 = vstv %s14287_s10  ;;  %v1572_v31 = vstv %s14289_s12  ;;  %s15748_s10 = sld [smem:[#allocation76_spill]]  ;;  %s15749_s12 = sld [smem:[#allocation55_spill]] }
 0x60d   :  { %v1625_v55 = vadd.f32 %v14233_v36, %v1570_v9  ;;  %v1397_v54 = vadd.f32 %v1393_v30, %v1352_v51  ;;  %v1398_v37 = vadd.f32 %v1394_v18, %v1353_v62  ;;  %v1528_v10 = vmul.f32 %v14066_v52, %v1527_v28 }
 0x60e   :  { %v1529_v32 = vmul.f32 %v14069_v53, %v1527_v28  ;;  %v1628_v17 = vmul.f32 0.999995, %v1624_v35  ;;  %v1573_v25 = vmul.f32 %v14076_v58, %v1572_v31  ;;  %v1574_v39 = vmul.f32 %v14079_v59, %v1572_v31 }
 0x60f   :  { %v1629_v7 = vmul.f32 0.999995, %v1625_v55  ;;  %v1442_v1 = vadd.f32 %v1438_v21, %v1397_v54  ;;  %v1443_v47 = vadd.f32 %v1439_v42, %v1398_v37  ;;  %v14321_v46 = vstv %s14300_s30  ;;  %s15753_s30 = sld [smem:[#allocation66_spill]] }
 0x610   :  { %v1223_v36 = vmul.f32 %v1220_v8, %v14082_v60  ;;  %v1632_v0 = vmax.f32 %v1628_v17, 0.0  ;;  %v1224_v30 = vmul.f32 %v1220_v8, %v14087_v2  ;;  %v1260_v18 = vmul.f32 %v14090_v3, %v14279_v43 }
 0x611   :  { %v1633_v9 = vmax.f32 %v1629_v7, 0.0  ;;  %v1487_v35 = vadd.f32 %v1483_v5, %v1442_v1  ;;  %v1488_v51 = vadd.f32 %v1484_v57, %v1443_v47  ;;  %v1261_v62 = vmul.f32 %v14097_v13, %v14279_v43 }
 0x612   :  { %v1305_v42 = vmul.f32 %v14100_v14, %v1302_v12  ;;  %v1264_v55 = vadd.f32 %v1260_v18, %v1223_v36  ;;  %v1306_v54 = vmul.f32 %v14103_v15, %v1302_v12  ;;  %v1350_v37 = vmul.f32 %v15722_v4, %v1347_v56 }
 0x613   :  { %v1637_v21 = vadd.f32 %v1633_v9, %v1632_v0  ;;  %v1532_v8 = vadd.f32 %v1528_v10, %v1487_v35  ;;  %v1533_v17 = vadd.f32 %v1529_v32, %v1488_v51  ;;  %v1265_v7 = vadd.f32 %v1261_v62, %v1224_v30 }
 0x614   :  { %v1351_v47 = vmul.f32 %v15723_v11, %v1347_v56  ;;  %v1309_v5 = vadd.f32 %v1305_v42, %v1264_v55  ;;  %v1395_v43 = vmul.f32 %v14120_v44, %v14294_v49  ;;  %v1396_v57 = vmul.f32 %v14129_v63, %v14294_v49 }
 0x615   :  { %1638 = vadd.xlane.f32.xlu0 %v1637_v21  ;;  %v1440_v12 = vmul.f32 %v15724_v50, %v1437_v6  ;;  %v1577_v1 = vadd.f32 %v1573_v25, %v1532_v8  ;;  %v1578_v36 = vadd.f32 %v1574_v39, %v1533_v17  ;;  %v1310_v0 = vadd.f32 %v1306_v54, %v1265_v7 }
 0x616   :  { %v1441_v10 = vmul.f32 %v15725_v33, %v1437_v6  ;;  %v1354_v32 = vadd.f32 %v1350_v37, %v1309_v5  ;;  %v1485_v56 = vmul.f32 %v14142_v16, %v1482_v38  ;;  %v1486_v9 = vmul.f32 %v14145_v20, %v1482_v38 }
 0x617   :  { %v1530_v30 = vmul.f32 %v14148_v19, %v1527_v28  ;;  %v1652_v18 = vadd.f32 %v14321_v46, %v1577_v1  ;;  %v1653_v49 = vadd.f32 %v14321_v46, %v1578_v36  ;;  %v1355_v25 = vadd.f32 %v1351_v47, %v1310_v0 }
 0x618   :  { %v1531_v39 = vmul.f32 %v14151_v61, %v1527_v28  ;;  %v1399_v6 = vadd.f32 %v1395_v43, %v1354_v32  ;;  %v1575_v35 = vmul.f32 %v14162_v45, %v1572_v31  ;;  %v1576_v38 = vmul.f32 %v14165_v48, %v1572_v31  ;;  %v15727_v43 = vld [vmem:[#allocation128_spill] sm:$0xff] }
 0x619   :  { %v14360_v51 = vstv %s14327_s11  ;;  %v1656_v62 = vmul.f32 0.999995, %v1652_v18  ;;  %v1657_v42 = vmul.f32 0.999995, %v1653_v49  ;;  %v1400_v21 = vadd.f32 %v1396_v57, %v1355_v25  ;;  %s15754_s11 = sld [smem:[#allocation77_spill]] }
 0x61a   :  { %v1227_v55 = vmul.f32 %v14360_v51, %v14002_v22  ;;  %v1444_v54 = vadd.f32 %v1440_v12, %v1399_v6  ;;  %v1228_v28 = vmul.f32 %v14360_v51, %v14007_v23  ;;  %v1267_v37 = vstv %s14334_s17  ;;  %s15755_s17 = sld [smem:[#allocation82_spill]] }
 0x61b   :  { %v14368_v8 = vstv %s14336_s14  ;;  %v1660_v31 = vmax.f32 %v1656_v62, 0.0  ;;  %v1661_v17 = vmax.f32 %v1657_v42, 0.0  ;;  %v1445_v7 = vadd.f32 %v1441_v10, %v1400_v21  ;;  %v15729_v42 = vld [vmem:[#allocation130_spill] sm:$0xff]  ;;  %s15756_s14 = sld [smem:[#allocation74_spill]] }
 0x61c   :  { %v1268_v47 = vmul.f32 %v14010_v24, %v1267_v37  ;;  %v1489_v5 = vadd.f32 %v1485_v56, %v1444_v54  ;;  %v1269_v22 = vmul.f32 %v15727_v43, %v1267_v37  ;;  %v1313_v23 = vmul.f32 %v14018_v26, %v14368_v8  ;;  %v15728_v56 = vld [vmem:[#allocation129_spill] sm:$0xff] }
 0x61d   :  { %v1314_v57 = vmul.f32 %v14021_v27, %v14368_v8  ;;  %v1664_v12 = vadd.f32 %v1661_v17, %v1660_v31  ;;  %v1490_v1 = vadd.f32 %v1486_v9, %v1445_v7  ;;  %v1357_v0 = vstv %s14345_s15  ;;  %s15757_s15 = sld [smem:[#allocation81_spill]] }
 0x61e   :  { %v1272_v36 = vadd.f32 %v1268_v47, %v1227_v55  ;;  %v1534_v24 = vadd.f32 %v1530_v30, %v1489_v5  ;;  %v1273_v10 = vadd.f32 %v1269_v22, %v1228_v28  ;;  %v1358_v32 = vmul.f32 %v14028_v29, %v1357_v0  ;;  %v15730_v47 = vld [vmem:[#allocation131_spill] sm:$0xff]  ;;  %v15731_v5 = vld [vmem:[#allocation132_spill] sm:$0xff] }
 0x61f   :  { %v1359_v18 = vmul.f32 %v15728_v56, %v1357_v0  ;;  %1665 = vadd.xlane.f32.xlu0 %v1664_v12  ;;  %v1535_v26 = vadd.f32 %v1531_v39, %v1490_v1  ;;  %v1402_v27 = vstv %s14353_s16  ;;  %v1447_v25 = vstv %s14355_s19  ;;  %s15758_s16 = sld [smem:[#allocation79_spill]]  ;;  %s15759_s19 = sld [smem:[#allocation75_spill]] }
 0x620   :  { %v1317_v49 = vadd.f32 %v1313_v23, %v1272_v36  ;;  %v1579_v9 = vadd.f32 %v1575_v35, %v1534_v24  ;;  %v1318_v6 = vadd.f32 %v1314_v57, %v1273_v10  ;;  %v1403_v62 = vmul.f32 %v14040_v34, %v1402_v27 }
 0x621   :  { %v1404_v21 = vmul.f32 %v15729_v42, %v1402_v27  ;;  %v1580_v55 = vadd.f32 %v1576_v38, %v1535_v26  ;;  %v1448_v54 = vmul.f32 %v14048_v40, %v1447_v25  ;;  %v1449_v29 = vmul.f32 %v14051_v41, %v1447_v25 }
 0x622   :  { %v1362_v30 = vadd.f32 %v1358_v32, %v1317_v49  ;;  %v1654_v28 = vadd.f32 %v14321_v46, %v1579_v9  ;;  %v1363_v39 = vadd.f32 %v1359_v18, %v1318_v6  ;;  %v1492_v31 = vstv %s14370_s6  ;;  %s15760_s6 = sld [smem:[#allocation83_spill]] }
 0x623   :  { %v1537_v17 = vstv %s14372_s18  ;;  %v1655_v35 = vadd.f32 %v14321_v46, %v1580_v55  ;;  %v1493_v34 = vmul.f32 %v15730_v47, %v1492_v31  ;;  %v1494_v43 = vmul.f32 %v15731_v5, %v1492_v31  ;;  %s15761_s18 = sld [smem:[#allocation84_spill]] }
 0x624   :  { %v1407_v7 = vadd.f32 %v1403_v62, %v1362_v30  ;;  %v1658_v38 = vmul.f32 0.999995, %v1654_v28  ;;  %v1408_v22 = vadd.f32 %v1404_v21, %v1363_v39  ;;  %v1538_v40 = vmul.f32 %v14066_v52, %v1537_v17 }
 0x625   :  { %v1539_v23 = vmul.f32 %v14069_v53, %v1537_v17  ;;  %v1659_v41 = vmul.f32 0.999995, %v1655_v35  ;;  %v1582_v12 = vstv %s14381_s20  ;;  %v1681_v1 = vstv %s14383_s22  ;;  %s15762_s20 = sld [smem:[#allocation67_spill]]  ;;  %s15763_s22 = sld [smem:[#allocation86_spill]] }
 0x626   :  { %v1452_v57 = vadd.f32 %v1448_v54, %v1407_v7  ;;  %v1662_v36 = vmax.f32 %v1658_v38, 0.0  ;;  %v1453_v24 = vadd.f32 %v1449_v29, %v1408_v22  ;;  %v1583_v10 = vmul.f32 %v14076_v58, %v1582_v12 }
 0x627   :  { %v1584_v46 = vmul.f32 %v14079_v59, %v1582_v12  ;;  %v1663_v32 = vmax.f32 %v1659_v41, 0.0  ;;  %v1229_v18 = vmul.f32 %v14360_v51, %v14082_v60  ;;  %v1230_v52 = vmul.f32 %v14360_v51, %v14087_v2 }
 0x628   :  { %v1497_v56 = vadd.f32 %v1493_v34, %v1452_v57  ;;  %v1498_v26 = vadd.f32 %v1494_v43, %v1453_v24  ;;  %v1270_v53 = vmul.f32 %v14090_v3, %v1267_v37  ;;  %v1271_v49 = vmul.f32 %v14097_v13, %v1267_v37 }
 0x629   :  { %v1315_v9 = vmul.f32 %v14100_v14, %v14368_v8  ;;  %v1667_v6 = vadd.f32 %v1663_v32, %v1662_v36  ;;  %v1316_v59 = vmul.f32 %v14103_v15, %v14368_v8  ;;  %v1360_v62 = vmul.f32 %v15722_v4, %v1357_v0 }
 0x62a   :  { %v1542_v58 = vadd.f32 %v1538_v40, %v1497_v56  ;;  %v1543_v42 = vadd.f32 %v1539_v23, %v1498_v26  ;;  %v1274_v60 = vadd.f32 %v1270_v53, %v1229_v18  ;;  %v1275_v21 = vadd.f32 %v1271_v49, %v1230_v52  ;;  %v15734_v56 = vld [vmem:[#allocation121_spill] sm:$0xff] }
 0x62b   :  { %v1361_v2 = vmul.f32 %v15723_v11, %v1357_v0  ;;  %1668 = vadd.xlane.f32.xlu0 %v1667_v6  ;;  %v1405_v3 = vmul.f32 %v14120_v44, %v1402_v27  ;;  %v1406_v14 = vmul.f32 %v14129_v63, %v1402_v27  ;;  %v1450_v54 = vmul.f32 %v15724_v50, %v1447_v25 }
 0x62c   :  { %v1587_v51 = vadd.f32 %v1583_v10, %v1542_v58  ;;  %v1588_v13 = vadd.f32 %v1584_v46, %v1543_v42  ;;  %v1319_v37 = vadd.f32 %v1315_v9, %v1274_v60  ;;  %v1320_v55 = vadd.f32 %v1316_v59, %v1275_v21 }
 0x62d   :  { %v1451_v29 = vmul.f32 %v15725_v33, %v1447_v25  ;;  %v1495_v11 = vmul.f32 %v14142_v16, %v1492_v31  ;;  %v1496_v44 = vmul.f32 %v14145_v20, %v1492_v31  ;;  %v1540_v47 = vmul.f32 %v14148_v19, %v1537_v17 }
 0x62e   :  { %v1682_v30 = vadd.f32 %v1681_v1, %v1587_v51  ;;  %v1683_v15 = vadd.f32 %v1681_v1, %v1588_v13  ;;  %v1364_v8 = vadd.f32 %v1360_v62, %v1319_v37  ;;  %v1365_v4 = vadd.f32 %v1361_v2, %v1320_v55  ;;  %v1591_v62 = vld [vmem:[%s15735_s26] sm:$0xf]  ;;  %s15765_s26 = sld [smem:[#allocation89_spill]] }
 0x62f   :  { %v1541_v50 = vmul.f32 %v14151_v61, %v1537_v17  ;;  %v1585_v5 = vmul.f32 %v14162_v45, %v1582_v12  ;;  %v1586_v16 = vmul.f32 %v14165_v48, %v1582_v12  ;;  %v15733_v12 = vmov 0.0  }
 0x630   :  { %v1686_v28 = vmul.f32 0.999995, %v1682_v30  ;;  %v1687_v0 = vmul.f32 0.999995, %v1683_v15  ;;  %v1409_v39 = vadd.f32 %v1405_v3, %v1364_v8  ;;  %v1410_v35 = vadd.f32 %v1406_v14, %v1365_v4 }
 0x631   :  { %v1614_v53 = vlaneseq }
 0x632   :  { %v1690_v7 = vmax.f32 %v1686_v28, 0.0  ;;  %v1691_v63 = vmax.f32 %v1687_v0, 0.0  ;;  %v1454_v27 = vadd.f32 %v1450_v54, %v1409_v39  ;;  %v1455_v34 = vadd.f32 %v1451_v29, %v1410_v35 }
 0x633   :  { %v1615_v9 = vshrl.u32 %v1614_v53, 7  ;;  %v14459_v53 = vld [vmem:[%s15739_s29] sm:$0xff] }
 0x634   :  { %v1694_v43 = vadd.f32 %v1691_v63, %v1690_v7  ;;  %v1499_v33 = vadd.f32 %v1495_v11, %v1454_v27  ;;  %v1500_v25 = vadd.f32 %v1496_v44, %v1455_v34 }
 0x635   :  { %v14438_v58 = vsub.s32 0, %v1615_v9  ;;  %v1644_v59 = vsub.s32 1, %v1615_v9  ;;  %v1674_v42 = vsub.s32 2, %v1615_v9  ;;  %v1704_v15 = vsub.s32 3, %v1615_v9 }
 0x636   :  { %1695 = vadd.xlane.f32.xlu0 %v1694_v43  ;;  %v1544_v38 = vadd.f32 %v1540_v47, %v1499_v33  ;;  %v1545_v22 = vadd.f32 %v1541_v50, %v1500_v25 }
 0x637   :  { %v1617_v60 = vrot.slane %v1591_v62, %v14438_v58  ;;  %v1645_v2 = vrot.slane %v1591_v62, %v1644_v59  ;;  %v1675_v55 = vrot.slane %v1591_v62, %v1674_v42  ;;  %v1705_v39 = vrot.slane %v1591_v62, %v1704_v15 }
 0x638   :  { %v1589_v40 = vadd.f32 %v1585_v5, %v1544_v38  ;;  %v1590_v20 = vadd.f32 %v1586_v16, %v1545_v22 }
 0x63a   :  { %v1684_v31 = vadd.f32 %v1681_v1, %v1589_v40  ;;  %v1685_v23 = vadd.f32 %v1681_v1, %v1590_v20  ;;  %v14433_v1 = vld [vmem:[%s15732_s23] sm:$0xff]  ;;  %s15764_s23 = sld [smem:[#allocation64_spill]] }
 0x63c   :  { %v1688_v19 = vmul.f32 0.999995, %v1684_v31  ;;  %v1689_v41 = vmul.f32 0.999995, %v1685_v23 }
 0x63e   :  { %v1692_v57 = vmax.f32 %v1688_v19, 0.0  ;;  %v1693_v36 = vmax.f32 %v1689_v41, 0.0  ;;  %v15737_v19 = vld [vmem:[#allocation126_spill] sm:$0xff] }
 0x640   :  { %v1697_v61 = vadd.f32 %v1693_v36, %v1692_v57  ;;  %v15738_v57 = vld [vmem:[#allocation127_spill] sm:$0xff] }
 0x642   :  { %1698 = vadd.xlane.f32.xlu0 %v1697_v61 }
 0x66e   :  { %v761_v45 = vpop.xlane.xlu0 %760 }
 0x66f   :  { %v763_v17 = vmul.f32 0.00390625, %v761_v45  ;;  %v758_v24 = vpop.xlane.xlu1 %757 }
 0x670   :  { %v762_v10 = vmul.f32 0.00390625, %v758_v24 }
 0x672   :  { %v11990_v46 = vpack.c.bf16 %v763_v17, %v762_v10 }
 0x673   :  { %v952_v48 = vpop.xlane.xlu1 %951 }
 0x674   :  { %11991 = vmatprep.subr.bf16.mxu1 %v11990_v46  ;;  %v953_v32 = vmul.f32 0.00390625, %v952_v48 }
 0x675   :  { %11993 = vmatpush3.bf16.msra.mxu1 %v11990_v46 }
 0x676   :  { %11235 = vmatprep.subr.mxu1 %v15733_v12 }
 0x678   :  { %11233 = vmatmul.mubr.msk.f32.vlgmr.msra.gmra.mrb[4].mxu1 %vm530_vm0, %v15734_v56 }
 0x679   :  { %11236 = vmatpush3.msra.mxu1 %v953_v32  ;;  %11237 = vmatprep.mubr.msk.f32.mxu1 %vm13432_vm2, %v15733_v12 }
 0x67c   :  { %11238 = vmatmul.mubr.msk.f32.vlgmr.msra.gmra.mrb[6].mxu1 %vm858_vm1, %v14433_v1 }
 0x67d   :  { %1190 = vmatprep.mubr.f32.mxu1 %v15733_v12 }
 0x682   :  { %v1608_v18 = vpop.xlane.xlu0 %1607 }
 0x683   :  { %v1612_v21 = vmul.f32 0.00390625, %v1608_v18  ;;  %v14449_v18 = vld [vmem:[%s15736_s3] sm:$0xff] }
 0x685   :  { %v1618_v14 = vmul.f32 %v1617_v60, %v1612_v21  ;;  %v1991_v21 = vld [vmem:[%s15740_s24 + $0x8] sm:$0xff] }
 0x689   :  { %v1611_v52 = vpop.xlane.xlu0 %1610 }
 0x68a   :  { %v1613_v13 = vmul.f32 0.00390625, %v1611_v52 }
 0x68c   :  { %v1619_v8 = vmul.f32 %v1617_v60, %v1613_v13  ;;  %v1990_v60 = vld [vmem:[%s15740_s24] sm:$0xff] }
 0x694   :  { %v1636_v26 = vpop.xlane.xlu0 %1635 }
 0x695   :  { %v1640_v51 = vmul.f32 0.00390625, %v1636_v26  ;;  %v14456_v26 = vld [vmem:[%s15736_s3 + $0x8] sm:$0xff]  ;;  %s15767_s3 = sld [smem:[#allocation87_spill]] }
 0x697   :  { %v1646_v30 = vmul.f32 %v1645_v2, %v1640_v51 }
 0x699   :  { %v1648_v11 = vadd.f32 %v1646_v30, %v1618_v14  ;;  %v1119_v30 = vld [vmem:[%s15741_s9 + $0x8] sm:$0xff] }
 0x6a2   :  { %v1639_v49 = vpop.xlane.xlu0 %1638 }
 0x6a3   :  { %v1641_v37 = vmul.f32 0.00390625, %v1639_v49 }
 0x6a5   :  { %v1647_v4 = vmul.f32 %v1645_v2, %v1641_v37  ;;  %v12002_v2 = vpack.c.bf16 %v1991_v21, %v1990_v60  ;;  %v1118_v37 = vld [vmem:[%s15741_s9] sm:$0xff]  ;;  %v2449_v60 = vld [vmem:[%s15743_s4 + $0x30] sm:$0xff]  ;;  %v2450_v21 = vld [vmem:[%s15743_s4 + $0x38] sm:$0xff]  ;;  %s15770_s9 = sld [smem:[#allocation91_spill]] }
 0x6a7   :  { %v1649_v44 = vadd.f32 %v1647_v4, %v1619_v8  ;;  %v1992_v4 = vld [vmem:[%s15740_s24 + $0x10] sm:$0xff] }
 0x6ac   :  { %v1666_v6 = vpop.xlane.xlu0 %1665 }
 0x6ad   :  { %v1670_v54 = vmul.f32 0.00390625, %v1666_v6 }
 0x6af   :  { %v1676_v0 = vmul.f32 %v1675_v55, %v1670_v54 }
 0x6b1   :  { %v1678_v47 = vadd.f32 %v1676_v0, %v1648_v11  ;;  %v1994_v11 = vld [vmem:[%s15740_s24 + $0x20] sm:$0xff]  ;;  %v1995_v0 = vld [vmem:[%s15740_s24 + $0x28] sm:$0xff] }
 0x6b8   :  { %v1669_v3 = vpop.xlane.xlu0 %1668 }
 0x6b9   :  { %v1671_v29 = vmul.f32 0.00390625, %v1669_v3 }
 0x6bb   :  { %v1677_v7 = vmul.f32 %v1675_v55, %v1671_v29  ;;  %v1892_v55 = vld [vmem:[%s15742_s1] sm:$0xf]  ;;  %v1993_v29 = vld [vmem:[%s15740_s24 + $0x18] sm:$0xff]  ;;  %s15771_s1 = sld [smem:[#allocation92_spill]] }
 0x6bd   :  { %v1679_v34 = vadd.f32 %v1677_v7, %v1649_v44  ;;  %v1997_v44 = vld [vmem:[%s15740_s24 + $0x38] sm:$0xff] }
 0x6c3   :  { %v1696_v28 = vpop.xlane.xlu0 %1695 }
 0x6c4   :  { %v1700_v35 = vmul.f32 0.00390625, %v1696_v28  ;;  %v12006_v28 = vpack.c.bf16 %v1993_v29, %v1992_v4  ;;  %v2454_v4 = vld [vmem:[%s15743_s4 + $0x58] sm:$0xff]  ;;  %v2471_v29 = vld [vmem:[%s15743_s4 + $0xe0] sm:$0xff] }
 0x6c6   :  { %v1706_v63 = vmul.f32 %v1705_v39, %v1700_v35  ;;  %v1996_v35 = vld [vmem:[%s15740_s24 + $0x30] sm:$0xff] }
 0x6c7   :  { %v12014_v7 = vpack.c.bf16 %v1997_v44, %v1996_v35  ;;  %v2456_v35 = vld [vmem:[%s15743_s4 + $0x68] sm:$0xff]  ;;  %v2473_v44 = vld [vmem:[%s15743_s4 + $0xf0] sm:$0xff] }
 0x6c8   :  { %v1708_v5 = vadd.f32 %v1706_v63, %v1678_v47  ;;  %v1998_v47 = vld [vmem:[%s15740_s24 + $0x40] sm:$0xff]  ;;  %s15769_s24 = sld [smem:[#allocation88_spill]] }
 0x6c9   :  { %v2459_v63 = vld [vmem:[%s15743_s4 + $0x80] sm:$0xff] }
 0x6cf   :  { %v1699_v27 = vpop.xlane.xlu0 %1698 }
 0x6d0   :  { %v1701_v50 = vmul.f32 0.00390625, %v1699_v27  ;;  %v2460_v27 = vld [vmem:[%s15743_s4 + $0x88] sm:$0xff] }
 0x6d2   :  { %v1707_v43 = vmul.f32 %v1705_v39, %v1701_v50  ;;  %v12010_v39 = vpack.c.bf16 %v1995_v0, %v1994_v11 }
 0x6d4   :  { %v1709_v33 = vadd.f32 %v1707_v43, %v1679_v34  ;;  %v12058_v34 = vpack.c.bf16 %v2460_v27, %v2459_v63  ;;  %v2457_v27 = vld [vmem:[%s15743_s4 + $0x70] sm:$0xff] }
 0x6d6   :  { %v12578_v25 = vpack.i.bf16 %v1709_v33, %v1708_v5  ;;  %v11994_v32 = vpack.c.bf16 %v1709_v33, %v1708_v5 }
 0x6d8   :  { %12579 = vrot.lane.b32.xlu0 %v12578_v25, %s13433_s28  ;;  %v10539_v25 = vld [vmem:[%s15744_s2] ss:$0 sm:$0xff]  ;;  %s15773_s2 = sld [smem:[#allocation96_spill]] }
 0x6dc   :  { %1718 = vrot.lane.b32.xlu0 %v1709_v33, %s13434_s13 }
 0x74a   :  { %v12580_v24 = vpop.permute.xlu0 %12579 }
 0x74b   :  { %v14444_v16 = vpop.f32.mrb[4].mxu1  ;;  %v12582_v10 = vunpack.i.h.bf16 %v12580_v24  ;;  %v12581_v46 = vunpack.i.l.bf16 %v12580_v24 }
 0x74c   :  { %v830_v38 = vpop.f32.mrb[5].mxu1 }
 0x74d   :  { %v831_v22 = vadd.f32 1e-05, %v830_v38  ;;  %v11998_v52 = vpack.c.bf16 %v12582_v10, %v12581_v46  ;;  %v2445_v10 = vld [vmem:[%s15743_s4 + $0x10] sm:$0xff]  ;;  %v2446_v46 = vld [vmem:[%s15743_s4 + $0x18] sm:$0xff] }
 0x74e   :  { %v1719_v15 = vpop.permute.xlu0 %1718 }
 0x74f   :  { %12594 = vrsqrt.f32 %v831_v22  ;;  %v1023_v40 = vpop.f32.mrb[6].mxu1 }
 0x750   :  { %1029 = vperm.xlu1 %12577, %v1023_v40   ;;  %v11239_v20 = vpop.f32.mrb[7].mxu1 }
 0x759   :  { %v12595_v31 = vpop.eup %12594 }
 0x75a   :  { %843 = vperm.xlu0 %12576, %v12595_v31  }
 0x7cf   :  { %v1030_v23 = vpop.permute.xlu1 %1029 }
 0x7d0   :  { %v1032_v41 = vsub.f32 %v15737_v19, %v1030_v23  ;;  %v1033_v36 = vsub.f32 %v15738_v57, %v1030_v23  ;;  %v2443_v23 = vld [vmem:[%s15743_s4] sm:$0xff]  ;;  %v2444_v19 = vld [vmem:[%s15743_s4 + $0x8] sm:$0xff]  ;;  %v2461_v57 = vld [vmem:[%s15743_s4 + $0x90] sm:$0xff] }
 0x7d2   :  { %v1034_v61 = vmul.f32 %v1032_v41, %v1032_v41  ;;  %v1035_v45 = vmul.f32 %v1033_v36, %v1033_v36 }
 0x7d4   :  { %v1036_v17 = vadd.f32 %v1035_v45, %v1034_v61  ;;  %v12060_v45 = vpack.c.bf16 %v2444_v19, %v2443_v23 }
 0x7d6   :  { %1037 = vadd.xlane.f32.xlu1 %v1036_v17 }
 0x863   :  { %v1038_v48 = vpop.xlane.xlu1 %1037 }
 0x864   :  { %v1039_v56 = vmul.f32 0.00390625, %v1038_v48  ;;  %v2463_v48 = vld [vmem:[%s15743_s4 + $0xa0] sm:$0xff] }
 0x866   :  { %11241 = vmatpush3.msra.mxu0 %v1039_v56  ;;  %v12064_v56 = vpack.c.bf16 %v2446_v46, %v2445_v10 }
 0x867   :  { %11243 = vmatmul.mubr.msk.f32.vlgmr.msra.gmra.mrb[4].mxu0 %vm858_vm1, %v14433_v1  ;;  %11995 = vmatprep.subr.bf16.mxu0 %v11994_v32  ;;  %v14466_v1 = vld [vmem:[%s15739_s29 + $0x8] sm:$0xff]  ;;  %s15768_s29 = sld [smem:[#allocation90_spill]] }
 0x868   :  { %11997 = vmatpush3.bf16.msra.mxu0 %v11994_v32  ;;  %11249 = vmatprep.mubr.msk.f32.mxu0 %vm530_vm0, %v14449_v18  ;;  %v2464_v32 = vld [vmem:[%s15743_s4 + $0xa8] sm:$0xff] }
 0x869   :  { %11999 = vmatprep.subr.bf16.mxu0 %v11998_v52 }
 0x86b   :  { %11250 = vmatmul.mubr.msk.f32.vlgmr.msra.gmra.mrb[6].mxu0 %vm530_vm0, %v14456_v26 }
 0x86c   :  { %12001 = vmatpush3.bf16.msra.mxu0 %v11998_v52  ;;  %11256 = vmatprep.mubr.msk.f32.mxu0 %vm530_vm0, %v14459_v53  ;;  %v12066_v52 = vpack.c.bf16 %v2464_v32, %v2463_v48  ;;  %v2329_v48 = vld [vmem:[%s15746_s7] sm:$0xff]  ;;  %v2330_v32 = vld [vmem:[%s15746_s7 + $0x8] sm:$0xff] }
 0x86d   :  { %12003 = vmatprep.subr.bf16.mxu0 %v12002_v2 }
 0x873   :  { %11257 = vmatmul.mubr.msk.f32.vlgmr.msra.gmra.mrb[6].mxu0 %vm530_vm0, %v14466_v1 }
 0x874   :  { %12005 = vmatpush3.bf16.msra.mxu0 %v12002_v2  ;;  %v2467_v2 = vld [vmem:[%s15743_s4 + $0xc0] sm:$0xff] }
 0x875   :  { %12007 = vmatprep.subr.bf16.mxu0 %v12006_v28 }
 0x878   :  { %12009 = vmatpush3.bf16.msra.mxu0 %v12006_v28  ;;  %v2472_v28 = vld [vmem:[%s15743_s4 + $0xe8] sm:$0xff] }
 0x879   :  { %12011 = vmatprep.subr.bf16.mxu0 %v12010_v39  ;;  %v12082_v0 = vpack.c.bf16 %v2472_v28, %v2471_v29  ;;  %v2337_v29 = vld [vmem:[%s15746_s7 + $0x40] sm:$0xff]  ;;  %v2338_v28 = vld [vmem:[%s15746_s7 + $0x48] sm:$0xff] }
 0x87c   :  { %12013 = vmatpush3.bf16.msra.mxu0 %v12010_v39  ;;  %v2455_v39 = vld [vmem:[%s15743_s4 + $0x60] sm:$0xff] }
 0x87d   :  { %12015 = vmatprep.subr.bf16.mxu0 %v12014_v7 }
 0x880   :  { %12017 = vmatpush3.bf16.msra.mxu0 %v12014_v7  ;;  %v2474_v7 = vld [vmem:[%s15743_s4 + $0xf8] sm:$0xff] }
 0x881   :  { %11280 = vmatprep.subr.mxu0 %v1998_v47  ;;  %v12086_v63 = vpack.c.bf16 %v2474_v7, %v2473_v44  ;;  %v2339_v44 = vld [vmem:[%s15746_s7 + $0x50] sm:$0xff]  ;;  %v2340_v7 = vld [vmem:[%s15746_s7 + $0x58] sm:$0xff] }
 0x884   :  { %11281 = vmatpush3.msra.mxu0 %v1998_v47  ;;  %v12084_v47 = vpack.c.bf16 %v2456_v35, %v2455_v39  ;;  %v12044_v39 = vpack.c.bf16 %v2338_v28, %v2337_v29  ;;  %v2585_v29 = vld [vmem:[%s15748_s10 + $0xd8] sm:$0xff] }
 0x885   :  { %12059 = vmatprep.subr.bf16.mxu0 %v12058_v34  ;;  %v2458_v34 = vld [vmem:[%s15743_s4 + $0x78] sm:$0xff] }
 0x93a   :  { %v1106_v49 = vpop.f32.mrb[4].mxu0 }
 0x93b   :  { %v1107_v9 = vadd.f32 1e-05, %v1106_v49  ;;  %v11244_v6 = vpop.f32.mrb[5].mxu0  ;;  %v2447_v49 = vld [vmem:[%s15743_s4 + $0x20] sm:$0xff] }
 0x93c   :  { %v2465_v6 = vld [vmem:[%s15743_s4 + $0xb0] sm:$0xff] }
 0x93d   :  { %12596 = vrsqrt.f32 %v1107_v9  ;;  %v2448_v9 = vld [vmem:[%s15743_s4 + $0x28] sm:$0xff] }
 0x946   :  { %v11258_v59 = vpop.f32.mrb[6].mxu0 }
 0x947   :  { %v12597_v62 = vpop.eup %12596  ;;  %v1881_v42 = vpop.f32.mrb[7].mxu0  ;;  %v12418_v8 = vadd.f32 %v11258_v59, %v1719_v15  ;;  %v2466_v59 = vld [vmem:[%s15743_s4 + $0xb8] sm:$0xff] }
 0x948   :  { %1113 = vperm.xlu1 %12577, %v12597_v62   ;;  %v12068_v62 = vpack.c.bf16 %v2448_v9, %v2447_v49  ;;  %v2331_v9 = vld [vmem:[%s15746_s7 + $0x10] sm:$0xff] }
 0x94c   :  { %1716 = vrot.lane.b32.xlu1 %v1708_v5, %s13434_s13  ;;  %s15766_s13 = sld [smem:[#allocation85_spill]] }
 0x9c7   :  { %v1114_v51 = vpop.permute.xlu1 %1113 }
 0x9c8   :  { %v1116_v3 = vmul.f32 %v1114_v51, %v1032_v41  ;;  %v1117_v13 = vmul.f32 %v1114_v51, %v1033_v36  ;;  %v2462_v36 = vld [vmem:[%s15743_s4 + $0x98] sm:$0xff]  ;;  %v2468_v51 = vld [vmem:[%s15743_s4 + $0xc8] sm:$0xff] }
 0x9c9   :  { %v12062_v24 = vpack.c.bf16 %v2462_v36, %v2461_v57 }
 0x9ca   :  { %1126 = vmatprep.subr.mxu1 %v1117_v13  ;;  %v12074_v13 = vpack.c.bf16 %v2468_v51, %v2467_v2  ;;  %v2333_v51 = vld [vmem:[%s15746_s7 + $0x20] sm:$0xff] }
 0x9cb   :  { %1127 = vmatpush1.msra.mxu1 %v1116_v3  ;;  %v1717_v14 = vpop.permute.xlu1 %1716  ;;  %v12072_v3 = vpack.c.bf16 %v2450_v21, %v2449_v60  ;;  %v2350_v60 = vld [vmem:[%s15746_s7 + $0xa8] sm:$0xff] }
 0x9cc   :  { %10463 = vmatmul.mubr.msk.f32.vlgmr.msra.gmra.mrb[8].mxu1 %vm858_vm1, %v1118_v37  ;;  %11259 = vmatprep.subr.msk.mxu1 %vm1907_vm3, %v1892_v55  ;;  %v12419_v54 = vadd.f32 %v1881_v42, %v1717_v14  ;;  %v12070_v42 = vpack.c.bf16 %v2466_v59, %v2465_v6  ;;  %v2451_v37 = vld [vmem:[%s15743_s4 + $0x40] sm:$0xff]  ;;  %v2469_v14 = vld [vmem:[%s15743_s4 + $0xd0] sm:$0xff]  ;;  %v2332_v6 = vld [vmem:[%s15746_s7 + $0x18] sm:$0xff] }
 0x9cd   :  { %1196 = vmatprep.mubr.f32.mxu1 %v15733_v12  ;;  %11260 = vmatpush3.msk.msra.mxu1 %vm1907_vm3, %v1892_v55  ;;  %v2452_v55 = vld [vmem:[%s15743_s4 + $0x48] sm:$0xff]  ;;  %v12032_v21 = vpack.c.bf16 %v2332_v6, %v2331_v9 }
 0x9ce   :  { %v15747_v59 = vld [vmem:[#allocation125_spill] sm:$0xff] }
 0x9cf   :  { %v2579_v9 = vld [vmem:[%s15748_s10 + $0xa8] sm:$0xff] }
 0x9d0   :  { %10464 = vmatmul.mubr.msk.f32.gmra.mrb[10].mxu1 %vm858_vm1, %v1119_v30  ;;  %v2470_v30 = vld [vmem:[%s15743_s4 + $0xd8] sm:$0xff] }
 0x9d1   :  { %11261 = vmatprep.mubr.msk.f32.mxu1 %vm1900_vm4, %v12419_v54  ;;  %v12076_v54 = vpack.c.bf16 %v2452_v55, %v2451_v37  ;;  %v12078_v15 = vpack.c.bf16 %v2470_v30, %v2469_v14  ;;  %v2352_v37 = vld [vmem:[%s15746_s7 + $0xb8] sm:$0xff] }
 0x9d2   :  { %v2336_v30 = vld [vmem:[%s15746_s7 + $0x38] sm:$0xff] }
 0x9d4   :  { %11262 = vmatmul.mubr.msk.f32.vlgmr.msra.gmra.mrb[12].mxu1 %vm1900_vm4, %v12418_v8  ;;  %v2453_v8 = vld [vmem:[%s15743_s4 + $0x50] sm:$0xff]  ;;  %s15772_s4 = sld [smem:[#allocation68_spill]] }
 0x9d5   :  { %v12080_v11 = vpack.c.bf16 %v2454_v4, %v2453_v8 }
 0xa9f   :  { %v14490_v50 = vpop.f32.mrb[8].mxu1 }
 0xaa0   :  { %v1194_v5 = vpop.f32.mrb[9].mxu1 }
 0xaa3   :  { %v14492_v43 = vpop.f32.mrb[10].mxu1 }
 0xaa4   :  { %v14494_v33 = vpop.f32.mrb[11].mxu1 }
 0xaa7   :  { %v11263_v38 = vpop.f32.mrb[12].mxu1 }
 0xaa8   :  { %v1983_v22 = vadd.f32 %v11263_v38, %v10539_v25  ;;  %v1977_v40 = vpop.f32.mrb[13].mxu1 }
 0xaa9   :  { %v1978_v20 = vadd.f32 %v10539_v25, %v1977_v40  ;;  %v2081_v25 = vld [vmem:[%s15745_s8] sm:$0xff]  ;;  %s15774_s8 = sld [smem:[#allocation97_spill]] }
 0xaaa   :  { %v1987_v31 = vmul.f32 0.999995, %v1983_v22  ;;  %11285 = vmatprep.subr.mxu1 %v2081_v25 }
 0xaab   :  { %v1986_v41 = vmul.f32 0.999995, %v1978_v20  ;;  %11286 = vmatpush3.msra.mxu1 %v2081_v25  ;;  %v2342_v25 = vld [vmem:[%s15746_s7 + $0x68] sm:$0xff] }
 0xaac   :  { %v1989_v17 = vmax.f32 %v1987_v31, 0.0 }
 0xaad   :  { %v1988_v61 = vmax.f32 %v1986_v41, 0.0 }
 0xaaf   :  { %11282 = vmatprep.mubr.msk.f32.mxu0 %vm1999_vm5, %v1988_v61  ;;  %v2345_v61 = vld [vmem:[%s15746_s7 + $0x80] sm:$0xff] }
 0xab0   :  { %11283 = vmatmul.mubr.msk.f32.vlgmr.msra.gmra.mrb[8].mxu0 %vm1999_vm5, %v1989_v17 }
 0xab1   :  { %12061 = vmatpush3.bf16.msra.mxu0 %v12060_v45  ;;  %2546 = vmatprep.mubr.f32.mxu0 %v1194_v5  ;;  %v12088_v5 = vpack.c.bf16 %v2458_v34, %v2457_v27  ;;  %v2346_v45 = vld [vmem:[%s15746_s7 + $0x88] sm:$0xff]  ;;  %v12048_v27 = vpack.c.bf16 %v2340_v7, %v2339_v44 }
 0xab2   :  { %12063 = vmatprep.subr.bf16.mxu0 %v12062_v24  ;;  %v12026_v46 = vpack.c.bf16 %v2346_v45, %v2345_v61  ;;  %v2577_v61 = vld [vmem:[%s15748_s10 + $0x98] sm:$0xff]  ;;  %v2587_v44 = vld [vmem:[%s15748_s10 + $0xe8] sm:$0xff] }
 0xab5   :  { %12065 = vmatpush3.bf16.msra.mxu0 %v12064_v56  ;;  %v2347_v56 = vld [vmem:[%s15746_s7 + $0x90] sm:$0xff] }
 0xab6   :  { %12067 = vmatprep.subr.bf16.mxu0 %v12066_v52  ;;  %v14553_v52 = vpop.permute.xlu0 %843 }
 0xab9   :  { %12069 = vmatpush3.bf16.msra.mxu0 %v12068_v62  ;;  %v852_v62 = vmul.f32 %v14553_v52, %v15747_v59  ;;  %v15752_v59 = vld [vmem:[#allocation122_spill] sm:$0xff] }
 0xaba   :  { %12071 = vmatprep.subr.bf16.mxu0 %v12070_v42  ;;  %v2349_v42 = vld [vmem:[%s15746_s7 + $0xa0] sm:$0xff] }
 0xabb   :  { %v12034_v2 = vpack.c.bf16 %v2350_v60, %v2349_v42  ;;  %v2562_v60 = vld [vmem:[%s15748_s10 + $0x20] sm:$0xff] }
 0xabd   :  { %12073 = vmatpush3.bf16.msra.mxu0 %v12072_v3  ;;  %v2334_v3 = vld [vmem:[%s15746_s7 + $0x28] sm:$0xff] }
 0xabe   :  { %12075 = vmatprep.subr.bf16.mxu0 %v12074_v13  ;;  %v2351_v13 = vld [vmem:[%s15746_s7 + $0xb0] sm:$0xff]  ;;  %v12036_v55 = vpack.c.bf16 %v2334_v3, %v2333_v51  ;;  %v2581_v51 = vld [vmem:[%s15748_s10 + $0xb8] sm:$0xff] }
 0xabf   :  { %v12038_v14 = vpack.c.bf16 %v2352_v37, %v2351_v13  ;;  %v2564_v37 = vld [vmem:[%s15748_s10 + $0x30] sm:$0xff] }
 0xac1   :  { %12077 = vmatpush3.bf16.msra.mxu0 %v12076_v54  ;;  %v2353_v54 = vld [vmem:[%s15746_s7 + $0xc0] sm:$0xff] }
 0xac2   :  { %12079 = vmatprep.subr.bf16.mxu0 %v12078_v15  ;;  %v2354_v15 = vld [vmem:[%s15746_s7 + $0xc8] sm:$0xff] }
 0xac3   :  { %v12042_v4 = vpack.c.bf16 %v2354_v15, %v2353_v54  ;;  %v2566_v15 = vld [vmem:[%s15748_s10 + $0x40] sm:$0xff] }
 0xac5   :  { %12081 = vmatpush3.bf16.msra.mxu0 %v12080_v11  ;;  %v2355_v11 = vld [vmem:[%s15746_s7 + $0xd0] sm:$0xff] }
 0xac6   :  { %12083 = vmatprep.subr.bf16.mxu0 %v12082_v0  ;;  %v2356_v0 = vld [vmem:[%s15746_s7 + $0xd8] sm:$0xff] }
 0xac7   :  { %v12046_v35 = vpack.c.bf16 %v2356_v0, %v2355_v11  ;;  %v2568_v0 = vld [vmem:[%s15748_s10 + $0x50] sm:$0xff] }
 0xac9   :  { %12085 = vmatpush3.bf16.msra.mxu0 %v12084_v47  ;;  %v2357_v47 = vld [vmem:[%s15746_s7 + $0xe0] sm:$0xff] }
 0xaca   :  { %12087 = vmatprep.subr.bf16.mxu0 %v12086_v63  ;;  %v2358_v63 = vld [vmem:[%s15746_s7 + $0xe8] sm:$0xff] }
 0xacb   :  { %v12050_v34 = vpack.c.bf16 %v2358_v63, %v2357_v47  ;;  %v2570_v63 = vld [vmem:[%s15748_s10 + $0x60] sm:$0xff] }
 0xacd   :  { %12089 = vmatpush3.bf16.msra.mxu0 %v12088_v5  ;;  %v2341_v5 = vld [vmem:[%s15746_s7 + $0x60] sm:$0xff] }
 0xad0   :  { %2547 = vmatmul.mubr.f32.vlgmr.msra.gmra.mrb[10].mxu0 %v14490_v50 }
 0xad1   :  { %2551 = vmatprep.mubr.f32.mxu0 %v14494_v33 }
 0xad4   :  { %2552 = vmatmul.mubr.f32.gmra.mrb[12].mxu0 %v14492_v43  ;;  %v836_v43 = vadd.f32 1e-05, %v14444_v16 }
 0xad6   :  { %12598 = vrsqrt.f32 %v836_v43  ;;  %v2574_v43 = vld [vmem:[%s15748_s10 + $0x80] sm:$0xff] }
 0xb83   :  { %v11284_v38 = vpop.f32.mrb[8].mxu0 }
 0xb84   :  { %v2072_v22 = vpop.f32.mrb[9].mxu0 }
 0xb85   :  { %11287 = vmatprep.mubr.msk.f32.mxu1 %vm858_vm1, %v2072_v22  ;;  %v2360_v22 = vld [vmem:[%s15746_s7 + $0xf8] sm:$0xff] }
 0xb86   :  { %11288 = vmatmul.mubr.msk.f32.vlgmr.msra.gmra.mrb[14].mxu1 %vm858_vm1, %v11284_v38  ;;  %v2359_v38 = vld [vmem:[%s15746_s7 + $0xf0] sm:$0xff] }
 0xb87   :  { %11294 = vmatprep.mubr.msk.f32.mxu1 %vm530_vm0, %v14449_v18  ;;  %v12599_v18 = vpop.eup %12598 }
 0xba3   :  { %v10857_v40 = vpop.f32.mrb[10].mxu0 }
 0xba4   :  { %v10858_v20 = vpop.f32.mrb[11].mxu0 }
 0xba5   :  { %v14535_v31 = vadd.f32 %v10858_v20, %v10857_v40  ;;  %v12052_v40 = vpack.c.bf16 %v2342_v25, %v2341_v5  ;;  %v12054_v20 = vpack.c.bf16 %v2360_v22, %v2359_v38  ;;  %v2589_v5 = vld [vmem:[%s15748_s10 + $0xf8] sm:$0xff]  ;;  %v2572_v22 = vld [vmem:[%s15748_s10 + $0x70] sm:$0xff] }
 0xba7   :  { %v10860_v50 = vpop.f32.mrb[12].mxu0 }
 0xba8   :  { %v10861_v33 = vpop.f32.mrb[13].mxu0 }
 0xba9   :  { %v14537_v23 = vadd.f32 %v10861_v33, %v10860_v50  ;;  %v2343_v50 = vld [vmem:[%s15746_s7 + $0x70] sm:$0xff]  ;;  %v2344_v33 = vld [vmem:[%s15746_s7 + $0x78] sm:$0xff] }
 0xc59   :  { %v11289_v19 = vpop.f32.mrb[14].mxu1 }
 0xc5a   :  { %v2154_v41 = vpop.f32.mrb[15].mxu1 }
 0xc5b   :  { %v12583_v57 = vpack.i.bf16 %v11289_v19, %v2154_v41  ;;  %v12018_v36 = vpack.c.bf16 %v11289_v19, %v2154_v41  ;;  %2165 = vrot.lane.b32.xlu0 %v2154_v41, %s13433_s28  ;;  %v12056_v41 = vpack.c.bf16 %v2344_v33, %v2343_v50  ;;  %v2678_v50 = vld [vmem:[%s15753_s30] sm:$0xff] }
 0xc5c   :  { %11306 = vmatprep.mubr.msk.f32.mxu0 %vm2680_vm6, %v2678_v50 }
 0xc5d   :  { %12584 = vrot.lane.b32.xlu1 %v12583_v57, %s13435_s0  ;;  %12019 = vmatprep.subr.bf16.mxu1 %v12018_v36 }
 0xc5e   :  { %12021 = vmatpush3.bf16.msra.mxu1 %v12018_v36  ;;  %v2558_v36 = vld [vmem:[%s15748_s10] sm:$0xff] }
 0xc61   :  { %848 = vperm.xlu1 %12577, %v12599_v18   ;;  %11295 = vmatmul.mubr.msk.f32.vlgmr.msra.gmra.mrb[16].mxu1 %vm530_vm0, %v14456_v26  ;;  %v2348_v26 = vld [vmem:[%s15746_s7 + $0x98] sm:$0xff]  ;;  %v2559_v18 = vld [vmem:[%s15748_s10 + $0x8] sm:$0xff] }
 0xc62   :  { %11301 = vmatprep.mubr.msk.f32.mxu1 %vm530_vm0, %v14459_v53  ;;  %v12028_v53 = vpack.c.bf16 %v2330_v32, %v2329_v48  ;;  %v12030_v49 = vpack.c.bf16 %v2348_v26, %v2347_v56  ;;  %v2560_v48 = vld [vmem:[%s15748_s10 + $0x10] sm:$0xff]  ;;  %v2561_v32 = vld [vmem:[%s15748_s10 + $0x18] sm:$0xff]  ;;  %v10554_v56 = vld.sshfl [vmem:[%s15749_s12] sm:$0x33 pattern:$0x76325410] }
 0xc63   :  { %v15751_v26 = vld [vmem:[#allocation123_spill] sm:$0xff]  ;;  %v12096_v6 = vpack.c.bf16 %v2561_v32, %v2560_v48  ;;  %v2679_v32 = vld [vmem:[%s15753_s30 + $0x8] sm:$0xff]  ;;  %s15777_s12 = sld [smem:[#allocation93_spill]]  ;;  %s15778_s30 = sld [smem:[#allocation98_spill]] }
 0xc65   :  { %2167 = vrot.lane.b32.xlu1 %v11289_v19, %s13433_s28  ;;  %v2575_v19 = vld [vmem:[%s15748_s10 + $0x88] sm:$0xff] }
 0xc66   :  { %v12090_v57 = vpack.c.bf16 %v2575_v19, %v2574_v43 }
 0xccf   :  { %v12585_v16 = vpop.permute.xlu1 %12584 }
 0xcd0   :  { %v12587_v17 = vunpack.i.h.bf16 %v12585_v16  ;;  %v12586_v24 = vunpack.i.l.bf16 %v12585_v16  ;;  %v2576_v16 = vld [vmem:[%s15748_s10 + $0x90] sm:$0xff] }
 0xcd2   :  { %v12022_v10 = vpack.c.bf16 %v12587_v17, %v12586_v24  ;;  %v12092_v17 = vpack.c.bf16 %v2559_v18, %v2558_v36  ;;  %v15750_v24 = vld [vmem:[#allocation124_spill] sm:$0xff] }
 0xcd4   :  { %12023 = vmatprep.subr.bf16.mxu1 %v12022_v10 }
 0xcd5   :  { %12025 = vmatpush3.bf16.msra.mxu1 %v12022_v10  ;;  %v851_v10 = vmul.f32 %v14553_v52, %v15750_v24  ;;  %v2605_v52 = vcombine.high %v10554_v56, %v10554_v56 }
 0xcd6   :  { %12027 = vmatprep.subr.bf16.mxu1 %v12026_v46  ;;  %v12094_v46 = vpack.c.bf16 %v2577_v61, %v2576_v16 }
 0xcd8   :  { %11302 = vmatmul.mubr.msk.f32.vlgmr.msra.gmra.mrb[16].mxu1 %vm530_vm0, %v14466_v1  ;;  %v2335_v1 = vld [vmem:[%s15746_s7 + $0x30] sm:$0xff]  ;;  %s15775_s7 = sld [smem:[#allocation94_spill]] }
 0xcd9   :  { %12029 = vmatpush3.bf16.msra.mxu1 %v12028_v53  ;;  %2432 = vmatprep.mubr.f32.mxu1 %v852_v62  ;;  %v12040_v8 = vpack.c.bf16 %v2336_v30, %v2335_v1  ;;  %v2583_v1 = vld [vmem:[%s15748_s10 + $0xc8] sm:$0xff] }
 0xcda   :  { %12031 = vmatprep.subr.bf16.mxu1 %v12030_v49  ;;  %v2578_v49 = vld [vmem:[%s15748_s10 + $0xa0] sm:$0xff] }
 0xcdb   :  { %v12098_v42 = vpack.c.bf16 %v2579_v9, %v2578_v49  ;;  %v2861_v9 = vld [vmem:[%s15755_s17 + $0x30] sm:$0xff] }
 0xcdd   :  { %12033 = vmatpush3.bf16.msra.mxu1 %v12032_v21  ;;  %v2563_v21 = vld [vmem:[%s15748_s10 + $0x28] sm:$0xff] }
 0xcde   :  { %12035 = vmatprep.subr.bf16.mxu1 %v12034_v2  ;;  %v2580_v2 = vld [vmem:[%s15748_s10 + $0xb0] sm:$0xff]  ;;  %v12100_v3 = vpack.c.bf16 %v2563_v21, %v2562_v60  ;;  %v2855_v21 = vld [vmem:[%s15755_s17] sm:$0xff] }
 0xcdf   :  { %v12102_v13 = vpack.c.bf16 %v2581_v51, %v2580_v2  ;;  %v2856_v2 = vld [vmem:[%s15755_s17 + $0x8] sm:$0xff] }
 0xce0   :  { %v849_v45 = vpop.permute.xlu1 %848  ;;  %v12130_v51 = vpack.c.bf16 %v2856_v2, %v2855_v21  ;;  %v3623_v2 = vld [vmem:[%s15767_s3] sm:$0xff] }
 0xce1   :  { %12037 = vmatpush3.bf16.msra.mxu1 %v12036_v55  ;;  %v854_v53 = vmul.f32 %v849_v45, %v15751_v26  ;;  %v853_v62 = vmul.f32 %v849_v45, %v15752_v59  ;;  %v2565_v55 = vld [vmem:[%s15748_s10 + $0x38] sm:$0xff]  ;;  %v10553_v45 = vld [vmem:[%s15754_s11] ss:$0 sm:$0xff]  ;;  %v2166_v26 = vpop.permute.xlu0 %2165  ;;  %s15779_s11 = sld [smem:[#allocation95_spill]] }
 0xce2   :  { %12039 = vmatprep.subr.bf16.mxu1 %v12038_v14  ;;  %v2582_v14 = vld [vmem:[%s15748_s10 + $0xc0] sm:$0xff]  ;;  %v12104_v30 = vpack.c.bf16 %v2565_v55, %v2564_v37 }
 0xce3   :  { %v12106_v54 = vpack.c.bf16 %v2583_v1, %v2582_v14  ;;  %v10551_v37 = vld [vmem:[%s15758_s16] ss:$0 sm:$0xff]  ;;  %s15783_s16 = sld [smem:[#allocation102_spill]] }
 0xce4   :  { %v2168_v59 = vpop.permute.xlu1 %2167  ;;  %v2863_v1 = vld [vmem:[%s15755_s17 + $0x40] sm:$0xff] }
 0xce5   :  { %12041 = vmatpush3.bf16.msra.mxu1 %v12040_v8  ;;  %v2567_v8 = vld [vmem:[%s15748_s10 + $0x48] sm:$0xff] }
 0xce6   :  { %12043 = vmatprep.subr.bf16.mxu1 %v12042_v4  ;;  %v2584_v4 = vld [vmem:[%s15748_s10 + $0xd0] sm:$0xff]  ;;  %v12108_v28 = vpack.c.bf16 %v2567_v8, %v2566_v15  ;;  %v2866_v8 = vld [vmem:[%s15755_s17 + $0x58] sm:$0xff] }
 0xce7   :  { %v12110_v11 = vpack.c.bf16 %v2585_v29, %v2584_v4  ;;  %v2865_v15 = vld [vmem:[%s15755_s17 + $0x50] sm:$0xff]  ;;  %v2867_v29 = vld [vmem:[%s15755_s17 + $0x60] sm:$0xff] }
 0xce8   :  { %v12142_v4 = vpack.c.bf16 %v2866_v8, %v2865_v15 }
 0xce9   :  { %12045 = vmatpush3.bf16.msra.mxu1 %v12044_v39  ;;  %v2569_v39 = vld [vmem:[%s15748_s10 + $0x58] sm:$0xff] }
 0xcea   :  { %12047 = vmatprep.subr.bf16.mxu1 %v12046_v35  ;;  %v2586_v35 = vld [vmem:[%s15748_s10 + $0xe0] sm:$0xff]  ;;  %v12112_v7 = vpack.c.bf16 %v2569_v39, %v2568_v0  ;;  %v2869_v0 = vld [vmem:[%s15755_s17 + $0x70] sm:$0xff]  ;;  %v2870_v39 = vld [vmem:[%s15755_s17 + $0x78] sm:$0xff] }
 0xceb   :  { %v12114_v47 = vpack.c.bf16 %v2587_v44, %v2586_v35 }
 0xced   :  { %12049 = vmatpush3.bf16.msra.mxu1 %v12048_v27  ;;  %v2571_v27 = vld [vmem:[%s15748_s10 + $0x68] sm:$0xff] }
 0xcee   :  { %12051 = vmatprep.subr.bf16.mxu1 %v12050_v34  ;;  %v2588_v34 = vld [vmem:[%s15748_s10 + $0xf0] sm:$0xff]  ;;  %v12116_v25 = vpack.c.bf16 %v2571_v27, %v2570_v63 }
 0xcef   :  { %v12118_v38 = vpack.c.bf16 %v2589_v5, %v2588_v34 }
 0xcf1   :  { %12053 = vmatpush3.bf16.msra.mxu1 %v12052_v40  ;;  %v2573_v40 = vld [vmem:[%s15748_s10 + $0x78] sm:$0xff]  ;;  %s15776_s10 = sld [smem:[#allocation99_spill]] }
 0xcf2   :  { %12055 = vmatprep.subr.bf16.mxu1 %v12054_v20  ;;  %v12120_v20 = vpack.c.bf16 %v2573_v40, %v2572_v22 }
 0xcf5   :  { %12057 = vmatpush3.bf16.msra.mxu1 %v12056_v41 }
 0xcf6   :  { %12091 = vmatprep.subr.bf16.mxu1 %v12090_v57 }
 0xcf8   :  { %2433 = vmatmul.mubr.f32.vlgmr.msra.gmra.mrb[18].mxu1 %v851_v10  ;;  %v2859_v10 = vld [vmem:[%s15755_s17 + $0x20] sm:$0xff] }
 0xcf9   :  { %2437 = vmatprep.mubr.f32.mxu1 %v854_v53  ;;  %12093 = vmatpush3.bf16.msra.mxu1 %v12092_v17 }
 0xcfa   :  { %12095 = vmatprep.subr.bf16.mxu1 %v12094_v46  ;;  %v2860_v46 = vld [vmem:[%s15755_s17 + $0x28] sm:$0xff] }
 0xcfb   :  { %v12122_v53 = vpack.c.bf16 %v2860_v46, %v2859_v10 }
 0xcfc   :  { %2438 = vmatmul.mubr.f32.gmra.mrb[20].mxu1 %v853_v62 }
 0xcfd   :  { %12097 = vmatpush3.bf16.msra.mxu1 %v12096_v6  ;;  %2672 = vmatprep.mubr.f32.mxu1 %v2605_v52  ;;  %v2862_v6 = vld [vmem:[%s15755_s17 + $0x38] sm:$0xff]  ;;  %v10552_v52 = vld [vmem:[%s15757_s15] ss:$0 sm:$0xff]  ;;  %s15782_s15 = sld [smem:[#allocation65_spill]] }
 0xcfe   :  { %12099 = vmatprep.subr.bf16.mxu1 %v12098_v42  ;;  %v12126_v42 = vpack.c.bf16 %v2862_v6, %v2861_v9  ;;  %v2549_v60 = vadd.f32 %v14535_v31, %v10552_v52  ;;  %v2554_v55 = vadd.f32 %v14537_v23, %v10552_v52  ;;  %v3539_v6 = vld [vmem:[%s15765_s26 + $0x10] sm:$0xff]  ;;  %v3540_v52 = vld [vmem:[%s15765_s26 + $0x18] sm:$0xff] }
 0xd01   :  { %12101 = vmatpush3.bf16.msra.mxu1 %v12100_v3  ;;  %v2857_v3 = vld [vmem:[%s15755_s17 + $0x10] sm:$0xff] }
 0xd02   :  { %12103 = vmatprep.subr.bf16.mxu1 %v12102_v13  ;;  %v2858_v13 = vld [vmem:[%s15755_s17 + $0x18] sm:$0xff] }
 0xd03   :  { %v12134_v31 = vpack.c.bf16 %v2858_v13, %v2857_v3 }
 0xd05   :  { %12105 = vmatpush3.bf16.msra.mxu1 %v12104_v30  ;;  %v2864_v30 = vld [vmem:[%s15755_s17 + $0x48] sm:$0xff] }
 0xd06   :  { %12107 = vmatprep.subr.bf16.mxu1 %v12106_v54  ;;  %v12138_v54 = vpack.c.bf16 %v2864_v30, %v2863_v1  ;;  %v13437_v1 = vmov 1.0   ;;  %v10577_v30 = vld [vmem:[%s15768_s29] ss:$0 sm:$0xff]  ;;  %s13446_s29 = smov 48  }
 0xd09   :  { %12109 = vmatpush3.bf16.msra.mxu1 %v12108_v28  ;;  %v2868_v28 = vld [vmem:[%s15755_s17 + $0x68] sm:$0xff]  ;;  %s15780_s17 = sld [smem:[#allocation100_spill]] }
 0xd0a   :  { %12111 = vmatprep.subr.bf16.mxu1 %v12110_v11  ;;  %v12146_v11 = vpack.c.bf16 %v2868_v28, %v2867_v29  ;;  %v14732_v29 = vld [vmem:[%s15769_s24] ss:$0 sm:$0xff]  ;;  %s13447_s24 = smov 40  }
 0xd0d   :  { %12113 = vmatpush3.bf16.msra.mxu1 %v12112_v7  ;;  %v12150_v7 = vpack.c.bf16 %v2870_v39, %v2869_v0 }
 0xd0e   :  { %12115 = vmatprep.subr.bf16.mxu1 %v12114_v47  ;;  %v10558_v47 = vld [vmem:[%s15759_s19] ss:$0 sm:$0xff]  ;;  %s15784_s19 = sld [smem:[#allocation103_spill]] }
 0xd11   :  { %12117 = vmatpush3.bf16.msra.mxu1 %v12116_v25  ;;  %v13436_v25 = vmov 0.0|0.0  }
 0xd12   :  { %12119 = vmatprep.subr.bf16.mxu1 %v12118_v38  ;;  %v10569_v38 = vld [vmem:[%s15760_s6] ss:$0 sm:$0xff]  ;;  %s13438_s6 = smov 88  }
 0xd15   :  { %12121 = vmatpush3.bf16.msra.mxu1 %v12120_v20 }
 0xd16   :  { %12154 = vmatprep.subr.bf16.mxu1 %v13436_v25 }
 0xd18   :  { %2673 = vmatmul.mubr.f32.vlgmr.msra.gmra.mrb[22].mxu1 %v10554_v56  ;;  %v2766_v56 = vld [vmem:[%s15756_s14] sm:$0xff]  ;;  %s15781_s14 = sld [smem:[#allocation101_spill]] }
 0xd19   :  { %11362 = vmatprep.mubr.msk.f32.mxu1 %vm13432_vm2, %v15733_v12 }
 0xdab   :  { %v11303_v33 = vpop.f32.mrb[16].mxu1 }
 0xdac   :  { %v2318_v43 = vpop.f32.mrb[17].mxu1  ;;  %v12420_v62 = vadd.f32 %v11303_v33, %v2168_v59  ;;  %v3283_v33 = vld [vmem:[%s15761_s18] sm:$0xff]  ;;  %v12179_v59 = vpack.c.bf16 %v3540_v52, %v3539_v6 }
 0xdad   :  { %v12421_v49 = vadd.f32 %v2318_v43, %v2166_v26  ;;  %v3284_v43 = vld [vmem:[%s15761_s18 + $0x8] sm:$0xff] }
 0xdcb   :  { %v10819_v19 = vpop.f32.mrb[18].mxu1 }
 0xdcc   :  { %v10820_v41 = vpop.f32.mrb[19].mxu1 }
 0xdcd   :  { %v10821_v57 = vadd.f32 %v10820_v41, %v10819_v19  ;;  %v3209_v41 = vld [vmem:[%s15762_s20] sm:$0x3] }
 0xdcf   :  { %v10822_v36 = vpop.f32.mrb[20].mxu1  ;;  %v2435_v14 = vadd.f32 %v10821_v57, %v10551_v37  ;;  %v12158_v57 = vpack.c.bf16 %v3284_v43, %v3283_v33 }
 0xdd0   :  { %v10823_v18 = vpop.f32.mrb[21].mxu1 }
 0xdd1   :  { %v10824_v16 = vadd.f32 %v10823_v18, %v10822_v36  ;;  %v3285_v36 = vld [vmem:[%s15761_s18 + $0x10] sm:$0xff]  ;;  %v3286_v18 = vld [vmem:[%s15761_s18 + $0x18] sm:$0xff]  ;;  %s13439_s18 = smov 96  }
 0xdd3   :  { %v2440_v23 = vadd.f32 %v10824_v16, %v10551_v37  ;;  %v12161_v16 = vpack.c.bf16 %v3286_v18, %v3285_v36 }
 0xdeb   :  { %v10895_v61 = vpop.f32.mrb[22].mxu1 }
 0xdec   :  { %v10896_v17 = vpop.f32.mrb[23].mxu1 }
 0xded   :  { %v10897_v24 = vadd.f32 %v10896_v17, %v10895_v61  ;;  %v3452_v61 = vld [vmem:[%s15763_s22] sm:$0xff] }
 0xdee   :  { %v3369_v17 = vld [vmem:[%s15764_s23] sm:$0xff] }
 0xdef   :  { %v2675_v48 = vadd.f32 %v10897_v24, %v10553_v45  ;;  %v3453_v45 = vld [vmem:[%s15763_s22 + $0x8] sm:$0xff] }
 0xdf0   :  { %v12167_v24 = vpack.c.bf16 %v3453_v45, %v3452_v61 }
 0xdf1   :  { %11304 = vmatprep.subr.msk.mxu0 %vm2687_vm7, %v2675_v48 }
 0xdf2   :  { %11305 = vmatpush3.msk.msra.mxu0 %vm2687_vm7, %v2675_v48  ;;  %v3370_v48 = vld [vmem:[%s15764_s23 + $0x8] sm:$0xff]  ;;  %s13441_s23 = smov 72  }
 0xdf3   :  { %11307 = vmatmul.mubr.msk.f32.vlgmr.msra.gmra.mrb[14].mxu0 %vm2680_vm6, %v2679_v32  ;;  %11309 = vmatprep.subr.mxu0 %v2766_v56  ;;  %v3537_v32 = vld [vmem:[%s15765_s26] sm:$0xff] }
 0xdf4   :  { %11311 = vmatprep.mubr.msk.f32.mxu0 %vm858_vm1, %v12421_v49  ;;  %11310 = vmatpush3.msra.mxu0 %v2766_v56  ;;  %v3538_v56 = vld [vmem:[%s15765_s26 + $0x8] sm:$0xff]  ;;  %v3455_v49 = vld [vmem:[%s15763_s22 + $0x18] sm:$0xff]  ;;  %s13442_s26 = smov 104  }
 0xdf5   :  { %12123 = vmatprep.subr.bf16.mxu0 %v12122_v53  ;;  %v12175_v26 = vpack.c.bf16 %v3538_v56, %v3537_v32 }
 0xdf7   :  { %11312 = vmatmul.mubr.msk.f32.vlgmr.msra.gmra.mrb[16].mxu0 %vm858_vm1, %v12420_v62  ;;  %v10571_v62 = vld [vmem:[%s15766_s13] ss:$0 sm:$0xff]  ;;  %s13444_s13 = smov 64  }
 0xdf8   :  { %12125 = vmatpush3.bf16.msra.mxu0 %v12122_v53  ;;  %11322 = vmatprep.mubr.msk.f32.mxu0 %vm2871_vm8, %v2549_v60  ;;  %v3454_v53 = vld [vmem:[%s15763_s22 + $0x10] sm:$0xff]  ;;  %s13440_s22 = smov 80  }
 0xdf9   :  { %12127 = vmatprep.subr.bf16.mxu0 %v12126_v42  ;;  %v12171_v9 = vpack.c.bf16 %v3455_v49, %v3454_v53 }
 0xdfc   :  { %12129 = vmatpush3.bf16.msra.mxu0 %v12126_v42 }
 0xdfd   :  { %12131 = vmatprep.subr.bf16.mxu0 %v12130_v51 }
 0xdff   :  { %11323 = vmatmul.mubr.msk.f32.vlgmr.msra.gmra.mrb[18].mxu0 %vm2871_vm8, %v2554_v55  ;;  %v3625_v55 = vld [vmem:[%s15767_s3 + $0x10] sm:$0xff] }
 0xe00   :  { %12133 = vmatpush3.bf16.msra.mxu0 %v12130_v51  ;;  %11333 = vmatprep.mubr.msk.f32.mxu0 %vm2871_vm8, %v2435_v14  ;;  %v3624_v51 = vld [vmem:[%s15767_s3 + $0x8] sm:$0xff] }
 0xe01   :  { %12135 = vmatprep.subr.bf16.mxu0 %v12134_v31  ;;  %v14694_v13 = vpack.c.bf16 %v3624_v51, %v3623_v2 }
 0xe04   :  { %12137 = vmatpush3.bf16.msra.mxu0 %v12134_v31  ;;  %v3626_v31 = vld [vmem:[%s15767_s3 + $0x18] sm:$0xff]  ;;  %s13445_s3 = smov 56  }
 0xe05   :  { %12139 = vmatprep.subr.bf16.mxu0 %v12138_v54  ;;  %v14703_v14 = vpack.c.bf16 %v3626_v31, %v3625_v55 }
 0xe07   :  { %11334 = vmatmul.mubr.msk.f32.vlgmr.msra.gmra.mrb[18].mxu0 %vm2871_vm8, %v2440_v23 }
 0xe08   :  { %12141 = vmatpush3.bf16.msra.mxu0 %v12138_v54 }
 0xe09   :  { %12143 = vmatprep.subr.bf16.mxu0 %v12142_v4 }
 0xe0c   :  { %12145 = vmatpush3.bf16.msra.mxu0 %v12142_v4 }
 0xe0d   :  { %12147 = vmatprep.subr.bf16.mxu0 %v12146_v11 }
 0xec6   :  { %v11308_v35 = vpop.f32.mrb[14].mxu0 }
 0xec7   :  { %v2757_v44 = vpop.f32.mrb[15].mxu0 }
 0xec8   :  { %11344 = vmatprep.mubr.msk.f32.mxu0 %vm2871_vm8, %v2757_v44 }
 0xec9   :  { %11345 = vmatmul.mubr.msk.f32.vlgmr.msra.gmra.mrb[18].mxu0 %vm2871_vm8, %v11308_v35 }
 0xeca   :  { %v11313_v63 = vpop.f32.mrb[16].mxu0  ;;  %12149 = vmatpush3.bf16.msra.mxu0 %v12146_v11 }
 0xecb   :  { %v2846_v27 = vpop.f32.mrb[17].mxu0  ;;  %12151 = vmatprep.subr.bf16.mxu0 %v12150_v7  ;;  %v2852_v5 = vadd.f32 %v11313_v63, %v10558_v47 }
 0xecc   :  { %v2847_v34 = vadd.f32 %v10558_v47, %v2846_v27 }
 0xece   :  { %12153 = vmatpush3.bf16.msra.mxu0 %v12150_v7  ;;  %11355 = vmatprep.mubr.msk.f32.mxu0 %vm2871_vm8, %v2847_v34 }
 0xecf   :  { %12176 = vmatprep.subr.bf16.mxu0 %v12175_v26 }
 0xed1   :  { %11356 = vmatmul.mubr.msk.f32.vlgmr.msra.gmra.mrb[18].mxu0 %vm2871_vm8, %v2852_v5 }
 0xed2   :  { %12178 = vmatpush3.bf16.msra.mxu0 %v12175_v26 }
 0xed3   :  { %12180 = vmatprep.subr.bf16.mxu0 %v12179_v59 }
 0xed6   :  { %12182 = vmatpush3.bf16.msra.mxu0 %v12179_v59 }
 0xed7   :  { %12189 = vmatprep.subr.bf16.mxu0 %v13436_v25 }
 0xfa4   :  { %v11357_v22 = vpop.f32.mrb[18].mxu0 }
 0xfa5   :  { %v3208_v40 = vadd.f32 %v11357_v22, %v10569_v38  ;;  %v3189_v20 = vpop.f32.mrb[19].mxu0 }
 0xfa6   :  { %v3207_v50 = vadd.f32 %v10569_v38, %v3189_v20 }
 0xfa8   :  { %v12155_v19 = vpack.c.bf16 %v3208_v40, %v3207_v50 }
 0xfaa   :  { %12156 = vmatpush3.bf16.msra.mxu1 %v12155_v19 }
 0xfab   :  { %12157 = vmatprep.subr.bf16.mxu1 %v13436_v25 }
 0xfad   :  { %11363 = vmatmul.mubr.msk.f32.vlgmr.msra.gmra.mrb[24].mxu1 %vm530_vm0, %v3209_v41 }
 0xfae   :  { %12159 = vmatpush3.bf16.msra.mxu1 %v12158_v57  ;;  %11373 = vmatprep.mubr.msk.f32.mxu1 %vm13432_vm2, %v15733_v12 }
 0xfaf   :  { %12160 = vmatprep.subr.bf16.mxu1 %v13436_v25 }
 0xfb2   :  { %12162 = vmatpush3.bf16.msra.mxu1 %v12161_v16  ;;  %v3628_v16 = vld [vmem:[%s15770_s9] sm:$0x1]  ;;  %s15785_s9 = sld [smem:[#allocation104_spill]] }
 0xfb3   :  { %12164 = vmatprep.subr.bf16.mxu1 %v12155_v19  ;;  %v10580_v61 = vmul.f32 -1.442695, %v3628_v16 }
0x1080   :  { %v3279_v10 = vpop.f32.mrb[24].mxu1 }
0x1081   :  { %11374 = vmatmul.mubr.msk.f32.vlgmr.msra.gmra.mrb[26].mxu1 %vm2871_vm8, %v3279_v10  ;;  %v11364_v46 = vpop.f32.mrb[25].mxu1 }
0x1082   :  { %12166 = vmatpush3.bf16.msra.mxu1 %v12155_v19  ;;  %11380 = vmatprep.mubr.msk.f32.mxu1 %vm530_vm0, %v3369_v17 }
0x1083   :  { %12168 = vmatprep.subr.bf16.mxu1 %v12167_v24 }
0x1085   :  { %11381 = vmatmul.mubr.msk.f32.vlgmr.msra.gmra.mrb[28].mxu1 %vm530_vm0, %v3370_v48 }
0x1086   :  { %12170 = vmatpush3.bf16.msra.mxu1 %v12167_v24 }
0x1087   :  { %12172 = vmatprep.subr.bf16.mxu1 %v12171_v9 }
0x108a   :  { %12174 = vmatpush3.bf16.msra.mxu1 %v12171_v9 }
0x108b   :  { %12183 = vmatprep.subr.bf16.mxu1 %v13436_v25 }
0x1154   :  { %v3363_v42 = vpop.f32.mrb[26].mxu1 }
0x1155   :  { %v3364_v60 = vadd.f32 %v10571_v62, %v3363_v42  ;;  %v11375_v21 = vpop.f32.mrb[27].mxu1 }
0x1157   :  { %3368 = vst.msk [vmem:[#allocation30] sm:$0x3] %vm3367_vm9, %v3364_v60 }
0x1158   :  { %v11382_v3 = vpop.f32.mrb[28].mxu1 }
0x1159   :  { %v3443_v37 = vpop.f32.mrb[29].mxu1 }
0x115a   :  { %11391 = vmatprep.mubr.msk.f32.mxu1 %vm2871_vm8, %v3443_v37  ;;  %11402 = vmatprep.mubr.msk.f32.mxu0 %vm2871_vm8, %v3443_v37 }
0x115b   :  { %11392 = vmatmul.mubr.msk.f32.vlgmr.msra.gmra.mrb[30].mxu1 %vm2871_vm8, %v11382_v3  ;;  %11403 = vmatmul.mubr.msk.f32.vlgmr.msra.gmra.mrb[20].mxu0 %vm2871_vm8, %v11382_v3 }
0x115c   :  { %12185 = vmatpush3.bf16.msra.mxu1 %v14694_v13  ;;  %11413 = vmatprep.mubr.msk.f32.mxu1 %vm13432_vm2, %v15733_v12 }
0x115d   :  { %12186 = vmatprep.subr.bf16.mxu1 %v13436_v25  ;;  %12191 = vmatpush3.bf16.msra.mxu0 %v14694_v13 }
0x115e   :  { %12192 = vmatprep.subr.bf16.mxu0 %v13436_v25  ;;  %11424 = vmatprep.mubr.msk.f32.mxu0 %vm13432_vm2, %v15733_v12 }
0x1160   :  { %12188 = vmatpush3.bf16.msra.mxu1 %v14703_v14 }
0x1161   :  { %12194 = vmatpush3.bf16.msra.mxu0 %v14703_v14  ;;  %12195 = vmatprep.subr.bf16.mxu1 %v13436_v25 }
0x1162   :  { %12201 = vmatprep.subr.bf16.mxu0 %v13436_v25 }
0x1163   :  { %11414 = vmatmul.mubr.msk.f32.vlgmr.msra.gmra.mrb[32].mxu1 %vm2871_vm8, %v13437_v1 }
0x1164   :  { %12197 = vmatpush3.bf16.msra.mxu1 %v14694_v13  ;;  %11435 = vmatprep.mubr.msk.f32.mxu1 %vm13432_vm2, %v15733_v12 }
0x1165   :  { %12198 = vmatprep.subr.bf16.mxu1 %v13436_v25 }
0x1168   :  { %12200 = vmatpush3.bf16.msra.mxu1 %v14703_v14 }
0x1169   :  { %12207 = vmatprep.subr.bf16.mxu1 %v13436_v25 }
0x122e   :  { %v14725_v54 = vpop.f32.mrb[30].mxu1  ;;  %v11404_v15 = vpop.f32.mrb[20].mxu0 }
0x122f   :  { %v14727_v8 = vadd.f32 %v11404_v15, %v10577_v30  ;;  %v14729_v23 = vpop.f32.mrb[31].mxu1  ;;  %v3614_v4 = vpop.f32.mrb[21].mxu0 }
0x1230   :  { %v14743_v22 = vadd.f32 %v10577_v30, %v3614_v4 }
0x1236   :  { %v3704_v28 = vpop.f32.mrb[32].mxu1 }
0x1237   :  { %v3708_v11 = vadd.f32 %v3704_v28, %v14729_v23  ;;  %v11415_v0 = vpop.f32.mrb[33].mxu1 }
0x1239   :  { %v3715_v39 = vadd.f32 %v14732_v29, %v3708_v11 }
0x123b   :  { %v10583_v35 = vmul.f32 -1.442695, %v3715_v39 }
0x123d   :  { %12600 = vpow2.f32 %v10583_v35 }
0x1247   :  { %v12601_v44 = vpop.eup %12600 }
0x1248   :  { %v3719_v7 = vadd.f32 1.0, %v12601_v44 }
0x124a   :  { %12602 = vrcp.f32 %v3719_v7 }
0x1254   :  { %v12603_v47 = vpop.eup %12602 }
0x1255   :  { %v3722_v63 = vadd.f32 1e-06, %v12603_v47  ;;  %11425 = vmatmul.mubr.msk.f32.vlgmr.msra.gmra.mrb[22].mxu0 %vm2871_vm8, %v12603_v47 }
0x1256   :  { %12203 = vmatpush3.bf16.msra.mxu0 %v14694_v13  ;;  %11446 = vmatprep.mubr.msk.f32.mxu0 %vm13432_vm2, %v15733_v12 }
0x1257   :  { %12604 = vrcp.f32 %v3722_v63  ;;  %12204 = vmatprep.subr.bf16.mxu0 %v13436_v25 }
0x125a   :  { %12206 = vmatpush3.bf16.msra.mxu0 %v14703_v14 }
0x125b   :  { %12213 = vmatprep.subr.bf16.mxu0 %v13436_v25 }
0x1261   :  { %v12605_v27 = vpop.eup %12604 }
0x1262   :  { %v3724_v34 = vsub.f32 0.0, %v12605_v27 }
0x1264   :  { %v3725_v5 = vmul.f32 1.442695, %v3724_v34 }
0x1266   :  { %12606 = vpow2.f32 %v3725_v5 }
0x1270   :  { %v12607_v38 = vpop.eup %12606 }
0x1271   :  { %v3728_v40 = vsub.f32 1.0, %v12607_v38  ;;  %v3727_v20 = vmul.f32 0.0, %v12607_v38 }
0x1273   :  { %v3729_v50 = vmul.f32 %v3728_v40, %v14743_v22 }
0x1275   :  { %v3730_v33 = vadd.f32 %v3729_v50, %v3727_v20 }
0x1328   :  { %v3810_v43 = vpop.f32.mrb[22].mxu0 }
0x1329   :  { %v3815_v19 = vrot.slane %v3810_v43, 6  ;;  %v11426_v41 = vpop.f32.mrb[23].mxu0 }
0x132b   :  { %v3817_v57 = vadd.f32 %v3815_v19, %v14729_v23 }
0x132d   :  { %v3818_v36 = vadd.f32 %v14732_v29, %v3817_v57 }
0x132f   :  { %v10586_v18 = vmul.f32 -1.442695, %v3818_v36 }
0x1331   :  { %12608 = vpow2.f32 %v10586_v18 }
0x1332   :  { %12610 = vpow2.f32 %v10580_v61 }
0x133b   :  { %v12609_v45 = vpop.eup %12608 }
0x133c   :  { %v3822_v17 = vadd.f32 1.0, %v12609_v45  ;;  %v12611_v24 = vpop.eup %12610 }
0x133d   :  { %v3632_v46 = vadd.f32 1.0, %v12611_v24 }
0x133e   :  { %12612 = vrcp.f32 %v3822_v17 }
0x1348   :  { %v12613_v10 = vpop.eup %12612 }
0x1349   :  { %v3825_v48 = vadd.f32 1e-06, %v12613_v10  ;;  %v3842_v32 = vrot.slane %v12613_v10, 2 }
0x134b   :  { %12614 = vrcp.f32 %v3825_v48  ;;  %11436 = vmatmul.mubr.msk.f32.vlgmr.msra.gmra.mrb[34].mxu1 %vm2871_vm8, %v3842_v32 }
0x134c   :  { %12616 = vrcp.f32 %v3632_v46  ;;  %12209 = vmatpush3.bf16.msra.mxu1 %v14694_v13  ;;  %11457 = vmatprep.mubr.msk.f32.mxu1 %vm13432_vm2, %v15733_v12 }
0x134d   :  { %12210 = vmatprep.subr.bf16.mxu1 %v13436_v25 }
0x1350   :  { %12212 = vmatpush3.bf16.msra.mxu1 %v14703_v14 }
0x1351   :  { %12219 = vmatprep.subr.bf16.mxu1 %v13436_v25 }
0x1355   :  { %v12615_v56 = vpop.eup %12614 }
0x1356   :  { %v12617_v26 = vpop.eup %12616  ;;  %v3827_v53 = vsub.f32 0.0, %v12615_v56 }
0x1357   :  { %v14757_v9 = vrot.slane %v12617_v26, %v14438_v58 }
0x1358   :  { %v3828_v49 = vmul.f32 1.442695, %v3827_v53 }
0x1359   :  { %vm3737_vm10 = vcmp.ge.f32.partialorder %v3730_v33, %v14757_v9 }
0x135a   :  { %12618 = vpow2.f32 %v3828_v49  ;;  %v3740_v6 = vsel %vm3737_vm10, 0.0, %v3730_v33  ;;  %v10584_v2 = vsel %vm3737_vm10, 1.0, %v15733_v12  ;;  %vm4544_vm10 = vcmask 1040384  }
0x135b   :  { %v3831_v52 = vrot.slane %v3740_v6, 6 }
0x1364   :  { %v12619_v59 = vpop.eup %12618 }
0x1365   :  { %v3833_v62 = vmul.f32 %v12619_v59, %v3831_v52  ;;  %v3834_v42 = vsub.f32 1.0, %v12619_v59 }
0x1367   :  { %v3835_v60 = vmul.f32 %v3834_v42, %v14743_v22 }
0x1369   :  { %v3836_v21 = vadd.f32 %v3835_v60, %v3833_v62 }
0x136b   :  { %vm3837_vm11 = vcmp.ge.f32.partialorder %v3836_v21, %v14757_v9 }
0x136c   :  { %v10587_v51 = vsel %vm3837_vm11, 1.0, %v15733_v12  ;;  %v3840_v63 = vsel %vm3837_vm11, 0.0, %v3836_v21  ;;  %vm4540_vm11 = vcmask 7168  }
0x136d   :  { %v4442_v3 = vsel %vm2687_vm7, %v10584_v2, %v10587_v51  ;;  %v3932_v27 = vrot.slane %v3840_v63, 6 }
0x141e   :  { %v3911_v37 = vpop.f32.mrb[34].mxu1 }
0x141f   :  { %v3916_v55 = vrot.slane %v3911_v37, 4  ;;  %v11437_v31 = vpop.f32.mrb[35].mxu1 }
0x1421   :  { %v3918_v30 = vadd.f32 %v3916_v55, %v14729_v23 }
0x1423   :  { %v3919_v15 = vadd.f32 %v14732_v29, %v3918_v30 }
0x1425   :  { %v10589_v4 = vmul.f32 -1.442695, %v3919_v15 }
0x1427   :  { %12620 = vpow2.f32 %v10589_v4 }
0x1431   :  { %v12621_v28 = vpop.eup %12620 }
0x1432   :  { %v3923_v11 = vadd.f32 1.0, %v12621_v28 }
0x1434   :  { %12622 = vrcp.f32 %v3923_v11 }
0x143e   :  { %v12623_v0 = vpop.eup %12622 }
0x143f   :  { %v3926_v39 = vadd.f32 1e-06, %v12623_v0  ;;  %v3943_v35 = vrot.slane %v12623_v0, 4 }
0x1441   :  { %12624 = vrcp.f32 %v3926_v39  ;;  %11447 = vmatmul.mubr.msk.f32.vlgmr.msra.gmra.mrb[24].mxu0 %vm2871_vm8, %v3943_v35 }
0x1442   :  { %12215 = vmatpush3.bf16.msra.mxu0 %v14694_v13  ;;  %11468 = vmatprep.mubr.msk.f32.mxu0 %vm13432_vm2, %v15733_v12 }
0x1443   :  { %12216 = vmatprep.subr.bf16.mxu0 %v13436_v25 }
0x1446   :  { %12218 = vmatpush3.bf16.msra.mxu0 %v14703_v14 }
0x1447   :  { %12225 = vmatprep.subr.bf16.mxu0 %v13436_v25 }
0x144b   :  { %v12625_v44 = vpop.eup %12624 }
0x144c   :  { %v3928_v7 = vsub.f32 0.0, %v12625_v44 }
0x144e   :  { %v3929_v47 = vmul.f32 1.442695, %v3928_v7 }
0x1450   :  { %12626 = vpow2.f32 %v3929_v47 }
0x145a   :  { %v12627_v34 = vpop.eup %12626 }
0x145b   :  { %v3934_v5 = vmul.f32 %v12627_v34, %v3932_v27  ;;  %v3935_v38 = vsub.f32 1.0, %v12627_v34 }
0x145d   :  { %v3936_v40 = vmul.f32 %v3935_v38, %v14743_v22 }
0x145f   :  { %v3937_v20 = vadd.f32 %v3936_v40, %v3934_v5 }
0x1461   :  { %vm3938_vm12 = vcmp.ge.f32.partialorder %v3937_v20, %v14757_v9 }
0x1462   :  { %v10590_v50 = vsel %vm3938_vm12, 1.0, %v15733_v12  ;;  %v3941_v48 = vsel %vm3938_vm12, 0.0, %v3937_v20  ;;  %vm4701_vm12 = vcmask 254976  }
0x1463   :  { %v4443_v33 = vsel %vm1907_vm3, %v4442_v3, %v10590_v50  ;;  %v4033_v32 = vrot.slane %v3941_v48, 6 }
0x1514   :  { %v4012_v43 = vpop.f32.mrb[24].mxu0 }
0x1515   :  { %v4017_v19 = vrot.slane %v4012_v43, 2  ;;  %v11448_v41 = vpop.f32.mrb[25].mxu0 }
0x1517   :  { %v4019_v57 = vadd.f32 %v4017_v19, %v14729_v23 }
0x1519   :  { %v4020_v36 = vadd.f32 %v14732_v29, %v4019_v57 }
0x151b   :  { %v10592_v18 = vmul.f32 -1.442695, %v4020_v36 }
0x151d   :  { %12628 = vpow2.f32 %v10592_v18 }
0x1527   :  { %v12629_v16 = vpop.eup %12628 }
0x1528   :  { %v4024_v61 = vadd.f32 1.0, %v12629_v16 }
0x152a   :  { %12630 = vrcp.f32 %v4024_v61 }
0x1534   :  { %v12631_v45 = vpop.eup %12630 }
0x1535   :  { %v4027_v17 = vadd.f32 1e-06, %v12631_v45  ;;  %v4044_v24 = vrot.slane %v12631_v45, 6 }
0x1537   :  { %12632 = vrcp.f32 %v4027_v17  ;;  %11458 = vmatmul.mubr.msk.f32.vlgmr.msra.gmra.mrb[36].mxu1 %vm2871_vm8, %v4044_v24 }
0x1538   :  { %12221 = vmatpush3.bf16.msra.mxu1 %v14694_v13  ;;  %11479 = vmatprep.mubr.msk.f32.mxu1 %vm13432_vm2, %v15733_v12 }
0x1539   :  { %12222 = vmatprep.subr.bf16.mxu1 %v13436_v25 }
0x153c   :  { %12224 = vmatpush3.bf16.msra.mxu1 %v14703_v14 }
0x153d   :  { %12231 = vmatprep.subr.bf16.mxu1 %v13436_v25 }
0x1541   :  { %v12633_v23 = vpop.eup %12632 }
0x1542   :  { %v4029_v10 = vsub.f32 0.0, %v12633_v23 }
0x1544   :  { %v4030_v46 = vmul.f32 1.442695, %v4029_v10 }
0x1546   :  { %12634 = vpow2.f32 %v4030_v46 }
0x1550   :  { %v12635_v56 = vpop.eup %12634 }
0x1551   :  { %v4035_v26 = vmul.f32 %v12635_v56, %v4033_v32  ;;  %v4036_v53 = vsub.f32 1.0, %v12635_v56 }
0x1553   :  { %v4037_v49 = vmul.f32 %v4036_v53, %v14743_v22 }
0x1555   :  { %v4038_v6 = vadd.f32 %v4037_v49, %v4035_v26 }
0x1557   :  { %vm4039_vm14 = vcmp.ge.f32.partialorder %v4038_v6, %v14757_v9 }
0x1558   :  { %v10593_v52 = vsel %vm4039_vm14, 1.0, %v15733_v12  ;;  %v4042_v59 = vsel %vm4039_vm14, 0.0, %v4038_v6  ;;  %vm4719_vm14 = vcmask 253952  }
0x1559   :  { %v14799_v62 = vsel %vm4444_vm13, %v4443_v33, %v10593_v52  ;;  %v4131_v28 = vrot.slane %v4042_v59, 6 }
0x155a   :  { %v4449_v42 = vsel %vm2871_vm8, %v14799_v62, 0.0 }
0x155b   :  { %4450 = vadd.xlane.f32.xlu0 %v4449_v42 }
0x160a   :  { %v4113_v60 = vpop.f32.mrb[36].mxu1 }
0x160b   :  { %v4117_v21 = vadd.f32 %v14725_v54, %v4113_v60  ;;  %v11459_v2 = vpop.f32.mrb[37].mxu1 }
0x160d   :  { %v4118_v22 = vadd.f32 %v14732_v29, %v4117_v21 }
0x160f   :  { %v10595_v51 = vmul.f32 -1.442695, %v4118_v22 }
0x1611   :  { %12636 = vpow2.f32 %v10595_v51 }
0x161b   :  { %v12637_v3 = vpop.eup %12636 }
0x161c   :  { %v4122_v37 = vadd.f32 1.0, %v12637_v3 }
0x161e   :  { %12638 = vrcp.f32 %v4122_v37 }
0x1628   :  { %v12639_v55 = vpop.eup %12638 }
0x1629   :  { %v4125_v31 = vadd.f32 1e-06, %v12639_v55  ;;  %11469 = vmatmul.mubr.msk.f32.vlgmr.msra.gmra.mrb[26].mxu0 %vm2871_vm8, %v12639_v55 }
0x162a   :  { %12227 = vmatpush3.bf16.msra.mxu0 %v14694_v13  ;;  %11490 = vmatprep.mubr.msk.f32.mxu0 %vm13432_vm2, %v15733_v12 }
0x162b   :  { %12640 = vrcp.f32 %v4125_v31  ;;  %12228 = vmatprep.subr.bf16.mxu0 %v13436_v25 }
0x162e   :  { %12230 = vmatpush3.bf16.msra.mxu0 %v14703_v14 }
0x162f   :  { %11500 = vmatprep.subr.mxu0 %v15733_v12 }
0x1635   :  { %v12641_v30 = vpop.eup %12640 }
0x1636   :  { %v4127_v15 = vsub.f32 0.0, %v12641_v30 }
0x1638   :  { %v4128_v4 = vmul.f32 1.442695, %v4127_v15 }
0x163a   :  { %12642 = vpow2.f32 %v4128_v4 }
0x1644   :  { %v12643_v11 = vpop.eup %12642 }
0x1645   :  { %v4133_v0 = vmul.f32 %v12643_v11, %v4131_v28  ;;  %v4134_v39 = vsub.f32 1.0, %v12643_v11 }
0x1647   :  { %v4135_v13 = vmul.f32 %v4134_v39, %v14727_v8 }
0x1649   :  { %v4136_v35 = vadd.f32 %v4135_v13, %v4133_v0 }
0x164b   :  { %vm4137_vm15 = vcmp.ge.f32.partialorder %v4136_v35, %v14757_v9 }
0x164c   :  { %v4140_v19 = vsel %vm4137_vm15, 0.0, %v4136_v35  ;;  %v10596_v45 = vsel %vm4137_vm15, 1.0, %v15733_v12 }
0x164d   :  { %v4231_v41 = vrot.slane %v4140_v19, 6 }
0x16fc   :  { %v4210_v44 = vpop.f32.mrb[26].mxu0 }
0x16fd   :  { %v4215_v7 = vrot.slane %v4210_v44, 6  ;;  %v11470_v47 = vpop.f32.mrb[27].mxu0 }
0x16ff   :  { %v4217_v63 = vadd.f32 %v14725_v54, %v4215_v7 }
0x1701   :  { %v4218_v14 = vadd.f32 %v14732_v29, %v4217_v63 }
0x1703   :  { %v10598_v27 = vmul.f32 -1.442695, %v4218_v14 }
0x1705   :  { %12644 = vpow2.f32 %v10598_v27 }
0x170f   :  { %v12645_v34 = vpop.eup %12644 }
0x1710   :  { %v4222_v5 = vadd.f32 1.0, %v12645_v34 }
0x1712   :  { %12646 = vrcp.f32 %v4222_v5 }
0x171c   :  { %v12647_v38 = vpop.eup %12646 }
0x171d   :  { %v4225_v40 = vadd.f32 1e-06, %v12647_v38  ;;  %v4242_v20 = vrot.slane %v12647_v38, 2 }
0x171f   :  { %12648 = vrcp.f32 %v4225_v40  ;;  %11480 = vmatmul.mubr.msk.f32.vlgmr.msra.gmra.mrb[38].mxu1 %vm2871_vm8, %v4242_v20 }
0x1720   :  { %11497 = vmatprep.mubr.msk.f32.mxu1 %vm13432_vm2, %v15733_v12 }
0x1729   :  { %v12649_v50 = vpop.eup %12648 }
0x172a   :  { %v4227_v33 = vsub.f32 0.0, %v12649_v50 }
0x172c   :  { %v4228_v43 = vmul.f32 1.442695, %v4227_v33 }
0x172e   :  { %12650 = vpow2.f32 %v4228_v43  ;;  %v4532_v43 = vld [vmem:[%s15771_s1] sm:$0x1]  ;;  %s15786_s1 = sld [smem:[#allocation105_spill]] }
0x1738   :  { %v12651_v57 = vpop.eup %12650 }
0x1739   :  { %v4233_v36 = vmul.f32 %v12651_v57, %v4231_v41  ;;  %v4234_v18 = vsub.f32 1.0, %v12651_v57 }
0x173b   :  { %v4235_v16 = vmul.f32 %v4234_v18, %v14727_v8  ;;  %v4721_v18 = vld [vmem:[%s15773_s2] sm:$0xff] }
0x173d   :  { %v4236_v61 = vadd.f32 %v4235_v16, %v4233_v36  ;;  %v4458_v36 = vld [vmem:[%s15772_s4] sm:$0x3]  ;;  %v4722_v16 = vld [vmem:[%s15773_s2 + $0x8] sm:$0xff]  ;;  %s15787_s4 = sld [smem:[#allocation107_spill]] }
0x173f   :  { %vm4237_vm4 = vcmp.ge.f32.partialorder %v4236_v61, %v14757_v9 }
0x1740   :  { %v10599_v17 = vsel %vm4237_vm4, 1.0, %v15733_v12  ;;  %v4240_v21 = vsel %vm4237_vm4, 0.0, %v4236_v61  ;;  %v12237_v61 = vpack.c.bf16 %v4722_v16, %v4721_v18 }
0x1741   :  { %v4446_v24 = vsel %vm2687_vm7, %v10596_v45, %v10599_v17  ;;  %v4332_v2 = vrot.slane %v4240_v21, 6  ;;  %v4723_v45 = vld [vmem:[%s15773_s2 + $0x10] sm:$0xff]  ;;  %v4724_v17 = vld [vmem:[%s15773_s2 + $0x18] sm:$0xff]  ;;  %v10607_v21 = vld [vmem:[%s15777_s12] ss:$0 sm:$0xff]  ;;  %s15788_s2 = sld [smem:[#allocation108_spill]] }
0x1742   :  { %s15794_s12 = sld [smem:[#allocation113_spill]] }
0x17f2   :  { %v4311_v23 = vpop.f32.mrb[38].mxu1 }
0x17f3   :  { %v4316_v10 = vrot.slane %v4311_v23, 4  ;;  %v11481_v46 = vpop.f32.mrb[39].mxu1 }
0x17f4   :  { %v4892_v46 = vld [vmem:[%s15774_s8] sm:$0xff] }
0x17f5   :  { %v4318_v48 = vadd.f32 %v14725_v54, %v4316_v10 }
0x17f7   :  { %v4319_v32 = vadd.f32 %v14732_v29, %v4318_v48  ;;  %v4893_v48 = vld [vmem:[%s15774_s8 + $0x8] sm:$0xff] }
0x17f9   :  { %v10601_v56 = vmul.f32 -1.442695, %v4319_v32  ;;  %v14865_v32 = vpack.c.bf16 %v4893_v48, %v4892_v46 }
0x17fb   :  { %12652 = vpow2.f32 %v10601_v56  ;;  %v4894_v56 = vld [vmem:[%s15774_s8 + $0x10] sm:$0xff] }
0x1805   :  { %v12653_v26 = vpop.eup %12652 }
0x1806   :  { %v4323_v53 = vadd.f32 1.0, %v12653_v26  ;;  %v4895_v26 = vld [vmem:[%s15774_s8 + $0x18] sm:$0xff]  ;;  %s15789_s8 = sld [smem:[#allocation106_spill]] }
0x1808   :  { %12654 = vrcp.f32 %v4323_v53  ;;  %v14873_v53 = vpack.c.bf16 %v4895_v26, %v4894_v56 }
0x1812   :  { %v12655_v49 = vpop.eup %12654 }
0x1813   :  { %v4326_v6 = vadd.f32 1e-06, %v12655_v49  ;;  %v4343_v52 = vrot.slane %v12655_v49, 4  ;;  %v4619_v49 = vld [vmem:[%s15775_s7] sm:$0xff] }
0x1815   :  { %12656 = vrcp.f32 %v4326_v6  ;;  %11491 = vmatmul.mubr.msk.f32.vlgmr.msra.gmra.mrb[28].mxu0 %vm2871_vm8, %v4343_v52  ;;  %v4620_v6 = vld [vmem:[%s15775_s7 + $0x8] sm:$0xff]  ;;  %s15790_s7 = sld [smem:[#allocation109_spill]] }
0x1816   :  { %11502 = vmatprep.mubr.msk.f32.mxu0 %vm13432_vm2, %v15733_v12  ;;  %11501 = vmatpush3.msk.msra.mxu0 %vm4544_vm10, %v4532_v43  ;;  %v12235_v52 = vpack.c.bf16 %v4620_v6, %v4619_v49 }
0x1817   :  { %12238 = vmatprep.subr.bf16.mxu0 %v12237_v61 }
0x181f   :  { %v12657_v59 = vpop.eup %12656 }
0x1820   :  { %v4328_v42 = vsub.f32 0.0, %v12657_v59  ;;  %v4806_v59 = vld [vmem:[%s15776_s10] sm:$0xff] }
0x1822   :  { %v4329_v60 = vmul.f32 1.442695, %v4328_v42  ;;  %v4807_v42 = vld [vmem:[%s15776_s10 + $0x8] sm:$0xff] }
0x1824   :  { %12658 = vpow2.f32 %v4329_v60  ;;  %v12245_v60 = vpack.c.bf16 %v4807_v42, %v4806_v59 }
0x182e   :  { %v12659_v22 = vpop.eup %12658 }
0x182f   :  { %v4334_v51 = vmul.f32 %v12659_v22, %v4332_v2  ;;  %v4335_v3 = vsub.f32 1.0, %v12659_v22  ;;  %v4808_v22 = vld [vmem:[%s15776_s10 + $0x10] sm:$0xff] }
0x1831   :  { %v4336_v37 = vmul.f32 %v4335_v3, %v14727_v8 }
0x1833   :  { %v4337_v55 = vadd.f32 %v4336_v37, %v4334_v51  ;;  %v4809_v51 = vld [vmem:[%s15776_s10 + $0x18] sm:$0xff]  ;;  %s15791_s10 = sld [smem:[#allocation110_spill]] }
0x1835   :  { %vm4338_vm5 = vcmp.ge.f32.partialorder %v4337_v55, %v14757_v9 }
0x1836   :  { %v10602_v31 = vsel %vm4338_vm5, 1.0, %v15733_v12  ;;  %v4341_v27 = vsel %vm4338_vm5, 0.0, %v4337_v55 }
0x1837   :  { %v4447_v30 = vsel %vm1907_vm3, %v4446_v24, %v10602_v31  ;;  %v4433_v34 = vrot.slane %v4341_v27, 6  ;;  %v12241_v24 = vpack.c.bf16 %v4724_v17, %v4723_v45  ;;  %v12249_v31 = vpack.c.bf16 %v4809_v51, %v4808_v22  ;;  %v10610_v27 = vld [vmem:[%s15779_s11] ss:$0 sm:$0xff]  ;;  %s15796_s11 = sld [smem:[#allocation115_spill]] }
0x1838   :  { %v4711_v45 = vld [vmem:[%s15781_s14] sm:$0x1]  ;;  %s13449_s14 = smov [#allocation33]  }
0x18e8   :  { %v4412_v15 = vpop.f32.mrb[28].mxu0 }
0x18e9   :  { %v4417_v4 = vrot.slane %v4412_v15, 2  ;;  %v11492_v28 = vpop.f32.mrb[29].mxu0 }
0x18eb   :  { %v4419_v11 = vadd.f32 %v14725_v54, %v4417_v4  ;;  %v14910_v4 = vld [vmem:[%s15778_s30] ss:$0 sm:$0xff]  ;;  %s15795_s30 = sld [smem:[#allocation114_spill]] }
0x18ed   :  { %v4420_v0 = vadd.f32 %v14732_v29, %v4419_v11 }
0x18ef   :  { %v10604_v39 = vmul.f32 -1.442695, %v4420_v0 }
0x18f1   :  { %12660 = vpow2.f32 %v10604_v39 }
0x18fb   :  { %v12661_v13 = vpop.eup %12660 }
0x18fc   :  { %v4424_v35 = vadd.f32 1.0, %v12661_v13 }
0x18fe   :  { %12662 = vrcp.f32 %v4424_v35 }
0x1908   :  { %v12663_v44 = vpop.eup %12662 }
0x1909   :  { %v4427_v7 = vadd.f32 1e-06, %v12663_v44 }
0x190b   :  { %12664 = vrcp.f32 %v4427_v7 }
0x1915   :  { %v12665_v47 = vpop.eup %12664 }
0x1916   :  { %v4429_v63 = vsub.f32 0.0, %v12665_v47 }
0x1918   :  { %v4430_v14 = vmul.f32 1.442695, %v4429_v63 }
0x191a   :  { %12666 = vpow2.f32 %v4430_v14 }
0x1924   :  { %v12667_v54 = vpop.eup %12666 }
0x1925   :  { %v4435_v5 = vmul.f32 %v12667_v54, %v4433_v34  ;;  %v4436_v29 = vsub.f32 1.0, %v12667_v54 }
0x1927   :  { %v4437_v38 = vmul.f32 %v4436_v29, %v14727_v8  ;;  %v4451_v8 = vpop.xlane.xlu0 %4450 }
0x1928   :  { %v4456_v41 = vmul.f32 0.03125, %v4451_v8 }
0x1929   :  { %v4438_v40 = vadd.f32 %v4437_v38, %v4435_v5 }
0x192b   :  { %vm4439_vm6 = vcmp.ge.f32.partialorder %v4438_v40, %v14757_v9 }
0x192c   :  { %v10605_v20 = vsel %vm4439_vm6, 1.0, %v15733_v12 }
0x192d   :  { %v14847_v50 = vsel %vm4444_vm13, %v4447_v30, %v10605_v20 }
0x192e   :  { %v4452_v33 = vsel %vm2871_vm8, %v14847_v50, 0.0 }
0x192f   :  { %4453 = vadd.xlane.f32.xlu1 %v4452_v33 }
0x19bc   :  { %v4454_v19 = vpop.xlane.xlu1 %4453 }
0x19bd   :  { %v4457_v9 = vmul.f32 0.03125, %v4454_v19 }
0x19bf   :  { %v12232_v57 = vpack.c.bf16 %v4457_v9, %v4456_v41 }
0x19c1   :  { %12233 = vmatpush3.bf16.msra.mxu1 %v12232_v57 }
0x19c2   :  { %12234 = vmatprep.subr.bf16.mxu1 %v13436_v25 }
0x19c4   :  { %11498 = vmatmul.mubr.msk.f32.vlgmr.msra.gmra.mrb[40].mxu1 %vm530_vm0, %v4458_v36 }
0x19c5   :  { %11509 = vmatprep.mubr.msk.f32.mxu1 %vm13432_vm2, %v15733_v12  ;;  %12236 = vmatpush3.bf16.msra.mxu1 %v12235_v52 }
0x19c6   :  { %12246 = vmatprep.subr.bf16.mxu1 %v12245_v60 }
0x1a97   :  { %v4528_v23 = vpop.f32.mrb[40].mxu1 }
0x1a98   :  { %11503 = vmatmul.mubr.msk.f32.vlgmr.msra.gmra.mrb[30].mxu0 %vm4540_vm11, %v4528_v23  ;;  %v11499_v10 = vpop.f32.mrb[41].mxu1 }
0x1a99   :  { %12240 = vmatpush3.bf16.msra.mxu0 %v12237_v61  ;;  %11520 = vmatprep.mubr.msk.f32.mxu0 %vm2871_vm8, %v14799_v62 }
0x1a9a   :  { %12242 = vmatprep.subr.bf16.mxu0 %v12241_v24 }
0x1a9d   :  { %12244 = vmatpush3.bf16.msra.mxu0 %v12241_v24 }
0x1a9e   :  { %12253 = vmatprep.subr.bf16.mxu0 %v13436_v25 }
0x1aa0   :  { %11521 = vmatmul.mubr.msk.f32.vlgmr.msra.gmra.mrb[32].mxu0 %vm2871_vm8, %v14847_v50 }
0x1aa1   :  { %12255 = vmatpush3.bf16.msra.mxu0 %v14865_v32  ;;  %11542 = vmatprep.mubr.msk.f32.mxu0 %vm13432_vm2, %v15733_v12 }
0x1aa2   :  { %12256 = vmatprep.subr.bf16.mxu0 %v13436_v25 }
0x1aa5   :  { %12258 = vmatpush3.bf16.msra.mxu0 %v14873_v53 }
0x1aa6   :  { %12265 = vmatprep.subr.bf16.mxu0 %v13436_v25 }
0x1aa8   :  { %11543 = vmatmul.mubr.msk.f32.vlgmr.msra.gmra.mrb[34].mxu0 %vm2871_vm8, %v13437_v1 }
0x1aa9   :  { %12267 = vmatpush3.bf16.msra.mxu0 %v14865_v32  ;;  %11564 = vmatprep.mubr.msk.f32.mxu0 %vm13432_vm2, %v15733_v12 }
0x1aaa   :  { %12268 = vmatprep.subr.bf16.mxu0 %v13436_v25 }
0x1aad   :  { %12270 = vmatpush3.bf16.msra.mxu0 %v14873_v53 }
0x1aae   :  { %12277 = vmatprep.subr.bf16.mxu0 %v13436_v25 }
0x1b6b   :  { %v4614_v2 = vpop.f32.mrb[30].mxu0 }
0x1b6c   :  { %v4615_v3 = vadd.f32 %v10607_v21, %v4614_v2  ;;  %v11504_v37 = vpop.f32.mrb[31].mxu0 }
0x1b6e   :  { %v4618_v55 = vmax.f32 %v4615_v3, 0.0 }
0x1b70   :  { %11510 = vmatmul.mubr.msk.f32.vlgmr.msra.gmra.mrb[42].mxu1 %vm530_vm0, %v4618_v55 }
0x1b71   :  { %12248 = vmatpush3.bf16.msra.mxu1 %v12245_v60  ;;  %11531 = vmatprep.mubr.msk.f32.mxu1 %vm2871_vm8, %v14799_v62 }
0x1b72   :  { %12250 = vmatprep.subr.bf16.mxu1 %v12249_v31 }
0x1b73   :  { %v14898_v30 = vpop.f32.mrb[32].mxu0 }
0x1b74   :  { %v14900_v15 = vpop.f32.mrb[33].mxu0 }
0x1b75   :  { %12252 = vmatpush3.bf16.msra.mxu1 %v12249_v31 }
0x1b76   :  { %12259 = vmatprep.subr.bf16.mxu1 %v13436_v25 }
0x1b78   :  { %11532 = vmatmul.mubr.msk.f32.vlgmr.msra.gmra.mrb[44].mxu1 %vm2871_vm8, %v14847_v50  ;;  %v14925_v50 = vld [vmem:[%s15780_s17] ss:$0 sm:$0xff] }
0x1b79   :  { %12261 = vmatpush3.bf16.msra.mxu1 %v14865_v32  ;;  %11553 = vmatprep.mubr.msk.f32.mxu1 %vm13432_vm2, %v15733_v12 }
0x1b7a   :  { %12262 = vmatprep.subr.bf16.mxu1 %v13436_v25 }
0x1b7b   :  { %v4963_v62 = vpop.f32.mrb[34].mxu0 }
0x1b7c   :  { %v4967_v28 = vadd.f32 %v4963_v62, %v14900_v15  ;;  %v11544_v11 = vpop.f32.mrb[35].mxu0 }
0x1b7d   :  { %12264 = vmatpush3.bf16.msra.mxu1 %v14873_v53 }
0x1b7e   :  { %v4974_v0 = vadd.f32 %v14910_v4, %v4967_v28  ;;  %12271 = vmatprep.subr.bf16.mxu1 %v13436_v25 }
0x1b80   :  { %v10620_v39 = vmul.f32 -1.442695, %v4974_v0 }
0x1b82   :  { %12668 = vpow2.f32 %v10620_v39 }
0x1b8c   :  { %v12669_v13 = vpop.eup %12668 }
0x1b8d   :  { %v4978_v35 = vadd.f32 1.0, %v12669_v13 }
0x1b8f   :  { %12670 = vrcp.f32 %v4978_v35 }
0x1b99   :  { %v12671_v44 = vpop.eup %12670 }
0x1b9a   :  { %11554 = vmatmul.mubr.msk.f32.vlgmr.msra.gmra.mrb[46].mxu1 %vm2871_vm8, %v12671_v44  ;;  %v4981_v7 = vadd.f32 1e-06, %v12671_v44 }
0x1b9b   :  { %12273 = vmatpush3.bf16.msra.mxu1 %v14865_v32  ;;  %11575 = vmatprep.mubr.msk.f32.mxu1 %vm13432_vm2, %v15733_v12 }
0x1b9c   :  { %12274 = vmatprep.subr.bf16.mxu1 %v13436_v25  ;;  %12672 = vrcp.f32 %v4981_v7 }
0x1b9f   :  { %12276 = vmatpush3.bf16.msra.mxu1 %v14873_v53 }
0x1ba0   :  { %12283 = vmatprep.subr.bf16.mxu1 %v13436_v25 }
0x1ba6   :  { %v12673_v47 = vpop.eup %12672 }
0x1ba7   :  { %v4983_v63 = vsub.f32 0.0, %v12673_v47 }
0x1ba9   :  { %v4984_v14 = vmul.f32 1.442695, %v4983_v63 }
0x1bab   :  { %12674 = vpow2.f32 %v4984_v14 }
0x1bb5   :  { %v12675_v20 = vpop.eup %12674 }
0x1bb6   :  { %v4987_v9 = vsub.f32 1.0, %v12675_v20  ;;  %v4986_v36 = vmul.f32 0.0, %v12675_v20 }
0x1c43   :  { %v4697_v34 = vpop.f32.mrb[42].mxu1 }
0x1c44   :  { %v4698_v54 = vadd.f32 %v10610_v27, %v4697_v34  ;;  %v11511_v5 = vpop.f32.mrb[43].mxu1 }
0x1c46   :  { %v4702_v29 = vsel %vm4701_vm12, %v4698_v54, 0.0 }
0x1c47   :  { %v4703_v38 = vrot.slane %v4702_v29, 4 }
0x1c49   :  { %v4704_v40 = vadd.f32 %v4703_v38, %v4702_v29 }
0x1c4b   :  { %v4705_v33 = vrot.slane %v4704_v40, 2  ;;  %v14927_v43 = vpop.f32.mrb[44].mxu1 }
0x1c4c   :  { %v4883_v8 = vpop.f32.mrb[45].mxu1 }
0x1c4d   :  { %v4706_v19 = vadd.f32 %v4705_v33, %v4704_v40  ;;  %v14930_v41 = vadd.f32 %v14925_v50, %v4883_v8 }
0x1c4f   :  { %v4707_v57 = vrot.slane %v4706_v19, 1  ;;  %v4988_v18 = vmul.f32 %v4987_v9, %v14930_v41 }
0x1c51   :  { %v4708_v16 = vadd.f32 %v4707_v57, %v4706_v19  ;;  %v4989_v61 = vadd.f32 %v4988_v18, %v4986_v36 }
0x1c53   :  { %v4710_v17 = vmul.f32 0.5, %v4708_v16 }
0x1c55   :  { %v4712_v24 = vadd.f32 %v4711_v45, %v4710_v17 }
0x1c57   :  { %v10612_v23 = vmul.f32 -1.442695, %v4712_v24 }
0x1c59   :  { %12676 = vpow2.f32 %v10612_v23 }
0x1c63   :  { %v12677_v10 = vpop.eup %12676 }
0x1c64   :  { %v4716_v46 = vadd.f32 1.0, %v12677_v10 }
0x1c66   :  { %12678 = vrcp.f32 %v4716_v46 }
0x1c6d   :  { %v5069_v48 = vpop.f32.mrb[46].mxu1 }
0x1c6e   :  { %v5074_v56 = vrot.slane %v5069_v48, 6  ;;  %v11555_v26 = vpop.f32.mrb[47].mxu1 }
0x1c70   :  { %v12679_v49 = vpop.eup %12678  ;;  %v5076_v6 = vadd.f32 %v5074_v56, %v14900_v15 }
0x1c71   :  { %v14936_v52 = vrot.slane %v12679_v49, %v14438_v58  ;;  %4720 = vst.msk [vmem:[#allocation36] sm:$0x1] %vm4719_vm14, %v12679_v49 }
0x1c72   :  { %v5077_v59 = vadd.f32 %v14910_v4, %v5076_v6 }
0x1c73   :  { %vm4996_vm15 = vcmp.ge.f32.partialorder %v4989_v61, %v14936_v52 }
0x1c74   :  { %v4999_v42 = vsel %vm4996_vm15, 0.0, %v4989_v61  ;;  %v10623_v60 = vmul.f32 -1.442695, %v5077_v59  ;;  %v10621_v35 = vsel %vm4996_vm15, 1.0, %v15733_v12 }
0x1c75   :  { %v5090_v62 = vrot.slane %v4999_v42, 6 }
0x1c76   :  { %12680 = vpow2.f32 %v10623_v60 }
0x1c80   :  { %v12681_v21 = vpop.eup %12680 }
0x1c81   :  { %v5081_v2 = vadd.f32 1.0, %v12681_v21 }
0x1c83   :  { %12682 = vrcp.f32 %v5081_v2 }
0x1c8d   :  { %v12683_v22 = vpop.eup %12682 }
0x1c8e   :  { %v5084_v51 = vadd.f32 1e-06, %v12683_v22  ;;  %v5101_v3 = vrot.slane %v12683_v22, 2 }
0x1c90   :  { %12684 = vrcp.f32 %v5084_v51  ;;  %11565 = vmatmul.mubr.msk.f32.vlgmr.msra.gmra.mrb[36].mxu0 %vm2871_vm8, %v5101_v3 }
0x1c91   :  { %12279 = vmatpush3.bf16.msra.mxu0 %v14865_v32  ;;  %11586 = vmatprep.mubr.msk.f32.mxu0 %vm13432_vm2, %v15733_v12 }
0x1c92   :  { %12280 = vmatprep.subr.bf16.mxu0 %v13436_v25 }
0x1c95   :  { %12282 = vmatpush3.bf16.msra.mxu0 %v14873_v53 }
0x1c96   :  { %12289 = vmatprep.subr.bf16.mxu0 %v13436_v25 }
0x1c9a   :  { %v12685_v37 = vpop.eup %12684 }
0x1c9b   :  { %v5086_v55 = vsub.f32 0.0, %v12685_v37 }
0x1c9d   :  { %v5087_v31 = vmul.f32 1.442695, %v5086_v55 }
0x1c9f   :  { %12686 = vpow2.f32 %v5087_v31 }
0x1ca9   :  { %v12687_v28 = vpop.eup %12686 }
0x1caa   :  { %v5092_v11 = vmul.f32 %v12687_v28, %v5090_v62  ;;  %v5093_v0 = vsub.f32 1.0, %v12687_v28 }
0x1cac   :  { %v5094_v39 = vmul.f32 %v5093_v0, %v14930_v41 }
0x1cae   :  { %v5095_v13 = vadd.f32 %v5094_v39, %v5092_v11 }
0x1cb0   :  { %vm5096_vm4 = vcmp.ge.f32.partialorder %v5095_v13, %v14936_v52 }
0x1cb1   :  { %v10624_v44 = vsel %vm5096_vm4, 1.0, %v15733_v12  ;;  %v5099_v7 = vsel %vm5096_vm4, 0.0, %v5095_v13 }
0x1cb2   :  { %v5702_v47 = vsel %vm2687_vm7, %v10621_v35, %v10624_v44  ;;  %v5191_v57 = vrot.slane %v5099_v7, 6 }
0x1d63   :  { %v5170_v63 = vpop.f32.mrb[36].mxu0 }
0x1d64   :  { %v5175_v14 = vrot.slane %v5170_v63, 4  ;;  %v11566_v27 = vpop.f32.mrb[37].mxu0 }
0x1d66   :  { %v5177_v34 = vadd.f32 %v5175_v14, %v14900_v15 }
0x1d68   :  { %v5178_v54 = vadd.f32 %v14910_v4, %v5177_v34 }
0x1d6a   :  { %v10626_v5 = vmul.f32 -1.442695, %v5178_v54 }
0x1d6c   :  { %12688 = vpow2.f32 %v10626_v5 }
0x1d76   :  { %v12689_v29 = vpop.eup %12688 }
0x1d77   :  { %v5182_v38 = vadd.f32 1.0, %v12689_v29 }
0x1d79   :  { %12690 = vrcp.f32 %v5182_v38  ;;  %v14994_v38 = vadd.f32 %v14927_v43, %v14925_v50 }
0x1d83   :  { %v12691_v40 = vpop.eup %12690 }
0x1d84   :  { %v5185_v20 = vadd.f32 1e-06, %v12691_v40  ;;  %v5202_v33 = vrot.slane %v12691_v40, 4 }
0x1d86   :  { %12692 = vrcp.f32 %v5185_v20  ;;  %11576 = vmatmul.mubr.msk.f32.vlgmr.msra.gmra.mrb[48].mxu1 %vm2871_vm8, %v5202_v33 }
0x1d87   :  { %12285 = vmatpush3.bf16.msra.mxu1 %v14865_v32  ;;  %11597 = vmatprep.mubr.msk.f32.mxu1 %vm13432_vm2, %v15733_v12 }
0x1d88   :  { %12286 = vmatprep.subr.bf16.mxu1 %v13436_v25 }
0x1d8b   :  { %12288 = vmatpush3.bf16.msra.mxu1 %v14873_v53 }
0x1d8c   :  { %12295 = vmatprep.subr.bf16.mxu1 %v13436_v25 }
0x1d90   :  { %v12693_v8 = vpop.eup %12692 }
0x1d91   :  { %v5187_v19 = vsub.f32 0.0, %v12693_v8 }
0x1d93   :  { %v5188_v9 = vmul.f32 1.442695, %v5187_v19 }
0x1d95   :  { %12694 = vpow2.f32 %v5188_v9 }
0x1d9f   :  { %v12695_v36 = vpop.eup %12694 }
0x1da0   :  { %v5193_v18 = vmul.f32 %v12695_v36, %v5191_v57  ;;  %v5194_v16 = vsub.f32 1.0, %v12695_v36 }
0x1da2   :  { %v5195_v61 = vmul.f32 %v5194_v16, %v14930_v41 }
0x1da4   :  { %v5196_v45 = vadd.f32 %v5195_v61, %v5193_v18 }
0x1da6   :  { %vm5197_vm5 = vcmp.ge.f32.partialorder %v5196_v45, %v14936_v52 }
0x1da7   :  { %v10627_v17 = vsel %vm5197_vm5, 1.0, %v15733_v12  ;;  %v5200_v24 = vsel %vm5197_vm5, 0.0, %v5196_v45 }
0x1da8   :  { %v5703_v23 = vsel %vm1907_vm3, %v5702_v47, %v10627_v17  ;;  %v5292_v51 = vrot.slane %v5200_v24, 6 }
0x1e59   :  { %v5271_v10 = vpop.f32.mrb[48].mxu1 }
0x1e5a   :  { %v5276_v46 = vrot.slane %v5271_v10, 2  ;;  %v11577_v48 = vpop.f32.mrb[49].mxu1 }
0x1e5c   :  { %v5278_v56 = vadd.f32 %v5276_v46, %v14900_v15 }
0x1e5e   :  { %v5279_v26 = vadd.f32 %v14910_v4, %v5278_v56 }
0x1e60   :  { %v10629_v49 = vmul.f32 -1.442695, %v5279_v26 }
0x1e62   :  { %12696 = vpow2.f32 %v10629_v49 }
0x1e6c   :  { %v12697_v6 = vpop.eup %12696 }
0x1e6d   :  { %v5283_v59 = vadd.f32 1.0, %v12697_v6 }
0x1e6f   :  { %12698 = vrcp.f32 %v5283_v59 }
0x1e79   :  { %v12699_v42 = vpop.eup %12698 }
0x1e7a   :  { %v5286_v60 = vadd.f32 1e-06, %v12699_v42  ;;  %v5303_v21 = vrot.slane %v12699_v42, 6 }
0x1e7c   :  { %12700 = vrcp.f32 %v5286_v60  ;;  %11587 = vmatmul.mubr.msk.f32.vlgmr.msra.gmra.mrb[38].mxu0 %vm2871_vm8, %v5303_v21 }
0x1e7d   :  { %12291 = vmatpush3.bf16.msra.mxu0 %v14865_v32  ;;  %11608 = vmatprep.mubr.msk.f32.mxu0 %vm13432_vm2, %v15733_v12 }
0x1e7e   :  { %12292 = vmatprep.subr.bf16.mxu0 %v13436_v25 }
0x1e81   :  { %12294 = vmatpush3.bf16.msra.mxu0 %v14873_v53 }
0x1e86   :  { %v12701_v15 = vpop.eup %12700 }
0x1e87   :  { %v5288_v2 = vsub.f32 0.0, %v12701_v15 }
0x1e89   :  { %v5289_v22 = vmul.f32 1.442695, %v5288_v2 }
0x1e8b   :  { %12702 = vpow2.f32 %v5289_v22 }
0x1e95   :  { %v12703_v3 = vpop.eup %12702 }
0x1e96   :  { %v5294_v37 = vmul.f32 %v12703_v3, %v5292_v51  ;;  %v5295_v55 = vsub.f32 1.0, %v12703_v3 }
0x1e98   :  { %v5296_v31 = vmul.f32 %v5295_v55, %v14930_v41 }
0x1e9a   :  { %v5297_v62 = vadd.f32 %v5296_v31, %v5294_v37 }
0x1e9c   :  { %vm5298_vm6 = vcmp.ge.f32.partialorder %v5297_v62, %v14936_v52 }
0x1e9d   :  { %v10630_v28 = vsel %vm5298_vm6, 1.0, %v15733_v12  ;;  %v5301_v11 = vsel %vm5298_vm6, 0.0, %v5297_v62 }
0x1e9e   :  { %v14981_v0 = vsel %vm4444_vm13, %v5703_v23, %v10630_v28  ;;  %v5390_v5 = vrot.slane %v5301_v11, 6 }
0x1f4f   :  { %v5372_v39 = vpop.f32.mrb[38].mxu0 }
0x1f50   :  { %v5376_v13 = vadd.f32 %v14898_v30, %v5372_v39  ;;  %v11588_v35 = vpop.f32.mrb[39].mxu0 }
0x1f52   :  { %v5377_v44 = vadd.f32 %v14910_v4, %v5376_v13 }
0x1f54   :  { %v10632_v7 = vmul.f32 -1.442695, %v5377_v44 }
0x1f56   :  { %12704 = vpow2.f32 %v10632_v7 }
0x1f60   :  { %v12705_v47 = vpop.eup %12704 }
0x1f61   :  { %v5381_v63 = vadd.f32 1.0, %v12705_v47 }
0x1f63   :  { %12706 = vrcp.f32 %v5381_v63 }
0x1f6d   :  { %v12707_v41 = vpop.eup %12706 }
0x1f6e   :  { %v5384_v14 = vadd.f32 1e-06, %v12707_v41  ;;  %11598 = vmatmul.mubr.msk.f32.vlgmr.msra.gmra.mrb[50].mxu1 %vm2871_vm8, %v12707_v41 }
0x1f6f   :  { %12297 = vmatpush3.bf16.msra.mxu1 %v14865_v32  ;;  %11619 = vmatprep.mubr.msk.f32.mxu1 %vm13432_vm2, %v15733_v12 }
0x1f70   :  { %12708 = vrcp.f32 %v5384_v14  ;;  %12298 = vmatprep.subr.bf16.mxu1 %v13436_v25 }
0x1f73   :  { %12300 = vmatpush3.bf16.msra.mxu1 %v14873_v53 }
0x1f74   :  { %11629 = vmatprep.subr.mxu1 %v15733_v12 }
0x1f7a   :  { %v12709_v27 = vpop.eup %12708 }
0x1f7b   :  { %v5386_v34 = vsub.f32 0.0, %v12709_v27 }
0x1f7d   :  { %v5387_v54 = vmul.f32 1.442695, %v5386_v34 }
0x1f7f   :  { %12710 = vpow2.f32 %v5387_v54  ;;  %v5708_v54 = vld [vmem:[%s15782_s15] sm:$0xff] }
0x1f89   :  { %v12711_v29 = vpop.eup %12710 }
0x1f8a   :  { %v5392_v32 = vmul.f32 %v12711_v29, %v5390_v5  ;;  %v5393_v40 = vsub.f32 1.0, %v12711_v29 }
0x1f8c   :  { %v5394_v20 = vmul.f32 %v5393_v40, %v14994_v38 }
0x1f8e   :  { %v5395_v33 = vadd.f32 %v5394_v20, %v5392_v32 }
0x1f90   :  { %vm5396_vm10 = vcmp.ge.f32.partialorder %v5395_v33, %v14936_v52 }
0x1f91   :  { %v5399_v53 = vsel %vm5396_vm10, 0.0, %v5395_v33  ;;  %v10633_v6 = vsel %vm5396_vm10, 1.0, %v15733_v12 }
0x1f92   :  { %v5490_v10 = vrot.slane %v5399_v53, 6 }
0x2041   :  { %v5469_v8 = vpop.f32.mrb[50].mxu1 }
0x2042   :  { %v5474_v19 = vrot.slane %v5469_v8, 6  ;;  %v11599_v9 = vpop.f32.mrb[51].mxu1 }
0x2044   :  { %v5476_v57 = vadd.f32 %v14898_v30, %v5474_v19 }
0x2046   :  { %v5477_v36 = vadd.f32 %v14910_v4, %v5476_v57 }
0x2048   :  { %v10635_v18 = vmul.f32 -1.442695, %v5477_v36 }
0x204a   :  { %12712 = vpow2.f32 %v10635_v18 }
0x2054   :  { %v12713_v50 = vpop.eup %12712 }
0x2055   :  { %v5481_v43 = vadd.f32 1.0, %v12713_v50 }
0x2057   :  { %12714 = vrcp.f32 %v5481_v43 }
0x2061   :  { %v12715_v16 = vpop.eup %12714 }
0x2062   :  { %v5484_v61 = vadd.f32 1e-06, %v12715_v16  ;;  %v5501_v45 = vrot.slane %v12715_v16, 2 }
0x2064   :  { %12716 = vrcp.f32 %v5484_v61  ;;  %11609 = vmatmul.mubr.msk.f32.vlgmr.msra.gmra.mrb[40].mxu0 %vm2871_vm8, %v5501_v45 }
0x2065   :  { %11626 = vmatprep.mubr.msk.f32.mxu0 %vm530_vm0, %v5708_v54 }
0x206e   :  { %v12717_v17 = vpop.eup %12716 }
0x206f   :  { %v5486_v24 = vsub.f32 0.0, %v12717_v17 }
0x2071   :  { %v5487_v23 = vmul.f32 1.442695, %v5486_v24 }
0x2073   :  { %12718 = vpow2.f32 %v5487_v23 }
0x207d   :  { %v12719_v46 = vpop.eup %12718 }
0x207e   :  { %v5492_v48 = vmul.f32 %v12719_v46, %v5490_v10  ;;  %v5493_v56 = vsub.f32 1.0, %v12719_v46  ;;  %v5709_v10 = vld [vmem:[%s15782_s15 + $0x8] sm:$0xff]  ;;  %s10295_s15 = sshll.u32 %s13449_s14, 4  ;;  %s15524_s15 = int_to_ptr.vmem [resolvable:$true] %s10295_s15 }
0x2080   :  { %v5494_v26 = vmul.f32 %v5493_v56, %v14994_v38  ;;  %v5947_v56 = vld [vmem:[%s15783_s16 + $0x10] sm:$0xff] }
0x2082   :  { %v5495_v49 = vadd.f32 %v5494_v26, %v5492_v48  ;;  %v5948_v26 = vld [vmem:[%s15783_s16 + $0x18] sm:$0xff] }
0x2084   :  { %vm5496_vm11 = vcmp.ge.f32.partialorder %v5495_v49, %v14936_v52 }
0x2085   :  { %v10636_v59 = vsel %vm5496_vm11, 1.0, %v15733_v12  ;;  %v5499_v42 = vsel %vm5496_vm11, 0.0, %v5495_v49  ;;  %v12309_v49 = vpack.c.bf16 %v5948_v26, %v5947_v56 }
0x2086   :  { %v5705_v60 = vsel %vm2687_vm7, %v10633_v6, %v10636_v59  ;;  %v5591_v35 = vrot.slane %v5499_v42, 6  ;;  %v10649_v59 = vld [vmem:[%s15784_s19] ss:$0 sm:$0xff] }
0x2137   :  { %v5570_v21 = vpop.f32.mrb[40].mxu0 }
0x2138   :  { %v5575_v15 = vrot.slane %v5570_v21, 4  ;;  %v11610_v2 = vpop.f32.mrb[41].mxu0 }
0x213a   :  { %v5577_v22 = vadd.f32 %v14898_v30, %v5575_v15 }
0x213c   :  { %v5578_v51 = vadd.f32 %v14910_v4, %v5577_v22 }
0x213e   :  { %v10638_v3 = vmul.f32 -1.442695, %v5578_v51 }
0x2140   :  { %12720 = vpow2.f32 %v10638_v3 }
0x214a   :  { %v12721_v37 = vpop.eup %12720 }
0x214b   :  { %v5582_v55 = vadd.f32 1.0, %v12721_v37 }
0x214d   :  { %12722 = vrcp.f32 %v5582_v55 }
0x2157   :  { %v12723_v31 = vpop.eup %12722 }
0x2158   :  { %v5585_v62 = vadd.f32 1e-06, %v12723_v31  ;;  %v5602_v28 = vrot.slane %v12723_v31, 4 }
0x215a   :  { %12724 = vrcp.f32 %v5585_v62  ;;  %11620 = vmatmul.mubr.msk.f32.vlgmr.msra.gmra.mrb[52].mxu1 %vm2871_vm8, %v5602_v28 }
0x215b   :  { %11631 = vmatprep.mubr.msk.f32.mxu1 %vm13432_vm2, %v15733_v12 }
0x2164   :  { %v12725_v11 = vpop.eup %12724 }
0x2165   :  { %v5587_v39 = vsub.f32 0.0, %v12725_v11 }
0x2167   :  { %v5588_v13 = vmul.f32 1.442695, %v5587_v39 }
0x2169   :  { %12726 = vpow2.f32 %v5588_v13 }
0x2173   :  { %v12727_v44 = vpop.eup %12726 }
0x2174   :  { %v5593_v7 = vmul.f32 %v12727_v44, %v5591_v35  ;;  %v5594_v47 = vsub.f32 1.0, %v12727_v44 }
0x2176   :  { %v5595_v63 = vmul.f32 %v5594_v47, %v14994_v38 }
0x2178   :  { %v5596_v41 = vadd.f32 %v5595_v63, %v5593_v7  ;;  %v13443_v63 = vmov -1e+30  }
0x217a   :  { %vm5597_vm7 = vcmp.ge.f32.partialorder %v5596_v41, %v14936_v52 }
0x217b   :  { %v10639_v14 = vsel %vm5597_vm7, 1.0, %v15733_v12  ;;  %v5600_v27 = vsel %vm5597_vm7, 0.0, %v5596_v41 }
0x217c   :  { %v5706_v34 = vsel %vm1907_vm3, %v5705_v60, %v10639_v14  ;;  %v5692_v50 = vrot.slane %v5600_v27, 6  ;;  %vm5793_vm3 = vcmask 261126  }
0x222d   :  { %v5671_v5 = vpop.f32.mrb[52].mxu1 }
0x222e   :  { %v5676_v29 = vrot.slane %v5671_v5, 2  ;;  %v11621_v32 = vpop.f32.mrb[53].mxu1 }
0x2230   :  { %v5678_v40 = vadd.f32 %v14898_v30, %v5676_v29 }
0x2232   :  { %v5679_v20 = vadd.f32 %v14910_v4, %v5678_v40 }
0x2234   :  { %v10641_v33 = vmul.f32 -1.442695, %v5679_v20 }
0x2236   :  { %12728 = vpow2.f32 %v10641_v33 }
0x2240   :  { %v12729_v53 = vpop.eup %12728 }
0x2241   :  { %v5683_v8 = vadd.f32 1.0, %v12729_v53 }
0x2243   :  { %12730 = vrcp.f32 %v5683_v8 }
0x224d   :  { %v12731_v19 = vpop.eup %12730 }
0x224e   :  { %v5686_v9 = vadd.f32 1e-06, %v12731_v19 }
0x2250   :  { %12732 = vrcp.f32 %v5686_v9 }
0x225a   :  { %v12733_v57 = vpop.eup %12732 }
0x225b   :  { %v5688_v36 = vsub.f32 0.0, %v12733_v57 }
0x225d   :  { %v5689_v18 = vmul.f32 1.442695, %v5688_v36 }
0x225f   :  { %12734 = vpow2.f32 %v5689_v18 }
0x2269   :  { %v12735_v43 = vpop.eup %12734 }
0x226a   :  { %v5694_v16 = vmul.f32 %v12735_v43, %v5692_v50  ;;  %v5695_v61 = vsub.f32 1.0, %v12735_v43 }
0x226c   :  { %v5696_v30 = vmul.f32 %v5695_v61, %v14994_v38  ;;  %v5946_v38 = vld [vmem:[%s15783_s16 + $0x8] sm:$0xff] }
0x226e   :  { %v5697_v4 = vadd.f32 %v5696_v30, %v5694_v16 }
0x2270   :  { %vm5698_vm12 = vcmp.ge.f32.partialorder %v5697_v4, %v14936_v52  ;;  %v5945_v52 = vld [vmem:[%s15783_s16] sm:$0xff] }
0x2271   :  { %v10642_v45 = vsel %vm5698_vm12, 1.0, %v15733_v12  ;;  %v5701_v17 = vsel %vm5698_vm12, 0.0, %v5697_v4  ;;  %v12305_v46 = vpack.c.bf16 %v5946_v38, %v5945_v52 }
0x2272   :  { %v5707_v24 = vsel %vm4444_vm13, %v5706_v34, %v10642_v45  ;;  %5794 = vst.msk [vmem:[#allocation35 - $0x6] sm:$0xc0] %vm5793_vm3, %v5701_v17 }
0x2273   :  { %v12301_v23 = vpack.c.bf16 %v5707_v24, %v14981_v0 }
0x2275   :  { %12302 = vmatprep.subr.bf16.mxu0 %v12301_v23 }
0x2276   :  { %12304 = vmatpush3.bf16.msra.mxu0 %v12301_v23 }
0x2277   :  { %11634 = vmatprep.subr.mxu0 %v15733_v12 }
0x2279   :  { %11627 = vmatmul.mubr.msk.f32.vlgmr.msra.gmra.mrb[42].mxu0 %vm530_vm0, %v5709_v10 }
0x227a   :  { %11636 = vmatprep.mubr.msk.f32.mxu0 %vm13432_vm2, %v15733_v12 }
0x234c   :  { %v15035_v48 = vpop.f32.mrb[42].mxu0 }
0x234d   :  { %5792 = vst.msk [vmem:[#allocation33 + $0x8] sm:$0xff] %vm2871_vm8, %v15035_v48  ;;  %v15041_v0 = vpop.f32.mrb[43].mxu0  ;;  %11635 = vmatpush3.xpose.msk.msra.mxu0 %vm2871_vm8, %v15035_v48 }
0x234e   :  { %5791 = vst.msk [vmem:[#allocation33] sm:$0xff] %vm2871_vm8, %v15041_v0  ;;  %11630 = vmatpush3.xpose.msk.msra.mxu1 %vm2871_vm8, %v15041_v0  ;;  %11650 = vmatprep.subr.mxu0 %v15733_v12 }
0x234f   :  { %12306 = vmatprep.subr.bf16.mxu1 %v12305_v46 }
0x2350   :  { %11637 = vmatmul.mubr.msk.f32.vlgmr.msra.gmra.mrb[44].mxu0 %vm2871_vm8, %v13437_v1 }
0x2351   :  { %11632 = vmatmul.mubr.msk.f32.vlgmr.msra.gmra.mrb[54].mxu1 %vm2871_vm8, %v13437_v1  ;;  %11652 = vmatprep.mubr.msk.f32.mxu0 %vm13432_vm2, %v15733_v12 }
0x2352   :  { %12308 = vmatpush3.bf16.msra.mxu1 %v12305_v46  ;;  %11647 = vmatprep.mubr.msk.f32.mxu1 %vm2871_vm8, %v15041_v0 }
0x2353   :  { %12310 = vmatprep.subr.bf16.mxu1 %v12309_v49 }
0x2356   :  { %12312 = vmatpush3.bf16.msra.mxu1 %v12309_v49 }
0x2357   :  { %11660 = vmatprep.subr.mxu1 %v15733_v12 }
0x2359   :  { %11648 = vmatmul.mubr.msk.f32.vlgmr.msra.gmra.mrb[56].mxu1 %vm2871_vm8, %v15035_v48 }
0x235a   :  { %11662 = vmatprep.mubr.msk.f32.mxu1 %vm13432_vm2, %v15733_v12 }
0x2423   :  { %v15086_v2 = vpop.f32.mrb[44].mxu0 }
0x2424   :  { %v15063_v6 = vpop.f32.mrb[54].mxu1  ;;  %v11638_v22 = vpop.f32.mrb[45].mxu0  ;;  %vm5943_vm14 = vcmp.gt.f32.partialorder %v15086_v2, 0.0 }
0x2425   :  { %v11633_v1 = vpop.f32.mrb[55].mxu1  ;;  %vm5868_vm13 = vcmp.gt.f32.partialorder %v15063_v6, 0.0  ;;  %v5944_v9 = vsel %vm5943_vm14, 0.0, %v13443_v63 }
0x2426   :  { %v5869_v41 = vsel %vm5868_vm13, 0.0, %v13443_v63  ;;  %v15154_v50 = vrot.slane %v5944_v9, %v14438_v58 }
0x2427   :  { %v15141_v14 = vrot.slane %v5869_v41, %v14438_v58 }
0x242c   :  { %v11649_v42 = vpop.f32.mrb[56].mxu1 }
0x242d   :  { %v6022_v60 = vpop.f32.mrb[57].mxu1  ;;  %v15080_v15 = vadd.f32 %v11649_v42, %v10649_v59 }
0x242e   :  { %v15066_v21 = vadd.f32 %v10649_v59, %v6022_v60 }
0x2430   :  { %6201 = vrot.lane.b32.xlu1 %v15066_v21, %s13438_s6  ;;  %6036 = vrot.lane.b32.xlu0 %v15066_v21, %s13439_s18 }
0x2434   :  { %6366 = vrot.lane.b32.xlu1 %v15066_v21, %s13440_s22  ;;  %6199 = vrot.lane.b32.xlu0 %v15066_v21, %s13433_s28 }
0x2438   :  { %6531 = vrot.lane.b32.xlu1 %v15066_v21, %s13441_s23  ;;  %6364 = vrot.lane.b32.xlu0 %v15066_v21, %s13435_s0 }
0x243c   :  { %6699 = vrot.lane.b32.xlu1 %v15080_v15, %s13439_s18  ;;  %6529 = vrot.lane.b32.xlu0 %v15066_v21, %s13442_s26 }
0x2440   :  { %6862 = vrot.lane.b32.xlu1 %v15080_v15, %s13433_s28  ;;  %6864 = vrot.lane.b32.xlu0 %v15080_v15, %s13438_s6 }
0x2444   :  { %7027 = vrot.lane.b32.xlu1 %v15080_v15, %s13435_s0  ;;  %7029 = vrot.lane.b32.xlu0 %v15080_v15, %s13440_s22 }
0x2448   :  { %7192 = vrot.lane.b32.xlu1 %v15080_v15, %s13442_s26  ;;  %7194 = vrot.lane.b32.xlu0 %v15080_v15, %s13441_s23 }
0x24a2   :  { %v6202_v51 = vpop.permute.xlu1 %6201  ;;  %v6037_v3 = vpop.permute.xlu0 %6036 }
0x24a3   :  { %11651 = vmatpush3.xpose.msk.msra.mxu0 %vm858_vm1, %v6037_v3  ;;  %11661 = vmatpush3.xpose.msk.msra.mxu1 %vm858_vm1, %v6202_v51 }
0x24a4   :  { %11670 = vmatprep.subr.mxu1 %v15733_v12  ;;  %11655 = vmatprep.subr.mxu0 %v15733_v12 }
0x24a6   :  { %v6367_v37 = vpop.permute.xlu1 %6366  ;;  %11653 = vmatmul.mubr.msk.f32.vlgmr.msra.gmra.mrb[46].mxu0 %vm858_vm1, %v15066_v21  ;;  %v6200_v55 = vpop.permute.xlu0 %6199 }
0x24a7   :  { %11663 = vmatmul.mubr.msk.f32.vlgmr.msra.gmra.mrb[58].mxu1 %vm858_vm1, %v6200_v55  ;;  %11657 = vmatprep.mubr.msk.f32.mxu0 %vm13432_vm2, %v15733_v12 }
0x24a8   :  { %11671 = vmatpush3.xpose.msk.msra.mxu1 %vm858_vm1, %v6367_v37  ;;  %11672 = vmatprep.mubr.msk.f32.mxu1 %vm13432_vm2, %v15733_v12 }
0x24a9   :  { %11680 = vmatprep.subr.mxu1 %v15733_v12 }
0x24aa   :  { %v6532_v31 = vpop.permute.xlu1 %6531  ;;  %v6365_v62 = vpop.permute.xlu0 %6364 }
0x24ab   :  { %11673 = vmatmul.mubr.msk.f32.vlgmr.msra.gmra.mrb[60].mxu1 %vm858_vm1, %v6365_v62 }
0x24ac   :  { %11681 = vmatpush3.xpose.msk.msra.mxu1 %vm858_vm1, %v6532_v31  ;;  %11682 = vmatprep.mubr.msk.f32.mxu1 %vm13432_vm2, %v15733_v12 }
0x24ad   :  { %11690 = vmatprep.subr.mxu1 %v15733_v12 }
0x24ae   :  { %v6700_v28 = vpop.permute.xlu1 %6699  ;;  %v6530_v11 = vpop.permute.xlu0 %6529 }
0x24af   :  { %11683 = vmatmul.mubr.msk.f32.vlgmr.msra.gmra.mrb[62].mxu1 %vm858_vm1, %v6530_v11 }
0x24b0   :  { %11691 = vmatpush3.xpose.msk.msra.mxu1 %vm858_vm1, %v6700_v28  ;;  %11692 = vmatprep.mubr.msk.f32.mxu1 %vm13432_vm2, %v15733_v12 }
0x24b1   :  { %11700 = vmatprep.subr.mxu1 %v15733_v12 }
0x24b2   :  { %v6863_v39 = vpop.permute.xlu1 %6862  ;;  %v6865_v13 = vpop.permute.xlu0 %6864 }
0x24b3   :  { %11693 = vmatmul.mubr.msk.f32.vlgmr.msra.gmra.mrb[64].mxu1 %vm858_vm1, %v15080_v15 }
0x24b4   :  { %11701 = vmatpush3.xpose.msk.msra.mxu1 %vm858_vm1, %v6865_v13  ;;  %11702 = vmatprep.mubr.msk.f32.mxu1 %vm13432_vm2, %v15733_v12 }
0x24b5   :  { %11710 = vmatprep.subr.mxu1 %v15733_v12 }
0x24b6   :  { %v7030_v35 = vpop.permute.xlu0 %7029  ;;  %v7028_v44 = vpop.permute.xlu1 %7027 }
0x24b7   :  { %11703 = vmatmul.mubr.msk.f32.vlgmr.msra.gmra.mrb[66].mxu1 %vm858_vm1, %v6863_v39 }
0x24b8   :  { %11711 = vmatpush3.xpose.msk.msra.mxu1 %vm858_vm1, %v7030_v35  ;;  %11712 = vmatprep.mubr.msk.f32.mxu1 %vm13432_vm2, %v15733_v12 }
0x24b9   :  { %11720 = vmatprep.subr.mxu1 %v15733_v12 }
0x24ba   :  { %v7195_v7 = vpop.permute.xlu0 %7194  ;;  %v7193_v47 = vpop.permute.xlu1 %7192 }
0x24bb   :  { %11713 = vmatmul.mubr.msk.f32.vlgmr.msra.gmra.mrb[68].mxu1 %vm858_vm1, %v7028_v44 }
0x24bc   :  { %11721 = vmatpush3.xpose.msk.msra.mxu1 %vm858_vm1, %v7195_v7  ;;  %11722 = vmatprep.mubr.msk.f32.mxu1 %vm13432_vm2, %v15733_v12 }
0x24bf   :  { %11723 = vmatmul.mubr.msk.f32.vlgmr.msra.gmra.mrb[70].mxu1 %vm858_vm1, %v7193_v47 }
0x2579   :  { %v6108_v27 = vpop.f32.mrb[46].mxu0 }
0x257a   :  { %v6109_v34 = vadd.f32 %v6108_v27, %v15141_v14  ;;  %v11654_v54 = vpop.f32.mrb[47].mxu0  ;;  %v6273_v5 = vpop.f32.mrb[58].mxu1 }
0x257b   :  { %v6274_v29 = vadd.f32 %v6273_v5, %v15141_v14  ;;  %v11664_v32 = vpop.f32.mrb[59].mxu1 }
0x257c   :  { %v6112_v40 = vsel %vm858_vm1, %v6109_v34, -inf }
0x257d   :  { %6113 = vmax.xlane.f32.xlu0 %v6112_v40  ;;  %v6277_v20 = vsel %vm858_vm1, %v6274_v29, -inf }
0x257e   :  { %6278 = vmax.xlane.f32.xlu1 %v6277_v20  ;;  %v6438_v33 = vpop.f32.mrb[60].mxu1 }
0x257f   :  { %v6439_v53 = vadd.f32 %v6438_v33, %v15141_v14  ;;  %v11674_v8 = vpop.f32.mrb[61].mxu1 }
0x2581   :  { %v6442_v19 = vsel %vm858_vm1, %v6439_v53, -inf }
0x2582   :  { %6443 = vmax.xlane.f32.xlu0 %v6442_v19  ;;  %v6603_v57 = vpop.f32.mrb[62].mxu1 }
0x2583   :  { %v15151_v36 = vadd.f32 %v6603_v57, %v15141_v14  ;;  %v11684_v18 = vpop.f32.mrb[63].mxu1 }
0x2585   :  { %v6607_v43 = vsel %vm858_vm1, %v15151_v36, -inf }
0x2586   :  { %6608 = vmax.xlane.f32.xlu0 %v6607_v43  ;;  %v6771_v16 = vpop.f32.mrb[64].mxu1 }
0x2587   :  { %v6772_v61 = vadd.f32 %v6771_v16, %v15154_v50  ;;  %v11694_v30 = vpop.f32.mrb[65].mxu1 }
0x2589   :  { %v6775_v4 = vsel %vm858_vm1, %v6772_v61, -inf }
0x258a   :  { %6776 = vmax.xlane.f32.xlu1 %v6775_v4  ;;  %v6936_v45 = vpop.f32.mrb[66].mxu1 }
0x258b   :  { %v6937_v17 = vadd.f32 %v6936_v45, %v15154_v50  ;;  %v11704_v24 = vpop.f32.mrb[67].mxu1 }
0x258d   :  { %v6940_v23 = vsel %vm858_vm1, %v6937_v17, -inf }
0x258e   :  { %6941 = vmax.xlane.f32.xlu0 %v6940_v23  ;;  %v7101_v58 = vpop.f32.mrb[68].mxu1 }
0x258f   :  { %v7102_v10 = vadd.f32 %v7101_v58, %v15154_v50  ;;  %v11714_v52 = vpop.f32.mrb[69].mxu1 }
0x2591   :  { %v7105_v38 = vsel %vm858_vm1, %v7102_v10, -inf }
0x2592   :  { %7106 = vmax.xlane.f32.xlu1 %v7105_v38  ;;  %v7266_v46 = vpop.f32.mrb[70].mxu1 }
0x2593   :  { %v11724_v56 = vpop.f32.mrb[71].mxu1  ;;  %v7267_v26 = vadd.f32 %v7266_v46, %v15154_v50 }
0x2595   :  { %v7270_v49 = vsel %vm858_vm1, %v7267_v26, -inf }
0x25a3   :  { %6123 = vrot.lane.b32.xlu1 %v15066_v21, %s13444_s13 }
0x25a4   :  { %6288 = vrot.lane.b32.xlu0 %v15066_v21, %s13445_s3 }
0x25c3   :  { %7271 = vmax.xlane.f32.xlu0 %v7270_v49 }
0x25d9   :  { %6453 = vrot.lane.b32.xlu0 %v15066_v21, %s13446_s29 }
0x260a   :  { %v6114_v6 = vpop.xlane.xlu0 %6113 }
0x260b   :  { %v6115_v1 = vsub.f32 %v6109_v34, %v6114_v6  ;;  %v6279_v59 = vpop.xlane.xlu1 %6278 }
0x260c   :  { %v6280_v42 = vsub.f32 %v6274_v29, %v6279_v59 }
0x260d   :  { %v6116_v60 = vmul.f32 1.442695, %v6115_v1 }
0x260e   :  { %v6281_v2 = vmul.f32 1.442695, %v6280_v42 }
0x260f   :  { %12736 = vpow2.f32 %v6116_v60  ;;  %v6444_v22 = vpop.xlane.xlu0 %6443 }
0x2610   :  { %12738 = vpow2.f32 %v6281_v2  ;;  %v6445_v51 = vsub.f32 %v6439_v53, %v6444_v22 }
0x2612   :  { %v6446_v3 = vmul.f32 1.442695, %v6445_v51 }
0x2613   :  { %v6609_v41 = vpop.xlane.xlu0 %6608 }
0x2614   :  { %12740 = vpow2.f32 %v6446_v3  ;;  %v6610_v27 = vsub.f32 %v15151_v36, %v6609_v41 }
0x2616   :  { %v6611_v54 = vmul.f32 1.442695, %v6610_v27 }
0x2617   :  { %v6777_v37 = vpop.xlane.xlu1 %6776 }
0x2618   :  { %v6778_v55 = vsub.f32 %v6772_v61, %v6777_v37 }
0x2619   :  { %v12737_v31 = vpop.eup %12736 }
0x261a   :  { %v15172_v62 = vpop.eup %12738  ;;  %v6779_v28 = vmul.f32 1.442695, %v6778_v55  ;;  %v6118_v11 = vsel %vm858_vm1, %v12737_v31, 0.0 }
0x261b   :  { %6119 = vadd.xlane.f32.xlu1 %v6118_v11  ;;  %v6283_v39 = vsel %vm858_vm1, %v15172_v62, 0.0  ;;  %v6942_v34 = vpop.xlane.xlu0 %6941  ;;  %v7357_v11 = vld [vmem:[%s15785_s9] sm:$0xff] }
0x261c   :  { %12742 = vpow2.f32 %v6779_v28  ;;  %6284 = vadd.xlane.f32.xlu0 %v6283_v39  ;;  %v6943_v5 = vsub.f32 %v6937_v17, %v6942_v34  ;;  %11730 = vmatprep.subr.mxu1 %v7357_v11  ;;  %v7358_v39 = vld [vmem:[%s15785_s9 + $0x8] sm:$0xff] }
0x261d   :  { %12744 = vpow2.f32 %v6611_v54  ;;  %11731 = vmatpush3.msra.mxu1 %v7357_v11  ;;  %v7359_v54 = vld [vmem:[%s15785_s9 + $0x10] sm:$0xff]  ;;  %v10686_v11 = vld [vmem:[#allocation2] ss:$0 sm:$0xff] }
0x261e   :  { %v15177_v13 = vpop.eup %12740  ;;  %v6944_v29 = vmul.f32 1.442695, %v6943_v5  ;;  %11735 = vmatprep.subr.mxu1 %v7358_v39 }
0x261f   :  { %v7107_v35 = vpop.xlane.xlu1 %7106  ;;  %v6448_v44 = vsel %vm858_vm1, %v15177_v13, 0.0  ;;  %v6289_v20 = vpop.permute.xlu0 %6288 }
0x2620   :  { %6449 = vadd.xlane.f32.xlu1 %v6448_v44  ;;  %12746 = vpow2.f32 %v6944_v29  ;;  %v7108_v32 = vsub.f32 %v7102_v10, %v7107_v35 }
0x2622   :  { %v7109_v40 = vmul.f32 1.442695, %v7108_v32 }
0x2623   :  { %v6124_v7 = vpop.permute.xlu1 %6123 }
0x2624   :  { %11656 = vmatpush3.msra.mxu0 %v6124_v7  ;;  %12748 = vpow2.f32 %v7109_v40 }
0x2625   :  { %11665 = vmatprep.subr.mxu0 %v15733_v12 }
0x2626   :  { %v15182_v47 = vpop.eup %12742 }
0x2627   :  { %v6781_v63 = vsel %vm858_vm1, %v15182_v47, 0.0  ;;  %v12745_v33 = vpop.eup %12744 }
0x2628   :  { %6782 = vadd.xlane.f32.xlu1 %v6781_v63 }
0x262a   :  { %v15192_v8 = vpop.eup %12746 }
0x262b   :  { %v6946_v57 = vsel %vm858_vm1, %v15192_v8, 0.0 }
0x262e   :  { %v15196_v36 = vpop.eup %12748 }
0x262f   :  { %v7111_v18 = vsel %vm858_vm1, %v15196_v36, 0.0 }
0x2632   :  { %6618 = vrot.lane.b32.xlu0 %v15066_v21, %s13447_s24  ;;  %v6613_v21 = vsel %vm858_vm1, %v12745_v33, 0.0 }
0x2639   :  { %6786 = vrot.lane.b32.xlu1 %v15080_v15, %s13444_s13 }
0x2650   :  { %v7272_v53 = vpop.xlane.xlu0 %7271 }
0x2651   :  { %v7273_v19 = vsub.f32 %v7267_v26, %v7272_v53  ;;  %6614 = vadd.xlane.f32.xlu0 %v6613_v21 }
0x2653   :  { %v7274_v9 = vmul.f32 1.442695, %v7273_v19 }
0x2654   :  { %v6454_v61 = vpop.permute.xlu0 %6453 }
0x2655   :  { %12750 = vpow2.f32 %v7274_v9  ;;  %6947 = vadd.xlane.f32.xlu0 %v6946_v57 }
0x265d   :  { %7112 = vadd.xlane.f32.xlu1 %v7111_v18 }
0x265f   :  { %v15200_v43 = vpop.eup %12750 }
0x2660   :  { %v7276_v16 = vsel %vm858_vm1, %v15200_v43, 0.0 }
0x2661   :  { %7277 = vadd.xlane.f32.xlu0 %v7276_v16 }
0x266e   :  { %7116 = vrot.lane.b32.xlu1 %v15080_v15, %s13446_s29 }
0x2672   :  { %7281 = vrot.lane.b32.xlu1 %v15080_v15, %s13447_s24 }
0x2677   :  { %6951 = vrot.lane.b32.xlu0 %v15080_v15, %s13445_s3 }
0x26a8   :  { %v6120_v30 = vpop.xlane.xlu1 %6119 }
0x26a9   :  { %12752 = vrcp.f32 %v6120_v30  ;;  %v6285_v4 = vpop.xlane.xlu0 %6284 }
0x26aa   :  { %12754 = vrcp.f32 %v6285_v4 }
0x26ad   :  { %v6450_v45 = vpop.xlane.xlu1 %6449  ;;  %v6619_v52 = vpop.permute.xlu0 %6618 }
0x26ae   :  { %12756 = vrcp.f32 %v6450_v45 }
0x26b3   :  { %v12753_v17 = vpop.eup %12752 }
0x26b4   :  { %v6122_v24 = vmul.f32 %v12753_v17, %v12737_v31  ;;  %v12755_v23 = vpop.eup %12754 }
0x26b5   :  { %v6287_v58 = vmul.f32 %v12755_v23, %v15172_v62  ;;  %v6783_v38 = vpop.xlane.xlu1 %6782 }
0x26b6   :  { %11658 = vmatmul.mubr.msk.f32.vlgmr.msra.gmra.mrb[48].mxu0 %vm858_vm1, %v6122_v24 }
0x26b7   :  { %11666 = vmatpush3.msra.mxu0 %v6289_v20  ;;  %11667 = vmatprep.mubr.msk.f32.mxu0 %vm13432_vm2, %v15733_v12  ;;  %v7360_v20 = vld [vmem:[%s15785_s9 + $0x18] sm:$0xff] }
0x26b8   :  { %11675 = vmatprep.subr.mxu0 %v15733_v12  ;;  %v12757_v15 = vpop.eup %12756 }
0x26b9   :  { %v6452_v10 = vmul.f32 %v12757_v15, %v15177_v13  ;;  %v6787_v26 = vpop.permute.xlu1 %6786 }
0x26ba   :  { %11668 = vmatmul.mubr.msk.f32.vlgmr.msra.gmra.mrb[50].mxu0 %vm858_vm1, %v6287_v58 }
0x26bb   :  { %11676 = vmatpush3.msra.mxu0 %v6454_v61  ;;  %11677 = vmatprep.mubr.msk.f32.mxu0 %vm13432_vm2, %v15733_v12 }
0x26bc   :  { %11685 = vmatprep.subr.mxu0 %v15733_v12 }
0x26be   :  { %11678 = vmatmul.mubr.msk.f32.vlgmr.msra.gmra.mrb[52].mxu0 %vm858_vm1, %v6452_v10  ;;  %v7746_v10 = vld [vmem:[%s15787_s4] sm:$0xff] }
0x26bf   :  { %11686 = vmatpush3.msra.mxu0 %v6619_v52  ;;  %11687 = vmatprep.mubr.msk.f32.mxu0 %vm13432_vm2, %v15733_v12  ;;  %v7747_v52 = vld [vmem:[%s15787_s4 + $0x8] sm:$0xff] }
0x26c0   :  { %11695 = vmatprep.subr.mxu0 %v15733_v12 }
0x26de   :  { %v6615_v46 = vpop.xlane.xlu0 %6614 }
0x26df   :  { %12758 = vrcp.f32 %v6615_v46  ;;  %v7748_v46 = vld [vmem:[%s15787_s4 + $0x10] sm:$0xff] }
0x26e0   :  { %12760 = vrcp.f32 %v6783_v38  ;;  %v12313_v38 = vpack.c.bf16 %v7747_v52, %v7746_v10 }
0x26e2   :  { %v6948_v56 = vpop.xlane.xlu0 %6947 }
0x26e3   :  { %12762 = vrcp.f32 %v6948_v56  ;;  %v7749_v56 = vld [vmem:[%s15787_s4 + $0x18] sm:$0xff] }
0x26e9   :  { %v12759_v49 = vpop.eup %12758 }
0x26ea   :  { %v6617_v6 = vmul.f32 %v12759_v49, %v12745_v33  ;;  %v7113_v1 = vpop.xlane.xlu1 %7112  ;;  %v12761_v59 = vpop.eup %12760  ;;  %v7840_v49 = vld [vmem:[%s15788_s2] sm:$0xff] }
0x26eb   :  { %12764 = vrcp.f32 %v7113_v1  ;;  %v6785_v42 = vmul.f32 %v12761_v59, %v15182_v47 }
0x26ec   :  { %11688 = vmatmul.mubr.msk.f32.vlgmr.msra.gmra.mrb[54].mxu0 %vm858_vm1, %v6617_v6  ;;  %v7841_v6 = vld [vmem:[%s15788_s2 + $0x8] sm:$0xff] }
0x26ed   :  { %11696 = vmatpush3.msra.mxu0 %v6787_v26  ;;  %11697 = vmatprep.mubr.msk.f32.mxu0 %vm13432_vm2, %v15733_v12  ;;  %v12763_v2 = vpop.eup %12762  ;;  %v12317_v26 = vpack.c.bf16 %v7749_v56, %v7748_v46  ;;  %v12321_v1 = vpack.c.bf16 %v7841_v6, %v7840_v49 }
0x26ee   :  { %v7278_v60 = vpop.xlane.xlu0 %7277  ;;  %11705 = vmatprep.subr.mxu0 %v15733_v12  ;;  %v6950_v22 = vmul.f32 %v12763_v2, %v15192_v8  ;;  %v7117_v51 = vpop.permute.xlu1 %7116  ;;  %v10678_v8 = vld [vmem:[%s15786_s1] ss:$0 sm:$0xff] }
0x26ef   :  { %12766 = vrcp.f32 %v7278_v60 }
0x26f0   :  { %11698 = vmatmul.mubr.msk.f32.vlgmr.msra.gmra.mrb[56].mxu0 %vm858_vm1, %v6785_v42 }
0x26f1   :  { %11707 = vmatprep.mubr.msk.f32.mxu0 %vm13432_vm2, %v15733_v12 }
0x26f2   :  { %v6952_v3 = vpop.permute.xlu0 %6951  ;;  %v7282_v31 = vpop.permute.xlu1 %7281 }
0x26f3   :  { %11706 = vmatpush3.msra.mxu0 %v6952_v3 }
0x26f4   :  { %11708 = vmatmul.mubr.msk.f32.vlgmr.msra.gmra.mrb[58].mxu0 %vm858_vm1, %v6950_v22  ;;  %11715 = vmatprep.subr.mxu0 %v15733_v12 }
0x26f5   :  { %v12765_v37 = vpop.eup %12764  ;;  %11716 = vmatpush3.msra.mxu0 %v7117_v51  ;;  %11717 = vmatprep.mubr.msk.f32.mxu0 %vm13432_vm2, %v15733_v12 }
0x26f6   :  { %v7115_v55 = vmul.f32 %v12765_v37, %v15196_v36  ;;  %11725 = vmatprep.subr.mxu0 %v15733_v12  ;;  %v10685_v37 = vld [vmem:[%s15789_s8] ss:$0 sm:$0xff] }
0x26f8   :  { %11718 = vmatmul.mubr.msk.f32.vlgmr.msra.gmra.mrb[60].mxu0 %vm858_vm1, %v7115_v55 }
0x26f9   :  { %v12767_v62 = vpop.eup %12766  ;;  %11726 = vmatpush3.msra.mxu0 %v7282_v31  ;;  %11727 = vmatprep.mubr.msk.f32.mxu0 %vm13432_vm2, %v15733_v12 }
0x26fa   :  { %v7280_v28 = vmul.f32 %v12767_v62, %v15200_v43  ;;  %12314 = vmatprep.subr.bf16.mxu0 %v12313_v38 }
0x26fc   :  { %11728 = vmatmul.mubr.msk.f32.vlgmr.msra.gmra.mrb[62].mxu0 %vm858_vm1, %v7280_v28 }
0x26fd   :  { %12316 = vmatpush3.bf16.msra.mxu0 %v12313_v38 }
0x26fe   :  { %12318 = vmatprep.subr.bf16.mxu0 %v12317_v26 }
0x2701   :  { %12320 = vmatpush3.bf16.msra.mxu0 %v12317_v26 }
0x2702   :  { %12322 = vmatprep.subr.bf16.mxu0 %v12321_v1 }
0x2789   :  { %v6195_v13 = vpop.f32.mrb[48].mxu0 }
0x278a   :  { %v11659_v35 = vpop.f32.mrb[49].mxu0  ;;  %11732 = vmatprep.mubr.msk.f32.mxu1 %vm858_vm1, %v6195_v13  ;;  %v7842_v13 = vld [vmem:[%s15788_s2 + $0x10] sm:$0xff] }
0x278b   :  { %v7843_v35 = vld [vmem:[%s15788_s2 + $0x18] sm:$0xff] }
0x278d   :  { %v6360_v44 = vpop.f32.mrb[50].mxu0 }
0x278e   :  { %v11669_v7 = vpop.f32.mrb[51].mxu0 }
0x2791   :  { %v6525_v47 = vpop.f32.mrb[52].mxu0 }
0x2792   :  { %v11679_v63 = vpop.f32.mrb[53].mxu0 }
0x2793   :  { %v7844_v63 = vld [vmem:[%s15788_s2 + $0x20] sm:$0xff] }
0x27bf   :  { %v6690_v41 = vpop.f32.mrb[54].mxu0 }
0x27c0   :  { %v11689_v27 = vpop.f32.mrb[55].mxu0 }
0x27c3   :  { %v6858_v34 = vpop.f32.mrb[56].mxu0 }
0x27c4   :  { %v11699_v5 = vpop.f32.mrb[57].mxu0  ;;  %11733 = vmatmul.mubr.msk.f32.vlgmr.msra.gmra.mrb[72].mxu1 %vm858_vm1, %v6858_v34  ;;  %v7846_v34 = vld [vmem:[%s15788_s2 + $0x30] sm:$0xff] }
0x27c5   :  { %11737 = vmatprep.mubr.msk.f32.mxu1 %vm858_vm1, %v6360_v44  ;;  %11736 = vmatpush3.msra.mxu1 %v7358_v39 }
0x27c6   :  { %11740 = vmatprep.subr.mxu1 %v7359_v54 }
0x27c7   :  { %v7023_v29 = vpop.f32.mrb[58].mxu0 }
0x27c8   :  { %v11709_v32 = vpop.f32.mrb[59].mxu0 }
0x27c9   :  { %v7849_v32 = vld [vmem:[%s15788_s2 + $0x48] sm:$0xff] }
0x27cb   :  { %v7188_v40 = vpop.f32.mrb[60].mxu0 }
0x27cc   :  { %v11719_v33 = vpop.f32.mrb[61].mxu0  ;;  %11738 = vmatmul.mubr.msk.f32.vlgmr.msra.gmra.mrb[72].mxu1 %vm858_vm1, %v7023_v29  ;;  %v7848_v29 = vld [vmem:[%s15788_s2 + $0x40] sm:$0xff] }
0x27cd   :  { %11742 = vmatprep.mubr.msk.f32.mxu1 %vm858_vm1, %v6525_v47  ;;  %11741 = vmatpush3.msra.mxu1 %v7359_v54  ;;  %v12325_v47 = vpack.c.bf16 %v7843_v35, %v7842_v13  ;;  %v7847_v54 = vld [vmem:[%s15788_s2 + $0x38] sm:$0xff] }
0x27ce   :  { %11745 = vmatprep.subr.mxu1 %v7360_v20  ;;  %v12333_v5 = vpack.c.bf16 %v7847_v54, %v7846_v34  ;;  %v7851_v33 = vld [vmem:[%s15788_s2 + $0x58] sm:$0xff] }
0x27cf   :  { %v7353_v53 = vpop.f32.mrb[62].mxu0 }
0x27d0   :  { %v11729_v21 = vpop.f32.mrb[63].mxu0 }
0x27d1   :  { %v7852_v21 = vld [vmem:[%s15788_s2 + $0x60] sm:$0xff] }
0x27d4   :  { %11743 = vmatmul.mubr.msk.f32.vlgmr.msra.gmra.mrb[72].mxu1 %vm858_vm1, %v7188_v40  ;;  %v12337_v40 = vpack.c.bf16 %v7849_v32, %v7848_v29  ;;  %v10693_v29 = vld [vmem:[%s15791_s10] ss:$0 sm:$0xff] }
0x27d5   :  { %11747 = vmatprep.mubr.msk.f32.mxu1 %vm858_vm1, %v6690_v41  ;;  %11746 = vmatpush3.msra.mxu1 %v7360_v20  ;;  %v7845_v41 = vld [vmem:[%s15788_s2 + $0x28] sm:$0xff]  ;;  %v7850_v20 = vld [vmem:[%s15788_s2 + $0x50] sm:$0xff] }
0x27d6   :  { %v12329_v27 = vpack.c.bf16 %v7845_v41, %v7844_v63 }
0x27dc   :  { %11748 = vmatmul.mubr.msk.f32.vlgmr.msra.gmra.mrb[72].mxu1 %vm858_vm1, %v7353_v53  ;;  %v12341_v53 = vpack.c.bf16 %v7851_v33, %v7850_v20 }
0x28af   :  { %v11749_v19 = vpop.f32.mrb[72].mxu1 }
0x28b0   :  { %v12422_v9 = vadd.f32 %v11749_v19, %v10678_v8  ;;  %v7689_v57 = vpop.f32.mrb[73].mxu1 }
0x28b1   :  { %v12423_v36 = vadd.f32 %v10678_v8, %v7689_v57  ;;  %v7853_v8 = vld [vmem:[%s15788_s2 + $0x68] sm:$0xff]  ;;  %v7855_v57 = vld [vmem:[%s15788_s2 + $0x78] sm:$0xff] }
0x28b2   :  { %v7701_v18 = vadd.f32 %v12422_v9, %v15035_v48  ;;  %v12345_v19 = vpack.c.bf16 %v7853_v8, %v7852_v21  ;;  %v7854_v9 = vld [vmem:[%s15788_s2 + $0x70] sm:$0xff] }
0x28b3   :  { %v7700_v43 = vadd.f32 %v12423_v36, %v15041_v0  ;;  %v12349_v36 = vpack.c.bf16 %v7855_v57, %v7854_v9 }
0x28b4   :  { %v7705_v16 = vsel %vm2871_vm8, %v7701_v18, 0.0 }
0x28b5   :  { %7706 = vadd.xlane.f32.xlu0 %v7705_v16  ;;  %v7702_v61 = vsel %vm2871_vm8, %v7700_v43, 0.0 }
0x28b6   :  { %7703 = vadd.xlane.f32.xlu1 %v7702_v61 }
0x2942   :  { %v7707_v30 = vpop.xlane.xlu0 %7706 }
0x2943   :  { %v7709_v4 = vmul.f32 0.03125, %v7707_v30  ;;  %v7704_v45 = vpop.xlane.xlu1 %7703 }
0x2944   :  { %v7708_v17 = vmul.f32 0.03125, %v7704_v45 }
0x2945   :  { %v7711_v24 = vsub.f32 %v7701_v18, %v7709_v4  ;;  %v10687_v18 = vld [vmem:[#allocation7] ss:$0 sm:$0xff] }
0x2946   :  { %v7710_v23 = vsub.f32 %v7700_v43, %v7708_v17  ;;  %v10690_v17 = vld [vmem:[#allocation9] ss:$0 sm:$0xff] }
0x2947   :  { %v7713_v58 = vmul.f32 %v7711_v24, %v7711_v24 }
0x2948   :  { %v7712_v48 = vmul.f32 %v7710_v23, %v7710_v23 }
0x2949   :  { %v7717_v0 = vsel %vm2871_vm8, %v7713_v58, 0.0 }
0x294a   :  { %7718 = vadd.xlane.f32.xlu0 %v7717_v0  ;;  %v7714_v15 = vsel %vm2871_vm8, %v7712_v48, 0.0 }
0x294b   :  { %7715 = vadd.xlane.f32.xlu1 %v7714_v15 }
0x29d7   :  { %v7719_v59 = vpop.xlane.xlu0 %7718 }
0x29d8   :  { %v7721_v42 = vmul.f32 0.03125, %v7719_v59  ;;  %v7716_v60 = vpop.xlane.xlu1 %7715 }
0x29d9   :  { %v7720_v2 = vmul.f32 0.03125, %v7716_v60 }
0x29da   :  { %v7723_v22 = vadd.f32 1e-05, %v7721_v42 }
0x29db   :  { %v7722_v51 = vadd.f32 1e-05, %v7720_v2  ;;  %v7984_v2 = vld [vmem:[%s15790_s7] sm:$0xff] }
0x29dc   :  { %12768 = vrsqrt.f32 %v7723_v22  ;;  %v7985_v22 = vld [vmem:[%s15790_s7 + $0x8] sm:$0xff] }
0x29dd   :  { %12770 = vrsqrt.f32 %v7722_v51  ;;  %v12353_v51 = vpack.c.bf16 %v7985_v22, %v7984_v2 }
0x29df   :  { %12354 = vmatprep.subr.bf16.mxu1 %v12353_v51 }
0x29e0   :  { %12356 = vmatpush3.bf16.msra.mxu1 %v12353_v51 }
0x29e6   :  { %v12769_v3 = vpop.eup %12768 }
0x29e7   :  { %v12771_v55 = vpop.eup %12770  ;;  %v7727_v31 = vmul.f32 %v12769_v3, %v7711_v24  ;;  %v7986_v3 = vld [vmem:[%s15790_s7 + $0x10] sm:$0xff] }
0x29e8   :  { %v7726_v62 = vmul.f32 %v12771_v55, %v7710_v23 }
0x29e9   :  { %v7736_v28 = vmul.f32 %v10685_v37, %v7727_v31 }
0x29ea   :  { %v7735_v39 = vmul.f32 %v10685_v37, %v7726_v62  ;;  %v7987_v37 = vld [vmem:[%s15790_s7 + $0x18] sm:$0xff] }
0x29eb   :  { %v7745_v7 = vadd.f32 %v10686_v11, %v7736_v28  ;;  %v12357_v55 = vpack.c.bf16 %v7987_v37, %v7986_v3 }
0x29ec   :  { %v7744_v44 = vadd.f32 %v10686_v11, %v7735_v39 }
0x29ed   :  { %12358 = vmatprep.subr.bf16.mxu1 %v12357_v55 }
0x29ee   :  { %11758 = vmatprep.mubr.msk.f32.mxu0 %vm2871_vm8, %v7744_v44  ;;  %12360 = vmatpush3.bf16.msra.mxu1 %v12357_v55 }
0x29ef   :  { %11759 = vmatmul.mubr.msk.f32.vlgmr.msra.gmra.mrb[64].mxu0 %vm2871_vm8, %v7745_v7  ;;  %11807 = vmatprep.subr.mxu1 %v15733_v12 }
0x29f0   :  { %12324 = vmatpush3.bf16.msra.mxu0 %v12321_v1 }
0x29f1   :  { %12326 = vmatprep.subr.bf16.mxu0 %v12325_v47 }
0x29f4   :  { %12328 = vmatpush3.bf16.msra.mxu0 %v12325_v47 }
0x29f5   :  { %12330 = vmatprep.subr.bf16.mxu0 %v12329_v27 }
0x29f8   :  { %12332 = vmatpush3.bf16.msra.mxu0 %v12329_v27  ;;  %v10692_v27 = vld [vmem:[#allocation12] ss:$0 sm:$0xff] }
0x29f9   :  { %12334 = vmatprep.subr.bf16.mxu0 %v12333_v5 }
0x29fc   :  { %12336 = vmatpush3.bf16.msra.mxu0 %v12333_v5 }
0x29fd   :  { %12338 = vmatprep.subr.bf16.mxu0 %v12337_v40 }
0x2a00   :  { %12340 = vmatpush3.bf16.msra.mxu0 %v12337_v40 }
0x2a01   :  { %12342 = vmatprep.subr.bf16.mxu0 %v12341_v53 }
0x2a04   :  { %12344 = vmatpush3.bf16.msra.mxu0 %v12341_v53 }
0x2a05   :  { %12346 = vmatprep.subr.bf16.mxu0 %v12345_v19 }
0x2a08   :  { %12348 = vmatpush3.bf16.msra.mxu0 %v12345_v19 }
0x2a09   :  { %12350 = vmatprep.subr.bf16.mxu0 %v12349_v36 }
0x2a0c   :  { %12352 = vmatpush3.bf16.msra.mxu0 %v12349_v36 }
0x2a0d   :  { %11832 = vmatprep.subr.mxu0 %v15733_v12 }
0x2ac2   :  { %v11760_v43 = vpop.f32.mrb[64].mxu0 }
0x2ac3   :  { %v7835_v16 = vadd.f32 %v11760_v43, %v10687_v18  ;;  %v7829_v61 = vpop.f32.mrb[65].mxu0 }
0x2ac4   :  { %v7830_v30 = vadd.f32 %v10687_v18, %v7829_v61 }
0x2ac5   :  { %v7839_v45 = vmax.f32 %v7835_v16, 0.0 }
0x2ac6   :  { %v7838_v4 = vmax.f32 %v7830_v30, 0.0 }
0x2ac8   :  { %11793 = vmatprep.mubr.f32.mxu0 %v7838_v4 }
0x2ac9   :  { %11794 = vmatmul.mubr.f32.vlgmr.msra.gmra.mrb[66].mxu0 %v7839_v45 }
0x2aca   :  { %11834 = vmatprep.mubr.msk.f32.mxu0 %vm13432_vm2, %v15733_v12 }
0x2b9c   :  { %v11795_v24 = vpop.f32.mrb[66].mxu0 }
0x2b9d   :  { %v7935_v23 = vadd.f32 %v11795_v24, %v10690_v17  ;;  %v7929_v58 = vpop.f32.mrb[67].mxu0 }
0x2b9e   :  { %v7930_v48 = vadd.f32 %v10690_v17, %v7929_v58 }
0x2b9f   :  { %v7939_v0 = vadd.f32 %v7935_v23, %v7745_v7 }
0x2ba0   :  { %v7938_v15 = vadd.f32 %v7930_v48, %v7744_v44  ;;  %v10691_v44 = vld [vmem:[#allocation10] ss:$0 sm:$0xff] }
0x2ba1   :  { %v7943_v10 = vsel %vm2871_vm8, %v7939_v0, 0.0 }
0x2ba2   :  { %7944 = vadd.xlane.f32.xlu0 %v7943_v10  ;;  %v7940_v52 = vsel %vm2871_vm8, %v7938_v15, 0.0 }
0x2ba3   :  { %7941 = vadd.xlane.f32.xlu1 %v7940_v52 }
0x2c2f   :  { %v7945_v38 = vpop.xlane.xlu0 %7944 }
0x2c30   :  { %v7947_v46 = vmul.f32 0.03125, %v7945_v38  ;;  %v7942_v56 = vpop.xlane.xlu1 %7941 }
0x2c31   :  { %v7946_v26 = vmul.f32 0.03125, %v7942_v56 }
0x2c32   :  { %v7949_v49 = vsub.f32 %v7939_v0, %v7947_v46 }
0x2c33   :  { %v7948_v6 = vsub.f32 %v7938_v15, %v7946_v26 }
0x2c34   :  { %v7951_v1 = vmul.f32 %v7949_v49, %v7949_v49 }
0x2c35   :  { %v7950_v59 = vmul.f32 %v7948_v6, %v7948_v6 }
0x2c36   :  { %v7955_v42 = vsel %vm2871_vm8, %v7951_v1, 0.0 }
0x2c37   :  { %7956 = vadd.xlane.f32.xlu0 %v7955_v42  ;;  %v7952_v60 = vsel %vm2871_vm8, %v7950_v59, 0.0 }
0x2c38   :  { %7953 = vadd.xlane.f32.xlu1 %v7952_v60 }
0x2cc4   :  { %v7957_v31 = vpop.xlane.xlu0 %7956 }
0x2cc5   :  { %v7959_v62 = vmul.f32 0.03125, %v7957_v31  ;;  %v7954_v28 = vpop.xlane.xlu1 %7953 }
0x2cc6   :  { %v7958_v11 = vmul.f32 0.03125, %v7954_v28 }
0x2cc7   :  { %v7961_v39 = vadd.f32 1e-05, %v7959_v62 }
0x2cc8   :  { %v7960_v13 = vadd.f32 1e-05, %v7958_v11 }
0x2cc9   :  { %12772 = vrsqrt.f32 %v7961_v39 }
0x2cca   :  { %12774 = vrsqrt.f32 %v7960_v13 }
0x2cd3   :  { %v12773_v35 = vpop.eup %12772 }
0x2cd4   :  { %v12775_v7 = vpop.eup %12774  ;;  %v7965_v47 = vmul.f32 %v12773_v35, %v7949_v49 }
0x2cd5   :  { %v7964_v63 = vmul.f32 %v12775_v7, %v7948_v6 }
0x2cd6   :  { %v7974_v41 = vmul.f32 %v10691_v44, %v7965_v47 }
0x2cd7   :  { %v7973_v34 = vmul.f32 %v10691_v44, %v7964_v63 }
0x2cd8   :  { %v15300_v5 = vadd.f32 %v10692_v27, %v7974_v41 }
0x2cd9   :  { %v15298_v54 = vadd.f32 %v10692_v27, %v7973_v34 }
0x2cdb   :  { %11804 = vmatprep.mubr.msk.f32.mxu1 %vm2871_vm8, %v15298_v54 }
0x2cdc   :  { %11805 = vmatmul.mubr.msk.f32.vlgmr.msra.gmra.mrb[74].mxu1 %vm2871_vm8, %v15300_v5 }
0x2cdd   :  { %11809 = vmatprep.mubr.msk.f32.mxu1 %vm13432_vm2, %v15733_v12 }
0x2daf   :  { %v11806_v32 = vpop.f32.mrb[74].mxu1 }
0x2db0   :  { %v15309_v40 = vadd.f32 %v11806_v32, %v10693_v29  ;;  %v8067_v20 = vpop.f32.mrb[75].mxu1 }
0x2db1   :  { %v15311_v33 = vadd.f32 %v10693_v29, %v8067_v20 }
0x2db3   :  { %8077 = vrot.lane.b32.xlu1 %v15311_v33, %s13439_s18 }
0x2db7   :  { %8242 = vrot.lane.b32.xlu1 %v15311_v33, %s13438_s6 }
0x2dbb   :  { %8240 = vrot.lane.b32.xlu1 %v15311_v33, %s13433_s28 }
0x2e25   :  { %v8078_v53 = vpop.permute.xlu1 %8077 }
0x2e26   :  { %11808 = vmatpush3.xpose.msk.msra.mxu1 %vm858_vm1, %v8078_v53 }
0x2e27   :  { %11812 = vmatprep.subr.mxu1 %v15733_v12 }
0x2e29   :  { %11810 = vmatmul.mubr.msk.f32.vlgmr.msra.gmra.mrb[76].mxu1 %vm858_vm1, %v15311_v33  ;;  %v8243_v45 = vpop.permute.xlu1 %8242 }
0x2e2a   :  { %11814 = vmatprep.mubr.msk.f32.mxu1 %vm13432_vm2, %v15733_v12 }
0x2e2d   :  { %v8241_v24 = vpop.permute.xlu1 %8240 }
0x2efc   :  { %v8149_v21 = vpop.f32.mrb[76].mxu1 }
0x2efd   :  { %v8150_v8 = vadd.f32 %v8149_v21, %v15141_v14  ;;  %v11811_v19 = vpop.f32.mrb[77].mxu1 }
0x2eff   :  { %v8153_v9 = vsel %vm858_vm1, %v8150_v8, -inf }
0x2f00   :  { %8154 = vmax.xlane.f32.xlu0 %v8153_v9 }
0x2f8d   :  { %v8155_v57 = vpop.xlane.xlu0 %8154 }
0x2f8e   :  { %v8156_v36 = vsub.f32 %v8150_v8, %v8155_v57 }
0x2f90   :  { %v8157_v18 = vmul.f32 1.442695, %v8156_v36 }
0x2f92   :  { %12776 = vpow2.f32 %v8157_v18 }
0x2f9c   :  { %v12777_v43 = vpop.eup %12776 }
0x2f9d   :  { %v8159_v16 = vsel %vm858_vm1, %v12777_v43, 0.0 }
0x2f9e   :  { %8160 = vadd.xlane.f32.xlu0 %v8159_v16 }
0x2fb4   :  { %8164 = vrot.lane.b32.xlu0 %v15311_v33, %s13444_s13 }
0x302b   :  { %v8161_v61 = vpop.xlane.xlu0 %8160 }
0x302c   :  { %12778 = vrcp.f32 %v8161_v61 }
0x302f   :  { %v8165_v30 = vpop.permute.xlu0 %8164 }
0x3030   :  { %11813 = vmatpush3.msra.mxu1 %v8165_v30 }
0x3031   :  { %11817 = vmatprep.subr.mxu1 %v15733_v12 }
0x3036   :  { %v12779_v4 = vpop.eup %12778 }
0x3037   :  { %v8163_v17 = vmul.f32 %v12779_v4, %v12777_v43 }
0x3039   :  { %11815 = vmatmul.mubr.msk.f32.vlgmr.msra.gmra.mrb[78].mxu1 %vm858_vm1, %v8163_v17 }
0x303a   :  { %11818 = vmatpush3.xpose.msk.msra.mxu1 %vm858_vm1, %v8243_v45  ;;  %11819 = vmatprep.mubr.msk.f32.mxu1 %vm13432_vm2, %v15733_v12 }
0x303b   :  { %11822 = vmatprep.subr.mxu1 %v15733_v12 }
0x303d   :  { %11820 = vmatmul.mubr.msk.f32.vlgmr.msra.gmra.mrb[80].mxu1 %vm858_vm1, %v8241_v24 }
0x303e   :  { %11824 = vmatprep.mubr.msk.f32.mxu1 %vm13432_vm2, %v15733_v12 }
0x310c   :  { %v15339_v23 = vpop.f32.mrb[78].mxu1 }
0x310d   :  { %v11816_v58 = vpop.f32.mrb[79].mxu1 }
0x3110   :  { %v8314_v48 = vpop.f32.mrb[80].mxu1 }
0x3111   :  { %v8315_v0 = vadd.f32 %v8314_v48, %v15141_v14  ;;  %v11821_v15 = vpop.f32.mrb[81].mxu1 }
0x3113   :  { %v8318_v10 = vsel %vm858_vm1, %v8315_v0, -inf }
0x3114   :  { %8319 = vmax.xlane.f32.xlu1 %v8318_v10 }
0x3125   :  { %8329 = vrot.lane.b32.xlu1 %v15311_v33, %s13445_s3 }
0x3129   :  { %8405 = vrot.lane.b32.xlu1 %v15311_v33, %s13435_s0 }
0x312d   :  { %8572 = vrot.lane.b32.xlu1 %v15311_v33, %s13441_s23 }
0x3131   :  { %8736 = vrot.lane.b32.xlu1 %v15309_v40, %s13439_s18 }
0x3135   :  { %8899 = vrot.lane.b32.xlu1 %v15309_v40, %s13433_s28  ;;  %s15792_s28 = sld [smem:[#allocation111_spill]] }
0x3139   :  { %9064 = vrot.lane.b32.xlu1 %v15309_v40, %s13435_s0  ;;  %s15793_s0 = sld [smem:[#allocation112_spill]] }
0x313d   :  { %9229 = vrot.lane.b32.xlu1 %v15309_v40, %s13442_s26 }
0x31a1   :  { %v8320_v52 = vpop.xlane.xlu1 %8319 }
0x31a2   :  { %v8321_v38 = vsub.f32 %v8315_v0, %v8320_v52 }
0x31a4   :  { %v8322_v46 = vmul.f32 1.442695, %v8321_v38 }
0x31a5   :  { %v8330_v56 = vpop.permute.xlu1 %8329 }
0x31a6   :  { %12780 = vpow2.f32 %v8322_v46  ;;  %11823 = vmatpush3.msra.mxu1 %v8330_v56 }
0x31a7   :  { %11827 = vmatprep.subr.mxu1 %v15733_v12 }
0x31a9   :  { %v8406_v1 = vpop.permute.xlu1 %8405 }
0x31ad   :  { %v8573_v2 = vpop.permute.xlu1 %8572 }
0x31b0   :  { %v12781_v26 = vpop.eup %12780 }
0x31b1   :  { %v8324_v49 = vsel %vm858_vm1, %v12781_v26, 0.0  ;;  %v8737_v51 = vpop.permute.xlu1 %8736 }
0x31b2   :  { %8325 = vadd.xlane.f32.xlu0 %v8324_v49 }
0x31b5   :  { %v8900_v37 = vpop.permute.xlu1 %8899 }
0x31b9   :  { %v9065_v31 = vpop.permute.xlu1 %9064 }
0x31bd   :  { %v9230_v28 = vpop.permute.xlu1 %9229 }
0x31c8   :  { %8407 = vrot.lane.b32.xlu0 %v15311_v33, %s13440_s22 }
0x31cc   :  { %8570 = vrot.lane.b32.xlu0 %v15311_v33, %s13442_s26 }
0x31d0   :  { %8901 = vrot.lane.b32.xlu0 %v15309_v40, %s13438_s6 }
0x31d4   :  { %9066 = vrot.lane.b32.xlu0 %v15309_v40, %s13440_s22 }
0x31d8   :  { %9231 = vrot.lane.b32.xlu0 %v15309_v40, %s13441_s23 }
0x323f   :  { %v8326_v6 = vpop.xlane.xlu0 %8325 }
0x3240   :  { %12782 = vrcp.f32 %v8326_v6 }
0x3243   :  { %v8408_v59 = vpop.permute.xlu0 %8407 }
0x3247   :  { %v8571_v22 = vpop.permute.xlu0 %8570 }
0x324a   :  { %v12783_v42 = vpop.eup %12782 }
0x324b   :  { %v8328_v60 = vmul.f32 %v12783_v42, %v12781_v26  ;;  %v8902_v3 = vpop.permute.xlu0 %8901 }
0x324d   :  { %11825 = vmatmul.mubr.msk.f32.vlgmr.msra.gmra.mrb[82].mxu1 %vm858_vm1, %v8328_v60 }
0x324e   :  { %11828 = vmatpush3.xpose.msk.msra.mxu1 %vm858_vm1, %v8408_v59  ;;  %11829 = vmatprep.mubr.msk.f32.mxu1 %vm13432_vm2, %v15733_v12 }
0x324f   :  { %11837 = vmatprep.subr.mxu1 %v15733_v12  ;;  %v9067_v55 = vpop.permute.xlu0 %9066 }
0x3251   :  { %11830 = vmatmul.mubr.msk.f32.vlgmr.msra.gmra.mrb[84].mxu1 %vm858_vm1, %v8406_v1 }
0x3252   :  { %11838 = vmatpush3.xpose.msk.msra.mxu1 %vm858_vm1, %v8573_v2  ;;  %11839 = vmatprep.mubr.msk.f32.mxu1 %vm13432_vm2, %v15733_v12 }
0x3253   :  { %11847 = vmatprep.subr.mxu1 %v15733_v12  ;;  %v9232_v62 = vpop.permute.xlu0 %9231 }
0x3255   :  { %11840 = vmatmul.mubr.msk.f32.vlgmr.msra.gmra.mrb[86].mxu1 %vm858_vm1, %v8571_v22 }
0x3256   :  { %11848 = vmatpush3.xpose.msk.msra.mxu1 %vm858_vm1, %v8737_v51  ;;  %11849 = vmatprep.mubr.msk.f32.mxu1 %vm13432_vm2, %v15733_v12 }
0x3257   :  { %11857 = vmatprep.subr.mxu1 %v15733_v12 }
0x3259   :  { %11850 = vmatmul.mubr.msk.f32.vlgmr.msra.gmra.mrb[88].mxu1 %vm858_vm1, %v15309_v40 }
0x325a   :  { %11858 = vmatpush3.xpose.msk.msra.mxu1 %vm858_vm1, %v8902_v3  ;;  %11859 = vmatprep.mubr.msk.f32.mxu1 %vm13432_vm2, %v15733_v12 }
0x325b   :  { %11867 = vmatprep.subr.mxu1 %v15733_v12 }
0x325d   :  { %11860 = vmatmul.mubr.msk.f32.vlgmr.msra.gmra.mrb[90].mxu1 %vm858_vm1, %v8900_v37 }
0x325e   :  { %11868 = vmatpush3.xpose.msk.msra.mxu1 %vm858_vm1, %v9067_v55  ;;  %11869 = vmatprep.mubr.msk.f32.mxu1 %vm13432_vm2, %v15733_v12 }
0x325f   :  { %11877 = vmatprep.subr.mxu1 %v15733_v12 }
0x3261   :  { %11870 = vmatmul.mubr.msk.f32.vlgmr.msra.gmra.mrb[92].mxu1 %vm858_vm1, %v9065_v31 }
0x3262   :  { %11878 = vmatpush3.xpose.msk.msra.mxu1 %vm858_vm1, %v9232_v62  ;;  %11879 = vmatprep.mubr.msk.f32.mxu1 %vm13432_vm2, %v15733_v12 }
0x3265   :  { %11880 = vmatmul.mubr.msk.f32.vlgmr.msra.gmra.mrb[94].mxu1 %vm858_vm1, %v9230_v28 }
0x3266   :  { %11889 = vmatprep.mubr.msk.f32.mxu1 %vm858_vm1, %v15339_v23 }
0x3320   :  { %v15402_v11 = vpop.f32.mrb[82].mxu1 }
0x3321   :  { %v11826_v39 = vpop.f32.mrb[83].mxu1 }
0x3324   :  { %v8479_v13 = vpop.f32.mrb[84].mxu1 }
0x3325   :  { %v8480_v35 = vadd.f32 %v8479_v13, %v15141_v14  ;;  %v11831_v44 = vpop.f32.mrb[85].mxu1 }
0x3327   :  { %v8483_v7 = vsel %vm858_vm1, %v8480_v35, -inf }
0x3328   :  { %8484 = vmax.xlane.f32.xlu0 %v8483_v7  ;;  %v8644_v47 = vpop.f32.mrb[86].mxu1 }
0x3329   :  { %v8645_v63 = vadd.f32 %v8644_v47, %v15141_v14  ;;  %v11841_v41 = vpop.f32.mrb[87].mxu1 }
0x332b   :  { %v8648_v27 = vsel %vm858_vm1, %v8645_v63, -inf }
0x332c   :  { %8649 = vmax.xlane.f32.xlu1 %v8648_v27  ;;  %v8808_v34 = vpop.f32.mrb[88].mxu1 }
0x332d   :  { %v8809_v29 = vadd.f32 %v8808_v34, %v15154_v50  ;;  %v11851_v32 = vpop.f32.mrb[89].mxu1 }
0x332f   :  { %v8812_v20 = vsel %vm858_vm1, %v8809_v29, -inf }
0x3330   :  { %8813 = vmax.xlane.f32.xlu0 %v8812_v20  ;;  %v8973_v53 = vpop.f32.mrb[90].mxu1 }
0x3331   :  { %v8974_v21 = vadd.f32 %v8973_v53, %v15154_v50  ;;  %v11861_v8 = vpop.f32.mrb[91].mxu1 }
0x3333   :  { %v8977_v19 = vsel %vm858_vm1, %v8974_v21, -inf }
0x3334   :  { %8978 = vmax.xlane.f32.xlu0 %v8977_v19  ;;  %v9138_v9 = vpop.f32.mrb[92].mxu1 }
0x3335   :  { %v9139_v14 = vadd.f32 %v9138_v9, %v15154_v50  ;;  %v11871_v57 = vpop.f32.mrb[93].mxu1 }
0x3337   :  { %v9142_v36 = vsel %vm858_vm1, %v9139_v14, -inf }
0x3338   :  { %9143 = vmax.xlane.f32.xlu1 %v9142_v36  ;;  %v9303_v18 = vpop.f32.mrb[94].mxu1  ;;  %v9394_v36 = vld [vmem:[%s15792_s28] sm:$0xff] }
0x3339   :  { %v9304_v43 = vadd.f32 %v9303_v18, %v15154_v50  ;;  %v11881_v16 = vpop.f32.mrb[95].mxu1  ;;  %11887 = vmatprep.subr.mxu1 %v9394_v36  ;;  %v9395_v18 = vld [vmem:[%s15792_s28 + $0x8] sm:$0xff] }
0x333a   :  { %11888 = vmatpush3.msra.mxu1 %v9394_v36 }
0x333b   :  { %v9307_v61 = vsel %vm858_vm1, %v9304_v43, -inf  ;;  %11892 = vmatprep.subr.mxu1 %v9395_v18 }
0x333c   :  { %9308 = vmax.xlane.f32.xlu0 %v9307_v61 }
0x3352   :  { %8494 = vrot.lane.b32.xlu0 %v15311_v33, %s13446_s29 }
0x33b5   :  { %v8485_v30 = vpop.xlane.xlu0 %8484 }
0x33b6   :  { %v8486_v4 = vsub.f32 %v8480_v35, %v8485_v30 }
0x33b8   :  { %v8487_v45 = vmul.f32 1.442695, %v8486_v4 }
0x33b9   :  { %v8650_v17 = vpop.xlane.xlu1 %8649 }
0x33ba   :  { %12784 = vpow2.f32 %v8487_v45  ;;  %v8651_v24 = vsub.f32 %v8645_v63, %v8650_v17  ;;  %v9396_v45 = vld [vmem:[%s15792_s28 + $0x10] sm:$0xff] }
0x33bc   :  { %v8652_v23 = vmul.f32 1.442695, %v8651_v24 }
0x33bd   :  { %v8814_v58 = vpop.xlane.xlu0 %8813 }
0x33be   :  { %12786 = vpow2.f32 %v8652_v23  ;;  %v8815_v48 = vsub.f32 %v8809_v29, %v8814_v58 }
0x33c0   :  { %v8816_v0 = vmul.f32 1.442695, %v8815_v48  ;;  %v9397_v48 = vld [vmem:[%s15792_s28 + $0x18] sm:$0xff] }
0x33c1   :  { %v8979_v15 = vpop.xlane.xlu0 %8978 }
0x33c2   :  { %12788 = vpow2.f32 %v8816_v0  ;;  %v8980_v50 = vsub.f32 %v8974_v21, %v8979_v15 }
0x33c4   :  { %v12785_v10 = vpop.eup %12784  ;;  %v8981_v52 = vmul.f32 1.442695, %v8980_v50  ;;  %v10722_v50 = vld [vmem:[#allocation13] ss:$0 sm:$0xff] }
0x33c5   :  { %v9144_v38 = vpop.xlane.xlu1 %9143  ;;  %v8489_v46 = vsel %vm858_vm1, %v12785_v10, 0.0 }
0x33c6   :  { %12790 = vpow2.f32 %v8981_v52  ;;  %v9145_v56 = vsub.f32 %v9139_v14, %v9144_v38  ;;  %8490 = vadd.xlane.f32.xlu1 %v8489_v46 }
0x33c8   :  { %v12787_v26 = vpop.eup %12786  ;;  %v9146_v49 = vmul.f32 1.442695, %v9145_v56 }
0x33c9   :  { %v9309_v6 = vpop.xlane.xlu0 %9308  ;;  %v8654_v1 = vsel %vm858_vm1, %v12787_v26, 0.0 }
0x33ca   :  { %12792 = vpow2.f32 %v9146_v49  ;;  %8655 = vadd.xlane.f32.xlu0 %v8654_v1  ;;  %v9310_v37 = vsub.f32 %v9304_v43, %v9309_v6 }
0x33cc   :  { %v12789_v59 = vpop.eup %12788  ;;  %v9311_v55 = vmul.f32 1.442695, %v9310_v37  ;;  %v9783_v37 = vld [vmem:[%s15793_s0] sm:$0xff] }
0x33cd   :  { %v8495_v42 = vpop.permute.xlu0 %8494  ;;  %v8818_v60 = vsel %vm858_vm1, %v12789_v59, 0.0 }
0x33ce   :  { %8819 = vadd.xlane.f32.xlu1 %v8818_v60  ;;  %11833 = vmatpush3.msra.mxu0 %v8495_v42  ;;  %12794 = vpow2.f32 %v9311_v55  ;;  %v9784_v55 = vld [vmem:[%s15793_s0 + $0x8] sm:$0xff] }
0x33cf   :  { %11842 = vmatprep.subr.mxu0 %v15733_v12 }
0x33d0   :  { %v12791_v2 = vpop.eup %12790 }
0x33d1   :  { %v8983_v22 = vsel %vm858_vm1, %v12791_v2, 0.0 }
0x33d2   :  { %8984 = vadd.xlane.f32.xlu0 %v8983_v22 }
0x33d4   :  { %v12793_v51 = vpop.eup %12792 }
0x33d5   :  { %v9148_v3 = vsel %vm858_vm1, %v12793_v51, 0.0 }
0x33d6   :  { %9149 = vadd.xlane.f32.xlu1 %v9148_v3 }
0x33d8   :  { %v12795_v31 = vpop.eup %12794 }
0x33d9   :  { %v9313_v62 = vsel %vm858_vm1, %v12795_v31, 0.0 }
0x33e7   :  { %8659 = vrot.lane.b32.xlu1 %v15311_v33, %s13447_s24 }
0x33e8   :  { %8823 = vrot.lane.b32.xlu0 %v15309_v40, %s13444_s13 }
0x33ec   :  { %8988 = vrot.lane.b32.xlu0 %v15309_v40, %s13445_s3 }
0x33f0   :  { %9153 = vrot.lane.b32.xlu0 %v15309_v40, %s13446_s29 }
0x33f4   :  { %9318 = vrot.lane.b32.xlu0 %v15309_v40, %s13447_s24 }
0x340b   :  { %9314 = vadd.xlane.f32.xlu1 %v9313_v62  ;;  %v9785_v62 = vld [vmem:[%s15793_s0 + $0x10] sm:$0xff] }
0x3453   :  { %v8491_v33 = vpop.xlane.xlu1 %8490 }
0x3454   :  { %12796 = vrcp.f32 %v8491_v33  ;;  %v9786_v33 = vld [vmem:[%s15793_s0 + $0x18] sm:$0xff] }
0x3457   :  { %v8656_v28 = vpop.xlane.xlu0 %8655 }
0x3458   :  { %12798 = vrcp.f32 %v8656_v28  ;;  %v12365_v28 = vpack.c.bf16 %v9786_v33, %v9785_v62 }
0x345b   :  { %v8820_v39 = vpop.xlane.xlu1 %8819 }
0x345c   :  { %12800 = vrcp.f32 %v8820_v39  ;;  %v9877_v39 = vld [vmem:[%s15794_s12] sm:$0xff] }
0x345e   :  { %v12797_v13 = vpop.eup %12796 }
0x345f   :  { %v8493_v35 = vmul.f32 %v12797_v13, %v12785_v10  ;;  %v8985_v44 = vpop.xlane.xlu0 %8984  ;;  %v9878_v13 = vld [vmem:[%s15794_s12 + $0x8] sm:$0xff] }
0x3460   :  { %12802 = vrcp.f32 %v8985_v44 }
0x3461   :  { %11835 = vmatmul.mubr.msk.f32.vlgmr.msra.gmra.mrb[68].mxu0 %vm858_vm1, %v8493_v35  ;;  %v12369_v35 = vpack.c.bf16 %v9878_v13, %v9877_v39 }
0x3462   :  { %11844 = vmatprep.mubr.msk.f32.mxu0 %vm13432_vm2, %v15733_v12  ;;  %v12799_v47 = vpop.eup %12798 }
0x3463   :  { %v9150_v40 = vpop.xlane.xlu1 %9149  ;;  %v8824_v7 = vpop.permute.xlu0 %8823  ;;  %v8658_v63 = vmul.f32 %v12799_v47, %v12787_v26 }
0x3464   :  { %12804 = vrcp.f32 %v9150_v40 }
0x3466   :  { %v12801_v27 = vpop.eup %12800 }
0x3467   :  { %v8660_v41 = vpop.permute.xlu1 %8659  ;;  %v8989_v34 = vpop.permute.xlu0 %8988  ;;  %v8822_v29 = vmul.f32 %v12801_v27, %v12789_v59 }
0x3468   :  { %11843 = vmatpush3.msra.mxu0 %v8660_v41 }
0x3469   :  { %11845 = vmatmul.mubr.msk.f32.vlgmr.msra.gmra.mrb[70].mxu0 %vm858_vm1, %v8658_v63  ;;  %11852 = vmatprep.subr.mxu0 %v15733_v12 }
0x346a   :  { %11853 = vmatpush3.msra.mxu0 %v8824_v7  ;;  %11854 = vmatprep.mubr.msk.f32.mxu0 %vm13432_vm2, %v15733_v12  ;;  %v12803_v32 = vpop.eup %12802 }
0x346b   :  { %11862 = vmatprep.subr.mxu0 %v15733_v12  ;;  %v8987_v20 = vmul.f32 %v12803_v32, %v12791_v2  ;;  %v9154_v53 = vpop.permute.xlu0 %9153  ;;  %v10730_v32 = vld [vmem:[#allocation16] ss:$0 sm:$0xff] }
0x346d   :  { %11855 = vmatmul.mubr.msk.f32.vlgmr.msra.gmra.mrb[72].mxu0 %vm858_vm1, %v8822_v29 }
0x346e   :  { %11863 = vmatpush3.msra.mxu0 %v8989_v34  ;;  %11864 = vmatprep.mubr.msk.f32.mxu0 %vm13432_vm2, %v15733_v12  ;;  %v12805_v21 = vpop.eup %12804  ;;  %v10729_v34 = vld [vmem:[#allocation15] ss:$0 sm:$0xff] }
0x346f   :  { %11872 = vmatprep.subr.mxu0 %v15733_v12  ;;  %v9152_v8 = vmul.f32 %v12805_v21, %v12793_v51  ;;  %v9319_v19 = vpop.permute.xlu0 %9318 }
0x3471   :  { %11865 = vmatmul.mubr.msk.f32.vlgmr.msra.gmra.mrb[74].mxu0 %vm858_vm1, %v8987_v20 }
0x3472   :  { %11873 = vmatpush3.msra.mxu0 %v9154_v53  ;;  %11874 = vmatprep.mubr.msk.f32.mxu0 %vm13432_vm2, %v15733_v12 }
0x3473   :  { %11882 = vmatprep.subr.mxu0 %v15733_v12 }
0x3475   :  { %11875 = vmatmul.mubr.msk.f32.vlgmr.msra.gmra.mrb[76].mxu0 %vm858_vm1, %v9152_v8 }
0x3476   :  { %11883 = vmatpush3.msra.mxu0 %v9319_v19  ;;  %11884 = vmatprep.mubr.msk.f32.mxu0 %vm13432_vm2, %v15733_v12  ;;  %v9879_v19 = vld [vmem:[%s15794_s12 + $0x10] sm:$0xff] }
0x3498   :  { %v9315_v9 = vpop.xlane.xlu1 %9314 }
0x3499   :  { %12806 = vrcp.f32 %v9315_v9  ;;  %v9880_v9 = vld [vmem:[%s15794_s12 + $0x18] sm:$0xff] }
0x349a   :  { %v12373_v36 = vpack.c.bf16 %v9880_v9, %v9879_v19 }
0x34a3   :  { %v12807_v14 = vpop.eup %12806 }
0x34a4   :  { %v9317_v57 = vmul.f32 %v12807_v14, %v12795_v31  ;;  %v12361_v31 = vpack.c.bf16 %v9784_v55, %v9783_v37 }
0x34a6   :  { %11885 = vmatmul.mubr.msk.f32.vlgmr.msra.gmra.mrb[78].mxu0 %vm858_vm1, %v9317_v57  ;;  %12362 = vmatprep.subr.bf16.mxu0 %v12361_v31 }
0x34a7   :  { %12364 = vmatpush3.bf16.msra.mxu0 %v12361_v31 }
0x34a8   :  { %12366 = vmatprep.subr.bf16.mxu0 %v12365_v28 }
0x34ab   :  { %12368 = vmatpush3.bf16.msra.mxu0 %v12365_v28 }
0x34ac   :  { %12370 = vmatprep.subr.bf16.mxu0 %v12369_v35 }
0x3534   :  { %v8566_v43 = vpop.f32.mrb[68].mxu0 }
0x3535   :  { %v11836_v16 = vpop.f32.mrb[69].mxu0 }
0x353c   :  { %v8731_v61 = vpop.f32.mrb[70].mxu0 }
0x353d   :  { %v11846_v30 = vpop.f32.mrb[71].mxu0 }
0x353e   :  { %v9884_v30 = vld [vmem:[%s15794_s12 + $0x38] sm:$0xff] }
0x3540   :  { %v8895_v4 = vpop.f32.mrb[72].mxu0 }
0x3541   :  { %v11856_v17 = vpop.f32.mrb[73].mxu0  ;;  %11890 = vmatmul.mubr.msk.f32.vlgmr.msra.gmra.mrb[96].mxu1 %vm858_vm1, %v8895_v4 }
0x3542   :  { %11894 = vmatprep.mubr.msk.f32.mxu1 %vm858_vm1, %v15402_v11  ;;  %11893 = vmatpush3.msra.mxu1 %v9395_v18  ;;  %v9881_v18 = vld [vmem:[%s15794_s12 + $0x20] sm:$0xff]  ;;  %v9886_v17 = vld [vmem:[%s15794_s12 + $0x48] sm:$0xff] }
0x3543   :  { %11897 = vmatprep.subr.mxu1 %v9396_v45 }
0x3544   :  { %v9060_v24 = vpop.f32.mrb[74].mxu0 }
0x3545   :  { %v11866_v23 = vpop.f32.mrb[75].mxu0 }
0x3546   :  { %v9887_v23 = vld [vmem:[%s15794_s12 + $0x50] sm:$0xff] }
0x3548   :  { %v9225_v58 = vpop.f32.mrb[76].mxu0 }
0x3549   :  { %v11876_v0 = vpop.f32.mrb[77].mxu0  ;;  %11895 = vmatmul.mubr.msk.f32.vlgmr.msra.gmra.mrb[96].mxu1 %vm858_vm1, %v9060_v24 }
0x354a   :  { %11899 = vmatprep.mubr.msk.f32.mxu1 %vm858_vm1, %v8566_v43  ;;  %11898 = vmatpush3.msra.mxu1 %v9396_v45  ;;  %v9882_v43 = vld [vmem:[%s15794_s12 + $0x28] sm:$0xff]  ;;  %v9885_v45 = vld [vmem:[%s15794_s12 + $0x40] sm:$0xff] }
0x354b   :  { %11902 = vmatprep.subr.mxu1 %v9397_v48  ;;  %v12377_v16 = vpack.c.bf16 %v9882_v43, %v9881_v18  ;;  %v12385_v24 = vpack.c.bf16 %v9886_v17, %v9885_v45  ;;  %v9889_v0 = vld [vmem:[%s15794_s12 + $0x60] sm:$0xff]  ;;  %v10179_v17 = vld [vmem:[%s15796_s11 + $0x8] sm:$0xff] }
0x354c   :  { %v10178_v45 = vld [vmem:[%s15796_s11] sm:$0xff] }
0x3551   :  { %11900 = vmatmul.mubr.msk.f32.vlgmr.msra.gmra.mrb[96].mxu1 %vm858_vm1, %v9225_v58  ;;  %v9888_v58 = vld [vmem:[%s15794_s12 + $0x58] sm:$0xff] }
0x3552   :  { %11904 = vmatprep.mubr.msk.f32.mxu1 %vm858_vm1, %v8731_v61  ;;  %11903 = vmatpush3.msra.mxu1 %v9397_v48  ;;  %v9883_v61 = vld [vmem:[%s15794_s12 + $0x30] sm:$0xff]  ;;  %v12389_v48 = vpack.c.bf16 %v9888_v58, %v9887_v23  ;;  %v10181_v58 = vld [vmem:[%s15796_s11 + $0x18] sm:$0xff] }
0x3553   :  { %12401 = vmatprep.subr.bf16.mxu1 %v13436_v25  ;;  %v12381_v4 = vpack.c.bf16 %v9884_v30, %v9883_v61  ;;  %v10096_v61 = vld [vmem:[%s15795_s30 + $0x18] sm:$0xff]  ;;  %v12816_v30 = vld [vmem:[%s15762_s20] sm:$0x3]  ;;  %v10180_v23 = vld [vmem:[%s15796_s11 + $0x10] sm:$0xff]  ;;  %s13448_s20 = smov [#allocation30]  }
0x3554   :  { %s10276_s17 = sshll.u32 %s13448_s20, 4  ;;  %s10277_s17 = int_to_ptr.vmem [resolvable:$true] %s10276_s17 }
0x3555   :  { %s13147_s16 = scalar_lea.vmem %s10277_s17, 32  ;;  %p13152_p9 = scmp.lt.s32.totalorder %s10277_s17, %s10277_s17 }
0x3556   :  { %p13148_p8 = scmp.ne.s32.totalorder %s10277_s17, %s13147_s16  ;;  %p13153_p10 = scmp.lt.s32.totalorder %s13147_s16, %s13147_s16 }
0x3558   :  { %p13154_p11 = por %p13153_p10, %p13152_p9 }
0x355a   :  { %p13155_p12 = pnand %p13154_p11, %p13148_p8 }
0x3579   :  { %v9390_v11 = vpop.f32.mrb[78].mxu0 }
0x357a   :  { %v11886_v15 = vpop.f32.mrb[79].mxu0  ;;  %11905 = vmatmul.mubr.msk.f32.vlgmr.msra.gmra.mrb[96].mxu1 %vm858_vm1, %v9390_v11  ;;  %v9890_v11 = vld [vmem:[%s15794_s12 + $0x68] sm:$0xff] }
0x357b   :  { %11957 = vmatprep.mubr.msk.f32.mxu1 %vm13432_vm2, %v15733_v12  ;;  %v12393_v15 = vpack.c.bf16 %v9890_v11, %v9889_v0  ;;  %v12414_v11 = vpack.c.bf16 %v10181_v58, %v10180_v23 }
0x364d   :  { %v11906_v10 = vpop.f32.mrb[96].mxu1 }
0x364e   :  { %v12424_v52 = vadd.f32 %v11906_v10, %v10722_v50  ;;  %v9726_v38 = vpop.f32.mrb[97].mxu1  ;;  %v9892_v10 = vld [vmem:[%s15794_s12 + $0x78] sm:$0xff] }
0x364f   :  { %v12425_v46 = vadd.f32 %v10722_v50, %v9726_v38  ;;  %v9891_v50 = vld [vmem:[%s15794_s12 + $0x70] sm:$0xff]  ;;  %v10731_v38 = vld [vmem:[#allocation18] ss:$0 sm:$0xff] }
0x3650   :  { %v9738_v56 = vadd.f32 %v12424_v52, %v15300_v5  ;;  %v12397_v52 = vpack.c.bf16 %v9892_v10, %v9891_v50 }
0x3651   :  { %v9737_v26 = vadd.f32 %v12425_v46, %v15298_v54 }
0x3652   :  { %v9742_v49 = vsel %vm2871_vm8, %v9738_v56, 0.0 }
0x3653   :  { %9743 = vadd.xlane.f32.xlu1 %v9742_v49  ;;  %v9739_v6 = vsel %vm2871_vm8, %v9737_v26, 0.0 }
0x3654   :  { %9740 = vadd.xlane.f32.xlu0 %v9739_v6 }
0x36e0   :  { %v9744_v1 = vpop.xlane.xlu1 %9743 }
0x36e1   :  { %v9746_v59 = vmul.f32 0.03125, %v9744_v1  ;;  %v9741_v42 = vpop.xlane.xlu0 %9740 }
0x36e2   :  { %v9745_v60 = vmul.f32 0.03125, %v9741_v42 }
0x36e3   :  { %v9748_v2 = vsub.f32 %v9738_v56, %v9746_v59  ;;  %v10734_v59 = vld [vmem:[#allocation19] ss:$0 sm:$0xff] }
0x36e4   :  { %v9747_v22 = vsub.f32 %v9737_v26, %v9745_v60 }
0x36e5   :  { %v9750_v5 = vmul.f32 %v9748_v2, %v9748_v2 }
0x36e6   :  { %v9749_v51 = vmul.f32 %v9747_v22, %v9747_v22 }
0x36e7   :  { %v9754_v3 = vsel %vm2871_vm8, %v9750_v5, 0.0 }
0x36e8   :  { %v9751_v54 = vsel %vm2871_vm8, %v9749_v51, 0.0 }
0x36e9   :  { %9752 = vadd.xlane.f32.xlu1 %v9751_v54 }
0x36ed   :  { %9755 = vadd.xlane.f32.xlu1 %v9754_v3 }
0x3776   :  { %v9753_v44 = vpop.xlane.xlu1 %9752 }
0x3777   :  { %v9757_v40 = vmul.f32 0.03125, %v9753_v44 }
0x3779   :  { %v9759_v7 = vadd.f32 1e-05, %v9757_v40 }
0x377a   :  { %v9756_v47 = vpop.xlane.xlu1 %9755 }
0x377b   :  { %12808 = vrsqrt.f32 %v9759_v7  ;;  %v9758_v63 = vmul.f32 0.03125, %v9756_v47 }
0x377d   :  { %v9760_v41 = vadd.f32 1e-05, %v9758_v63 }
0x377f   :  { %12810 = vrsqrt.f32 %v9760_v41 }
0x3785   :  { %v12809_v27 = vpop.eup %12808 }
0x3786   :  { %v9763_v29 = vmul.f32 %v12809_v27, %v9747_v22 }
0x3788   :  { %v9772_v20 = vmul.f32 %v10729_v34, %v9763_v29  ;;  %v10735_v29 = vld [vmem:[#allocation21] ss:$0 sm:$0xff] }
0x3789   :  { %v12811_v53 = vpop.eup %12810 }
0x378a   :  { %v9764_v21 = vmul.f32 %v12811_v53, %v9748_v2  ;;  %v9781_v8 = vadd.f32 %v10730_v32, %v9772_v20 }
0x378c   :  { %v9773_v14 = vmul.f32 %v10729_v34, %v9764_v21  ;;  %11915 = vmatprep.mubr.msk.f32.mxu0 %vm2871_vm8, %v9781_v8  ;;  %v10736_v21 = vld [vmem:[#allocation22] ss:$0 sm:$0xff] }
0x378e   :  { %v9782_v57 = vadd.f32 %v10730_v32, %v9773_v14 }
0x3790   :  { %11916 = vmatmul.mubr.msk.f32.vlgmr.msra.gmra.mrb[80].mxu0 %vm2871_vm8, %v9782_v57 }
0x3791   :  { %12372 = vmatpush3.bf16.msra.mxu0 %v12369_v35 }
0x3792   :  { %12374 = vmatprep.subr.bf16.mxu0 %v12373_v36 }
0x3795   :  { %12376 = vmatpush3.bf16.msra.mxu0 %v12373_v36  ;;  %v10094_v36 = vld [vmem:[%s15795_s30 + $0x8] sm:$0xff] }
0x3796   :  { %12378 = vmatprep.subr.bf16.mxu0 %v12377_v16 }
0x3799   :  { %12380 = vmatpush3.bf16.msra.mxu0 %v12377_v16  ;;  %v10095_v16 = vld [vmem:[%s15795_s30 + $0x10] sm:$0xff] }
0x379a   :  { %12382 = vmatprep.subr.bf16.mxu0 %v12381_v4 }
0x379d   :  { %12384 = vmatpush3.bf16.msra.mxu0 %v12381_v4  ;;  %v12408_v4 = vpack.c.bf16 %v10096_v61, %v10095_v16 }
0x379e   :  { %12386 = vmatprep.subr.bf16.mxu0 %v12385_v24 }
0x37a1   :  { %12388 = vmatpush3.bf16.msra.mxu0 %v12385_v24  ;;  %v12411_v24 = vpack.c.bf16 %v10179_v17, %v10178_v45 }
0x37a2   :  { %12390 = vmatprep.subr.bf16.mxu0 %v12389_v48 }
0x37a5   :  { %12392 = vmatpush3.bf16.msra.mxu0 %v12389_v48 }
0x37a6   :  { %12394 = vmatprep.subr.bf16.mxu0 %v12393_v15 }
0x37a9   :  { %12396 = vmatpush3.bf16.msra.mxu0 %v12393_v15 }
0x37aa   :  { %12398 = vmatprep.subr.bf16.mxu0 %v12397_v52 }
0x37ad   :  { %12400 = vmatpush3.bf16.msra.mxu0 %v12397_v52 }
0x3863   :  { %v11917_v46 = vpop.f32.mrb[80].mxu0 }
0x3864   :  { %v9872_v56 = vadd.f32 %v11917_v46, %v10731_v38  ;;  %v9866_v26 = vpop.f32.mrb[81].mxu0 }
0x3865   :  { %v9867_v49 = vadd.f32 %v10731_v38, %v9866_v26 }
0x3866   :  { %v9876_v1 = vmax.f32 %v9872_v56, 0.0 }
0x3867   :  { %v9875_v6 = vmax.f32 %v9867_v49, 0.0 }
0x3869   :  { %11950 = vmatprep.mubr.f32.mxu0 %v9875_v6 }
0x386a   :  { %11951 = vmatmul.mubr.f32.vlgmr.msra.gmra.mrb[82].mxu0 %v9876_v1 }
0x393d   :  { %v11952_v42 = vpop.f32.mrb[82].mxu0 }
0x393e   :  { %v9972_v60 = vadd.f32 %v11952_v42, %v10734_v59  ;;  %v9966_v2 = vpop.f32.mrb[83].mxu0 }
0x393f   :  { %v9967_v22 = vadd.f32 %v10734_v59, %v9966_v2 }
0x3940   :  { %v9976_v51 = vadd.f32 %v9972_v60, %v9782_v57  ;;  %v10093_v57 = vld [vmem:[%s15795_s30] sm:$0xff] }
0x3941   :  { %v9975_v54 = vadd.f32 %v9967_v22, %v9781_v8  ;;  %v12405_v43 = vpack.c.bf16 %v10094_v36, %v10093_v57 }
0x3942   :  { %v9980_v5 = vsel %vm2871_vm8, %v9976_v51, 0.0 }
0x3943   :  { %9981 = vadd.xlane.f32.xlu0 %v9980_v5  ;;  %v9977_v3 = vsel %vm2871_vm8, %v9975_v54, 0.0 }
0x3944   :  { %9978 = vadd.xlane.f32.xlu1 %v9977_v3 }
0x39d0   :  { %v9982_v37 = vpop.xlane.xlu0 %9981 }
0x39d1   :  { %v9984_v55 = vmul.f32 0.03125, %v9982_v37  ;;  %v9979_v31 = vpop.xlane.xlu1 %9978 }
0x39d2   :  { %v9983_v62 = vmul.f32 0.03125, %v9979_v31 }
0x39d3   :  { %v9986_v33 = vsub.f32 %v9976_v51, %v9984_v55 }
0x39d4   :  { %v9985_v28 = vsub.f32 %v9975_v54, %v9983_v62 }
0x39d5   :  { %v9988_v39 = vmul.f32 %v9986_v33, %v9986_v33 }
0x39d6   :  { %v9987_v13 = vmul.f32 %v9985_v28, %v9985_v28 }
0x39d7   :  { %v9992_v35 = vsel %vm2871_vm8, %v9988_v39, 0.0 }
0x39d8   :  { %9993 = vadd.xlane.f32.xlu0 %v9992_v35  ;;  %v9989_v44 = vsel %vm2871_vm8, %v9987_v13, 0.0 }
0x39d9   :  { %9990 = vadd.xlane.f32.xlu1 %v9989_v44 }
0x3a65   :  { %v9994_v40 = vpop.xlane.xlu0 %9993 }
0x3a66   :  { %v9996_v7 = vmul.f32 0.03125, %v9994_v40  ;;  %v9991_v47 = vpop.xlane.xlu1 %9990 }
0x3a67   :  { %v9995_v63 = vmul.f32 0.03125, %v9991_v47 }
0x3a68   :  { %v9998_v41 = vadd.f32 1e-05, %v9996_v7 }
0x3a69   :  { %v9997_v27 = vadd.f32 1e-05, %v9995_v63 }
0x3a6a   :  { %12812 = vrsqrt.f32 %v9998_v41 }
0x3a6b   :  { %12814 = vrsqrt.f32 %v9997_v27 }
0x3a74   :  { %v12813_v34 = vpop.eup %12812 }
0x3a75   :  { %v12815_v32 = vpop.eup %12814  ;;  %v10002_v20 = vmul.f32 %v12813_v34, %v9986_v33 }
0x3a76   :  { %v10001_v53 = vmul.f32 %v12815_v32, %v9985_v28 }
0x3a77   :  { %v10011_v8 = vmul.f32 %v10735_v29, %v10002_v20 }
0x3a78   :  { %v10010_v19 = vmul.f32 %v10735_v29, %v10001_v53 }
0x3a79   :  { %v10020_v9 = vadd.f32 %v10736_v21, %v10011_v8 }
0x3a7a   :  { %v10019_v14 = vadd.f32 %v10736_v21, %v10010_v19 }
0x3a7b   :  { %10022 = vst.msk [vmem:[#allocation38 + $0x8] sm:$0xff] %vm2871_vm8, %v10020_v9 }
0x3a7c   :  { %v12402_v18 = vpack.c.bf16 %v10020_v9, %v10019_v14  ;;  %10021 = vst.msk [vmem:[#allocation38] sm:$0xff] %vm2871_vm8, %v10019_v14 }
0x3a7e   :  { %12403 = vmatpush3.bf16.msra.mxu1 %v12402_v18 }
0x3a7f   :  { %12404 = vmatprep.subr.bf16.mxu1 %v13436_v25 }
0x3a81   :  { %11958 = vmatmul.mubr.msk.f32.vlgmr.msra.gmra.mrb[98].mxu1 %vm530_vm0, %v12816_v30 }
0x3a82   :  { %12406 = vmatpush3.bf16.msra.mxu1 %v12405_v43  ;;  %11968 = vmatprep.mubr.msk.f32.mxu1 %vm13432_vm2, %v15733_v12 }
0x3a83   :  { %12407 = vmatprep.subr.bf16.mxu1 %v13436_v25 }
0x3a86   :  { %12409 = vmatpush3.bf16.msra.mxu1 %v12408_v4 }
0x3a87   :  { %12410 = vmatprep.subr.bf16.mxu1 %v13436_v25 }
0x3b54   :  { %v10089_v48 = vpop.f32.mrb[98].mxu1 }
0x3b55   :  { %11969 = vmatmul.mubr.msk.f32.vlgmr.msra.gmra.mrb[100].mxu1 %vm2871_vm8, %v10089_v48  ;;  %v11959_v0 = vpop.f32.mrb[99].mxu1 }
0x3b56   :  { %12412 = vmatpush3.bf16.msra.mxu1 %v12411_v24  ;;  %11979 = vmatprep.mubr.msk.f32.mxu1 %vm13432_vm2, %v15733_v12 }
0x3b57   :  { %12413 = vmatprep.subr.bf16.mxu1 %v13436_v25 }
0x3b5a   :  { %12415 = vmatpush3.bf16.msra.mxu1 %v12414_v11 }
0x3b5d   :  { %11980 = vmatmul.mubr.msk.f32.vlgmr.msra.gmra.mrb[102].mxu1 %vm2871_vm8, %v10089_v48 }
0x3b5e   :  { %13158 = shalt.err (!%p13155_p12)
}
0x3b5f   :  { %s15797_s19 = sld [smem:[#allocation119_spill]] }
0x3b65   :  { %s13159_s6 = scalar_lea.hbm %s15797_s19, 32 }
0x3b66   :  { %p13160_p13 = scmp.ne.s32.totalorder %s15797_s19, %s13159_s6  ;;  %p13163_p0 = scmp.lt.u32.totalorder %s13159_s6, %s15797_s19 }
0x3b68   :  { %p13165_p1 = pnand %p13163_p0, %p13160_p13 }
0x3b6a   :  { %13168 = shalt.err (!%p13165_p1)
}
0x3b6b   :  { %10279 = dma.vmem_to_hbm [thread:$0]  %s10277_s17, 32, %s15797_s19, [#allocation31]  }
0x3b6c   :  { %s13169_s18 = scalar_lea.vmem %s15524_s15, 256  ;;  %p13174_p3 = scmp.lt.s32.totalorder %s15524_s15, %s15524_s15 }
0x3b6d   :  { %p13170_p2 = scmp.ne.s32.totalorder %s15524_s15, %s13169_s18  ;;  %p13175_p4 = scmp.lt.s32.totalorder %s13169_s18, %s13169_s18 }
0x3b6f   :  { %p13176_p5 = por %p13175_p4, %p13174_p3 }
0x3b71   :  { %p13177_p6 = pnand %p13176_p5, %p13170_p2 }
0x3b73   :  { %13180 = shalt.err (!%p13177_p6)
}
0x3b74   :  { %s13181_s22 = scalar_lea.hbm %s13875_s21, 256 }
0x3b75   :  { %p13182_p7 = scmp.ne.s32.totalorder %s13875_s21, %s13181_s22  ;;  %p13185_p8 = scmp.lt.u32.totalorder %s13181_s22, %s13875_s21 }
0x3b77   :  { %p13187_p9 = pnand %p13185_p8, %p13182_p7 }
0x3b79   :  { %13190 = shalt.err (!%p13187_p9)
}
0x3b7a   :  { %s13450_s23 = smov 128   ;;  %s13451_s26 = smov 8  }
0x3b7b   :  { %10301 = dma.vmem_to_hbm [thread:$0]  %s15524_s15, 256, %s13875_s21, [#allocation34], %s13450_s23, %s13450_s23, %s13451_s26  }
0x3b7c   :  { %s13452_s13 = smov [#allocation36]  }
0x3b7d   :  { %s10318_s3 = sshll.u32 %s13452_s13, 4  ;;  %s10319_s3 = int_to_ptr.vmem [resolvable:$true] %s10318_s3 }
0x3b7e   :  { %s13191_s29 = scalar_lea.vmem %s10319_s3, 16  ;;  %s13195_s24 = scalar_lea.vmem %s10319_s3, 32 }
0x3b7f   :  { %p13192_p10 = scmp.ne.s32.totalorder %s10319_s3, %s13191_s29  ;;  %p13196_p11 = scmp.lt.s32.totalorder %s10319_s3, %s10319_s3 }
0x3b80   :  { %p13197_p12 = scmp.lt.s32.totalorder %s13195_s24, %s13191_s29 }
0x3b82   :  { %p13198_p13 = por %p13197_p12, %p13196_p11 }
0x3b84   :  { %p13199_p0 = pnand %p13198_p13, %p13192_p10 }
0x3b86   :  { %13202 = shalt.err (!%p13199_p0)
}
0x3b87   :  { %s13203_s9 = scalar_lea.hbm %s13885_s5, 16 }
0x3b88   :  { %p13204_p1 = scmp.ne.s32.totalorder %s13885_s5, %s13203_s9  ;;  %p13207_p2 = scmp.lt.u32.totalorder %s13203_s9, %s13885_s5 }
0x3b8a   :  { %p13209_p3 = pnand %p13207_p2, %p13204_p1 }
0x3b8c   :  { %13212 = shalt.err (!%p13209_p3)
}
0x3b8d   :  { %10321 = dma.vmem_to_hbm [thread:$0]  %s10319_s3, 16, %s13885_s5, [#allocation37]  }
0x3b8e   :  { %s13453_s21 = smov [#allocation35]  }
0x3b8f   :  { %s10308_s1 = sshll.u32 %s13453_s21, 4  ;;  %s10309_s1 = int_to_ptr.vmem [resolvable:$true] %s10308_s1 }
0x3b90   :  { %s13213_s4 = scalar_lea.vmem %s10309_s1, 32  ;;  %p13218_p5 = scmp.lt.s32.totalorder %s10309_s1, %s10309_s1 }
0x3b91   :  { %p13214_p4 = scmp.ne.s32.totalorder %s10309_s1, %s13213_s4  ;;  %p13219_p6 = scmp.lt.s32.totalorder %s13213_s4, %s13213_s4 }
0x3b93   :  { %p13220_p7 = por %p13219_p6, %p13218_p5 }
0x3b95   :  { %p13221_p8 = pnand %p13220_p7, %p13214_p4 }
0x3b97   :  { %13224 = shalt.err (!%p13221_p8)
}
0x3b98   :  { %s13225_s2 = scalar_lea.hbm %s13880_s25, 32 }
0x3b99   :  { %p13226_p9 = scmp.ne.s32.totalorder %s13880_s25, %s13225_s2  ;;  %p13229_p10 = scmp.lt.u32.totalorder %s13225_s2, %s13880_s25 }
0x3b9b   :  { %p13231_p11 = pnand %p13229_p10, %p13226_p9 }
0x3b9d   :  { %13234 = shalt.err (!%p13231_p11)
}
0x3b9e   :  { %10311 = dma.vmem_to_hbm [thread:$0]  %s10309_s1, 32, %s13880_s25, [#allocation34]  }
0x3b9f   :  { %s13454_s5 = smov [#allocation38]  }
0x3ba0   :  { %s10327_s8 = sshll.u32 %s13454_s5, 4  ;;  %s10328_s8 = int_to_ptr.vmem [resolvable:$true] %s10327_s8 }
0x3ba1   :  { %s13235_s7 = scalar_lea.vmem %s10328_s8, 256  ;;  %p13240_p13 = scmp.lt.s32.totalorder %s10328_s8, %s10328_s8 }
0x3ba2   :  { %p13236_p12 = scmp.ne.s32.totalorder %s10328_s8, %s13235_s7  ;;  %p13241_p0 = scmp.lt.s32.totalorder %s13235_s7, %s13235_s7 }
0x3ba4   :  { %p13242_p1 = por %p13241_p0, %p13240_p13 }
0x3ba6   :  { %p13243_p2 = pnand %p13242_p1, %p13236_p12 }
0x3ba8   :  { %13246 = shalt.err (!%p13243_p2)
}
0x3ba9   :  { %s13247_s10 = scalar_lea.hbm %s13890_s27, 256 }
0x3baa   :  { %p13248_p3 = scmp.ne.s32.totalorder %s13890_s27, %s13247_s10  ;;  %p13251_p4 = scmp.lt.u32.totalorder %s13247_s10, %s13890_s27 }
0x3bac   :  { %p13253_p5 = pnand %p13251_p4, %p13248_p3 }
0x3bae   :  { %13256 = shalt.err (!%p13253_p5)
}
0x3baf   :  { %10333 = dma.vmem_to_hbm [thread:$0]  %s10328_s8, 256, %s13890_s27, [#allocation37], %s13450_s23, %s13450_s23, %s13451_s26   ;;  %v10738_v12 = vld [vmem:[#allocation24] ss:$0 sm:$0xff] }
0x3bb0   :  { %s13455_s25 = smov [#allocation29]  }
0x3bb1   :  { %s10266_s28 = sshll.u32 %s13455_s25, 4  ;;  %s10267_s28 = int_to_ptr.vmem [resolvable:$true] %s10266_s28 }
0x3bb2   :  { %s13257_s0 = scalar_lea.vmem %s10267_s28, 32  ;;  %p13262_p7 = scmp.lt.s32.totalorder %s10267_s28, %s10267_s28 }
0x3bb3   :  { %p13258_p6 = scmp.ne.s32.totalorder %s10267_s28, %s13257_s0  ;;  %p13263_p8 = scmp.lt.s32.totalorder %s13257_s0, %s13257_s0 }
0x3bb5   :  { %p13264_p9 = por %p13263_p8, %p13262_p7 }
0x3bb7   :  { %p13265_p10 = pnand %p13264_p9, %p13258_p6 }
0x3c28   :  { %v10173_v25 = vpop.f32.mrb[100].mxu1 }
0x3c29   :  { %v10174_v15 = vadd.f32 %v10738_v12, %v10173_v25  ;;  %v11970_v50 = vpop.f32.mrb[101].mxu1 }
0x3c2b   :  { %10177 = vst.msk [vmem:[#allocation29] sm:$0x3] %vm3367_vm9, %v10174_v15 }
0x3c2c   :  { %13268 = shalt.err (!%p13265_p10)
}
0x3c2d   :  { %s15798_s12 = sld [smem:[#allocation118_spill]] }
0x3c33   :  { %s13269_s27 = scalar_lea.hbm %s15798_s12, 32 }
0x3c34   :  { %p13270_p11 = scmp.ne.s32.totalorder %s15798_s12, %s13269_s27  ;;  %p13273_p12 = scmp.lt.u32.totalorder %s13269_s27, %s15798_s12 }
0x3c36   :  { %p13275_p13 = pnand %p13273_p12, %p13270_p11 }
0x3c38   :  { %13278 = shalt.err (!%p13275_p13)
}
0x3c39   :  { %10269 = dma.vmem_to_hbm [thread:$0]  %s10267_s28, 32, %s15798_s12, [#allocation4]   ;;  %v10740_v10 = vld [vmem:[#allocation25] ss:$0 sm:$0xff]  ;;  %v10255_v52 = vpop.f32.mrb[102].mxu1 }
0x3c3a   :  { %s13456_s30 = smov [#allocation32]   ;;  %v10256_v38 = vadd.f32 %v10740_v10, %v10255_v52  ;;  %v11981_v46 = vpop.f32.mrb[103].mxu1 }
0x3c3b   :  { %s10286_s11 = sshll.u32 %s13456_s30, 4  ;;  %s10287_s11 = int_to_ptr.vmem [resolvable:$true] %s10286_s11 }
0x3c3c   :  { %10259 = vst.msk [vmem:[#allocation32] sm:$0x3] %vm3367_vm9, %v10256_v38  ;;  %s13279_s20 = scalar_lea.vmem %s10287_s11, 32  ;;  %p13284_p1 = scmp.lt.s32.totalorder %s10287_s11, %s10287_s11 }
0x3c3d   :  { %p13280_p0 = scmp.ne.s32.totalorder %s10287_s11, %s13279_s20  ;;  %p13285_p2 = scmp.lt.s32.totalorder %s13279_s20, %s13279_s20 }
0x3c3f   :  { %p13286_p3 = por %p13285_p2, %p13284_p1 }
0x3c41   :  { %p13287_p4 = pnand %p13286_p3, %p13280_p0 }
0x3c43   :  { %13290 = shalt.err (!%p13287_p4)
}
0x3c44   :  { %s15799_s17 = sld [smem:[#allocation120_spill]] }
0x3c4a   :  { %s13291_s14 = scalar_lea.hbm %s15799_s17, 32 }
0x3c4b   :  { %p13292_p5 = scmp.ne.s32.totalorder %s15799_s17, %s13291_s14  ;;  %p13295_p6 = scmp.lt.u32.totalorder %s13291_s14, %s15799_s17 }
0x3c4d   :  { %p13297_p7 = pnand %p13295_p6, %p13292_p5 }
0x3c4f   :  { %13300 = shalt.err (!%p13297_p7)
}
0x3c50   :  { %10289 = dma.vmem_to_hbm [thread:$0]  %s10287_s11, 32, %s15799_s17, [#allocation31]  }
0x3c51   :  { %13321 = dma.done.wait [#allocation4], 32  }
0x3c52   :  { %13322 = vsyncadd [#allocation4], 4294967264 }
0x3c53   :  { %13323 = dma.done.wait [#allocation31], 64  }
0x3c54   :  { %13324 = vsyncadd [#allocation31], 4294967232 }
0x3c55   :  { %13325 = dma.done.wait [#allocation34], 288  }
0x3c56   :  { %13326 = vsyncadd [#allocation34], 4294967008 }
0x3c57   :  { %13327 = dma.done.wait [#allocation37], 272  }
0x3c58   :  { %13328 = vsyncadd [#allocation37], 4294967024 }
0x3c59   :  { %10355 = vsyncpa [#allocation3], 1 }
0x3c5a   :  { %10356 = vsyncpa [#allocation8], 1 }
0x3c5b   :  { %10357 = vsyncpa [#allocation11], 1 }
0x3c5c   :  { %10358 = vsyncpa [#allocation14], 1 }
0x3c5d   :  { %10359 = vsyncpa [#allocation17], 1 }
0x3c5e   :  { %10360 = vsyncpa [#allocation20], 1 }
0x3c5f   :  { %10361 = vsyncpa [#allocation23], 1 }
0x3c60   :  { %10362 = vsyncpa [#allocation26], 1 }
0x3c61   :  { %10363 = vsyncpa [#allocation4], 1 }
0x3c62   :  { %10364 = vsyncpa [#allocation31], 1 }
0x3c63   :  { %10365 = vsyncpa [#allocation34], 1 }
0x3c64   :  { %10366 = vsyncpa [#allocation37], 1 }
0x3c65   :  { %10367 = vsyncpa [#allocation5], 1 }
0x3c66   :  { %10368 = vsyncpa [#allocation6], 1 }

</bundles_post_ra>
